<compile_context>
chip_gen: v7x
topology: tpu7x:2x2x1
jax: 0.10.0
libtpu: 0.0.40
codegen_flags: <defaults>
</compile_context>

<pallas_src>
import jax
import jax.numpy as jnp
from jax import lax
from jax.experimental import pallas as pl
from jax.experimental.pallas import tpu as pltpu

EPS = 1e-5
LANE = 128     # channel dims padded to a multiple of the TPU lane width


def _round_up(x, m):
    return (x + m - 1) // m * m


def _vmem_budget_and_limit():
    """Generation-aware (resident-estimate budget, scoped-VMEM limit) in bytes."""
    cap = None
    try:
        cap = int(pltpu.get_tpu_info().vmem_capacity_bytes)
        if cap <= 0:
            cap = None
    except Exception:
        cap = None
    if cap is None:
        try:
            kind = jax.devices()[0].device_kind.lower()
        except Exception:
            kind = ""
        cap = 128 * 1024 * 1024 if ("v5" in kind or "v6" in kind) else 64 * 1024 * 1024
    if cap >= 96 * 1024 * 1024:
        # v5e / v6e: 128 MiB physical VMEM per TensorCore
        return 96 * 1024 * 1024, 100 * 1024 * 1024
    # v7x: 64 MiB physical VMEM per TensorCore — leave room for compiler scratch/temporaries
    return 26 * 1024 * 1024, 48 * 1024 * 1024


def _make_block_kernel(N, Hout, Wout, Ci, Cp, conv1_mode, has_skip_conv, cdt):
    """Fused Block kernel. All tensors are channels-last and lane-padded (Ci, Cp = mult. of 128).

    conv1_mode:
      "pad"    : x1 is the halo-padded input (N, Hout+2, Wout+2, Ci); taps sliced in-kernel.
      "parity" : stride-2; x1 is the parity-decomposed padded input (4*N, Hp2, Wp2, Ci);
                 all 9 taps are static contiguous slices (no strided loads, no HBM im2col).
      "im2col" : x1 is a wrapper-built (M, 9*Ci) slab (fallback for exotic strides).
    """
    M = N * Hout * Wout
    inv_m = 1.0 / float(M)

    def bn_scale_shift(acc, g, b):
        # One-pass batch stats (f32) folded into a per-channel scale/shift FMA.
        # TODO(synk): for large M, compute sum/sumsq via a ones-vector MXU matmul (or chunked
        #             fused pass) to take the reduction off the VPU/vld slots and bound temps.
        s = jnp.sum(acc, axis=0, keepdims=True)
        q = jnp.sum(acc * acc, axis=0, keepdims=True)
        mean = s * inv_m
        var = jnp.maximum(q * inv_m - mean * mean, 0.0)
        scale = g * lax.rsqrt(var + EPS)
        shift = b - mean * scale
        return acc * scale + shift

    def compute(x1_ref, xs_ref, w1_ref, g1_ref, b1_ref, w2_ref, g2_ref, b2_ref,
                ws_ref, gs_ref, bs_ref, o_ref, y1p_ref):
        # ---------- conv1: 3x3, stride s, pad 1 -> single im2col MXU matmul (K = 9*Ci) ----------
        if conv1_mode == "im2col":
            patches1 = x1_ref[...]                                       # (M, 9*Ci)
        elif conv1_mode == "pad":
            xp = x1_ref[...]                                             # (N, Hout+2, Wout+2, Ci)
            taps = [xp[:, kh:kh + Hout, kw:kw + Wout, :].reshape(M, Ci)
                    for kh in range(3) for kw in range(3)]
            patches1 = jnp.concatenate(taps, axis=1)                     # lane-aligned 128 chunks
        else:  # "parity": stride-2 taps from parity-decomposed input, static slices only
            xq = x1_ref[...]                                             # (4*N, Hp2, Wp2, Ci)
            taps = []
            for kh in range(3):
                hp, h0 = kh % 2, kh // 2
                for kw in range(3):
                    wp, w0 = kw % 2, kw // 2
                    p = hp * 2 + wp
                    taps.append(xq[p * N:(p + 1) * N,
                                   h0:h0 + Hout, w0:w0 + Wout, :].reshape(M, Ci))
            patches1 = jnp.concatenate(taps, axis=1)
        acc1 = jnp.dot(patches1, w1_ref[...], preferred_element_type=jnp.float32)   # (M, Cp) f32

        # ---------- BN1 (+ fused ReLU) ----------
        y1 = jnp.maximum(bn_scale_shift(acc1, g1_ref[...], b1_ref[...]), 0.0)       # (M, Cp) f32

        # ---------- conv2: 3x3, stride 1, pad 1 ----------
        # Intermediate is stored ONCE, in the compute dtype (bf16 fast path).  The W halo is
        # folded into the interior store (in-register pad + one dense, unmasked store); only
        # the two full top/bottom halo rows are zeroed separately.
        y1r = y1.reshape(N, Hout, Wout, Cp)
        zcol = jnp.zeros((N, Hout, 1, Cp), jnp.float32)
        y1w = jnp.concatenate([zcol, y1r, zcol], axis=2).astype(cdt)     # (N, Hout, Wout+2, Cp)
        y1p_ref[:, 0:1, :, :] = jnp.zeros((N, 1, Wout + 2, Cp), cdt)
        y1p_ref[:, Hout + 1:Hout + 2, :, :] = jnp.zeros((N, 1, Wout + 2, Cp), cdt)
        y1p_ref[:, 1:Hout + 1, :, :] = y1w

        y1p = y1p_ref[...]                                               # (N, Hout+2, Wout+2, Cp)
        taps2 = [y1p[:, kh:kh + Hout, kw:kw + Wout, :].reshape(M, Cp)
                 for kh in range(3) for kw in range(3)]
        patches2 = jnp.concatenate(taps2, axis=1)                        # (M, 9*Cp) in cdt
        acc2 = jnp.dot(patches2, w2_ref[...], preferred_element_type=jnp.float32)   # (M, Cp) f32

        # ---------- BN2 ----------
        y2 = bn_scale_shift(acc2, g2_ref[...], b2_ref[...])

        # ---------- skip path ----------
        xs = xs_ref[...]                                                 # (M, Ci), pre-strided
        if has_skip_conv:
            a = jnp.dot(xs, ws_ref[...], preferred_element_type=jnp.float32)        # 1x1 conv
            a = bn_scale_shift(a, gs_ref[...], bs_ref[...])
        else:
            a = xs.astype(jnp.float32)       # identity skip: passed in f32 (full-precision add)

        # ---------- residual add + ReLU; lane-dense (Cp = mult. of 128) store ----------
        o_ref[...] = jnp.maximum(y2 + a, 0.0).reshape(N, Hout, Wout, Cp).astype(o_ref.dtype)

    if has_skip_conv:
        def kernel(x1, xs, w1, g1, b1, w2, g2, b2, ws, gs, bs, o, y1p):
            compute(x1, xs, w1, g1, b1, w2, g2, b2, ws, gs, bs, o, y1p)
    else:
        def kernel(x1, xs, w1, g1, b1, w2, g2, b2, o, y1p):
            compute(x1, xs, w1, g1, b1, w2, g2, b2, None, None, None, o, y1p)
    return kernel


def block_forward_nhwc(x_nhwc, params, stride, compute_dtype=jnp.bfloat16,
                       out_dtype=jnp.float32, keep_padded=False):
    """Block forward on an NHWC activation.

    All compute runs inside one Pallas kernel; the wrapper only does layout plumbing.
    `out_dtype=bf16, keep_padded=True` keeps chained blocks lane-dense (Cp = mult. of 128) and
    halves output writeback; the default (f32 + channel slice) is used for correctness checks.
    """
    N, H, W, Cin = x_nhwc.shape
    Cout = params["w1"].shape[0]
    Hout = (H + 2 - 3) // stride + 1
    Wout = (W + 2 - 3) // stride + 1
    M = N * Hout * Wout
    has_skip_conv = not (Cin == Cout and stride == 1)
    Ci = _round_up(Cin, LANE)
    Cp = _round_up(Cout, LANE)
    cdt = compute_dtype

    x32 = x_nhwc.astype(jnp.float32)
    # conv1 halo pad (pad=1) and channel lane-pad folded into a single pad op.
    x_pad = jnp.pad(x32, ((0, 0), (1, 1), (1, 1), (0, Ci - Cin)))

    if stride == 1:
        conv1_mode = "pad"
        x1 = x_pad.astype(cdt)                    # kernel builds the im2col slab in VMEM
    elif stride == 2:
        # Parity (even/odd H,W) decomposition: a pure re-arrangement (~1x input bytes, no 9x
        # HBM im2col slab).  Kernel tap (kh,kw) = static contiguous slice of parity plane
        # p = (kh%2)*2 + (kw%2) at offsets (kh//2, kw//2).
        conv1_mode = "parity"
        Hp = _round_up(H + 2, 2)
        Wp = _round_up(W + 2, 2)
        xpp = jnp.pad(x_pad, ((0, 0), (0, Hp - (H + 2)), (0, Wp - (W + 2)), (0, 0)))
        xq = xpp.reshape(N, Hp // 2, 2, Wp // 2, 2, Ci)
        xq = jnp.transpose(xq, (2, 4, 0, 1, 3, 5)).reshape(4 * N, Hp // 2, Wp // 2, Ci)
        x1 = xq.astype(cdt)
    else:
        # TODO(synk): generalize the parity decomposition to arbitrary strides; fallback builds
        #             the im2col slab in the wrapper (extra HBM round trip).
        conv1_mode = "im2col"
        taps = [x_pad[:, kh:kh + (Hout - 1) * stride + 1:stride,
                         kw:kw + (Wout - 1) * stride + 1:stride, :].reshape(M, Ci)
                for kh in range(3) for kw in range(3)]
        x1 = jnp.concatenate(taps, axis=1).astype(cdt)

    # Skip-path input: pre-strided, lane-padded, flattened to a lane-dense (M, Ci) slab.
    # Identity skip stays f32 so the residual add is full precision (matches PyTorch);
    # projection skip feeds the MXU, so the compute dtype is fine.
    x_skip = jnp.pad(x32[:, ::stride, ::stride, :], ((0, 0), (0, 0), (0, 0), (0, Ci - Cin)))
    x_skip = x_skip.reshape(M, Ci)
    x_skip = x_skip.astype(cdt) if has_skip_conv else x_skip

    def prep_w3x3(w, cin_pad):                    # OIHW -> HWIO -> (9*cin_pad, Cp)
        w = jnp.transpose(w, (2, 3, 1, 0)).astype(jnp.float32)
        w = jnp.pad(w, ((0, 0), (0, 0), (0, cin_pad - w.shape[2]), (0, Cp - w.shape[3])))
        return w.reshape(9 * cin_pad, Cp).astype(cdt)   # row-major (kh,kw,ci) matches tap order

    def prep_gb(v):
        return jnp.pad(v.astype(jnp.float32), (0, Cp - Cout)).reshape(1, Cp)

    w1 = prep_w3x3(params["w1"], Ci)
    w2 = prep_w3x3(params["w2"], Cp)
    g1, b1 = prep_gb(params["g1"]), prep_gb(params["b1"])
    g2, b2 = prep_gb(params["g2"]), prep_gb(params["b2"])

    args = [x1, x_skip, w1, g1, b1, w2, g2, b2]
    if has_skip_conv:
        ws = jnp.transpose(params["ws"], (2, 3, 1, 0)).reshape(Cin, Cout).astype(jnp.float32)
        ws = jnp.pad(ws, ((0, Ci - Cin), (0, Cp - Cout))).astype(cdt)
        args += [ws, prep_gb(params["gs"]), prep_gb(params["bs"])]

    # Whole-block-resident design: explicit VMEM sanity guard (BN batch-stats are global, so
    # tiling M requires a two-phase reduction — see TODO(synk) at top of file).
    itemsize = jnp.dtype(cdt).itemsize
    out_itemsize = jnp.dtype(out_dtype).itemsize
    est = (sum(a.size * jnp.dtype(a.dtype).itemsize for a in args)
           + N * (Hout + 2) * (Wout + 2) * Cp * itemsize   # conv2 scratch (compute dtype)
           + M * (9 * Ci + 9 * Cp) * itemsize              # im2col patch slabs
           + 6 * M * Cp * 4                                # f32 accumulators / BN temporaries
           + M * Cp * out_itemsize)                        # output
    budget, vmem_limit = _vmem_budget_and_limit()
    if est > budget:
        raise NotImplementedError("Block too large for the whole-block-in-VMEM kernel")

    kernel = _make_block_kernel(N, Hout, Wout, Ci, Cp, conv1_mode, has_skip_conv, cdt)
    vmem = pl.BlockSpec(memory_space=pltpu.MemorySpace.VMEM)
    out = pl.pallas_call(
        kernel,
        out_shape=jax.ShapeDtypeStruct((N, Hout, Wout, Cp), out_dtype),
        in_specs=[vmem] * len(args),
        out_specs=vmem,
        scratch_shapes=[pltpu.VMEM((N, Hout + 2, Wout + 2, Cp), cdt)],
        compiler_params=pltpu.CompilerParams(vmem_limit_bytes=vmem_limit),
    )(*args)
    return out if keep_padded else out[..., :Cout]


def block_forward(x_nchw, params, stride, compute_dtype=jnp.bfloat16):
    """NCHW adapter (transposes are test-harness glue; a full network should stay NHWC, call
    block_forward_nhwc directly, and keep padded bf16 activations between blocks)."""
    out = block_forward_nhwc(jnp.transpose(x_nchw, (0, 2, 3, 1)), params, stride, compute_dtype)
    return jnp.transpose(out, (0, 3, 1, 2))


# ------------------------- pure-JAX NCHW reference (mirrors PyTorch) -------------------------
def block_reference(x, params, stride):
    def conv(x, w, s, p):
        return lax.conv_general_dilated(x, w, (s, s), [(p, p), (p, p)],
                                        dimension_numbers=("NCHW", "OIHW", "NCHW"))

    def bn(x, g, b):
        mean = x.mean(axis=(0, 2, 3), keepdims=True)
        var = ((x - mean) ** 2).mean(axis=(0, 2, 3), keepdims=True)
        return (x - mean) / jnp.sqrt(var + EPS) * g.reshape(1, -1, 1, 1) + b.reshape(1, -1, 1, 1)

    Cin, Cout = x.shape[1], params["w1"].shape[0]
    y = conv(x, params["w1"], stride, 1)
    y = jnp.maximum(bn(y, params["g1"], params["b1"]), 0.0)
    y = conv(y, params["w2"], 1, 1)
    y = bn(y, params["g2"], params["b2"])
    if Cin == Cout and stride == 1:
        a = x
    else:
        a = bn(conv(x, params["ws"], stride, 0), params["gs"], params["bs"])
    return jnp.maximum(y + a, 0.0)


def _make_params(key, Cin, Cout):
    k1, k2, k3 = jax.random.split(key, 3)
    return {
        "w1": 0.1 * jax.random.normal(k1, (Cout, Cin, 3, 3), jnp.float32),
        "w2": 0.1 * jax.random.normal(k2, (Cout, Cout, 3, 3), jnp.float32),
        "ws": 0.1 * jax.random.normal(k3, (Cout, Cin, 1, 1), jnp.float32),
        "g1": jnp.ones((Cout,), jnp.float32), "b1": jnp.zeros((Cout,), jnp.float32),
        "g2": jnp.ones((Cout,), jnp.float32), "b2": jnp.zeros((Cout,), jnp.float32),
        "gs": jnp.ones((Cout,), jnp.float32), "bs": jnp.zeros((Cout,), jnp.float32),
    }


if __name__ == "__main__":
    key = jax.random.PRNGKey(0)
    kx, kp = jax.random.split(key)

    configs = [
        # (N, Cin, Cout, H, W, stride)
        (2, 4, 8, 16, 16, 1),    # projection skip (conv1x1 + BN)
        (2, 8, 8, 16, 16, 1),    # identity skip
        (2, 4, 8, 16, 16, 2),    # strided block with projection skip (parity conv1 path)
    ]

    for (N, Cin, Cout, H, W, stride) in configs:
        kx, kxi = jax.random.split(kx)
        kp, kpi = jax.random.split(kp)
        x = jax.random.normal(kxi, (N, Cin, H, W), dtype=jnp.float32)
        params = _make_params(kpi, Cin, Cout)

        ref = jax.block_until_ready(block_reference(x, params, stride))

        # exact-semantics check: f32 compute mode, tight tolerance
        out_f32 = jax.block_until_ready(block_forward(x, params, stride, jnp.float32))
        assert out_f32.shape == ref.shape
        assert jnp.allclose(out_f32, ref, atol=1e-3, rtol=1e-3), \
            (stride, float(jnp.max(jnp.abs(out_f32 - ref))))

        # fast path: bf16 activations/weights/intermediates with f32 accumulation
        out_bf16 = jax.block_until_ready(block_forward(x, params, stride, jnp.bfloat16))
        assert out_bf16.shape == ref.shape
        assert jnp.allclose(out_bf16, ref, atol=2e-2, rtol=5e-2), \
            (stride, float(jnp.max(jnp.abs(out_bf16 - ref))))

        # chained-block fast path: bf16, channel-padded (lane-dense) output kept between blocks
        x_nhwc = jnp.transpose(x, (0, 2, 3, 1))
        out_pad = jax.block_until_ready(
            block_forward_nhwc(x_nhwc, params, stride, compute_dtype=jnp.bfloat16,
                               out_dtype=jnp.bfloat16, keep_padded=True))
        assert out_pad.shape[-1] % LANE == 0
        ref_nhwc = jnp.transpose(ref, (0, 2, 3, 1))
        diff = jnp.abs(out_pad[..., :Cout].astype(jnp.float32) - ref_nhwc)
        assert jnp.allclose(out_pad[..., :Cout].astype(jnp.float32), ref_nhwc,
                            atol=5e-2, rtol=1e-1), (stride, float(jnp.max(diff)))

    print("KERNEL_OK")
</pallas_src>

<mosaic_0001>
module attributes {stable_mosaic.version = 11 : i64} {
  func.func @kernel(%arg0: memref<2x18x18x128xf32, #tpu.memory_space<vmem>>, %arg1: memref<512x128xf32, #tpu.memory_space<vmem>>, %arg2: memref<1152x128xf32, #tpu.memory_space<vmem>>, %arg3: memref<1x128xf32, #tpu.memory_space<vmem>>, %arg4: memref<1x128xf32, #tpu.memory_space<vmem>>, %arg5: memref<1152x128xf32, #tpu.memory_space<vmem>>, %arg6: memref<1x128xf32, #tpu.memory_space<vmem>>, %arg7: memref<1x128xf32, #tpu.memory_space<vmem>>, %arg8: memref<128x128xf32, #tpu.memory_space<vmem>>, %arg9: memref<1x128xf32, #tpu.memory_space<vmem>>, %arg10: memref<1x128xf32, #tpu.memory_space<vmem>>, %arg11: memref<2x16x16x128xf32, #tpu.memory_space<vmem>>, %arg12: memref<2x18x18x128xf32, #tpu.memory_space<vmem>>) attributes {dimension_semantics = [], scalar_prefetch = 0 : i64, scratch_operands = 1 : i64, tpu.core_type = #tpu.core_type<tc>} {
    %c0 = arith.constant 0 : index
    %c0_0 = arith.constant 0 : index
    %c0_1 = arith.constant 0 : index
    %c0_2 = arith.constant 0 : index
    %0 = vector.load %arg0[%c0, %c0_0, %c0_1, %c0_2] : memref<2x18x18x128xf32, #tpu.memory_space<vmem>>, vector<2x18x18x128xf32>
    %1 = vector.extract_strided_slice %0 {offsets = [0, 0, 0, 0], sizes = [2, 16, 16, 128], strides = [1, 1, 1, 1]} : vector<2x18x18x128xf32> to vector<2x16x16x128xf32>
    %2 = vector.shape_cast %1 : vector<2x16x16x128xf32> to vector<512x128xf32>
    %3 = vector.extract_strided_slice %0 {offsets = [0, 0, 1, 0], sizes = [2, 16, 16, 128], strides = [1, 1, 1, 1]} : vector<2x18x18x128xf32> to vector<2x16x16x128xf32>
    %4 = vector.shape_cast %3 : vector<2x16x16x128xf32> to vector<512x128xf32>
    %5 = vector.extract_strided_slice %0 {offsets = [0, 0, 2, 0], sizes = [2, 16, 16, 128], strides = [1, 1, 1, 1]} : vector<2x18x18x128xf32> to vector<2x16x16x128xf32>
    %6 = vector.shape_cast %5 : vector<2x16x16x128xf32> to vector<512x128xf32>
    %7 = vector.extract_strided_slice %0 {offsets = [0, 1, 0, 0], sizes = [2, 16, 16, 128], strides = [1, 1, 1, 1]} : vector<2x18x18x128xf32> to vector<2x16x16x128xf32>
    %8 = vector.shape_cast %7 : vector<2x16x16x128xf32> to vector<512x128xf32>
    %9 = vector.extract_strided_slice %0 {offsets = [0, 1, 1, 0], sizes = [2, 16, 16, 128], strides = [1, 1, 1, 1]} : vector<2x18x18x128xf32> to vector<2x16x16x128xf32>
    %10 = vector.shape_cast %9 : vector<2x16x16x128xf32> to vector<512x128xf32>
    %11 = vector.extract_strided_slice %0 {offsets = [0, 1, 2, 0], sizes = [2, 16, 16, 128], strides = [1, 1, 1, 1]} : vector<2x18x18x128xf32> to vector<2x16x16x128xf32>
    %12 = vector.shape_cast %11 : vector<2x16x16x128xf32> to vector<512x128xf32>
    %13 = vector.extract_strided_slice %0 {offsets = [0, 2, 0, 0], sizes = [2, 16, 16, 128], strides = [1, 1, 1, 1]} : vector<2x18x18x128xf32> to vector<2x16x16x128xf32>
    %14 = vector.shape_cast %13 : vector<2x16x16x128xf32> to vector<512x128xf32>
    %15 = vector.extract_strided_slice %0 {offsets = [0, 2, 1, 0], sizes = [2, 16, 16, 128], strides = [1, 1, 1, 1]} : vector<2x18x18x128xf32> to vector<2x16x16x128xf32>
    %16 = vector.shape_cast %15 : vector<2x16x16x128xf32> to vector<512x128xf32>
    %17 = vector.extract_strided_slice %0 {offsets = [0, 2, 2, 0], sizes = [2, 16, 16, 128], strides = [1, 1, 1, 1]} : vector<2x18x18x128xf32> to vector<2x16x16x128xf32>
    %18 = vector.shape_cast %17 : vector<2x16x16x128xf32> to vector<512x128xf32>
    %19 = tpu.concatenate %2, %4, %6, %8, %10, %12, %14, %16, %18 in 1 : vector<512x128xf32>, vector<512x128xf32>, vector<512x128xf32>, vector<512x128xf32>, vector<512x128xf32>, vector<512x128xf32>, vector<512x128xf32>, vector<512x128xf32>, vector<512x128xf32> -> vector<512x1152xf32>
    %c0_3 = arith.constant 0 : index
    %c0_4 = arith.constant 0 : index
    %20 = vector.load %arg2[%c0_3, %c0_4] : memref<1152x128xf32, #tpu.memory_space<vmem>>, vector<1152x128xf32>
    %cst = arith.constant dense<0.000000e+00> : vector<512x128xf32>
    %21 = tpu.matmul %19, %20, %cst {dimension_numbers = #tpu.dot_dimension_numbers<[1], [0], [0], [1], [0, 0, 1, 1], [], []>} : vector<512x1152xf32>, vector<1152x128xf32>, vector<512x128xf32> -> vector<512x128xf32>
    %c0_5 = arith.constant 0 : index
    %c0_6 = arith.constant 0 : index
    %22 = vector.load %arg3[%c0_5, %c0_6] : memref<1x128xf32, #tpu.memory_space<vmem>>, vector<1x128xf32>
    %c0_7 = arith.constant 0 : index
    %c0_8 = arith.constant 0 : index
    %23 = vector.load %arg4[%c0_7, %c0_8] : memref<1x128xf32, #tpu.memory_space<vmem>>, vector<1x128xf32>
    %cst_9 = arith.constant dense<0.000000e+00> : vector<128xf32>
    %24 = vector.multi_reduction <add>, %21, %cst_9 [0] : vector<512x128xf32> to vector<128xf32>
    %25 = vector.shape_cast %24 : vector<128xf32> to vector<1x128xf32>
    %26 = arith.mulf %21, %21 : vector<512x128xf32>
    %cst_10 = arith.constant dense<0.000000e+00> : vector<128xf32>
    %27 = vector.multi_reduction <add>, %26, %cst_10 [0] : vector<512x128xf32> to vector<128xf32>
    %28 = vector.shape_cast %27 : vector<128xf32> to vector<1x128xf32>
    %cst_11 = arith.constant 0.001953125 : f32
    %29 = vector.broadcast %cst_11 : f32 to vector<1x128xf32>
    %30 = arith.mulf %25, %29 : vector<1x128xf32>
    %cst_12 = arith.constant 0.001953125 : f32
    %31 = vector.broadcast %cst_12 : f32 to vector<1x128xf32>
    %32 = arith.mulf %28, %31 : vector<1x128xf32>
    %33 = arith.mulf %30, %30 : vector<1x128xf32>
    %34 = arith.subf %32, %33 : vector<1x128xf32>
    %cst_13 = arith.constant 0.000000e+00 : f32
    %35 = vector.broadcast %cst_13 : f32 to vector<1x128xf32>
    %36 = arith.maximumf %34, %35 : vector<1x128xf32>
    %cst_14 = arith.constant 9.99999974E-6 : f32
    %37 = vector.broadcast %cst_14 : f32 to vector<1x128xf32>
    %38 = arith.addf %36, %37 : vector<1x128xf32>
    %39 = math.rsqrt %38 : vector<1x128xf32>
    %40 = arith.mulf %22, %39 : vector<1x128xf32>
    %41 = arith.mulf %30, %40 : vector<1x128xf32>
    %42 = arith.subf %23, %41 : vector<1x128xf32>
    %43 = vector.broadcast %40 : vector<1x128xf32> to vector<512x128xf32>
    %44 = arith.mulf %21, %43 : vector<512x128xf32>
    %45 = vector.broadcast %42 : vector<1x128xf32> to vector<512x128xf32>
    %46 = arith.addf %44, %45 : vector<512x128xf32>
    %cst_15 = arith.constant 0.000000e+00 : f32
    %47 = vector.broadcast %cst_15 : f32 to vector<512x128xf32>
    %48 = arith.maximumf %46, %47 : vector<512x128xf32>
    %49 = vector.shape_cast %48 : vector<512x128xf32> to vector<2x16x16x128xf32>
    %cst_16 = arith.constant 0.000000e+00 : f32
    %50 = vector.broadcast %cst_16 : f32 to vector<2x16x1x128xf32>
    %51 = tpu.concatenate %50, %49, %50 in 2 : vector<2x16x1x128xf32>, vector<2x16x16x128xf32>, vector<2x16x1x128xf32> -> vector<2x16x18x128xf32>
    %cst_17 = arith.constant 0.000000e+00 : f32
    %52 = vector.broadcast %cst_17 : f32 to vector<2x1x18x128xf32>
    %c0_18 = arith.constant 0 : index
    %c0_19 = arith.constant 0 : index
    %c0_20 = arith.constant 0 : index
    %c0_21 = arith.constant 0 : index
    %53 = vector.load %arg12[%c0_18, %c0_19, %c0_20, %c0_21] : memref<2x18x18x128xf32, #tpu.memory_space<vmem>>, vector<2x1x18x128xf32>
    tpu.vector_store %arg12[%c0_18, %c0_19, %c0_20, %c0_21], %52 {strides = array<i32>} : memref<2x18x18x128xf32, #tpu.memory_space<vmem>>, vector<2x1x18x128xf32>,
    %cst_22 = arith.constant 0.000000e+00 : f32
    %54 = vector.broadcast %cst_22 : f32 to vector<2x1x18x128xf32>
    %c0_23 = arith.constant 0 : index
    %c17 = arith.constant 17 : index
    %c0_24 = arith.constant 0 : index
    %c0_25 = arith.constant 0 : index
    %55 = vector.load %arg12[%c0_23, %c17, %c0_24, %c0_25] : memref<2x18x18x128xf32, #tpu.memory_space<vmem>>, vector<2x1x18x128xf32>
    tpu.vector_store %arg12[%c0_23, %c17, %c0_24, %c0_25], %54 {strides = array<i32>} : memref<2x18x18x128xf32, #tpu.memory_space<vmem>>, vector<2x1x18x128xf32>,
    %c0_26 = arith.constant 0 : index
    %c1 = arith.constant 1 : index
    %c0_27 = arith.constant 0 : index
    %c0_28 = arith.constant 0 : index
    %56 = vector.load %arg12[%c0_26, %c1, %c0_27, %c0_28] : memref<2x18x18x128xf32, #tpu.memory_space<vmem>>, vector<2x16x18x128xf32>
    tpu.vector_store %arg12[%c0_26, %c1, %c0_27, %c0_28], %51 {strides = array<i32>} : memref<2x18x18x128xf32, #tpu.memory_space<vmem>>, vector<2x16x18x128xf32>,
    %c0_29 = arith.constant 0 : index
    %c0_30 = arith.constant 0 : index
    %c0_31 = arith.constant 0 : index
    %c0_32 = arith.constant 0 : index
    %57 = vector.load %arg12[%c0_29, %c0_30, %c0_31, %c0_32] : memref<2x18x18x128xf32, #tpu.memory_space<vmem>>, vector<2x18x18x128xf32>
    %58 = vector.extract_strided_slice %57 {offsets = [0, 0, 0, 0], sizes = [2, 16, 16, 128], strides = [1, 1, 1, 1]} : vector<2x18x18x128xf32> to vector<2x16x16x128xf32>
    %59 = vector.shape_cast %58 : vector<2x16x16x128xf32> to vector<512x128xf32>
    %60 = vector.extract_strided_slice %57 {offsets = [0, 0, 1, 0], sizes = [2, 16, 16, 128], strides = [1, 1, 1, 1]} : vector<2x18x18x128xf32> to vector<2x16x16x128xf32>
    %61 = vector.shape_cast %60 : vector<2x16x16x128xf32> to vector<512x128xf32>
    %62 = vector.extract_strided_slice %57 {offsets = [0, 0, 2, 0], sizes = [2, 16, 16, 128], strides = [1, 1, 1, 1]} : vector<2x18x18x128xf32> to vector<2x16x16x128xf32>
    %63 = vector.shape_cast %62 : vector<2x16x16x128xf32> to vector<512x128xf32>
    %64 = vector.extract_strided_slice %57 {offsets = [0, 1, 0, 0], sizes = [2, 16, 16, 128], strides = [1, 1, 1, 1]} : vector<2x18x18x128xf32> to vector<2x16x16x128xf32>
    %65 = vector.shape_cast %64 : vector<2x16x16x128xf32> to vector<512x128xf32>
    %66 = vector.extract_strided_slice %57 {offsets = [0, 1, 1, 0], sizes = [2, 16, 16, 128], strides = [1, 1, 1, 1]} : vector<2x18x18x128xf32> to vector<2x16x16x128xf32>
    %67 = vector.shape_cast %66 : vector<2x16x16x128xf32> to vector<512x128xf32>
    %68 = vector.extract_strided_slice %57 {offsets = [0, 1, 2, 0], sizes = [2, 16, 16, 128], strides = [1, 1, 1, 1]} : vector<2x18x18x128xf32> to vector<2x16x16x128xf32>
    %69 = vector.shape_cast %68 : vector<2x16x16x128xf32> to vector<512x128xf32>
    %70 = vector.extract_strided_slice %57 {offsets = [0, 2, 0, 0], sizes = [2, 16, 16, 128], strides = [1, 1, 1, 1]} : vector<2x18x18x128xf32> to vector<2x16x16x128xf32>
    %71 = vector.shape_cast %70 : vector<2x16x16x128xf32> to vector<512x128xf32>
    %72 = vector.extract_strided_slice %57 {offsets = [0, 2, 1, 0], sizes = [2, 16, 16, 128], strides = [1, 1, 1, 1]} : vector<2x18x18x128xf32> to vector<2x16x16x128xf32>
    %73 = vector.shape_cast %72 : vector<2x16x16x128xf32> to vector<512x128xf32>
    %74 = vector.extract_strided_slice %57 {offsets = [0, 2, 2, 0], sizes = [2, 16, 16, 128], strides = [1, 1, 1, 1]} : vector<2x18x18x128xf32> to vector<2x16x16x128xf32>
    %75 = vector.shape_cast %74 : vector<2x16x16x128xf32> to vector<512x128xf32>
    %76 = tpu.concatenate %59, %61, %63, %65, %67, %69, %71, %73, %75 in 1 : vector<512x128xf32>, vector<512x128xf32>, vector<512x128xf32>, vector<512x128xf32>, vector<512x128xf32>, vector<512x128xf32>, vector<512x128xf32>, vector<512x128xf32>, vector<512x128xf32> -> vector<512x1152xf32>
    %c0_33 = arith.constant 0 : index
    %c0_34 = arith.constant 0 : index
    %77 = vector.load %arg5[%c0_33, %c0_34] : memref<1152x128xf32, #tpu.memory_space<vmem>>, vector<1152x128xf32>
    %cst_35 = arith.constant dense<0.000000e+00> : vector<512x128xf32>
    %78 = tpu.matmul %76, %77, %cst_35 {dimension_numbers = #tpu.dot_dimension_numbers<[1], [0], [0], [1], [0, 0, 1, 1], [], []>} : vector<512x1152xf32>, vector<1152x128xf32>, vector<512x128xf32> -> vector<512x128xf32>
    %c0_36 = arith.constant 0 : index
    %c0_37 = arith.constant 0 : index
    %79 = vector.load %arg6[%c0_36, %c0_37] : memref<1x128xf32, #tpu.memory_space<vmem>>, vector<1x128xf32>
    %c0_38 = arith.constant 0 : index
    %c0_39 = arith.constant 0 : index
    %80 = vector.load %arg7[%c0_38, %c0_39] : memref<1x128xf32, #tpu.memory_space<vmem>>, vector<1x128xf32>
    %cst_40 = arith.constant dense<0.000000e+00> : vector<128xf32>
    %81 = vector.multi_reduction <add>, %78, %cst_40 [0] : vector<512x128xf32> to vector<128xf32>
    %82 = vector.shape_cast %81 : vector<128xf32> to vector<1x128xf32>
    %83 = arith.mulf %78, %78 : vector<512x128xf32>
    %cst_41 = arith.constant dense<0.000000e+00> : vector<128xf32>
    %84 = vector.multi_reduction <add>, %83, %cst_41 [0] : vector<512x128xf32> to vector<128xf32>
    %85 = vector.shape_cast %84 : vector<128xf32> to vector<1x128xf32>
    %cst_42 = arith.constant 0.001953125 : f32
    %86 = vector.broadcast %cst_42 : f32 to vector<1x128xf32>
    %87 = arith.mulf %82, %86 : vector<1x128xf32>
    %cst_43 = arith.constant 0.001953125 : f32
    %88 = vector.broadcast %cst_43 : f32 to vector<1x128xf32>
    %89 = arith.mulf %85, %88 : vector<1x128xf32>
    %90 = arith.mulf %87, %87 : vector<1x128xf32>
    %91 = arith.subf %89, %90 : vector<1x128xf32>
    %cst_44 = arith.constant 0.000000e+00 : f32
    %92 = vector.broadcast %cst_44 : f32 to vector<1x128xf32>
    %93 = arith.maximumf %91, %92 : vector<1x128xf32>
    %cst_45 = arith.constant 9.99999974E-6 : f32
    %94 = vector.broadcast %cst_45 : f32 to vector<1x128xf32>
    %95 = arith.addf %93, %94 : vector<1x128xf32>
    %96 = math.rsqrt %95 : vector<1x128xf32>
    %97 = arith.mulf %79, %96 : vector<1x128xf32>
    %98 = arith.mulf %87, %97 : vector<1x128xf32>
    %99 = arith.subf %80, %98 : vector<1x128xf32>
    %100 = vector.broadcast %97 : vector<1x128xf32> to vector<512x128xf32>
    %101 = arith.mulf %78, %100 : vector<512x128xf32>
    %102 = vector.broadcast %99 : vector<1x128xf32> to vector<512x128xf32>
    %103 = arith.addf %101, %102 : vector<512x128xf32>
    %c0_46 = arith.constant 0 : index
    %c0_47 = arith.constant 0 : index
    %104 = vector.load %arg1[%c0_46, %c0_47] : memref<512x128xf32, #tpu.memory_space<vmem>>, vector<512x128xf32>
    %c0_48 = arith.constant 0 : index
    %c0_49 = arith.constant 0 : index
    %105 = vector.load %arg8[%c0_48, %c0_49] : memref<128x128xf32, #tpu.memory_space<vmem>>, vector<128x128xf32>
    %cst_50 = arith.constant dense<0.000000e+00> : vector<512x128xf32>
    %106 = tpu.matmul %104, %105, %cst_50 {dimension_numbers = #tpu.dot_dimension_numbers<[1], [0], [0], [1], [0, 0, 1, 1], [], []>} : vector<512x128xf32>, vector<128x128xf32>, vector<512x128xf32> -> vector<512x128xf32>
    %c0_51 = arith.constant 0 : index
    %c0_52 = arith.constant 0 : index
    %107 = vector.load %arg9[%c0_51, %c0_52] : memref<1x128xf32, #tpu.memory_space<vmem>>, vector<1x128xf32>
    %c0_53 = arith.constant 0 : index
    %c0_54 = arith.constant 0 : index
    %108 = vector.load %arg10[%c0_53, %c0_54] : memref<1x128xf32, #tpu.memory_space<vmem>>, vector<1x128xf32>
    %cst_55 = arith.constant dense<0.000000e+00> : vector<128xf32>
    %109 = vector.multi_reduction <add>, %106, %cst_55 [0] : vector<512x128xf32> to vector<128xf32>
    %110 = vector.shape_cast %109 : vector<128xf32> to vector<1x128xf32>
    %111 = arith.mulf %106, %106 : vector<512x128xf32>
    %cst_56 = arith.constant dense<0.000000e+00> : vector<128xf32>
    %112 = vector.multi_reduction <add>, %111, %cst_56 [0] : vector<512x128xf32> to vector<128xf32>
    %113 = vector.shape_cast %112 : vector<128xf32> to vector<1x128xf32>
    %cst_57 = arith.constant 0.001953125 : f32
    %114 = vector.broadcast %cst_57 : f32 to vector<1x128xf32>
    %115 = arith.mulf %110, %114 : vector<1x128xf32>
    %cst_58 = arith.constant 0.001953125 : f32
    %116 = vector.broadcast %cst_58 : f32 to vector<1x128xf32>
    %117 = arith.mulf %113, %116 : vector<1x128xf32>
    %118 = arith.mulf %115, %115 : vector<1x128xf32>
    %119 = arith.subf %117, %118 : vector<1x128xf32>
    %cst_59 = arith.constant 0.000000e+00 : f32
    %120 = vector.broadcast %cst_59 : f32 to vector<1x128xf32>
    %121 = arith.maximumf %119, %120 : vector<1x128xf32>
    %cst_60 = arith.constant 9.99999974E-6 : f32
    %122 = vector.broadcast %cst_60 : f32 to vector<1x128xf32>
    %123 = arith.addf %121, %122 : vector<1x128xf32>
    %124 = math.rsqrt %123 : vector<1x128xf32>
    %125 = arith.mulf %107, %124 : vector<1x128xf32>
    %126 = arith.mulf %115, %125 : vector<1x128xf32>
    %127 = arith.subf %108, %126 : vector<1x128xf32>
    %128 = vector.broadcast %125 : vector<1x128xf32> to vector<512x128xf32>
    %129 = arith.mulf %106, %128 : vector<512x128xf32>
    %130 = vector.broadcast %127 : vector<1x128xf32> to vector<512x128xf32>
    %131 = arith.addf %129, %130 : vector<512x128xf32>
    %132 = arith.addf %103, %131 : vector<512x128xf32>
    %cst_61 = arith.constant 0.000000e+00 : f32
    %133 = vector.broadcast %cst_61 : f32 to vector<512x128xf32>
    %134 = arith.maximumf %132, %133 : vector<512x128xf32>
    %135 = vector.shape_cast %134 : vector<512x128xf32> to vector<2x16x16x128xf32>
    %c0_62 = arith.constant 0 : index
    %c0_63 = arith.constant 0 : index
    %c0_64 = arith.constant 0 : index
    %c0_65 = arith.constant 0 : index
    %136 = vector.load %arg11[%c0_62, %c0_63, %c0_64, %c0_65] : memref<2x16x16x128xf32, #tpu.memory_space<vmem>>, vector<2x16x16x128xf32>
    tpu.vector_store %arg11[%c0_62, %c0_63, %c0_64, %c0_65], %135 {strides = array<i32>} : memref<2x16x16x128xf32, #tpu.memory_space<vmem>>, vector<2x16x16x128xf32>,
    return
  }
}

</mosaic_0001>

<bundles_post_ra>
// kernel: tpu_custom_call.1
= control target key start
LH: loop header
LB: loop body
LE: loop exit
PB: predicated region body
PF: predicated region fallthrough
CT: control target
= control target key end

     0   :  { %16 = vsyncpa [#allocation4], 0  ;;  %s17865_s0 = inlined_call_operand.vmem [shape: f32[2,18,18,128], index: 0, kind: input, shape index: {}]   ;;  %s17866_s1 = inlined_call_operand.hbm [shape: f32[512,128], index: 1, kind: input, shape index: {}]   ;;  %s17867_s2 = inlined_call_operand.vmem [shape: f32[1152,128], index: 2, kind: input, shape index: {}]   ;;  %s17868_s3 = inlined_call_operand.vmem [shape: f32[1,128], index: 3, kind: input, shape index: {}]   ;;  %s17869_s4 = inlined_call_operand.vmem [shape: f32[1,128], index: 4, kind: input, shape index: {}]   ;;  %s17870_s5 = inlined_call_operand.hbm [shape: f32[1152,128], index: 5, kind: input, shape index: {}]   ;;  %s17871_s6 = inlined_call_operand.vmem [shape: f32[1,128], index: 6, kind: input, shape index: {}]   ;;  %s17872_s7 = inlined_call_operand.vmem [shape: f32[1,128], index: 7, kind: input, shape index: {}]   ;;  %s17873_s8 = inlined_call_operand.vmem [shape: f32[128,128], index: 8, kind: input, shape index: {}]   ;;  %s17874_s9 = inlined_call_operand.vmem [shape: f32[1,128], index: 9, kind: input, shape index: {}]   ;;  %s17875_s10 = inlined_call_operand.vmem [shape: f32[1,128], index: 10, kind: input, shape index: {}]   ;;  %s17876_s11 = inlined_call_operand.hbm [shape: f32[2,16,16,128], index: 11, kind: output, shape index: {}]  }
   0x1   :  { %17 = vsyncpa [#allocation7], 0 }
   0x2   :  { %18 = vsyncpa [#allocation5], 0  ;;  %s10021_s17 = smov [#allocation3]   ;;  %s9949_s21 = scalar_lea.hbm %s17866_s1, 8192 }
   0x3   :  { %s26_s18 = sshll.u32 %s10021_s17, 4  ;;  %p9950_p0 = scmp.ne.s32.totalorder %s17866_s1, %s9949_s21  ;;  %s27_s18 = int_to_ptr.vmem [resolvable:$true] %s26_s18 }
   0x4   :  { %p9953_p1 = scmp.lt.u32.totalorder %s9949_s21, %s17866_s1 }
   0x6   :  { %p9955_p2 = pnand %p9953_p1, %p9950_p0 }
   0x8   :  { %9958 = shalt.err (!%p9955_p2)
}
   0x9   :  { %s9959_s26 = scalar_lea.vmem %s27_s18, 8192  ;;  %p9964_p4 = scmp.lt.s32.totalorder %s27_s18, %s27_s18 }
   0xa   :  { %p9960_p3 = scmp.ne.s32.totalorder %s27_s18, %s9959_s26  ;;  %p9965_p5 = scmp.lt.s32.totalorder %s9959_s26, %s9959_s26 }
   0xc   :  { %p9966_p6 = por %p9965_p5, %p9964_p4 }
   0xe   :  { %p9967_p7 = pnand %p9966_p6, %p9960_p3 }
  0x10   :  { %9970 = shalt.err (!%p9967_p7)
}
  0x11   :  { %s10022_s27 = smov 128   ;;  %s10023_s28 = smov 8  }
  0x12   :  { %32 = dma.hbm_to_vmem [thread:$0]  %s17866_s1, 8192, %s27_s18, [#allocation4], %s10022_s27, %s10022_s27, %s10023_s28  }
  0x13   :  { %s10024_s12 = smov [#allocation6]   ;;  %s9971_s16 = scalar_lea.hbm %s17870_s5, 18432 }
  0x14   :  { %s44_s13 = sshll.u32 %s10024_s12, 4  ;;  %p9972_p8 = scmp.ne.s32.totalorder %s17870_s5, %s9971_s16  ;;  %s45_s13 = int_to_ptr.vmem [resolvable:$true] %s44_s13 }
  0x15   :  { %p9975_p9 = scmp.lt.u32.totalorder %s9971_s16, %s17870_s5 }
  0x17   :  { %p9977_p10 = pnand %p9975_p9, %p9972_p8 }
  0x19   :  { %9980 = shalt.err (!%p9977_p10)
}
  0x1a   :  { %s9981_s22 = scalar_lea.vmem %s45_s13, 18432  ;;  %p9986_p12 = scmp.lt.s32.totalorder %s45_s13, %s45_s13 }
  0x1b   :  { %p9982_p11 = scmp.ne.s32.totalorder %s45_s13, %s9981_s22  ;;  %p9987_p13 = scmp.lt.s32.totalorder %s9981_s22, %s9981_s22 }
  0x1d   :  { %p9988_p0 = por %p9987_p13, %p9986_p12 }
  0x1f   :  { %p9989_p1 = pnand %p9988_p0, %p9982_p11 }
  0x21   :  { %9992 = shalt.err (!%p9989_p1)
}
  0x22   :  { %50 = dma.hbm_to_vmem [thread:$0]  %s17870_s5, 18432, %s45_s13, [#allocation7], %s10022_s27, %s10022_s27, %s10023_s28  }
  0x23   :  { %10015 = dma.done.wait [#allocation4], 8192  }
  0x24   :  { %10016 = vsyncadd [#allocation4], 4294959104 }
  0x25   :  { %10017 = dma.done.wait [#allocation7], 18432  }
  0x26   :  { %10018 = vsyncadd [#allocation7], 4294948864  ;;  %v17877_v0 = vmov 0.0|0.0   ;;  %v789_v1 = vld [vmem:[%s17867_s2] sm:$0xff]  ;;  %v790_v2 = vld [vmem:[%s17867_s2 + $0x8] sm:$0xff]  ;;  %vm271_vm0 = vcmask 1046528  }
  0x27   :  { %8503 = vmatprep.subr.bf16.mxu0 %v17877_v0  ;;  %v791_v3 = vld [vmem:[%s17867_s2 + $0x10] sm:$0xff]  ;;  %v8504_v4 = vpack.c.bf16 %v790_v2, %v789_v1  ;;  %v792_v5 = vld [vmem:[%s17867_s2 + $0x18] sm:$0xff]  ;;  %v793_v7 = vld [vmem:[%s17867_s2 + $0x20] sm:$0xff]  ;;  %vm496_vm1 = vcmask 1045504   ;;  %vm3340_vm2 = vcmask 1040384  }
  0x28   :  { %v8507_v6 = vpack.c.bf16 %v792_v5, %v791_v3  ;;  %v794_v8 = vld [vmem:[%s17867_s2 + $0x28] sm:$0xff]  ;;  %v795_v10 = vld [vmem:[%s17867_s2 + $0x30] sm:$0xff]  ;;  %v796_v11 = vld [vmem:[%s17867_s2 + $0x38] sm:$0xff] }
  0x29   :  { %8505 = vmatpush1.bf16.msra.mxu0 %v8504_v4  ;;  %v8510_v9 = vpack.c.bf16 %v794_v8, %v793_v7  ;;  %v10148_v12 = vld [vmem:[%s17865_s0] sm:$0xff]  ;;  %v8513_v13 = vpack.c.bf16 %v796_v11, %v795_v10  ;;  %v10153_v14 = vld [vmem:[%s17865_s0 + $0x8] sm:$0xff]  ;;  %v799_v21 = vld [vmem:[%s17867_s2 + $0x50] sm:$0xff] }
  0x2a   :  { %8506 = vmatprep.subr.bf16.mxu0 %v17877_v0  ;;  %v272_v15 = vrot.slane %v10148_v12, 1  ;;  %v797_v16 = vld [vmem:[%s17867_s2 + $0x40] sm:$0xff]  ;;  %v798_v17 = vld [vmem:[%s17867_s2 + $0x48] sm:$0xff]  ;;  %v273_v18 = vrot.slane %v10153_v14, 1  ;;  %v800_v22 = vld [vmem:[%s17867_s2 + $0x58] sm:$0xff] }
  0x2b   :  { %v8516_v20 = vpack.c.bf16 %v798_v17, %v797_v16  ;;  %v8519_v23 = vpack.c.bf16 %v800_v22, %v799_v21  ;;  %v801_v24 = vld [vmem:[%s17867_s2 + $0x60] sm:$0xff]  ;;  %v802_v25 = vld [vmem:[%s17867_s2 + $0x68] sm:$0xff]  ;;  %v803_v27 = vld [vmem:[%s17867_s2 + $0x70] sm:$0xff] }
  0x2c   :  { %v274_v19 = vsel %vm271_vm0, %v272_v15, %v273_v18  ;;  %v8522_v26 = vpack.c.bf16 %v802_v25, %v801_v24  ;;  %v804_v28 = vld [vmem:[%s17867_s2 + $0x78] sm:$0xff]  ;;  %v805_v30 = vld [vmem:[%s17867_s2 + $0x80] sm:$0xff]  ;;  %v806_v31 = vld [vmem:[%s17867_s2 + $0x88] sm:$0xff] }
  0x2d   :  { %8508 = vmatpush1.bf16.msra.mxu0 %v8507_v6  ;;  %997 = vmatprep.mubr.f32.mxu0 %v274_v19  ;;  %v8525_v29 = vpack.c.bf16 %v804_v28, %v803_v27  ;;  %v8528_v32 = vpack.c.bf16 %v806_v31, %v805_v30  ;;  %v807_v33 = vld [vmem:[%s17867_s2 + $0x90] sm:$0xff]  ;;  %v808_v34 = vld [vmem:[%s17867_s2 + $0x98] sm:$0xff]  ;;  %v809_v36 = vld [vmem:[%s17867_s2 + $0xa0] sm:$0xff] }
  0x2e   :  { %8509 = vmatprep.subr.bf16.mxu0 %v17877_v0  ;;  %v8531_v35 = vpack.c.bf16 %v808_v34, %v807_v33  ;;  %v810_v37 = vld [vmem:[%s17867_s2 + $0xa8] sm:$0xff]  ;;  %v811_v39 = vld [vmem:[%s17867_s2 + $0xb0] sm:$0xff]  ;;  %v812_v40 = vld [vmem:[%s17867_s2 + $0xb8] sm:$0xff] }
  0x2f   :  { %v8534_v38 = vpack.c.bf16 %v810_v37, %v809_v36  ;;  %v8537_v41 = vpack.c.bf16 %v812_v40, %v811_v39  ;;  %v813_v42 = vld [vmem:[%s17867_s2 + $0xc0] sm:$0xff]  ;;  %v814_v43 = vld [vmem:[%s17867_s2 + $0xc8] sm:$0xff]  ;;  %v815_v45 = vld [vmem:[%s17867_s2 + $0xd0] sm:$0xff] }
  0x30   :  { %v8540_v44 = vpack.c.bf16 %v814_v43, %v813_v42  ;;  %v816_v46 = vld [vmem:[%s17867_s2 + $0xd8] sm:$0xff]  ;;  %v817_v48 = vld [vmem:[%s17867_s2 + $0xe0] sm:$0xff]  ;;  %v818_v49 = vld [vmem:[%s17867_s2 + $0xe8] sm:$0xff] }
  0x31   :  { %8511 = vmatpush1.bf16.msra.mxu0 %v8510_v9  ;;  %v8543_v47 = vpack.c.bf16 %v816_v46, %v815_v45  ;;  %v8546_v50 = vpack.c.bf16 %v818_v49, %v817_v48  ;;  %v819_v51 = vld [vmem:[%s17867_s2 + $0xf0] sm:$0xff]  ;;  %v820_v52 = vld [vmem:[%s17867_s2 + $0xf8] sm:$0xff]  ;;  %v821_v55 = vld [vmem:[%s17867_s2 + $0x100] sm:$0xff] }
  0x32   :  { %8512 = vmatprep.subr.bf16.mxu0 %v17877_v0  ;;  %v10247_v53 = vld [vmem:[%s17865_s0 + $0x10] sm:$0x3]  ;;  %v8549_v54 = vpack.c.bf16 %v820_v52, %v819_v51  ;;  %v822_v56 = vld [vmem:[%s17867_s2 + $0x108] sm:$0xff]  ;;  %v10260_v58 = vld [vmem:[%s17865_s0 + $0x18] sm:$0xff] }
  0x33   :  { %v275_v57 = vrot.slane %v10247_v53, 1  ;;  %v10265_v59 = vld [vmem:[%s17865_s0 + $0x20] sm:$0xff]  ;;  %v8552_v60 = vpack.c.bf16 %v822_v56, %v821_v55  ;;  %v277_v62 = vrot.slane %v10260_v58, 1  ;;  %v823_v1 = vld [vmem:[%s17867_s2 + $0x110] sm:$0xff]  ;;  %v824_v2 = vld [vmem:[%s17867_s2 + $0x118] sm:$0xff] }
  0x34   :  { %v278_v63 = vrot.slane %v10265_v59, 1  ;;  %v10282_v3 = vld [vmem:[%s17865_s0 + $0x28] sm:$0x3]  ;;  %v8555_v4 = vpack.c.bf16 %v824_v2, %v823_v1  ;;  %v825_v7 = vld [vmem:[%s17867_s2 + $0x120] sm:$0xff]  ;;  %v10299_v9 = vld [vmem:[%s17865_s0 + $0x30] sm:$0xff] }
  0x35   :  { %8514 = vmatpush1.bf16.msra.mxu0 %v8513_v13  ;;  %v276_v61 = vsel %vm271_vm0, %v273_v18, %v275_v57  ;;  %v280_v6 = vrot.slane %v10282_v3, 1  ;;  %v826_v8 = vld [vmem:[%s17867_s2 + $0x128] sm:$0xff]  ;;  %v10304_v10 = vld [vmem:[%s17865_s0 + $0x38] sm:$0xff]  ;;  %v282_v15 = vrot.slane %v10299_v9, 1  ;;  %v827_v17 = vld [vmem:[%s17867_s2 + $0x130] sm:$0xff] }
  0x36   :  { %8515 = vmatprep.subr.bf16.mxu0 %v17877_v0  ;;  %v10286_v5 = vsel %vm271_vm0, %v277_v62, %v278_v63  ;;  %v8558_v11 = vpack.c.bf16 %v826_v8, %v825_v7  ;;  %v283_v16 = vrot.slane %v10304_v10, 1  ;;  %v828_v18 = vld [vmem:[%s17867_s2 + $0x138] sm:$0xff]  ;;  %v10323_v19 = vld [vmem:[%s17865_s0 + $0x40] sm:$0x3]  ;;  %v830_v24 = vld [vmem:[%s17867_s2 + $0x148] sm:$0xff] }
  0x37   :  { %18515 = vst [vmem:[#allocation12_spill] sm:$0xff] %v10286_v5  ;;  %v10309_v13 = vsel %vm271_vm0, %v278_v63, %v280_v6  ;;  %v285_v22 = vrot.slane %v10323_v19, 1  ;;  %v10341_v25 = vld [vmem:[%s17865_s0 + $0x48] sm:$0xff]  ;;  %v831_v31 = vld [vmem:[%s17867_s2 + $0x150] sm:$0xff]  ;;  %v10365_v33 = vld [vmem:[%s17865_s0 + $0x58] sm:$0x3] }
  0x38   :  { %18516 = vst [vmem:[#allocation13_spill] sm:$0xff] %v10309_v13  ;;  %v10328_v21 = vsel %vm271_vm0, %v282_v15, %v283_v16  ;;  %v290_v36 = vrot.slane %v10365_v33, 1  ;;  %v833_v37 = vld [vmem:[%s17867_s2 + $0x160] sm:$0xff]  ;;  %v10388_v40 = vld [vmem:[%s17865_s0 + $0x68] sm:$0xff]  ;;  %v835_v45 = vld [vmem:[%s17867_s2 + $0x170] sm:$0xff] }
  0x39   :  { %8517 = vmatpush1.bf16.msra.mxu0 %v8516_v20  ;;  %v8561_v20 = vpack.c.bf16 %v828_v18, %v827_v17  ;;  %18517 = vst [vmem:[#allocation14_spill] sm:$0xff] %v10328_v21  ;;  %v10351_v28 = vsel %vm271_vm0, %v283_v16, %v285_v22  ;;  %v10383_v39 = vld [vmem:[%s17865_s0 + $0x60] sm:$0xff]  ;;  %v836_v46 = vld [vmem:[%s17867_s2 + $0x178] sm:$0xff]  ;;  %v838_v52 = vld [vmem:[%s17867_s2 + $0x188] sm:$0xff] }
  0x3a   :  { %8518 = vmatprep.subr.bf16.mxu0 %v17877_v0  ;;  %18518 = vst [vmem:[#allocation15_spill] sm:$0xff] %v10351_v28  ;;  %v292_v43 = vrot.slane %v10383_v39, 1  ;;  %v8573_v48 = vpack.c.bf16 %v836_v46, %v835_v45  ;;  %v837_v51 = vld [vmem:[%s17867_s2 + $0x180] sm:$0xff]  ;;  %v839_v62 = vld [vmem:[%s17867_s2 + $0x190] sm:$0xff]  ;;  %v840_v63 = vld [vmem:[%s17867_s2 + $0x198] sm:$0xff] }
  0x3b   :  { %v10430_v55 = vld [vmem:[%s17865_s0 + $0x80] sm:$0xff]  ;;  %v8576_v56 = vpack.c.bf16 %v838_v52, %v837_v51  ;;  %v10449_v1 = vld [vmem:[%s17865_s0 + $0x88] sm:$0x3]  ;;  %v8579_v2 = vpack.c.bf16 %v840_v63, %v839_v62  ;;  %v10472_v15 = vld [vmem:[%s17865_s0 + $0x98] sm:$0xff] }
  0x3c   :  { %v300_v6 = vrot.slane %v10449_v1, 1  ;;  %v841_v7 = vld [vmem:[%s17867_s2 + $0x1a0] sm:$0xff]  ;;  %v842_v8 = vld [vmem:[%s17867_s2 + $0x1a8] sm:$0xff]  ;;  %v10549_v51 = vld [vmem:[%s17865_s0 + $0xd0] sm:$0x3] }
  0x3d   :  { %8520 = vmatpush1.bf16.msra.mxu0 %v8519_v23  ;;  %v829_v23 = vld [vmem:[%s17867_s2 + $0x140] sm:$0xff]  ;;  %v8582_v16 = vpack.c.bf16 %v842_v8, %v841_v7  ;;  %v10536_v45 = vld [vmem:[%s17865_s0 + $0xc8] sm:$0xff]  ;;  %vm14204_vm3 = vmneg %vm3340_vm2 }
  0x3e   :  { %8521 = vmatprep.subr.bf16.mxu0 %v17877_v0  ;;  %v8564_v27 = vpack.c.bf16 %v830_v24, %v829_v23  ;;  %v10485_v22 = vld [vmem:[%s17865_s0 + $0xa0] sm:$0x3]  ;;  %v846_v8 = vld [vmem:[%s17867_s2 + $0x1c8] sm:$0xff] }
  0x3f   :  { %v305_v24 = vrot.slane %v10485_v22, 1  ;;  %v845_v7 = vld [vmem:[%s17867_s2 + $0x1c0] sm:$0xff] }
  0x41   :  { %8523 = vmatpush1.bf16.msra.mxu0 %v8522_v26  ;;  %v10346_v26 = vld [vmem:[%s17865_s0 + $0x50] sm:$0xff] }
  0x42   :  { %8524 = vmatprep.subr.bf16.mxu0 %v17877_v0  ;;  %v288_v30 = vrot.slane %v10346_v26, 1 }
  0x44   :  { %v10393_v42 = vsel %vm271_vm0, %v288_v30, %v290_v36  ;;  %v843_v36 = vld [vmem:[%s17867_s2 + $0x1b0] sm:$0xff] }
  0x45   :  { %8526 = vmatpush1.bf16.msra.mxu0 %v8525_v29  ;;  %v287_v29 = vrot.slane %v10341_v25, 1  ;;  %18520 = vst [vmem:[#allocation17_spill] sm:$0xff] %v10393_v42 }
  0x46   :  { %8527 = vmatprep.subr.bf16.mxu0 %v17877_v0 }
  0x49   :  { %8529 = vmatpush1.bf16.msra.mxu0 %v8528_v32  ;;  %v832_v32 = vld [vmem:[%s17867_s2 + $0x158] sm:$0xff] }
  0x4a   :  { %8530 = vmatprep.subr.bf16.mxu0 %v17877_v0  ;;  %v8567_v34 = vpack.c.bf16 %v832_v32, %v831_v31 }
  0x4d   :  { %8532 = vmatpush1.bf16.msra.mxu0 %v8531_v35  ;;  %v10370_v35 = vsel %vm271_vm0, %v287_v29, %v288_v30  ;;  %v10502_v29 = vld [vmem:[%s17865_s0 + $0xb0] sm:$0xff] }
  0x4e   :  { %8533 = vmatprep.subr.bf16.mxu0 %v17877_v0  ;;  %18519 = vst [vmem:[#allocation16_spill] sm:$0xff] %v10370_v35  ;;  %v308_v32 = vrot.slane %v10502_v29, 1 }
  0x51   :  { %8535 = vmatpush1.bf16.msra.mxu0 %v8534_v38  ;;  %v834_v38 = vld [vmem:[%s17867_s2 + $0x168] sm:$0xff] }
  0x52   :  { %8536 = vmatprep.subr.bf16.mxu0 %v17877_v0 }
  0x55   :  { %8538 = vmatpush1.bf16.msra.mxu0 %v8537_v41  ;;  %v8570_v41 = vpack.c.bf16 %v834_v38, %v833_v37  ;;  %v844_v37 = vld [vmem:[%s17867_s2 + $0x1b8] sm:$0xff] }
  0x56   :  { %8539 = vmatprep.subr.bf16.mxu0 %v17877_v0  ;;  %v8585_v38 = vpack.c.bf16 %v844_v37, %v843_v36 }
  0x59   :  { %8541 = vmatpush1.bf16.msra.mxu0 %v8540_v44  ;;  %v293_v44 = vrot.slane %v10388_v40, 1 }
  0x5a   :  { %8542 = vmatprep.subr.bf16.mxu0 %v17877_v0 }
  0x5b   :  { %v10412_v49 = vsel %vm271_vm0, %v292_v43, %v293_v44 }
  0x5c   :  { %18521 = vst [vmem:[#allocation18_spill] sm:$0xff] %v10412_v49 }
  0x5d   :  { %8544 = vmatpush1.bf16.msra.mxu0 %v8543_v47  ;;  %v10407_v47 = vld [vmem:[%s17865_s0 + $0x70] sm:$0x3] }
  0x5e   :  { %8545 = vmatprep.subr.bf16.mxu0 %v17877_v0 }
  0x61   :  { %8547 = vmatpush1.bf16.msra.mxu0 %v8546_v50  ;;  %v295_v50 = vrot.slane %v10407_v47, 1 }
  0x62   :  { %8548 = vmatprep.subr.bf16.mxu0 %v17877_v0 }
  0x63   :  { %v10435_v57 = vsel %vm271_vm0, %v293_v44, %v295_v50  ;;  %v10531_v44 = vld [vmem:[%s17865_s0 + $0xc0] sm:$0xff]  ;;  %v313_v50 = vrot.slane %v10536_v45, 1 }
  0x64   :  { %18522 = vst [vmem:[#allocation19_spill] sm:$0xff] %v10435_v57 }
  0x65   :  { %8550 = vmatpush1.bf16.msra.mxu0 %v8549_v54  ;;  %v10425_v54 = vld [vmem:[%s17865_s0 + $0x78] sm:$0xff] }
  0x66   :  { %8551 = vmatprep.subr.bf16.mxu0 %v17877_v0 }
  0x68   :  { %998 = vmatmul.mubr.f32.vlgmr.msra.gmra.mrb[0].mxu0 %v10148_v12 }
  0x69   :  { %8553 = vmatpush1.bf16.msra.mxu0 %v8552_v60  ;;  %1002 = vmatprep.mubr.f32.mxu0 %v276_v61  ;;  %v297_v60 = vrot.slane %v10425_v54, 1  ;;  %v298_v61 = vrot.slane %v10430_v55, 1 }
  0x6a   :  { %8554 = vmatprep.subr.bf16.mxu0 %v17877_v0 }
  0x6b   :  { %v10477_v17 = vsel %vm271_vm0, %v298_v61, %v300_v6  ;;  %v10577_v6 = vld [vmem:[%s17865_s0 + $0xe8] sm:$0x3] }
  0x6c   :  { %1003 = vmatmul.mubr.f32.gmra.mrb[2].mxu0 %v10153_v14  ;;  %18524 = vst [vmem:[#allocation21_spill] sm:$0xff] %v10477_v17 }
  0x6d   :  { %1007 = vmatprep.mubr.f32.mxu0 %v10286_v5  ;;  %8556 = vmatpush1.bf16.msra.mxu0 %v8555_v4  ;;  %v10454_v4 = vsel %vm271_vm0, %v297_v60, %v298_v61  ;;  %v10560_v60 = vld [vmem:[%s17865_s0 + $0xd8] sm:$0xff]  ;;  %v10565_v61 = vld [vmem:[%s17865_s0 + $0xe0] sm:$0xff]  ;;  %v10858_v5 = vld [vmem:[%s17865_s0 + $0x1f0] sm:$0x3] }
  0x6e   :  { %8557 = vmatprep.subr.bf16.mxu0 %v17877_v0  ;;  %18523 = vst [vmem:[#allocation20_spill] sm:$0xff] %v10454_v4  ;;  %v317_v63 = vrot.slane %v10560_v60, 1  ;;  %18556 = vst [vmem:[#allocation51_spill] sm:$0xff] %v10858_v5 }
  0x70   :  { %1008 = vmatmul.mubr.f32.gmra.mrb[4].mxu0 %v10260_v58 }
  0x71   :  { %1012 = vmatprep.mubr.f32.mxu0 %v10309_v13  ;;  %8559 = vmatpush1.bf16.msra.mxu0 %v8558_v11  ;;  %v10467_v11 = vld [vmem:[%s17865_s0 + $0x90] sm:$0xff]  ;;  %v10831_v13 = vld [vmem:[%s17865_s0 + $0x1d8] sm:$0x3] }
  0x72   :  { %8560 = vmatprep.subr.bf16.mxu0 %v17877_v0  ;;  %v302_v18 = vrot.slane %v10467_v11, 1  ;;  %18551 = vst [vmem:[#allocation46_spill] sm:$0xff] %v10831_v13 }
  0x74   :  { %1013 = vmatmul.mubr.f32.gmra.mrb[6].mxu0 %v10265_v59 }
  0x75   :  { %1017 = vmatprep.mubr.f32.mxu0 %v10328_v21  ;;  %8562 = vmatpush1.bf16.msra.mxu0 %v8561_v20  ;;  %v303_v20 = vrot.slane %v10472_v15, 1 }
  0x76   :  { %8563 = vmatprep.subr.bf16.mxu0 %v17877_v0 }
  0x77   :  { %v10490_v23 = vsel %vm271_vm0, %v302_v18, %v303_v20  ;;  %v10507_v30 = vsel %vm271_vm0, %v303_v20, %v305_v24  ;;  %v320_v20 = vrot.slane %v10577_v6, 1  ;;  %v10594_v24 = vld [vmem:[%s17865_s0 + $0xf0] sm:$0xff] }
  0x78   :  { %1018 = vmatmul.mubr.f32.gmra.mrb[8].mxu0 %v10299_v9  ;;  %18525 = vst [vmem:[#allocation22_spill] sm:$0xff] %v10490_v23  ;;  %18526 = vst [vmem:[#allocation23_spill] sm:$0xff] %v10507_v30  ;;  %v322_v36 = vrot.slane %v10594_v24, 1 }
  0x79   :  { %1022 = vmatprep.mubr.f32.mxu0 %v10351_v28  ;;  %8565 = vmatpush1.bf16.msra.mxu0 %v8564_v27  ;;  %v10497_v27 = vld [vmem:[%s17865_s0 + $0xa8] sm:$0xff]  ;;  %v10817_v28 = vld [vmem:[%s17865_s0 + $0x1d0] sm:$0xff] }
  0x7a   :  { %8566 = vmatprep.subr.bf16.mxu0 %v17877_v0  ;;  %v307_v31 = vrot.slane %v10497_v27, 1  ;;  %18549 = vst [vmem:[#allocation45_spill] sm:$0xff] %v10817_v28 }
  0x7c   :  { %1023 = vmatmul.mubr.f32.gmra.mrb[10].mxu0 %v10304_v10 }
  0x7d   :  { %1027 = vmatprep.mubr.f32.mxu0 %v10370_v35  ;;  %8568 = vmatpush1.bf16.msra.mxu0 %v8567_v34  ;;  %v10514_v34 = vld [vmem:[%s17865_s0 + $0xb8] sm:$0x3]  ;;  %v10812_v35 = vld [vmem:[%s17865_s0 + $0x1c8] sm:$0xff] }
  0x7e   :  { %8569 = vmatprep.subr.bf16.mxu0 %v17877_v0  ;;  %v310_v43 = vrot.slane %v10514_v34, 1  ;;  %18548 = vst [vmem:[#allocation44_spill] sm:$0xff] %v10812_v35 }
  0x80   :  { %1028 = vmatmul.mubr.f32.gmra.mrb[12].mxu0 %v10341_v25  ;;  %v10542_v46 = vsel %vm271_vm0, %v308_v32, %v310_v43 }
  0x81   :  { %1032 = vmatprep.mubr.f32.mxu0 %v10393_v42  ;;  %8571 = vmatpush1.bf16.msra.mxu0 %v8570_v41  ;;  %v10525_v41 = vsel %vm271_vm0, %v307_v31, %v308_v32  ;;  %18528 = vst [vmem:[#allocation25_spill] sm:$0xff] %v10542_v46  ;;  %v10599_v31 = vld [vmem:[%s17865_s0 + $0xf8] sm:$0xff] }
  0x82   :  { %8572 = vmatprep.subr.bf16.mxu0 %v17877_v0  ;;  %18527 = vst [vmem:[#allocation24_spill] sm:$0xff] %v10525_v41  ;;  %v323_v37 = vrot.slane %v10599_v31, 1  ;;  %v10788_v42 = vld [vmem:[%s17865_s0 + $0x1b8] sm:$0xff] }
  0x83   :  { %18545 = vst [vmem:[#allocation41_spill] sm:$0xff] %v10788_v42 }
  0x84   :  { %1033 = vmatmul.mubr.f32.gmra.mrb[14].mxu0 %v10346_v26  ;;  %v10617_v43 = vsel %vm271_vm0, %v322_v36, %v323_v37 }
  0x85   :  { %1037 = vmatprep.mubr.f32.mxu0 %v10412_v49  ;;  %8574 = vmatpush1.bf16.msra.mxu0 %v8573_v48  ;;  %v312_v48 = vrot.slane %v10531_v44, 1  ;;  %18533 = vst [vmem:[#allocation30_spill] sm:$0xff] %v10617_v43  ;;  %v10783_v49 = vld [vmem:[%s17865_s0 + $0x1b0] sm:$0xff] }
  0x86   :  { %8575 = vmatprep.subr.bf16.mxu0 %v17877_v0 }
  0x87   :  { %v10554_v52 = vsel %vm271_vm0, %v312_v48, %v313_v50 }
  0x88   :  { %1038 = vmatmul.mubr.f32.gmra.mrb[16].mxu0 %v10383_v39  ;;  %18529 = vst [vmem:[#allocation26_spill] sm:$0xff] %v10554_v52 }
  0x89   :  { %1042 = vmatprep.mubr.f32.mxu0 %v10435_v57  ;;  %8577 = vmatpush1.bf16.msra.mxu0 %v8576_v56  ;;  %v315_v56 = vrot.slane %v10549_v51, 1 }
  0x8a   :  { %8578 = vmatprep.subr.bf16.mxu0 %v17877_v0 }
  0x8b   :  { %v10570_v62 = vsel %vm271_vm0, %v313_v50, %v315_v56  ;;  %v10623_v50 = vld [vmem:[%s17865_s0 + $0x108] sm:$0xff]  ;;  %v10628_v56 = vld [vmem:[%s17865_s0 + $0x110] sm:$0xff] }
  0x8c   :  { %1043 = vmatmul.mubr.f32.gmra.mrb[18].mxu0 %v10388_v40  ;;  %18530 = vst [vmem:[#allocation27_spill] sm:$0xff] %v10570_v62 }
  0x8d   :  { %1047 = vmatprep.mubr.f32.mxu0 %v10454_v4  ;;  %8580 = vmatpush1.bf16.msra.mxu0 %v8579_v2  ;;  %v318_v2 = vrot.slane %v10565_v61, 1  ;;  %v851_v4 = vld [vmem:[%s17867_s2 + $0x1f0] sm:$0xff] }
  0x8e   :  { %8581 = vmatprep.subr.bf16.mxu0 %v17877_v0 }
  0x8f   :  { %v10588_v18 = vsel %vm271_vm0, %v317_v63, %v318_v2  ;;  %v10605_v32 = vsel %vm271_vm0, %v318_v2, %v320_v20  ;;  %v327_v2 = vrot.slane %v10623_v50, 1  ;;  %v848_v20 = vld [vmem:[%s17867_s2 + $0x1d8] sm:$0xff] }
  0x90   :  { %1048 = vmatmul.mubr.f32.gmra.mrb[20].mxu0 %v10425_v54  ;;  %18531 = vst [vmem:[#allocation28_spill] sm:$0xff] %v10588_v18  ;;  %18532 = vst [vmem:[#allocation29_spill] sm:$0xff] %v10605_v32 }
  0x91   :  { %1052 = vmatprep.mubr.f32.mxu0 %v10477_v17  ;;  %8583 = vmatpush1.bf16.msra.mxu0 %v8582_v16  ;;  %v8588_v16 = vpack.c.bf16 %v846_v8, %v845_v7  ;;  %v328_v7 = vrot.slane %v10628_v56, 1  ;;  %v10640_v8 = vld [vmem:[%s17865_s0 + $0x118] sm:$0x3] }
  0x92   :  { %8584 = vmatprep.subr.bf16.mxu0 %v17877_v0  ;;  %v10766_v17 = vld [vmem:[%s17865_s0 + $0x178] sm:$0x3] }
  0x93   :  { %v350_v57 = vrot.slane %v10766_v17, 1 }
  0x94   :  { %1053 = vmatmul.mubr.f32.gmra.mrb[22].mxu0 %v10430_v55 }
  0x95   :  { %1057 = vmatprep.mubr.f32.mxu0 %v10490_v23  ;;  %8586 = vmatpush1.bf16.msra.mxu0 %v8585_v38  ;;  %v10612_v38 = vld [vmem:[%s17865_s0 + $0x100] sm:$0x3] }
  0x96   :  { %8587 = vmatprep.subr.bf16.mxu0 %v17877_v0  ;;  %v325_v48 = vrot.slane %v10612_v38, 1 }
  0x98   :  { %1058 = vmatmul.mubr.f32.gmra.mrb[24].mxu0 %v10467_v11  ;;  %v10633_v63 = vsel %vm271_vm0, %v323_v37, %v325_v48  ;;  %v10651_v37 = vsel %vm271_vm0, %v327_v2, %v328_v7  ;;  %v330_v48 = vrot.slane %v10640_v8, 1 }
  0x99   :  { %1062 = vmatprep.mubr.f32.mxu0 %v10507_v30  ;;  %8589 = vmatpush1.bf16.msra.mxu0 %v8588_v16  ;;  %18534 = vst [vmem:[#allocation31_spill] sm:$0xff] %v10633_v63  ;;  %v847_v16 = vld [vmem:[%s17867_s2 + $0x1d0] sm:$0xff]  ;;  %18535 = vst [vmem:[#allocation32_spill] sm:$0xff] %v10651_v37  ;;  %v10725_v30 = vld [vmem:[%s17865_s0 + $0x158] sm:$0xff] }
  0x9a   :  { %8590 = vmatprep.subr.bf16.mxu0 %v17877_v0  ;;  %v8591_v36 = vpack.c.bf16 %v848_v20, %v847_v16  ;;  %v10657_v0 = vld [vmem:[%s17865_s0 + $0x120] sm:$0xff]  ;;  %v10668_v2 = vsel %vm271_vm0, %v328_v7, %v330_v48  ;;  %v10686_v7 = vld [vmem:[%s17865_s0 + $0x138] sm:$0xff] }
  0x9b   :  { %18537 = vst [vmem:[#allocation33_spill] sm:$0xff] %v10668_v2  ;;  %v332_v16 = vrot.slane %v10657_v0, 1  ;;  %v10691_v48 = vld [vmem:[%s17865_s0 + $0x140] sm:$0xff] }
  0x9c   :  { %1063 = vmatmul.mubr.f32.gmra.mrb[26].mxu0 %v10472_v15 }
  0x9d   :  { %1067 = vmatprep.mubr.f32.mxu0 %v10525_v41  ;;  %8592 = vmatpush1.bf16.msra.mxu0 %v8591_v36  ;;  %v10720_v41 = vld [vmem:[%s17865_s0 + $0x150] sm:$0xff] }
  0xa0   :  { %1068 = vmatmul.mubr.f32.gmra.mrb[28].mxu0 %v10497_v27 }
  0xa1   :  { %1072 = vmatprep.mubr.f32.mxu0 %v10542_v46 }
  0xa4   :  { %1073 = vmatmul.mubr.f32.gmra.mrb[30].mxu0 %v10502_v29 }
  0xa5   :  { %1077 = vmatprep.mubr.f32.mxu0 %v10554_v52  ;;  %v849_v52 = vld [vmem:[%s17867_s2 + $0x1e0] sm:$0xff] }
  0xa8   :  { %1078 = vmatmul.mubr.f32.gmra.mrb[32].mxu0 %v10531_v44 }
  0xa9   :  { %1082 = vmatprep.mubr.f32.mxu0 %v10570_v62  ;;  %v10703_v62 = vld [vmem:[%s17865_s0 + $0x148] sm:$0x3] }
  0xaa   :  { %v340_v46 = vrot.slane %v10703_v62, 1 }
  0xac   :  { %1083 = vmatmul.mubr.f32.gmra.mrb[34].mxu0 %v10536_v45 }
  0xad   :  { %1087 = vmatprep.mubr.f32.mxu0 %v10588_v18  ;;  %v338_v18 = vrot.slane %v10691_v48, 1 }
  0xb0   :  { %1088 = vmatmul.mubr.f32.gmra.mrb[36].mxu0 %v10560_v60 }
  0xb1   :  { %1092 = vmatprep.mubr.f32.mxu0 %v10605_v32  ;;  %v10675_v32 = vld [vmem:[%s17865_s0 + $0x130] sm:$0x3] }
  0xb4   :  { %1093 = vmatmul.mubr.f32.gmra.mrb[38].mxu0 %v10565_v61 }
  0xb5   :  { %1097 = vmatprep.mubr.f32.mxu0 %v10617_v43  ;;  %v10662_v43 = vld [vmem:[%s17865_s0 + $0x128] sm:$0xff] }
  0xb6   :  { %v333_v20 = vrot.slane %v10662_v43, 1 }
  0xb8   :  { %1098 = vmatmul.mubr.f32.gmra.mrb[40].mxu0 %v10594_v24  ;;  %v10680_v36 = vsel %vm271_vm0, %v332_v16, %v333_v20  ;;  %v337_v16 = vrot.slane %v10686_v7, 1 }
  0xb9   :  { %1102 = vmatprep.mubr.f32.mxu0 %v10633_v63  ;;  %v18536_v63 = vmov 0.0|0.0   ;;  %18538 = vst [vmem:[#allocation34_spill] sm:$0xff] %v10680_v36 }
  0xba   :  { %8593 = vmatprep.subr.bf16.mxu0 %v18536_v63 }
  0xbc   :  { %1103 = vmatmul.mubr.f32.gmra.mrb[42].mxu0 %v10599_v31 }
  0xbd   :  { %1107 = vmatprep.mubr.f32.mxu0 %v10651_v37  ;;  %v335_v37 = vrot.slane %v10675_v32, 1 }
  0xc0   :  { %1108 = vmatmul.mubr.f32.gmra.mrb[44].mxu0 %v10623_v50 }
  0xc1   :  { %1112 = vmatprep.mubr.f32.mxu0 %v10668_v2  ;;  %v10696_v2 = vsel %vm271_vm0, %v333_v20, %v335_v37  ;;  %v850_v37 = vld [vmem:[%s17867_s2 + $0x1e8] sm:$0xff] }
  0xc2   :  { %18539 = vst [vmem:[#allocation35_spill] sm:$0xff] %v10696_v2  ;;  %v8594_v20 = vpack.c.bf16 %v850_v37, %v849_v52  ;;  %v10731_v52 = vsel %vm271_vm0, %v338_v18, %v340_v46  ;;  %v343_v37 = vrot.slane %v10725_v30, 1  ;;  %v10749_v46 = vld [vmem:[%s17865_s0 + $0x168] sm:$0xff] }
  0xc3   :  { %18541 = vst [vmem:[#allocation37_spill] sm:$0xff] %v10731_v52 }
  0xc4   :  { %1113 = vmatmul.mubr.f32.gmra.mrb[46].mxu0 %v10628_v56 }
  0xc5   :  { %1117 = vmatprep.mubr.f32.mxu0 %v10680_v36  ;;  %v10714_v36 = vsel %vm271_vm0, %v337_v16, %v338_v18  ;;  %8595 = vmatpush1.bf16.msra.mxu0 %v8594_v20  ;;  %v342_v16 = vrot.slane %v10720_v41, 1  ;;  %v10754_v18 = vld [vmem:[%s17865_s0 + $0x170] sm:$0xff] }
  0xc6   :  { %18540 = vst [vmem:[#allocation36_spill] sm:$0xff] %v10714_v36  ;;  %8596 = vmatprep.subr.bf16.mxu0 %v18536_v63  ;;  %v348_v23 = vrot.slane %v10754_v18, 1 }
  0xc7   :  { %v10743_v20 = vsel %vm271_vm0, %v342_v16, %v343_v37  ;;  %v347_v16 = vrot.slane %v10749_v46, 1 }
  0xc8   :  { %1118 = vmatmul.mubr.f32.gmra.mrb[48].mxu0 %v10657_v0  ;;  %18542 = vst [vmem:[#allocation38_spill] sm:$0xff] %v10743_v20 }
  0xc9   :  { %1122 = vmatprep.mubr.f32.mxu0 %v10696_v2  ;;  %v10738_v2 = vld [vmem:[%s17865_s0 + $0x160] sm:$0x3] }
  0xcc   :  { %1123 = vmatmul.mubr.f32.gmra.mrb[50].mxu0 %v10662_v43 }
  0xcd   :  { %1127 = vmatprep.mubr.f32.mxu0 %v10714_v36  ;;  %v345_v36 = vrot.slane %v10738_v2, 1 }
  0xd0   :  { %1128 = vmatmul.mubr.f32.gmra.mrb[52].mxu0 %v10686_v7 }
  0xd1   :  { %1132 = vmatprep.mubr.f32.mxu0 %v10731_v52  ;;  %v10759_v52 = vsel %vm271_vm0, %v343_v37, %v345_v36  ;;  %v852_v36 = vld [vmem:[%s17867_s2 + $0x1f8] sm:$0xff] }
  0xd2   :  { %18543 = vst [vmem:[#allocation39_spill] sm:$0xff] %v10759_v52  ;;  %v8597_v37 = vpack.c.bf16 %v852_v36, %v851_v4  ;;  %v10794_v4 = vsel %vm271_vm0, %v348_v23, %v350_v57  ;;  %v353_v36 = vrot.slane %v10788_v42, 1 }
  0xd3   :  { %18546 = vst [vmem:[#allocation42_spill] sm:$0xff] %v10794_v4 }
  0xd4   :  { %1133 = vmatmul.mubr.f32.gmra.mrb[54].mxu0 %v10691_v48 }
  0xd5   :  { %1137 = vmatprep.mubr.f32.mxu0 %v10743_v20  ;;  %v10777_v20 = vsel %vm271_vm0, %v347_v16, %v348_v23  ;;  %8598 = vmatpush1.bf16.msra.mxu0 %v8597_v37  ;;  %v352_v16 = vrot.slane %v10783_v49, 1  ;;  %v497_v37 = vrot.slane %v10148_v12, 2 }
  0xd6   :  { %18544 = vst [vmem:[#allocation40_spill] sm:$0xff] %v10777_v20  ;;  %8599 = vmatprep.subr.bf16.mxu0 %v18536_v63 }
  0xd7   :  { %v354_v57 = vsel %vm271_vm0, %v352_v16, %v353_v36  ;;  %v357_v16 = vrot.slane %v10812_v35, 1 }
  0xd8   :  { %1138 = vmatmul.mubr.f32.gmra.mrb[56].mxu0 %v10720_v41 }
  0xd9   :  { %1142 = vmatprep.mubr.f32.mxu0 %v10759_v52  ;;  %v10801_v52 = vld [vmem:[%s17865_s0 + $0x1c0] sm:$0x3] }
  0xda   :  { %18547 = vst [vmem:[#allocation43_spill] sm:$0xff] %v10801_v52  ;;  %v355_v23 = vrot.slane %v10801_v52, 1  ;;  %v10886_v52 = vld [vmem:[%s17865_s0 + $0x208] sm:$0x3] }
  0xdb   :  { %18561 = vst [vmem:[#allocation56_spill] sm:$0xff] %v10886_v52 }
  0xdc   :  { %1143 = vmatmul.mubr.f32.gmra.mrb[58].mxu0 %v10725_v30  ;;  %v356_v12 = vsel %vm271_vm0, %v353_v36, %v355_v23  ;;  %v360_v36 = vrot.slane %v10831_v13, 1  ;;  %v10841_v23 = vld [vmem:[%s17865_s0 + $0x1e0] sm:$0xff] }
  0xdd   :  { %1147 = vmatprep.mubr.f32.mxu0 %v10777_v20  ;;  %v358_v20 = vrot.slane %v10817_v28, 1  ;;  %18553 = vst [vmem:[#allocation48_spill] sm:$0xff] %v10841_v23 }
  0xe0   :  { %1148 = vmatmul.mubr.f32.gmra.mrb[60].mxu0 %v10749_v46 }
  0xe1   :  { %1152 = vmatprep.mubr.f32.mxu0 %v10794_v4  ;;  %v18550_v4 = vrot.slane %v10153_v14, 2 }
  0xe3   :  { %v10826_v21 = vsel %vm496_vm1, %v497_v37, %v18550_v4  ;;  %v10846_v4 = vld [vmem:[%s17865_s0 + $0x1e8] sm:$0xff]  ;;  %v10851_v37 = vsel %vm271_vm0, %v358_v20, %v360_v36  ;;  %v10874_v36 = vld [vmem:[%s17865_s0 + $0x200] sm:$0xff] }
  0xe4   :  { %1153 = vmatmul.mubr.f32.gmra.mrb[62].mxu0 %v10754_v18  ;;  %18554 = vst [vmem:[#allocation49_spill] sm:$0xff] %v10846_v4  ;;  %18555 = vst [vmem:[#allocation50_spill] sm:$0xff] %v10851_v37 }
  0xe5   :  { %1157 = vmatprep.mubr.f32.mxu0 %v354_v57  ;;  %v10835_v57 = vsel %vm271_vm0, %v357_v16, %v358_v20  ;;  %v363_v16 = vrot.slane %v10846_v4, 1  ;;  %v10869_v20 = vld [vmem:[%s17865_s0 + $0x1f8] sm:$0xff]  ;;  %18559 = vst [vmem:[#allocation54_spill] sm:$0xff] %v10874_v36 }
  0xe6   :  { %18552 = vst [vmem:[#allocation47_spill] sm:$0xff] %v10835_v57  ;;  %18558 = vst [vmem:[#allocation53_spill] sm:$0xff] %v10869_v20 }
  0xe8   :  { %1158 = vmatmul.mubr.f32.gmra.mrb[64].mxu0 %v10783_v49 }
  0xe9   :  { %1162 = vmatprep.mubr.f32.mxu0 %v356_v12  ;;  %v362_v12 = vrot.slane %v10841_v23, 1 }
  0xeb   :  { %v10863_v13 = vsel %vm271_vm0, %v362_v12, %v363_v16  ;;  %v367_v12 = vrot.slane %v10869_v20, 1 }
  0xec   :  { %1163 = vmatmul.mubr.f32.gmra.mrb[66].mxu0 %v10788_v42  ;;  %18557 = vst [vmem:[#allocation52_spill] sm:$0xff] %v10863_v13  ;;  %v11224_v42 = vld [vmem:[%s17865_s0 + $0x328] sm:$0x3] }
  0xed   :  { %1167 = vmatprep.mubr.f32.mxu0 %v10835_v57  ;;  %v365_v57 = vrot.slane %v10858_v5, 1  ;;  %v368_v5 = vrot.slane %v10874_v36, 1  ;;  %18617 = vst [vmem:[#allocation112_spill] sm:$0xff] %v11224_v42 }
  0xf0   :  { %1168 = vmatmul.mubr.f32.gmra.mrb[68].mxu0 %v10812_v35 }
  0xf1   :  { %1172 = vmatprep.mubr.f32.mxu0 %v10851_v37  ;;  %v10879_v37 = vsel %vm271_vm0, %v363_v16, %v365_v57  ;;  %v10897_v57 = vld [vmem:[%s17865_s0 + $0x210] sm:$0xff]  ;;  %v10902_v16 = vld [vmem:[%s17865_s0 + $0x218] sm:$0xff] }
  0xf2   :  { %18560 = vst [vmem:[#allocation55_spill] sm:$0xff] %v10879_v37  ;;  %18563 = vst [vmem:[#allocation58_spill] sm:$0xff] %v10897_v57 }
  0xf3   :  { %18564 = vst [vmem:[#allocation59_spill] sm:$0xff] %v10902_v16 }
  0xf4   :  { %1173 = vmatmul.mubr.f32.gmra.mrb[70].mxu0 %v10817_v28  ;;  %v10891_v28 = vsel %vm271_vm0, %v367_v12, %v368_v5  ;;  %v372_v12 = vrot.slane %v10897_v57, 1 }
  0xf5   :  { %1177 = vmatprep.mubr.f32.mxu0 %v10863_v13  ;;  %18562 = vst [vmem:[#allocation57_spill] sm:$0xff] %v10891_v28  ;;  %v370_v13 = vrot.slane %v10886_v52, 1  ;;  %v373_v52 = vrot.slane %v10902_v16, 1 }
  0xf8   :  { %1178 = vmatmul.mubr.f32.gmra.mrb[72].mxu0 %v10841_v23  ;;  %v10914_v23 = vld [vmem:[%s17865_s0 + $0x220] sm:$0x3] }
  0xf9   :  { %1182 = vmatprep.mubr.f32.mxu0 %v10879_v37  ;;  %v10907_v37 = vsel %vm271_vm0, %v368_v5, %v370_v13  ;;  %18566 = vst [vmem:[#allocation61_spill] sm:$0xff] %v10914_v23  ;;  %v10925_v5 = vld [vmem:[%s17865_s0 + $0x228] sm:$0xff]  ;;  %v10930_v13 = vld [vmem:[%s17865_s0 + $0x230] sm:$0xff] }
  0xfa   :  { %18565 = vst [vmem:[#allocation60_spill] sm:$0xff] %v10907_v37  ;;  %18568 = vst [vmem:[#allocation63_spill] sm:$0xff] %v10925_v5 }
  0xfb   :  { %18569 = vst [vmem:[#allocation64_spill] sm:$0xff] %v10930_v13 }
  0xfc   :  { %1183 = vmatmul.mubr.f32.gmra.mrb[74].mxu0 %v10846_v4  ;;  %v10919_v4 = vsel %vm271_vm0, %v372_v12, %v373_v52  ;;  %v377_v12 = vrot.slane %v10925_v5, 1 }
  0xfd   :  { %1187 = vmatprep.mubr.f32.mxu0 %v10891_v28  ;;  %18567 = vst [vmem:[#allocation62_spill] sm:$0xff] %v10919_v4  ;;  %v375_v28 = vrot.slane %v10914_v23, 1  ;;  %v378_v23 = vrot.slane %v10930_v13, 1 }
 0x100   :  { %1188 = vmatmul.mubr.f32.gmra.mrb[76].mxu0 %v10869_v20  ;;  %v10942_v20 = vld [vmem:[%s17865_s0 + $0x238] sm:$0x3] }
 0x101   :  { %1192 = vmatprep.mubr.f32.mxu0 %v10907_v37  ;;  %v10935_v37 = vsel %vm271_vm0, %v373_v52, %v375_v28  ;;  %18571 = vst [vmem:[#allocation66_spill] sm:$0xff] %v10942_v20  ;;  %v10953_v28 = vld [vmem:[%s17865_s0 + $0x240] sm:$0xff]  ;;  %v10958_v52 = vld [vmem:[%s17865_s0 + $0x248] sm:$0xff] }
 0x102   :  { %18570 = vst [vmem:[#allocation65_spill] sm:$0xff] %v10935_v37  ;;  %18573 = vst [vmem:[#allocation68_spill] sm:$0xff] %v10953_v28 }
 0x103   :  { %18574 = vst [vmem:[#allocation69_spill] sm:$0xff] %v10958_v52 }
 0x104   :  { %1193 = vmatmul.mubr.f32.gmra.mrb[78].mxu0 %v10874_v36  ;;  %v10947_v36 = vsel %vm271_vm0, %v377_v12, %v378_v23  ;;  %v382_v12 = vrot.slane %v10953_v28, 1 }
 0x105   :  { %1197 = vmatprep.mubr.f32.mxu0 %v10919_v4  ;;  %18572 = vst [vmem:[#allocation67_spill] sm:$0xff] %v10947_v36  ;;  %v380_v4 = vrot.slane %v10942_v20, 1  ;;  %v383_v20 = vrot.slane %v10958_v52, 1 }
 0x108   :  { %1198 = vmatmul.mubr.f32.gmra.mrb[80].mxu0 %v10897_v57  ;;  %v10970_v57 = vld [vmem:[%s17865_s0 + $0x250] sm:$0x3] }
 0x109   :  { %1202 = vmatprep.mubr.f32.mxu0 %v10935_v37  ;;  %v10963_v37 = vsel %vm271_vm0, %v378_v23, %v380_v4  ;;  %18576 = vst [vmem:[#allocation71_spill] sm:$0xff] %v10970_v57  ;;  %v10981_v23 = vld [vmem:[%s17865_s0 + $0x258] sm:$0xff]  ;;  %v10986_v4 = vld [vmem:[%s17865_s0 + $0x260] sm:$0xff] }
 0x10a   :  { %18575 = vst [vmem:[#allocation70_spill] sm:$0xff] %v10963_v37  ;;  %18578 = vst [vmem:[#allocation73_spill] sm:$0xff] %v10981_v23 }
 0x10b   :  { %18579 = vst [vmem:[#allocation74_spill] sm:$0xff] %v10986_v4 }
 0x10c   :  { %1203 = vmatmul.mubr.f32.gmra.mrb[82].mxu0 %v10902_v16  ;;  %v10975_v16 = vsel %vm271_vm0, %v382_v12, %v383_v20  ;;  %v387_v12 = vrot.slane %v10981_v23, 1 }
 0x10d   :  { %1207 = vmatprep.mubr.f32.mxu0 %v10947_v36  ;;  %18577 = vst [vmem:[#allocation72_spill] sm:$0xff] %v10975_v16  ;;  %v385_v36 = vrot.slane %v10970_v57, 1  ;;  %v388_v57 = vrot.slane %v10986_v4, 1 }
 0x110   :  { %1208 = vmatmul.mubr.f32.gmra.mrb[84].mxu0 %v10925_v5  ;;  %v10998_v5 = vld [vmem:[%s17865_s0 + $0x268] sm:$0x3] }
 0x111   :  { %1212 = vmatprep.mubr.f32.mxu0 %v10963_v37  ;;  %v10991_v37 = vsel %vm271_vm0, %v383_v20, %v385_v36  ;;  %18581 = vst [vmem:[#allocation76_spill] sm:$0xff] %v10998_v5  ;;  %v11009_v20 = vld [vmem:[%s17865_s0 + $0x270] sm:$0xff]  ;;  %v11014_v36 = vld [vmem:[%s17865_s0 + $0x278] sm:$0xff] }
 0x112   :  { %18580 = vst [vmem:[#allocation75_spill] sm:$0xff] %v10991_v37  ;;  %18583 = vst [vmem:[#allocation78_spill] sm:$0xff] %v11009_v20 }
 0x113   :  { %18584 = vst [vmem:[#allocation79_spill] sm:$0xff] %v11014_v36 }
 0x114   :  { %1213 = vmatmul.mubr.f32.gmra.mrb[86].mxu0 %v10930_v13  ;;  %v11003_v13 = vsel %vm271_vm0, %v387_v12, %v388_v57  ;;  %v392_v12 = vrot.slane %v11009_v20, 1 }
 0x115   :  { %1217 = vmatprep.mubr.f32.mxu0 %v10975_v16  ;;  %18582 = vst [vmem:[#allocation77_spill] sm:$0xff] %v11003_v13  ;;  %v390_v16 = vrot.slane %v10998_v5, 1  ;;  %v393_v5 = vrot.slane %v11014_v36, 1 }
 0x118   :  { %1218 = vmatmul.mubr.f32.gmra.mrb[88].mxu0 %v10953_v28  ;;  %v11026_v28 = vld [vmem:[%s17865_s0 + $0x280] sm:$0x3] }
 0x119   :  { %1222 = vmatprep.mubr.f32.mxu0 %v10991_v37  ;;  %v11019_v37 = vsel %vm271_vm0, %v388_v57, %v390_v16  ;;  %18586 = vst [vmem:[#allocation81_spill] sm:$0xff] %v11026_v28  ;;  %v11037_v57 = vld [vmem:[%s17865_s0 + $0x288] sm:$0xff]  ;;  %v11042_v16 = vld [vmem:[%s17865_s0 + $0x290] sm:$0xff] }
 0x11a   :  { %18585 = vst [vmem:[#allocation80_spill] sm:$0xff] %v11019_v37  ;;  %18588 = vst [vmem:[#allocation83_spill] sm:$0xff] %v11037_v57 }
 0x11b   :  { %18589 = vst [vmem:[#allocation84_spill] sm:$0xff] %v11042_v16 }
 0x11c   :  { %1223 = vmatmul.mubr.f32.gmra.mrb[90].mxu0 %v10958_v52  ;;  %v11031_v52 = vsel %vm271_vm0, %v392_v12, %v393_v5  ;;  %v397_v12 = vrot.slane %v11037_v57, 1 }
 0x11d   :  { %1227 = vmatprep.mubr.f32.mxu0 %v11003_v13  ;;  %18587 = vst [vmem:[#allocation82_spill] sm:$0xff] %v11031_v52  ;;  %v395_v13 = vrot.slane %v11026_v28, 1  ;;  %v398_v28 = vrot.slane %v11042_v16, 1 }
 0x120   :  { %1228 = vmatmul.mubr.f32.gmra.mrb[92].mxu0 %v10981_v23  ;;  %v11054_v23 = vld [vmem:[%s17865_s0 + $0x298] sm:$0x3] }
 0x121   :  { %1232 = vmatprep.mubr.f32.mxu0 %v11019_v37  ;;  %v11047_v37 = vsel %vm271_vm0, %v393_v5, %v395_v13  ;;  %18591 = vst [vmem:[#allocation86_spill] sm:$0xff] %v11054_v23  ;;  %v11065_v5 = vld [vmem:[%s17865_s0 + $0x2a0] sm:$0xff]  ;;  %v11070_v13 = vld [vmem:[%s17865_s0 + $0x2a8] sm:$0xff] }
 0x122   :  { %18590 = vst [vmem:[#allocation85_spill] sm:$0xff] %v11047_v37  ;;  %18593 = vst [vmem:[#allocation88_spill] sm:$0xff] %v11065_v5 }
 0x123   :  { %18594 = vst [vmem:[#allocation89_spill] sm:$0xff] %v11070_v13 }
 0x124   :  { %1233 = vmatmul.mubr.f32.gmra.mrb[94].mxu0 %v10986_v4  ;;  %v11059_v4 = vsel %vm271_vm0, %v397_v12, %v398_v28  ;;  %v402_v12 = vrot.slane %v11065_v5, 1 }
 0x125   :  { %1237 = vmatprep.mubr.f32.mxu0 %v11031_v52  ;;  %18592 = vst [vmem:[#allocation87_spill] sm:$0xff] %v11059_v4  ;;  %v400_v52 = vrot.slane %v11054_v23, 1  ;;  %v403_v23 = vrot.slane %v11070_v13, 1 }
 0x128   :  { %1238 = vmatmul.mubr.f32.gmra.mrb[96].mxu0 %v11009_v20  ;;  %v11082_v20 = vld [vmem:[%s17865_s0 + $0x2b0] sm:$0x3] }
 0x129   :  { %1242 = vmatprep.mubr.f32.mxu0 %v11047_v37  ;;  %v11075_v37 = vsel %vm271_vm0, %v398_v28, %v400_v52  ;;  %18596 = vst [vmem:[#allocation91_spill] sm:$0xff] %v11082_v20  ;;  %v11093_v28 = vld [vmem:[%s17865_s0 + $0x2b8] sm:$0xff]  ;;  %v11098_v52 = vld [vmem:[%s17865_s0 + $0x2c0] sm:$0xff] }
 0x12a   :  { %18595 = vst [vmem:[#allocation90_spill] sm:$0xff] %v11075_v37  ;;  %18598 = vst [vmem:[#allocation93_spill] sm:$0xff] %v11093_v28 }
 0x12b   :  { %18599 = vst [vmem:[#allocation94_spill] sm:$0xff] %v11098_v52 }
 0x12c   :  { %1243 = vmatmul.mubr.f32.gmra.mrb[98].mxu0 %v11014_v36  ;;  %v11087_v36 = vsel %vm271_vm0, %v402_v12, %v403_v23  ;;  %v407_v12 = vrot.slane %v11093_v28, 1 }
 0x12d   :  { %1247 = vmatprep.mubr.f32.mxu0 %v11059_v4  ;;  %18597 = vst [vmem:[#allocation92_spill] sm:$0xff] %v11087_v36  ;;  %v405_v4 = vrot.slane %v11082_v20, 1  ;;  %v408_v20 = vrot.slane %v11098_v52, 1 }
 0x130   :  { %1248 = vmatmul.mubr.f32.gmra.mrb[100].mxu0 %v11037_v57  ;;  %v11110_v57 = vld [vmem:[%s17865_s0 + $0x2c8] sm:$0x3] }
 0x131   :  { %1252 = vmatprep.mubr.f32.mxu0 %v11075_v37  ;;  %v11103_v37 = vsel %vm271_vm0, %v403_v23, %v405_v4  ;;  %18601 = vst [vmem:[#allocation96_spill] sm:$0xff] %v11110_v57  ;;  %v11121_v23 = vld [vmem:[%s17865_s0 + $0x2d0] sm:$0xff]  ;;  %v11126_v4 = vld [vmem:[%s17865_s0 + $0x2d8] sm:$0xff] }
 0x132   :  { %18600 = vst [vmem:[#allocation95_spill] sm:$0xff] %v11103_v37  ;;  %18603 = vst [vmem:[#allocation98_spill] sm:$0xff] %v11121_v23 }
 0x133   :  { %18604 = vst [vmem:[#allocation99_spill] sm:$0xff] %v11126_v4 }
 0x134   :  { %1253 = vmatmul.mubr.f32.gmra.mrb[102].mxu0 %v11042_v16  ;;  %v11115_v16 = vsel %vm271_vm0, %v407_v12, %v408_v20  ;;  %v412_v12 = vrot.slane %v11121_v23, 1 }
 0x135   :  { %1257 = vmatprep.mubr.f32.mxu0 %v11087_v36  ;;  %18602 = vst [vmem:[#allocation97_spill] sm:$0xff] %v11115_v16  ;;  %v410_v36 = vrot.slane %v11110_v57, 1  ;;  %v413_v57 = vrot.slane %v11126_v4, 1 }
 0x138   :  { %1258 = vmatmul.mubr.f32.gmra.mrb[104].mxu0 %v11065_v5  ;;  %v11138_v5 = vld [vmem:[%s17865_s0 + $0x2e0] sm:$0x3] }
 0x139   :  { %1262 = vmatprep.mubr.f32.mxu0 %v11103_v37  ;;  %v11131_v37 = vsel %vm271_vm0, %v408_v20, %v410_v36  ;;  %18606 = vst [vmem:[#allocation101_spill] sm:$0xff] %v11138_v5  ;;  %v11149_v20 = vld [vmem:[%s17865_s0 + $0x2e8] sm:$0xff]  ;;  %v11154_v36 = vld [vmem:[%s17865_s0 + $0x2f0] sm:$0xff] }
 0x13a   :  { %18605 = vst [vmem:[#allocation100_spill] sm:$0xff] %v11131_v37  ;;  %18608 = vst [vmem:[#allocation103_spill] sm:$0xff] %v11149_v20 }
 0x13b   :  { %18609 = vst [vmem:[#allocation104_spill] sm:$0xff] %v11154_v36 }
 0x13c   :  { %1263 = vmatmul.mubr.f32.gmra.mrb[106].mxu0 %v11070_v13  ;;  %v11143_v13 = vsel %vm271_vm0, %v412_v12, %v413_v57  ;;  %v417_v12 = vrot.slane %v11149_v20, 1 }
 0x13d   :  { %1267 = vmatprep.mubr.f32.mxu0 %v11115_v16  ;;  %18607 = vst [vmem:[#allocation102_spill] sm:$0xff] %v11143_v13  ;;  %v415_v16 = vrot.slane %v11138_v5, 1  ;;  %v418_v5 = vrot.slane %v11154_v36, 1 }
 0x140   :  { %1268 = vmatmul.mubr.f32.gmra.mrb[108].mxu0 %v11093_v28  ;;  %v11166_v28 = vld [vmem:[%s17865_s0 + $0x2f8] sm:$0x3] }
 0x141   :  { %1272 = vmatprep.mubr.f32.mxu0 %v11131_v37  ;;  %v11159_v37 = vsel %vm271_vm0, %v413_v57, %v415_v16  ;;  %18611 = vst [vmem:[#allocation106_spill] sm:$0xff] %v11166_v28  ;;  %v11177_v57 = vld [vmem:[%s17865_s0 + $0x300] sm:$0xff]  ;;  %v11182_v16 = vld [vmem:[%s17865_s0 + $0x308] sm:$0xff] }
 0x142   :  { %18610 = vst [vmem:[#allocation105_spill] sm:$0xff] %v11159_v37 }
 0x144   :  { %1273 = vmatmul.mubr.f32.gmra.mrb[110].mxu0 %v11098_v52  ;;  %v11171_v52 = vsel %vm271_vm0, %v417_v12, %v418_v5  ;;  %v422_v12 = vrot.slane %v11177_v57, 1 }
 0x145   :  { %1277 = vmatprep.mubr.f32.mxu0 %v11143_v13  ;;  %18612 = vst [vmem:[#allocation107_spill] sm:$0xff] %v11171_v52  ;;  %v420_v13 = vrot.slane %v11166_v28, 1  ;;  %v423_v28 = vrot.slane %v11182_v16, 1 }
 0x148   :  { %1278 = vmatmul.mubr.f32.gmra.mrb[112].mxu0 %v11121_v23  ;;  %v11194_v23 = vld [vmem:[%s17865_s0 + $0x310] sm:$0x3] }
 0x149   :  { %1282 = vmatprep.mubr.f32.mxu0 %v11159_v37  ;;  %v11187_v37 = vsel %vm271_vm0, %v418_v5, %v420_v13  ;;  %18614 = vst [vmem:[#allocation109_spill] sm:$0xff] %v11194_v23  ;;  %v11205_v5 = vld [vmem:[%s17865_s0 + $0x318] sm:$0xff]  ;;  %v11210_v13 = vld [vmem:[%s17865_s0 + $0x320] sm:$0xff] }
 0x14a   :  { %18613 = vst [vmem:[#allocation108_spill] sm:$0xff] %v11187_v37  ;;  %v428_v35 = vrot.slane %v11210_v13, 1 }
 0x14c   :  { %1283 = vmatmul.mubr.f32.gmra.mrb[114].mxu0 %v11126_v4  ;;  %v11199_v4 = vsel %vm271_vm0, %v422_v12, %v423_v28  ;;  %v18057_v12 = vrot.slane %v10725_v30, 2 }
 0x14d   :  { %1287 = vmatprep.mubr.f32.mxu0 %v11171_v52  ;;  %18615 = vst [vmem:[#allocation110_spill] sm:$0xff] %v11199_v4  ;;  %v425_v52 = vrot.slane %v11194_v23, 1 }
 0x14f   :  { %v11217_v23 = vsel %vm271_vm0, %v423_v28, %v425_v52  ;;  %v430_v52 = vrot.slane %v11224_v42, 1  ;;  %v857_v42 = vld [vmem:[%s17867_s2 + $0x220] sm:$0xff] }
 0x150   :  { %1288 = vmatmul.mubr.f32.gmra.mrb[116].mxu0 %v11149_v20  ;;  %18616 = vst [vmem:[#allocation111_spill] sm:$0xff] %v11217_v23  ;;  %v427_v20 = vrot.slane %v11205_v5, 1 }
 0x151   :  { %1292 = vmatprep.mubr.f32.mxu0 %v11187_v37  ;;  %v567_v37 = vrot.slane %v10720_v41, 2 }
 0x152   :  { %v11235_v28 = vsel %vm271_vm0, %v427_v20, %v428_v35  ;;  %v854_v20 = vld [vmem:[%s17867_s2 + $0x208] sm:$0xff] }
 0x153   :  { %18618 = vst [vmem:[#allocation113_spill] sm:$0xff] %v11235_v28 }
 0x154   :  { %1293 = vmatmul.mubr.f32.gmra.mrb[118].mxu0 %v11154_v36  ;;  %v11241_v36 = vsel %vm271_vm0, %v428_v35, %v430_v52  ;;  %v500_v35 = vrot.slane %v10247_v53, 2  ;;  %v855_v52 = vld [vmem:[%s17867_s2 + $0x210] sm:$0xff]  ;;  %v503_v53 = vrot.slane %v10265_v59, 2 }
 0x155   :  { %1297 = vmatprep.mubr.f32.mxu0 %v11199_v4  ;;  %v11229_v4 = vsel %vm496_vm1, %v567_v37, %v18057_v12  ;;  %18619 = vst [vmem:[#allocation114_spill] sm:$0xff] %v11241_v36  ;;  %v853_v37 = vld [vmem:[%s17867_s2 + $0x200] sm:$0xff] }
 0x156   :  { %8187 = vmatprep.mubr.f32.mxu1 %v11229_v4  ;;  %v8600_v12 = vpack.c.bf16 %v854_v20, %v853_v37  ;;  %v502_v37 = vrot.slane %v10260_v58, 2 }
 0x158   :  { %1298 = vmatmul.mubr.f32.gmra.mrb[120].mxu0 %v11177_v57 }
 0x159   :  { %1302 = vmatprep.mubr.f32.mxu0 %v11217_v23 }
 0x15c   :  { %1303 = vmatmul.mubr.f32.gmra.mrb[122].mxu0 %v11182_v16 }
 0x15d   :  { %1307 = vmatprep.mubr.f32.mxu0 %v11235_v28  ;;  %v18620_v28 = vrot.slane %v10153_v14, 2  ;;  %v11276_v14 = vsel %vm496_vm1, %v502_v37, %v503_v53 }
 0x15f   :  { %v501_v23 = vsel %vm496_vm1, %v18620_v28, %v500_v35  ;;  %v861_v35 = vld [vmem:[%s17867_s2 + $0x240] sm:$0xff] }
 0x160   :  { %1308 = vmatmul.mubr.f32.gmra.mrb[124].mxu0 %v11205_v5 }
 0x161   :  { %1312 = vmatprep.mubr.f32.mxu0 %v11241_v36  ;;  %v856_v36 = vld [vmem:[%s17867_s2 + $0x218] sm:$0xff] }
 0x162   :  { %v8603_v20 = vpack.c.bf16 %v856_v36, %v855_v52  ;;  %v859_v36 = vld [vmem:[%s17867_s2 + $0x230] sm:$0xff]  ;;  %v862_v52 = vld [vmem:[%s17867_s2 + $0x248] sm:$0xff] }
 0x163   :  { %v8612_v37 = vpack.c.bf16 %v862_v52, %v861_v35  ;;  %v518_v52 = vrot.slane %v10388_v40, 2 }
 0x164   :  { %1313 = vmatmul.mubr.f32.gmra.mrb[126].mxu0 %v11210_v13 }
 0x165   :  { %1382 = vmatprep.mubr.f32.mxu0 %v10260_v58  ;;  %v505_v58 = vrot.slane %v10282_v3, 2  ;;  %v507_v3 = vrot.slane %v10299_v9, 2 }
 0x168   :  { %1383 = vmatmul.mubr.f32.vlgmr.msra.gmra.mrb[0].mxu0 %v10826_v21  ;;  %v858_v21 = vld [vmem:[%s17867_s2 + $0x228] sm:$0xff] }
 0x169   :  { %8601 = vmatpush1.bf16.msra.mxu0 %v8600_v12  ;;  %1387 = vmatprep.mubr.f32.mxu0 %v10265_v59  ;;  %v8606_v59 = vpack.c.bf16 %v858_v21, %v857_v42  ;;  %v860_v12 = vld [vmem:[%s17867_s2 + $0x238] sm:$0xff]  ;;  %v508_v42 = vrot.slane %v10304_v10, 2 }
 0x16a   :  { %8602 = vmatprep.subr.bf16.mxu0 %v18536_v63  ;;  %v8609_v28 = vpack.c.bf16 %v860_v12, %v859_v36  ;;  %v865_v36 = vld [vmem:[%s17867_s2 + $0x260] sm:$0xff]  ;;  %v866_v12 = vld [vmem:[%s17867_s2 + $0x268] sm:$0xff] }
 0x16c   :  { %1388 = vmatmul.mubr.f32.gmra.mrb[2].mxu0 %v501_v23  ;;  %v11289_v23 = vsel %vm496_vm1, %v503_v53, %v505_v58  ;;  %v863_v53 = vld [vmem:[%s17867_s2 + $0x250] sm:$0xff]  ;;  %v513_v58 = vrot.slane %v10346_v26, 2 }
 0x16d   :  { %1392 = vmatprep.mubr.f32.mxu0 %v10299_v9  ;;  %8604 = vmatpush1.bf16.msra.mxu0 %v8603_v20  ;;  %v11303_v9 = vsel %vm496_vm1, %v507_v3, %v508_v42  ;;  %v864_v20 = vld [vmem:[%s17867_s2 + $0x258] sm:$0xff]  ;;  %v8618_v3 = vpack.c.bf16 %v866_v12, %v865_v36  ;;  %v523_v36 = vrot.slane %v10430_v55, 2 }
 0x16e   :  { %8605 = vmatprep.subr.bf16.mxu0 %v18536_v63  ;;  %18621 = vst [vmem:[#allocation115_spill] sm:$0xff] %v11303_v9 }
 0x170   :  { %1393 = vmatmul.mubr.f32.gmra.mrb[4].mxu0 %v11276_v14 }
 0x171   :  { %1397 = vmatprep.mubr.f32.mxu0 %v10304_v10  ;;  %8607 = vmatpush1.bf16.msra.mxu0 %v8606_v59  ;;  %v510_v10 = vrot.slane %v10323_v19, 2  ;;  %v512_v19 = vrot.slane %v10341_v25, 2  ;;  %v8615_v59 = vpack.c.bf16 %v864_v20, %v863_v53  ;;  %v870_v53 = vld [vmem:[%s17867_s2 + $0x288] sm:$0xff] }
 0x172   :  { %8608 = vmatprep.subr.bf16.mxu0 %v18536_v63 }
 0x173   :  { %v11316_v21 = vsel %vm496_vm1, %v508_v42, %v510_v10  ;;  %v867_v42 = vld [vmem:[%s17867_s2 + $0x270] sm:$0xff] }
 0x174   :  { %1398 = vmatmul.mubr.f32.gmra.mrb[6].mxu0 %v11289_v23  ;;  %18622 = vst [vmem:[#allocation116_spill] sm:$0xff] %v11316_v21 }
 0x175   :  { %1402 = vmatprep.mubr.f32.mxu0 %v10341_v25  ;;  %8610 = vmatpush1.bf16.msra.mxu0 %v8609_v28  ;;  %v11330_v25 = vsel %vm496_vm1, %v512_v19, %v513_v58  ;;  %v868_v28 = vld [vmem:[%s17867_s2 + $0x278] sm:$0xff]  ;;  %v871_v19 = vld [vmem:[%s17867_s2 + $0x290] sm:$0xff] }
 0x176   :  { %8611 = vmatprep.subr.bf16.mxu0 %v18536_v63  ;;  %18623 = vst [vmem:[#allocation117_spill] sm:$0xff] %v11330_v25  ;;  %v8621_v10 = vpack.c.bf16 %v868_v28, %v867_v42 }
 0x178   :  { %1403 = vmatmul.mubr.f32.gmra.mrb[8].mxu0 %v11303_v9 }
 0x179   :  { %1407 = vmatprep.mubr.f32.mxu0 %v10346_v26  ;;  %8613 = vmatpush1.bf16.msra.mxu0 %v8612_v37  ;;  %v515_v26 = vrot.slane %v10365_v33, 2  ;;  %v517_v33 = vrot.slane %v10383_v39, 2  ;;  %v869_v37 = vld [vmem:[%s17867_s2 + $0x280] sm:$0xff] }
 0x17a   :  { %8614 = vmatprep.subr.bf16.mxu0 %v18536_v63  ;;  %v8624_v20 = vpack.c.bf16 %v870_v53, %v869_v37  ;;  %v532_v53 = vrot.slane %v10497_v27, 2 }
 0x17b   :  { %v11343_v35 = vsel %vm496_vm1, %v513_v58, %v515_v26  ;;  %v872_v58 = vld [vmem:[%s17867_s2 + $0x298] sm:$0xff]  ;;  %v873_v26 = vld [vmem:[%s17867_s2 + $0x2a0] sm:$0xff] }
 0x17c   :  { %1408 = vmatmul.mubr.f32.gmra.mrb[10].mxu0 %v11316_v21  ;;  %18624 = vst [vmem:[#allocation118_spill] sm:$0xff] %v11343_v35  ;;  %v8627_v12 = vpack.c.bf16 %v872_v58, %v871_v19  ;;  %v535_v19 = vrot.slane %v10514_v34, 2  ;;  %v538_v58 = vrot.slane %v10536_v45, 2  ;;  %v540_v34 = vrot.slane %v10549_v51, 2 }
 0x17d   :  { %1412 = vmatprep.mubr.f32.mxu0 %v10383_v39  ;;  %8616 = vmatpush1.bf16.msra.mxu0 %v8615_v59  ;;  %v11357_v39 = vsel %vm496_vm1, %v517_v33, %v518_v52  ;;  %v527_v33 = vrot.slane %v10467_v11, 2 }
 0x17e   :  { %8617 = vmatprep.subr.bf16.mxu0 %v18536_v63  ;;  %18625 = vst [vmem:[#allocation119_spill] sm:$0xff] %v11357_v39 }
 0x180   :  { %1413 = vmatmul.mubr.f32.gmra.mrb[12].mxu0 %v11330_v25 }
 0x181   :  { %1417 = vmatprep.mubr.f32.mxu0 %v10388_v40  ;;  %8619 = vmatpush1.bf16.msra.mxu0 %v8618_v3  ;;  %v520_v40 = vrot.slane %v10407_v47, 2  ;;  %v522_v47 = vrot.slane %v10425_v54, 2  ;;  %v874_v3 = vld [vmem:[%s17867_s2 + $0x2a8] sm:$0xff] }
 0x182   :  { %8620 = vmatprep.subr.bf16.mxu0 %v18536_v63  ;;  %v8630_v42 = vpack.c.bf16 %v874_v3, %v873_v26  ;;  %v543_v26 = vrot.slane %v10565_v61, 2 }
 0x183   :  { %v11370_v59 = vsel %vm496_vm1, %v518_v52, %v520_v40  ;;  %v528_v52 = vrot.slane %v10472_v15, 2  ;;  %v533_v40 = vrot.slane %v10502_v29, 2 }
 0x184   :  { %1418 = vmatmul.mubr.f32.gmra.mrb[14].mxu0 %v11343_v35  ;;  %18626 = vst [vmem:[#allocation120_spill] sm:$0xff] %v11370_v59 }
 0x185   :  { %1422 = vmatprep.mubr.f32.mxu0 %v10425_v54  ;;  %8622 = vmatpush1.bf16.msra.mxu0 %v8621_v10  ;;  %v11384_v54 = vsel %vm496_vm1, %v522_v47, %v523_v36  ;;  %v530_v10 = vrot.slane %v10485_v22, 2 }
 0x186   :  { %8623 = vmatprep.subr.bf16.mxu0 %v18536_v63  ;;  %18627 = vst [vmem:[#allocation121_spill] sm:$0xff] %v11384_v54 }
 0x187   :  { %v11411_v37 = vsel %vm496_vm1, %v528_v52, %v530_v10  ;;  %v552_v10 = vrot.slane %v10623_v50, 2 }
 0x188   :  { %1423 = vmatmul.mubr.f32.gmra.mrb[16].mxu0 %v11357_v39  ;;  %18630 = vst [vmem:[#allocation124_spill] sm:$0xff] %v11411_v37 }
 0x189   :  { %1427 = vmatprep.mubr.f32.mxu0 %v10430_v55  ;;  %8625 = vmatpush1.bf16.msra.mxu0 %v8624_v20  ;;  %v525_v55 = vrot.slane %v10449_v1, 2  ;;  %v11399_v1 = vsel %vm496_vm1, %v527_v33, %v528_v52  ;;  %v11419_v20 = vsel %vm496_vm1, %v532_v53, %v533_v40  ;;  %v879_v52 = vld [vmem:[%s17867_s2 + $0x2d0] sm:$0xff]  ;;  %v555_v53 = vrot.slane %v10640_v8, 2 }
 0x18a   :  { %8626 = vmatprep.subr.bf16.mxu0 %v18536_v63  ;;  %18629 = vst [vmem:[#allocation123_spill] sm:$0xff] %v11399_v1  ;;  %18631 = vst [vmem:[#allocation125_spill] sm:$0xff] %v11419_v20  ;;  %v560_v8 = vrot.slane %v10675_v32, 2 }
 0x18b   :  { %v11391_v28 = vsel %vm496_vm1, %v523_v36, %v525_v55  ;;  %v877_v36 = vld [vmem:[%s17867_s2 + $0x2c0] sm:$0xff]  ;;  %v545_v55 = vrot.slane %v10577_v6, 2  ;;  %v550_v6 = vrot.slane %v10612_v38, 2 }
 0x18c   :  { %1428 = vmatmul.mubr.f32.gmra.mrb[18].mxu0 %v11370_v59  ;;  %18628 = vst [vmem:[#allocation122_spill] sm:$0xff] %v11391_v28 }
 0x18d   :  { %1432 = vmatprep.mubr.f32.mxu0 %v10467_v11  ;;  %8628 = vmatpush1.bf16.msra.mxu0 %v8627_v12  ;;  %v875_v11 = vld [vmem:[%s17867_s2 + $0x2b0] sm:$0xff]  ;;  %v542_v12 = vrot.slane %v10560_v60, 2 }
 0x18e   :  { %8629 = vmatprep.subr.bf16.mxu0 %v18536_v63 }
 0x18f   :  { %v11452_v3 = vsel %vm496_vm1, %v542_v12, %v543_v26 }
 0x190   :  { %1433 = vmatmul.mubr.f32.gmra.mrb[20].mxu0 %v11384_v54  ;;  %18635 = vst [vmem:[#allocation129_spill] sm:$0xff] %v11452_v3 }
 0x191   :  { %1437 = vmatprep.mubr.f32.mxu0 %v10472_v15  ;;  %8631 = vmatpush1.bf16.msra.mxu0 %v8630_v42  ;;  %v876_v15 = vld [vmem:[%s17867_s2 + $0x2b8] sm:$0xff]  ;;  %v548_v42 = vrot.slane %v10599_v31, 2 }
 0x192   :  { %8632 = vmatprep.subr.bf16.mxu0 %v18536_v63  ;;  %v8633_v22 = vpack.c.bf16 %v876_v15, %v875_v11  ;;  %v553_v11 = vrot.slane %v10628_v56, 2 }
 0x194   :  { %1438 = vmatmul.mubr.f32.gmra.mrb[22].mxu0 %v11391_v28  ;;  %v11485_v15 = vsel %vm496_vm1, %v552_v10, %v553_v11  ;;  %v18648_v10 = vld [vmem:[#allocation43_spill] sm:$0xff] }
 0x195   :  { %1442 = vmatprep.mubr.f32.mxu0 %v10497_v27  ;;  %8634 = vmatpush1.bf16.msra.mxu0 %v8633_v22  ;;  %v11425_v27 = vsel %vm496_vm1, %v533_v40, %v535_v19  ;;  %18639 = vst [vmem:[#allocation133_spill] sm:$0xff] %v11485_v15  ;;  %v558_v40 = vrot.slane %v10662_v43, 2  ;;  %v881_v19 = vld [vmem:[%s17867_s2 + $0x2e0] sm:$0xff] }
 0x196   :  { %8635 = vmatprep.subr.bf16.mxu0 %v18536_v63  ;;  %18632 = vst [vmem:[#allocation126_spill] sm:$0xff] %v11425_v27 }
 0x198   :  { %1443 = vmatmul.mubr.f32.gmra.mrb[24].mxu0 %v11399_v1 }
 0x199   :  { %1447 = vmatprep.mubr.f32.mxu0 %v10502_v29  ;;  %v537_v29 = vrot.slane %v10531_v44, 2 }
 0x19b   :  { %v11432_v47 = vsel %vm496_vm1, %v537_v29, %v538_v58  ;;  %v562_v29 = vrot.slane %v10686_v7, 2 }
 0x19c   :  { %1448 = vmatmul.mubr.f32.gmra.mrb[26].mxu0 %v11411_v37  ;;  %18633 = vst [vmem:[#allocation127_spill] sm:$0xff] %v11432_v47 }
 0x19d   :  { %1452 = vmatprep.mubr.f32.mxu0 %v10531_v44  ;;  %v878_v44 = vld [vmem:[%s17867_s2 + $0x2c8] sm:$0xff] }
 0x19e   :  { %v8636_v51 = vpack.c.bf16 %v878_v44, %v877_v36  ;;  %v565_v36 = vrot.slane %v10703_v62, 2  ;;  %v884_v62 = vld [vmem:[%s17867_s2 + $0x2f8] sm:$0xff]  ;;  %v18645_v44 = vrot.slane %v10725_v30, 2 }
 0x1a0   :  { %1453 = vmatmul.mubr.f32.gmra.mrb[28].mxu0 %v11419_v20 }
 0x1a1   :  { %1457 = vmatprep.mubr.f32.mxu0 %v10536_v45  ;;  %v11444_v45 = vsel %vm496_vm1, %v538_v58, %v540_v34  ;;  %8637 = vmatpush1.bf16.msra.mxu0 %v8636_v51  ;;  %v563_v58 = vrot.slane %v10691_v48, 2 }
 0x1a2   :  { %18634 = vst [vmem:[#allocation128_spill] sm:$0xff] %v11444_v45  ;;  %8638 = vmatprep.subr.bf16.mxu0 %v18536_v63 }
 0x1a3   :  { %v11518_v34 = vsel %vm496_vm1, %v562_v29, %v563_v58  ;;  %v18652_v29 = vld [vmem:[#allocation49_spill] sm:$0xff] }
 0x1a4   :  { %1458 = vmatmul.mubr.f32.gmra.mrb[30].mxu0 %v11425_v27  ;;  %18643 = vst [vmem:[#allocation137_spill] sm:$0xff] %v11518_v34 }
 0x1a5   :  { %1462 = vmatprep.mubr.f32.mxu0 %v10560_v60  ;;  %v11458_v60 = vsel %vm496_vm1, %v543_v26, %v545_v55  ;;  %v572_v26 = vrot.slane %v10749_v46, 2  ;;  %v11547_v55 = vld [vmem:[%s17865_s0 + $0x180] sm:$0xff] }
 0x1a6   :  { %18636 = vst [vmem:[#allocation130_spill] sm:$0xff] %v11458_v60 }
 0x1a8   :  { %1463 = vmatmul.mubr.f32.gmra.mrb[32].mxu0 %v11432_v47 }
 0x1a9   :  { %1467 = vmatprep.mubr.f32.mxu0 %v10565_v61  ;;  %v547_v61 = vrot.slane %v10594_v24, 2 }
 0x1ab   :  { %v11465_v33 = vsel %vm496_vm1, %v547_v61, %v548_v42 }
 0x1ac   :  { %1468 = vmatmul.mubr.f32.gmra.mrb[34].mxu0 %v11444_v45  ;;  %18637 = vst [vmem:[#allocation131_spill] sm:$0xff] %v11465_v33 }
 0x1ad   :  { %1472 = vmatprep.mubr.f32.mxu0 %v10594_v24  ;;  %v880_v24 = vld [vmem:[%s17867_s2 + $0x2d8] sm:$0xff] }
 0x1ae   :  { %v8639_v38 = vpack.c.bf16 %v880_v24, %v879_v52  ;;  %v18647_v24 = vld [vmem:[#allocation44_spill] sm:$0xff] }
 0x1b0   :  { %1473 = vmatmul.mubr.f32.gmra.mrb[36].mxu0 %v11452_v3 }
 0x1b1   :  { %1477 = vmatprep.mubr.f32.mxu0 %v10599_v31  ;;  %v11477_v31 = vsel %vm496_vm1, %v548_v42, %v550_v6  ;;  %8640 = vmatpush1.bf16.msra.mxu0 %v8639_v38  ;;  %v577_v42 = vrot.slane %v10783_v49, 2  ;;  %v18646_v6 = vld [vmem:[#allocation41_spill] sm:$0xff]  ;;  %v18650_v49 = vld [vmem:[#allocation48_spill] sm:$0xff] }
 0x1b2   :  { %18638 = vst [vmem:[#allocation132_spill] sm:$0xff] %v11477_v31  ;;  %8641 = vmatprep.subr.bf16.mxu0 %v18536_v63  ;;  %v578_v52 = vrot.slane %v18646_v6, 2  ;;  %v18649_v38 = vld [vmem:[#allocation45_spill] sm:$0xff] }
 0x1b4   :  { %1478 = vmatmul.mubr.f32.gmra.mrb[38].mxu0 %v11458_v60 }
 0x1b5   :  { %1482 = vmatprep.mubr.f32.mxu0 %v10623_v50  ;;  %v11491_v50 = vsel %vm496_vm1, %v553_v11, %v555_v53  ;;  %v580_v11 = vrot.slane %v18648_v10, 2 }
 0x1b6   :  { %18640 = vst [vmem:[#allocation134_spill] sm:$0xff] %v11491_v50 }
 0x1b7   :  { %v581_v53 = vsel %vm496_vm1, %v578_v52, %v580_v11 }
 0x1b8   :  { %1483 = vmatmul.mubr.f32.gmra.mrb[40].mxu0 %v11465_v33 }
 0x1b9   :  { %1487 = vmatprep.mubr.f32.mxu0 %v10628_v56  ;;  %v557_v56 = vrot.slane %v10657_v0, 2 }
 0x1bb   :  { %v11498_v22 = vsel %vm496_vm1, %v557_v56, %v558_v40  ;;  %v582_v56 = vrot.slane %v18647_v24, 2 }
 0x1bc   :  { %1488 = vmatmul.mubr.f32.gmra.mrb[42].mxu0 %v11477_v31  ;;  %18641 = vst [vmem:[#allocation135_spill] sm:$0xff] %v11498_v22 }
 0x1bd   :  { %1492 = vmatprep.mubr.f32.mxu0 %v10657_v0  ;;  %v882_v0 = vld [vmem:[%s17867_s2 + $0x2e8] sm:$0xff] }
 0x1be   :  { %v8642_v32 = vpack.c.bf16 %v882_v0, %v881_v19  ;;  %v18651_v19 = vld [vmem:[#allocation46_spill] sm:$0xff] }
 0x1bf   :  { %v585_v0 = vrot.slane %v18651_v19, 2  ;;  %v18661_v19 = vld [vmem:[#allocation64_spill] sm:$0xff] }
 0x1c0   :  { %1493 = vmatmul.mubr.f32.gmra.mrb[44].mxu0 %v11485_v15 }
 0x1c1   :  { %1497 = vmatprep.mubr.f32.mxu0 %v10662_v43  ;;  %v11510_v43 = vsel %vm496_vm1, %v558_v40, %v560_v8  ;;  %8643 = vmatpush1.bf16.msra.mxu0 %v8642_v32  ;;  %v583_v40 = vrot.slane %v18649_v38, 2  ;;  %v587_v32 = vrot.slane %v18650_v49, 2 }
 0x1c2   :  { %18642 = vst [vmem:[#allocation136_spill] sm:$0xff] %v11510_v43  ;;  %8644 = vmatprep.subr.bf16.mxu0 %v18536_v63 }
 0x1c3   :  { %v11578_v8 = vsel %vm496_vm1, %v582_v56, %v583_v40 }
 0x1c4   :  { %1498 = vmatmul.mubr.f32.gmra.mrb[46].mxu0 %v11491_v50 }
 0x1c5   :  { %1502 = vmatprep.mubr.f32.mxu0 %v10686_v7  ;;  %v11524_v7 = vsel %vm496_vm1, %v563_v58, %v565_v36  ;;  %v11584_v58 = vsel %vm496_vm1, %v583_v40, %v585_v0  ;;  %v588_v36 = vrot.slane %v18652_v29, 2  ;;  %v18660_v40 = vld [vmem:[#allocation61_spill] sm:$0xff] }
 0x1c6   :  { %18644 = vst [vmem:[#allocation138_spill] sm:$0xff] %v11524_v7 }
 0x1c8   :  { %1503 = vmatmul.mubr.f32.gmra.mrb[48].mxu0 %v11498_v22 }
 0x1c9   :  { %1507 = vmatprep.mubr.f32.mxu0 %v10691_v48  ;;  %v570_v48 = vrot.slane %v10738_v2, 2  ;;  %v573_v2 = vrot.slane %v10754_v18, 2 }
 0x1cb   :  { %v11540_v12 = vsel %vm496_vm1, %v18645_v44, %v570_v48  ;;  %v18653_v48 = vld [vmem:[#allocation53_spill] sm:$0xff] }
 0x1cc   :  { %1508 = vmatmul.mubr.f32.gmra.mrb[50].mxu0 %v11510_v43 }
 0x1cd   :  { %1512 = vmatprep.mubr.f32.mxu0 %v10720_v41  ;;  %v883_v41 = vld [vmem:[%s17867_s2 + $0x2f0] sm:$0xff] }
 0x1ce   :  { %v8645_v51 = vpack.c.bf16 %v884_v62, %v883_v41  ;;  %v11591_v41 = vsel %vm496_vm1, %v587_v32, %v588_v36  ;;  %v18654_v62 = vld [vmem:[#allocation51_spill] sm:$0xff]  ;;  %v603_v32 = vrot.slane %v18661_v19, 2 }
 0x1cf   :  { %v590_v44 = vrot.slane %v18654_v62, 2  ;;  %v18663_v62 = vld [vmem:[#allocation66_spill] sm:$0xff] }
 0x1d0   :  { %1513 = vmatmul.mubr.f32.gmra.mrb[52].mxu0 %v11518_v34 }
 0x1d1   :  { %1517 = vmatprep.mubr.f32.mxu0 %v10725_v30  ;;  %8646 = vmatpush1.bf16.msra.mxu0 %v8645_v51  ;;  %v11553_v30 = vsel %vm496_vm1, %v572_v26, %v573_v2  ;;  %v18655_v26 = vld [vmem:[#allocation54_spill] sm:$0xff]  ;;  %v592_v51 = vrot.slane %v18653_v48, 2 }
 0x1d2   :  { %8647 = vmatprep.subr.bf16.mxu0 %v18536_v63 }
 0x1d4   :  { %1518 = vmatmul.mubr.f32.gmra.mrb[54].mxu0 %v11524_v7 }
 0x1d5   :  { %1522 = vmatprep.mubr.f32.mxu0 %v10749_v46  ;;  %v575_v46 = vrot.slane %v10766_v17, 2  ;;  %v579_v17 = vsel %vm496_vm1, %v577_v42, %v578_v52  ;;  %v18656_v42 = vld [vmem:[#allocation58_spill] sm:$0xff]  ;;  %v18657_v52 = vld [vmem:[#allocation56_spill] sm:$0xff] }
 0x1d6   :  { %v597_v11 = vrot.slane %v18656_v42, 2 }
 0x1d7   :  { %v11564_v61 = vsel %vm496_vm1, %v573_v2, %v575_v46  ;;  %v11597_v2 = vsel %vm496_vm1, %v588_v36, %v590_v44  ;;  %v593_v46 = vrot.slane %v18655_v26, 2  ;;  %v18662_v36 = vld [vmem:[#allocation68_spill] sm:$0xff]  ;;  %v605_v44 = vrot.slane %v18663_v62, 2  ;;  %v18670_v62 = vld [vmem:[#allocation79_spill] sm:$0xff] }
 0x1d8   :  { %1523 = vmatmul.mubr.f32.gmra.mrb[56].mxu0 %v11229_v4 }
 0x1d9   :  { %1527 = vmatprep.mubr.f32.mxu0 %v10754_v18  ;;  %v11559_v18 = vld [vmem:[%s17865_s0 + $0x188] sm:$0xff]  ;;  %v11604_v6 = vsel %vm496_vm1, %v592_v51, %v593_v46  ;;  %v11636_v51 = vsel %vm496_vm1, %v603_v32, %v605_v44 }
 0x1dc   :  { %1528 = vmatmul.mubr.f32.gmra.mrb[58].mxu0 %v11540_v12 }
 0x1dd   :  { %1532 = vmatprep.mubr.f32.mxu0 %v11547_v55 }
 0x1e0   :  { %1533 = vmatmul.mubr.f32.gmra.mrb[60].mxu0 %v11553_v30 }
 0x1e1   :  { %1537 = vmatprep.mubr.f32.mxu0 %v11559_v18 }
 0x1e4   :  { %1538 = vmatmul.mubr.f32.gmra.mrb[62].mxu0 %v11564_v61 }
 0x1e5   :  { %1542 = vmatprep.mubr.f32.mxu0 %v18647_v24  ;;  %v595_v24 = vrot.slane %v18657_v52, 2  ;;  %v18665_v52 = vld [vmem:[#allocation73_spill] sm:$0xff] }
 0x1e7   :  { %v11610_v10 = vsel %vm496_vm1, %v593_v46, %v595_v24  ;;  %v607_v46 = vrot.slane %v18662_v36, 2 }
 0x1e8   :  { %1543 = vmatmul.mubr.f32.gmra.mrb[64].mxu0 %v579_v17  ;;  %v18658_v17 = vld [vmem:[#allocation59_spill] sm:$0xff] }
 0x1e9   :  { %1547 = vmatprep.mubr.f32.mxu0 %v18649_v38  ;;  %v598_v38 = vrot.slane %v18658_v17, 2 }
 0x1eb   :  { %v11617_v56 = vsel %vm496_vm1, %v597_v11, %v598_v38 }
 0x1ec   :  { %1548 = vmatmul.mubr.f32.gmra.mrb[66].mxu0 %v581_v53  ;;  %v18659_v53 = vld [vmem:[#allocation63_spill] sm:$0xff] }
 0x1ed   :  { %1552 = vmatprep.mubr.f32.mxu0 %v18650_v49  ;;  %v600_v49 = vrot.slane %v18660_v40, 2  ;;  %v612_v40 = vrot.slane %v18665_v52, 2 }
 0x1ef   :  { %v11623_v0 = vsel %vm496_vm1, %v598_v38, %v600_v49  ;;  %v18667_v38 = vld [vmem:[#allocation74_spill] sm:$0xff] }
 0x1f0   :  { %1553 = vmatmul.mubr.f32.gmra.mrb[68].mxu0 %v11578_v8  ;;  %v613_v49 = vrot.slane %v18667_v38, 2 }
 0x1f1   :  { %1557 = vmatprep.mubr.f32.mxu0 %v18652_v29  ;;  %v602_v29 = vrot.slane %v18659_v53, 2 }
 0x1f4   :  { %1558 = vmatmul.mubr.f32.gmra.mrb[70].mxu0 %v11584_v58 }
 0x1f5   :  { %1562 = vmatprep.mubr.f32.mxu0 %v18653_v48  ;;  %v11630_v48 = vsel %vm496_vm1, %v602_v29, %v603_v32  ;;  %v11656_v29 = vsel %vm496_vm1, %v612_v40, %v613_v49  ;;  %v18669_v32 = vld [vmem:[#allocation76_spill] sm:$0xff] }
 0x1f8   :  { %1563 = vmatmul.mubr.f32.gmra.mrb[72].mxu0 %v11591_v41 }
 0x1f9   :  { %1567 = vmatprep.mubr.f32.mxu0 %v18655_v26  ;;  %v18664_v26 = vld [vmem:[#allocation69_spill] sm:$0xff] }
 0x1fc   :  { %1568 = vmatmul.mubr.f32.gmra.mrb[74].mxu0 %v11597_v2 }
 0x1fd   :  { %1572 = vmatprep.mubr.f32.mxu0 %v18656_v42  ;;  %v608_v42 = vrot.slane %v18664_v26, 2 }
 0x1ff   :  { %v11643_v24 = vsel %vm496_vm1, %v607_v46, %v608_v42  ;;  %v618_v46 = vrot.slane %v18670_v62, 2 }
 0x200   :  { %1573 = vmatmul.mubr.f32.gmra.mrb[76].mxu0 %v11604_v6 }
 0x201   :  { %1577 = vmatprep.mubr.f32.mxu0 %v18658_v17  ;;  %v18666_v17 = vld [vmem:[#allocation71_spill] sm:$0xff] }
 0x202   :  { %v610_v11 = vrot.slane %v18666_v17, 2  ;;  %v18672_v17 = vld [vmem:[#allocation81_spill] sm:$0xff] }
 0x204   :  { %1578 = vmatmul.mubr.f32.gmra.mrb[78].mxu0 %v11610_v10 }
 0x205   :  { %1582 = vmatprep.mubr.f32.mxu0 %v18659_v53  ;;  %v11649_v53 = vsel %vm496_vm1, %v608_v42, %v610_v11  ;;  %v18671_v42 = vld [vmem:[#allocation83_spill] sm:$0xff]  ;;  %v620_v11 = vrot.slane %v18672_v17, 2  ;;  %v18678_v17 = vld [vmem:[#allocation89_spill] sm:$0xff] }
 0x207   :  { %v11675_v40 = vsel %vm496_vm1, %v618_v46, %v620_v11  ;;  %v628_v11 = vrot.slane %v18678_v17, 2 }
 0x208   :  { %1583 = vmatmul.mubr.f32.gmra.mrb[80].mxu0 %v11617_v56  ;;  %18674 = vst [vmem:[#allocation41_spill] sm:$0xff] %v11675_v40 }
 0x209   :  { %1587 = vmatprep.mubr.f32.mxu0 %v18661_v19  ;;  %v18668_v19 = vld [vmem:[#allocation78_spill] sm:$0xff] }
 0x20c   :  { %1588 = vmatmul.mubr.f32.gmra.mrb[82].mxu0 %v11623_v0 }
 0x20d   :  { %1592 = vmatprep.mubr.f32.mxu0 %v18662_v36  ;;  %v615_v36 = vrot.slane %v18669_v32, 2  ;;  %v18675_v32 = vld [vmem:[#allocation88_spill] sm:$0xff] }
 0x20f   :  { %v11662_v44 = vsel %vm496_vm1, %v613_v49, %v615_v36  ;;  %v622_v49 = vrot.slane %v18671_v42, 2 }
 0x210   :  { %1593 = vmatmul.mubr.f32.gmra.mrb[84].mxu0 %v11630_v48 }
 0x211   :  { %1597 = vmatprep.mubr.f32.mxu0 %v18664_v26  ;;  %v617_v26 = vrot.slane %v18668_v19, 2 }
 0x214   :  { %1598 = vmatmul.mubr.f32.gmra.mrb[86].mxu0 %v11636_v51 }
 0x215   :  { %1602 = vmatprep.mubr.f32.mxu0 %v18665_v52  ;;  %v11669_v52 = vsel %vm496_vm1, %v617_v26, %v618_v46 }
 0x218   :  { %1603 = vmatmul.mubr.f32.gmra.mrb[88].mxu0 %v11643_v24 }
 0x219   :  { %1607 = vmatprep.mubr.f32.mxu0 %v18667_v38  ;;  %v18673_v38 = vld [vmem:[#allocation84_spill] sm:$0xff] }
 0x21c   :  { %1608 = vmatmul.mubr.f32.gmra.mrb[90].mxu0 %v11649_v53 }
 0x21d   :  { %1612 = vmatprep.mubr.f32.mxu0 %v18668_v19  ;;  %v623_v19 = vrot.slane %v18673_v38, 2 }
 0x21f   :  { %v11682_v36 = vsel %vm496_vm1, %v622_v49, %v623_v19 }
 0x220   :  { %1613 = vmatmul.mubr.f32.gmra.mrb[92].mxu0 %v11656_v29  ;;  %18676 = vst [vmem:[#allocation44_spill] sm:$0xff] %v11682_v36 }
 0x221   :  { %1617 = vmatprep.mubr.f32.mxu0 %v18670_v62  ;;  %v18677_v62 = vld [vmem:[#allocation86_spill] sm:$0xff] }
 0x222   :  { %v625_v26 = vrot.slane %v18677_v62, 2 }
 0x224   :  { %1618 = vmatmul.mubr.f32.gmra.mrb[94].mxu0 %v11662_v44  ;;  %v11688_v46 = vsel %vm496_vm1, %v623_v19, %v625_v26 }
 0x225   :  { %1622 = vmatprep.mubr.f32.mxu0 %v18671_v42  ;;  %18679 = vst [vmem:[#allocation43_spill] sm:$0xff] %v11688_v46  ;;  %v627_v42 = vrot.slane %v18675_v32, 2 }
 0x227   :  { %v11695_v49 = vsel %vm496_vm1, %v627_v42, %v628_v11 }
 0x228   :  { %1623 = vmatmul.mubr.f32.gmra.mrb[96].mxu0 %v11669_v52  ;;  %18681 = vst [vmem:[#allocation45_spill] sm:$0xff] %v11695_v49 }
 0x229   :  { %1627 = vmatprep.mubr.f32.mxu0 %v18673_v38  ;;  %v18680_v38 = vld [vmem:[#allocation93_spill] sm:$0xff] }
 0x22c   :  { %1628 = vmatmul.mubr.f32.gmra.mrb[98].mxu0 %v11675_v40  ;;  %v18682_v40 = vld [vmem:[#allocation91_spill] sm:$0xff] }
 0x22d   :  { %1632 = vmatprep.mubr.f32.mxu0 %v18675_v32  ;;  %v630_v62 = vrot.slane %v18682_v40, 2  ;;  %v632_v32 = vrot.slane %v18680_v38, 2 }
 0x22f   :  { %v11701_v19 = vsel %vm496_vm1, %v628_v11, %v630_v62  ;;  %v18689_v62 = vld [vmem:[#allocation103_spill] sm:$0xff] }
 0x230   :  { %1633 = vmatmul.mubr.f32.gmra.mrb[100].mxu0 %v11682_v36  ;;  %v18683_v36 = vld [vmem:[#allocation94_spill] sm:$0xff]  ;;  %18684 = vst [vmem:[#allocation48_spill] sm:$0xff] %v11701_v19 }
 0x231   :  { %1637 = vmatprep.mubr.f32.mxu0 %v18678_v17  ;;  %v633_v26 = vrot.slane %v18683_v36, 2  ;;  %v18685_v17 = vld [vmem:[#allocation98_spill] sm:$0xff] }
 0x233   :  { %v11708_v42 = vsel %vm496_vm1, %v632_v32, %v633_v26 }
 0x234   :  { %1638 = vmatmul.mubr.f32.gmra.mrb[102].mxu0 %v11688_v46  ;;  %18686 = vst [vmem:[#allocation46_spill] sm:$0xff] %v11708_v42  ;;  %v18687_v46 = vld [vmem:[#allocation96_spill] sm:$0xff] }
 0x235   :  { %1642 = vmatprep.mubr.f32.mxu0 %v18680_v38  ;;  %v635_v40 = vrot.slane %v18687_v46, 2  ;;  %v637_v38 = vrot.slane %v18685_v17, 2 }
 0x237   :  { %v11714_v11 = vsel %vm496_vm1, %v633_v26, %v635_v40 }
 0x238   :  { %1643 = vmatmul.mubr.f32.gmra.mrb[104].mxu0 %v11695_v49  ;;  %v18688_v49 = vld [vmem:[#allocation99_spill] sm:$0xff] }
 0x239   :  { %1647 = vmatprep.mubr.f32.mxu0 %v18683_v36  ;;  %v638_v36 = vrot.slane %v18688_v49, 2 }
 0x23b   :  { %v11721_v32 = vsel %vm496_vm1, %v637_v38, %v638_v36  ;;  %v18692_v38 = vld [vmem:[#allocation106_spill] sm:$0xff] }
 0x23c   :  { %1648 = vmatmul.mubr.f32.gmra.mrb[106].mxu0 %v11701_v19  ;;  %v18690_v19 = vld [vmem:[#allocation101_spill] sm:$0xff] }
 0x23d   :  { %1652 = vmatprep.mubr.f32.mxu0 %v18685_v17  ;;  %v640_v46 = vrot.slane %v18690_v19, 2  ;;  %v642_v17 = vrot.slane %v18689_v62, 2  ;;  %v645_v19 = vrot.slane %v18692_v38, 2 }
 0x23f   :  { %v11727_v26 = vsel %vm496_vm1, %v638_v36, %v640_v46 }
 0x240   :  { %1653 = vmatmul.mubr.f32.gmra.mrb[108].mxu0 %v11708_v42  ;;  %v18691_v42 = vld [vmem:[#allocation104_spill] sm:$0xff] }
 0x241   :  { %1657 = vmatprep.mubr.f32.mxu0 %v18688_v49  ;;  %v643_v49 = vrot.slane %v18691_v42, 2 }
 0x243   :  { %v11734_v40 = vsel %vm496_vm1, %v642_v17, %v643_v49  ;;  %v11740_v36 = vsel %vm496_vm1, %v643_v49, %v645_v19  ;;  %v18694_v17 = vld [vmem:[#allocation109_spill] sm:$0xff]  ;;  %v11760_v19 = vld [vmem:[%s17865_s0 + $0x330] sm:$0xff] }
 0x244   :  { %1658 = vmatmul.mubr.f32.gmra.mrb[110].mxu0 %v11714_v11  ;;  %v650_v38 = vrot.slane %v18694_v17, 2  ;;  %18695 = vst [vmem:[#allocation53_spill] sm:$0xff] %v11760_v19  ;;  %v18696_v17 = vld [vmem:[#allocation112_spill] sm:$0xff] }
 0x245   :  { %1662 = vmatprep.mubr.f32.mxu0 %v18689_v62  ;;  %v647_v62 = vrot.slane %v11177_v57, 2 }
 0x248   :  { %1663 = vmatmul.mubr.f32.gmra.mrb[112].mxu0 %v11721_v32 }
 0x249   :  { %1667 = vmatprep.mubr.f32.mxu0 %v18691_v42  ;;  %v648_v42 = vrot.slane %v11182_v16, 2 }
 0x24b   :  { %v11747_v46 = vsel %vm496_vm1, %v647_v62, %v648_v42  ;;  %v11753_v49 = vsel %vm496_vm1, %v648_v42, %v650_v38  ;;  %v885_v42 = vld [vmem:[%s17867_s2 + $0x300] sm:$0xff]  ;;  %v886_v38 = vld [vmem:[%s17867_s2 + $0x308] sm:$0xff] }
 0x24c   :  { %1668 = vmatmul.mubr.f32.gmra.mrb[114].mxu0 %v11727_v26  ;;  %18693 = vst [vmem:[#allocation49_spill] sm:$0xff] %v11747_v46 }
 0x24d   :  { %1672 = vmatprep.mubr.f32.mxu0 %v11177_v57  ;;  %v652_v57 = vrot.slane %v11205_v5, 2 }
 0x250   :  { %1673 = vmatmul.mubr.f32.gmra.mrb[116].mxu0 %v11734_v40 }
 0x251   :  { %1677 = vmatprep.mubr.f32.mxu0 %v11182_v16  ;;  %v653_v16 = vrot.slane %v11210_v13, 2 }
 0x253   :  { %v11765_v62 = vsel %vm496_vm1, %v652_v57, %v653_v16  ;;  %v8648_v57 = vpack.c.bf16 %v886_v38, %v885_v42  ;;  %v890_v42 = vld [vmem:[%s17867_s2 + $0x328] sm:$0xff] }
 0x254   :  { %1678 = vmatmul.mubr.f32.gmra.mrb[118].mxu0 %v11740_v36  ;;  %v18700_v38 = vld [vmem:[#allocation13_spill] sm:$0xff] }
 0x255   :  { %1682 = vmatprep.mubr.f32.mxu0 %v11205_v5  ;;  %v11771_v5 = vld [vmem:[%s17865_s0 + $0x338] sm:$0xff] }
 0x256   :  { %18697 = vst [vmem:[#allocation51_spill] sm:$0xff] %v11771_v5 }
 0x258   :  { %1683 = vmatmul.mubr.f32.gmra.mrb[120].mxu0 %v11747_v46  ;;  %v655_v46 = vrot.slane %v18696_v17, 2  ;;  %v887_v17 = vld [vmem:[%s17867_s2 + $0x310] sm:$0xff] }
 0x259   :  { %1687 = vmatprep.mubr.f32.mxu0 %v11210_v13 }
 0x25a   :  { %v11776_v13 = vsel %vm496_vm1, %v653_v16, %v655_v46  ;;  %v888_v46 = vld [vmem:[%s17867_s2 + $0x318] sm:$0xff]  ;;  %v18699_v16 = vld [vmem:[#allocation12_spill] sm:$0xff] }
 0x25b   :  { %18698 = vst [vmem:[#allocation54_spill] sm:$0xff] %v11776_v13 }
 0x25c   :  { %1688 = vmatmul.mubr.f32.gmra.mrb[122].mxu0 %v11753_v49 }
 0x25d   :  { %1692 = vmatprep.mubr.f32.mxu0 %v11760_v19 }
 0x260   :  { %1693 = vmatmul.mubr.f32.gmra.mrb[124].mxu0 %v11765_v62 }
 0x261   :  { %1697 = vmatprep.mubr.f32.mxu0 %v11771_v5  ;;  %v8651_v5 = vpack.c.bf16 %v888_v46, %v887_v17  ;;  %v18701_v17 = vld [vmem:[#allocation14_spill] sm:$0xff] }
 0x264   :  { %1698 = vmatmul.mubr.f32.gmra.mrb[126].mxu0 %v11776_v13 }
 0x265   :  { %1767 = vmatprep.mubr.f32.mxu0 %v11276_v14  ;;  %v889_v14 = vld [vmem:[%s17867_s2 + $0x320] sm:$0xff] }
 0x268   :  { %1768 = vmatmul.mubr.f32.vlgmr.msra.gmra.mrb[0].mxu0 %v18699_v16  ;;  %v8654_v16 = vpack.c.bf16 %v890_v42, %v889_v14  ;;  %v894_v14 = vld [vmem:[%s17867_s2 + $0x348] sm:$0xff]  ;;  %v18702_v42 = vld [vmem:[#allocation15_spill] sm:$0xff] }
 0x269   :  { %8649 = vmatpush1.bf16.msra.mxu0 %v8648_v57  ;;  %1772 = vmatprep.mubr.f32.mxu0 %v11289_v23  ;;  %v891_v23 = vld [vmem:[%s17867_s2 + $0x330] sm:$0xff]  ;;  %v892_v57 = vld [vmem:[%s17867_s2 + $0x338] sm:$0xff] }
 0x26a   :  { %8650 = vmatprep.subr.bf16.mxu0 %v18536_v63  ;;  %v8657_v46 = vpack.c.bf16 %v892_v57, %v891_v23  ;;  %v896_v23 = vld [vmem:[%s17867_s2 + $0x358] sm:$0xff]  ;;  %v18703_v57 = vld [vmem:[#allocation16_spill] sm:$0xff] }
 0x26c   :  { %1773 = vmatmul.mubr.f32.gmra.mrb[2].mxu0 %v18700_v38 }
 0x26d   :  { %1777 = vmatprep.mubr.f32.mxu0 %v11303_v9  ;;  %8652 = vmatpush1.bf16.msra.mxu0 %v8651_v5  ;;  %v893_v5 = vld [vmem:[%s17867_s2 + $0x340] sm:$0xff]  ;;  %v728_v9 = vrot.slane %v11559_v18, 1 }
 0x26e   :  { %8653 = vmatprep.subr.bf16.mxu0 %v18536_v63  ;;  %v8660_v38 = vpack.c.bf16 %v894_v14, %v893_v5  ;;  %v898_v5 = vld [vmem:[%s17867_s2 + $0x368] sm:$0xff] }
 0x26f   :  { %v18704_v14 = vld [vmem:[#allocation17_spill] sm:$0xff] }
 0x270   :  { %1778 = vmatmul.mubr.f32.gmra.mrb[4].mxu0 %v18701_v17 }
 0x271   :  { %1782 = vmatprep.mubr.f32.mxu0 %v11316_v21  ;;  %8655 = vmatpush1.bf16.msra.mxu0 %v8654_v16  ;;  %v895_v16 = vld [vmem:[%s17867_s2 + $0x350] sm:$0xff] }
 0x272   :  { %8656 = vmatprep.subr.bf16.mxu0 %v18536_v63  ;;  %v8663_v21 = vpack.c.bf16 %v896_v23, %v895_v16  ;;  %v900_v16 = vld [vmem:[%s17867_s2 + $0x378] sm:$0xff]  ;;  %v18705_v23 = vld [vmem:[#allocation18_spill] sm:$0xff] }
 0x274   :  { %1783 = vmatmul.mubr.f32.gmra.mrb[6].mxu0 %v18702_v42 }
 0x275   :  { %1787 = vmatprep.mubr.f32.mxu0 %v11330_v25  ;;  %8658 = vmatpush1.bf16.msra.mxu0 %v8657_v46  ;;  %v897_v46 = vld [vmem:[%s17867_s2 + $0x360] sm:$0xff] }
 0x276   :  { %8659 = vmatprep.subr.bf16.mxu0 %v18536_v63  ;;  %v8666_v25 = vpack.c.bf16 %v898_v5, %v897_v46  ;;  %v902_v46 = vld [vmem:[%s17867_s2 + $0x388] sm:$0xff]  ;;  %v18706_v5 = vld [vmem:[#allocation19_spill] sm:$0xff] }
 0x278   :  { %1788 = vmatmul.mubr.f32.gmra.mrb[8].mxu0 %v18703_v57 }
 0x279   :  { %1792 = vmatprep.mubr.f32.mxu0 %v11343_v35  ;;  %8661 = vmatpush1.bf16.msra.mxu0 %v8660_v38  ;;  %v899_v38 = vld [vmem:[%s17867_s2 + $0x370] sm:$0xff] }
 0x27a   :  { %8662 = vmatprep.subr.bf16.mxu0 %v18536_v63  ;;  %v8669_v35 = vpack.c.bf16 %v900_v16, %v899_v38  ;;  %v904_v38 = vld [vmem:[%s17867_s2 + $0x398] sm:$0xff]  ;;  %v18707_v16 = vld [vmem:[#allocation20_spill] sm:$0xff] }
 0x27c   :  { %1793 = vmatmul.mubr.f32.gmra.mrb[10].mxu0 %v18704_v14 }
 0x27d   :  { %1797 = vmatprep.mubr.f32.mxu0 %v11357_v39  ;;  %8664 = vmatpush1.bf16.msra.mxu0 %v8663_v21  ;;  %v901_v21 = vld [vmem:[%s17867_s2 + $0x380] sm:$0xff] }
 0x27e   :  { %8665 = vmatprep.subr.bf16.mxu0 %v18536_v63  ;;  %v8672_v39 = vpack.c.bf16 %v902_v46, %v901_v21  ;;  %v906_v21 = vld [vmem:[%s17867_s2 + $0x3a8] sm:$0xff] }
 0x27f   :  { %v18708_v46 = vld [vmem:[#allocation21_spill] sm:$0xff] }
 0x280   :  { %1798 = vmatmul.mubr.f32.gmra.mrb[12].mxu0 %v18705_v23 }
 0x281   :  { %1802 = vmatprep.mubr.f32.mxu0 %v11370_v59  ;;  %8667 = vmatpush1.bf16.msra.mxu0 %v8666_v25  ;;  %v903_v25 = vld [vmem:[%s17867_s2 + $0x390] sm:$0xff] }
 0x282   :  { %8668 = vmatprep.subr.bf16.mxu0 %v18536_v63  ;;  %v8675_v59 = vpack.c.bf16 %v904_v38, %v903_v25  ;;  %v18710_v25 = vld [vmem:[#allocation23_spill] sm:$0xff]  ;;  %v18711_v38 = vld [vmem:[#allocation24_spill] sm:$0xff] }
 0x284   :  { %1803 = vmatmul.mubr.f32.gmra.mrb[14].mxu0 %v18706_v5 }
 0x285   :  { %1807 = vmatprep.mubr.f32.mxu0 %v11384_v54  ;;  %8670 = vmatpush1.bf16.msra.mxu0 %v8669_v35  ;;  %v905_v35 = vld [vmem:[%s17867_s2 + $0x3a0] sm:$0xff] }
 0x286   :  { %8671 = vmatprep.subr.bf16.mxu0 %v18536_v63  ;;  %v8678_v54 = vpack.c.bf16 %v906_v21, %v905_v35  ;;  %v908_v35 = vld [vmem:[%s17867_s2 + $0x3b8] sm:$0xff] }
 0x288   :  { %1808 = vmatmul.mubr.f32.gmra.mrb[16].mxu0 %v18707_v16 }
 0x289   :  { %1812 = vmatprep.mubr.f32.mxu0 %v11391_v28  ;;  %8673 = vmatpush1.bf16.msra.mxu0 %v8672_v39  ;;  %v18709_v39 = vld [vmem:[#allocation22_spill] sm:$0xff]  ;;  %v727_v28 = vrot.slane %v11547_v55, 1 }
 0x28a   :  { %8674 = vmatprep.subr.bf16.mxu0 %v18536_v63 }
 0x28c   :  { %1813 = vmatmul.mubr.f32.gmra.mrb[18].mxu0 %v18708_v46 }
 0x28d   :  { %1817 = vmatprep.mubr.f32.mxu0 %v11399_v1  ;;  %8676 = vmatpush1.bf16.msra.mxu0 %v8675_v59  ;;  %v907_v59 = vld [vmem:[%s17867_s2 + $0x3b0] sm:$0xff]  ;;  %v18715_v1 = vld [vmem:[#allocation28_spill] sm:$0xff] }
 0x28e   :  { %8677 = vmatprep.subr.bf16.mxu0 %v18536_v63  ;;  %v8681_v21 = vpack.c.bf16 %v908_v35, %v907_v59  ;;  %v909_v59 = vld [vmem:[%s17867_s2 + $0x3c0] sm:$0xff]  ;;  %v910_v35 = vld [vmem:[%s17867_s2 + $0x3c8] sm:$0xff] }
 0x290   :  { %1818 = vmatmul.mubr.f32.gmra.mrb[20].mxu0 %v18709_v39 }
 0x291   :  { %1822 = vmatprep.mubr.f32.mxu0 %v11411_v37  ;;  %8679 = vmatpush1.bf16.msra.mxu0 %v8678_v54  ;;  %v18712_v54 = vld [vmem:[#allocation25_spill] sm:$0xff]  ;;  %v18714_v37 = vld [vmem:[#allocation27_spill] sm:$0xff] }
 0x292   :  { %8680 = vmatprep.subr.bf16.mxu0 %v18536_v63 }
 0x294   :  { %1823 = vmatmul.mubr.f32.gmra.mrb[22].mxu0 %v18710_v25 }
 0x295   :  { %1827 = vmatprep.mubr.f32.mxu0 %v11419_v20  ;;  %8682 = vmatpush1.bf16.msra.mxu0 %v8681_v21  ;;  %v18713_v20 = vld [vmem:[#allocation26_spill] sm:$0xff]  ;;  %v8684_v21 = vpack.c.bf16 %v910_v35, %v909_v59  ;;  %v912_v35 = vld [vmem:[%s17867_s2 + $0x3d8] sm:$0xff] }
 0x296   :  { %8683 = vmatprep.subr.bf16.mxu0 %v18536_v63  ;;  %v911_v59 = vld [vmem:[%s17867_s2 + $0x3d0] sm:$0xff] }
 0x298   :  { %1828 = vmatmul.mubr.f32.gmra.mrb[24].mxu0 %v18711_v38 }
 0x299   :  { %1832 = vmatprep.mubr.f32.mxu0 %v11425_v27  ;;  %8685 = vmatpush1.bf16.msra.mxu0 %v8684_v21  ;;  %v18719_v27 = vld [vmem:[#allocation32_spill] sm:$0xff]  ;;  %v8687_v21 = vpack.c.bf16 %v912_v35, %v911_v59  ;;  %v914_v35 = vld [vmem:[%s17867_s2 + $0x3e8] sm:$0xff] }
 0x29a   :  { %8686 = vmatprep.subr.bf16.mxu0 %v18536_v63  ;;  %v913_v59 = vld [vmem:[%s17867_s2 + $0x3e0] sm:$0xff] }
 0x29c   :  { %1833 = vmatmul.mubr.f32.gmra.mrb[26].mxu0 %v18712_v54 }
 0x29d   :  { %1837 = vmatprep.mubr.f32.mxu0 %v11432_v47  ;;  %v18716_v47 = vld [vmem:[#allocation29_spill] sm:$0xff]  ;;  %8688 = vmatpush1.bf16.msra.mxu0 %v8687_v21  ;;  %v8690_v21 = vpack.c.bf16 %v914_v35, %v913_v59  ;;  %v117_v59 = vld [vmem:[%s17865_s0 + $0x190] sm:$0x3]  ;;  %v18727_v35 = vld [vmem:[#allocation40_spill] sm:$0xff] }
 0x29e   :  { %8689 = vmatprep.subr.bf16.mxu0 %v18536_v63 }
 0x2a0   :  { %1838 = vmatmul.mubr.f32.gmra.mrb[28].mxu0 %v18713_v20 }
 0x2a1   :  { %1842 = vmatprep.mubr.f32.mxu0 %v11444_v45  ;;  %v18718_v45 = vld [vmem:[#allocation31_spill] sm:$0xff]  ;;  %8691 = vmatpush1.bf16.msra.mxu0 %v8690_v21 }
 0x2a2   :  { %8692 = vmatprep.subr.bf16.mxu0 %v18536_v63  ;;  %v916_v21 = vld [vmem:[%s17867_s2 + $0x3f8] sm:$0xff] }
 0x2a4   :  { %1843 = vmatmul.mubr.f32.gmra.mrb[30].mxu0 %v18714_v37 }
 0x2a5   :  { %1847 = vmatprep.mubr.f32.mxu0 %v11452_v3  ;;  %v18717_v3 = vld [vmem:[#allocation30_spill] sm:$0xff] }
 0x2a8   :  { %1848 = vmatmul.mubr.f32.gmra.mrb[32].mxu0 %v18715_v1 }
 0x2a9   :  { %1852 = vmatprep.mubr.f32.mxu0 %v11458_v60  ;;  %v18723_v60 = vld [vmem:[#allocation36_spill] sm:$0xff] }
 0x2ac   :  { %1853 = vmatmul.mubr.f32.gmra.mrb[34].mxu0 %v18716_v47 }
 0x2ad   :  { %1857 = vmatprep.mubr.f32.mxu0 %v11465_v33  ;;  %v18720_v33 = vld [vmem:[#allocation33_spill] sm:$0xff] }
 0x2b0   :  { %1858 = vmatmul.mubr.f32.gmra.mrb[36].mxu0 %v18717_v3  ;;  %v12137_v3 = vld [vmem:[%s17865_s0 + $0x1a0] sm:$0xff] }
 0x2b1   :  { %1862 = vmatprep.mubr.f32.mxu0 %v11477_v31  ;;  %v18722_v31 = vld [vmem:[#allocation35_spill] sm:$0xff]  ;;  %18769 = vst [vmem:[#allocation63_spill] sm:$0xff] %v12137_v3 }
 0x2b4   :  { %1863 = vmatmul.mubr.f32.gmra.mrb[38].mxu0 %v18718_v45 }
 0x2b5   :  { %1867 = vmatprep.mubr.f32.mxu0 %v11485_v15  ;;  %v18721_v15 = vld [vmem:[#allocation34_spill] sm:$0xff] }
 0x2b8   :  { %1868 = vmatmul.mubr.f32.gmra.mrb[40].mxu0 %v18719_v27 }
 0x2b9   :  { %1872 = vmatprep.mubr.f32.mxu0 %v11491_v50  ;;  %v741_v50 = vrot.slane %v11547_v55, 2  ;;  %v18734_v55 = vld [vmem:[#allocation55_spill] sm:$0xff] }
 0x2bc   :  { %1873 = vmatmul.mubr.f32.gmra.mrb[42].mxu0 %v18720_v33 }
 0x2bd   :  { %1877 = vmatprep.mubr.f32.mxu0 %v11498_v22  ;;  %v18724_v22 = vld [vmem:[#allocation37_spill] sm:$0xff] }
 0x2c0   :  { %1878 = vmatmul.mubr.f32.gmra.mrb[44].mxu0 %v18721_v15 }
 0x2c1   :  { %1882 = vmatprep.mubr.f32.mxu0 %v11510_v43  ;;  %v18726_v43 = vld [vmem:[#allocation39_spill] sm:$0xff] }
 0x2c4   :  { %1883 = vmatmul.mubr.f32.gmra.mrb[46].mxu0 %v18722_v31  ;;  %v730_v31 = vrot.slane %v117_v59, 1 }
 0x2c5   :  { %1887 = vmatprep.mubr.f32.mxu0 %v11518_v34  ;;  %v18725_v34 = vld [vmem:[#allocation38_spill] sm:$0xff] }
 0x2c8   :  { %1888 = vmatmul.mubr.f32.gmra.mrb[48].mxu0 %v18723_v60  ;;  %v11962_v60 = vsel %vm271_vm0, %v727_v28, %v728_v9  ;;  %v917_v28 = vld [vmem:[%s17867_s2 + $0x400] sm:$0xff] }
 0x2c9   :  { %1892 = vmatprep.mubr.f32.mxu0 %v11524_v7  ;;  %v742_v7 = vrot.slane %v11559_v18, 2  ;;  %18729 = vst [vmem:[#allocation58_spill] sm:$0xff] %v11962_v60  ;;  %v18735_v18 = vld [vmem:[#allocation57_spill] sm:$0xff] }
 0x2cc   :  { %1893 = vmatmul.mubr.f32.gmra.mrb[50].mxu0 %v18724_v22  ;;  %v744_v22 = vrot.slane %v117_v59, 2  ;;  %v18738_v59 = vld [vmem:[#allocation65_spill] sm:$0xff] }
 0x2cd   :  { %1897 = vmatprep.mubr.f32.mxu0 %v11229_v4  ;;  %v915_v4 = vld [vmem:[%s17867_s2 + $0x3f0] sm:$0xff] }
 0x2ce   :  { %v11965_v15 = vsel %vm496_vm1, %v742_v7, %v744_v22  ;;  %v918_v22 = vld [vmem:[%s17867_s2 + $0x408] sm:$0xff] }
 0x2d0   :  { %1898 = vmatmul.mubr.f32.gmra.mrb[52].mxu0 %v18725_v34  ;;  %v11957_v34 = vsel %vm496_vm1, %v741_v50, %v742_v7  ;;  %v11970_v50 = vsel %vm271_vm0, %v728_v9, %v730_v31  ;;  %v11982_v7 = vpack.c.bf16 %v918_v22, %v917_v28  ;;  %v18732_v9 = vld [vmem:[#allocation50_spill] sm:$0xff]  ;;  %v18733_v31 = vld [vmem:[#allocation52_spill] sm:$0xff] }
 0x2d1   :  { %1902 = vmatprep.mubr.f32.mxu0 %v11540_v12  ;;  %18730 = vst [vmem:[#allocation56_spill] sm:$0xff] %v11970_v50  ;;  %v18740_v22 = vld [vmem:[#allocation70_spill] sm:$0xff] }
 0x2d2   :  { %8983 = vmatprep.subr.bf16.mxu1 %v11982_v7 }
 0x2d3   :  { %8991 = vmatpush3.bf16.msra.mxu1 %v11982_v7 }
 0x2d4   :  { %1903 = vmatmul.mubr.f32.gmra.mrb[54].mxu0 %v18726_v43  ;;  %v8693_v43 = vpack.c.bf16 %v916_v21, %v915_v4  ;;  %v18739_v4 = vld [vmem:[#allocation67_spill] sm:$0xff]  ;;  %v919_v21 = vld [vmem:[%s17867_s2 + $0x410] sm:$0xff] }
 0x2d5   :  { %1907 = vmatprep.mubr.f32.mxu0 %v11553_v30 }
 0x2d6   :  { %8694 = vmatpush1.bf16.msra.mxu0 %v8693_v43  ;;  %v18731_v43 = vld [vmem:[#allocation47_spill] sm:$0xff] }
 0x2d7   :  { %8696 = vmatprep.subr.bf16.mxu0 %v11982_v7 }
 0x2d8   :  { %1908 = vmatmul.mubr.f32.gmra.mrb[56].mxu0 %v18727_v35  ;;  %v18728_v35 = vld [vmem:[#allocation42_spill] sm:$0xff] }
 0x2d9   :  { %1912 = vmatprep.mubr.f32.mxu0 %v11564_v61 }
 0x2dc   :  { %1913 = vmatmul.mubr.f32.gmra.mrb[58].mxu0 %v18728_v35 }
 0x2dd   :  { %1917 = vmatprep.mubr.f32.mxu0 %v11957_v34 }
 0x2e0   :  { %1918 = vmatmul.mubr.f32.gmra.mrb[60].mxu0 %v11962_v60  ;;  %v18756_v60 = vld [vmem:[#allocation46_spill] sm:$0xff] }
 0x2e1   :  { %1922 = vmatprep.mubr.f32.mxu0 %v11965_v15 }
 0x2e4   :  { %1923 = vmatmul.mubr.f32.gmra.mrb[62].mxu0 %v11970_v50  ;;  %v926_v50 = vld [vmem:[%s17867_s2 + $0x448] sm:$0xff] }
 0x2e5   :  { %1927 = vmatprep.mubr.f32.mxu0 %v11578_v8  ;;  %v18736_v8 = vld [vmem:[#allocation60_spill] sm:$0xff] }
 0x2e8   :  { %1928 = vmatmul.mubr.f32.gmra.mrb[64].mxu0 %v18731_v43  ;;  %v920_v43 = vld [vmem:[%s17867_s2 + $0x418] sm:$0xff] }
 0x2e9   :  { %1932 = vmatprep.mubr.f32.mxu0 %v11584_v58  ;;  %v18737_v58 = vld [vmem:[#allocation62_spill] sm:$0xff]  ;;  %v12009_v28 = vpack.c.bf16 %v920_v43, %v919_v21  ;;  %v18744_v21 = vld [vmem:[#allocation80_spill] sm:$0xff] }
 0x2ea   :  { %v18745_v43 = vld [vmem:[#allocation82_spill] sm:$0xff] }
 0x2eb   :  { %8984 = vmatprep.subr.bf16.mxu1 %v12009_v28 }
 0x2ec   :  { %1933 = vmatmul.mubr.f32.gmra.mrb[66].mxu0 %v18732_v9  ;;  %8992 = vmatpush3.bf16.msra.mxu1 %v12009_v28  ;;  %v18741_v9 = vld [vmem:[#allocation72_spill] sm:$0xff] }
 0x2ed   :  { %1937 = vmatprep.mubr.f32.mxu0 %v11591_v41 }
 0x2f0   :  { %1938 = vmatmul.mubr.f32.gmra.mrb[68].mxu0 %v18733_v31  ;;  %v924_v31 = vld [vmem:[%s17867_s2 + $0x438] sm:$0xff] }
 0x2f1   :  { %1942 = vmatprep.mubr.f32.mxu0 %v11597_v2 }
 0x2f4   :  { %1943 = vmatmul.mubr.f32.gmra.mrb[70].mxu0 %v18734_v55  ;;  %v923_v55 = vld [vmem:[%s17867_s2 + $0x430] sm:$0xff] }
 0x2f5   :  { %1947 = vmatprep.mubr.f32.mxu0 %v11604_v6 }
 0x2f8   :  { %1948 = vmatmul.mubr.f32.gmra.mrb[72].mxu0 %v18735_v18 }
 0x2f9   :  { %1952 = vmatprep.mubr.f32.mxu0 %v11610_v10 }
 0x2fc   :  { %1953 = vmatmul.mubr.f32.gmra.mrb[74].mxu0 %v18736_v8  ;;  %v18749_v8 = vld [vmem:[#allocation87_spill] sm:$0xff] }
 0x2fd   :  { %1957 = vmatprep.mubr.f32.mxu0 %v11617_v56 }
 0x300   :  { %1958 = vmatmul.mubr.f32.gmra.mrb[76].mxu0 %v18737_v58  ;;  %v18747_v58 = vld [vmem:[#allocation85_spill] sm:$0xff] }
 0x301   :  { %1962 = vmatprep.mubr.f32.mxu0 %v11623_v0 }
 0x304   :  { %1963 = vmatmul.mubr.f32.gmra.mrb[78].mxu0 %v18738_v59  ;;  %v18743_v59 = vld [vmem:[#allocation77_spill] sm:$0xff] }
 0x305   :  { %1967 = vmatprep.mubr.f32.mxu0 %v11630_v48 }
 0x308   :  { %1968 = vmatmul.mubr.f32.gmra.mrb[80].mxu0 %v18739_v4  ;;  %v18742_v4 = vld [vmem:[#allocation75_spill] sm:$0xff] }
 0x309   :  { %1972 = vmatprep.mubr.f32.mxu0 %v11636_v51 }
 0x30c   :  { %1973 = vmatmul.mubr.f32.gmra.mrb[82].mxu0 %v18740_v22  ;;  %v18746_v22 = vld [vmem:[#allocation41_spill] sm:$0xff] }
 0x30d   :  { %1977 = vmatprep.mubr.f32.mxu0 %v11643_v24 }
 0x310   :  { %1978 = vmatmul.mubr.f32.gmra.mrb[84].mxu0 %v18741_v9  ;;  %v18748_v9 = vld [vmem:[#allocation44_spill] sm:$0xff] }
 0x311   :  { %1982 = vmatprep.mubr.f32.mxu0 %v11649_v53 }
 0x314   :  { %1983 = vmatmul.mubr.f32.gmra.mrb[86].mxu0 %v18742_v4  ;;  %v18750_v4 = vld [vmem:[#allocation43_spill] sm:$0xff] }
 0x315   :  { %1987 = vmatprep.mubr.f32.mxu0 %v11656_v29 }
 0x318   :  { %1988 = vmatmul.mubr.f32.gmra.mrb[88].mxu0 %v18743_v59  ;;  %v921_v59 = vld [vmem:[%s17867_s2 + $0x420] sm:$0xff] }
 0x319   :  { %1992 = vmatprep.mubr.f32.mxu0 %v11662_v44 }
 0x31c   :  { %1993 = vmatmul.mubr.f32.gmra.mrb[90].mxu0 %v18744_v21  ;;  %v922_v21 = vld [vmem:[%s17867_s2 + $0x428] sm:$0xff] }
 0x31d   :  { %1997 = vmatprep.mubr.f32.mxu0 %v11669_v52  ;;  %v12035_v18 = vpack.c.bf16 %v922_v21, %v921_v59  ;;  %v18754_v59 = vld [vmem:[#allocation48_spill] sm:$0xff]  ;;  %v12049_v21 = vpack.c.bf16 %v924_v31, %v923_v55  ;;  %v18757_v31 = vld [vmem:[#allocation97_spill] sm:$0xff]  ;;  %v927_v55 = vld [vmem:[%s17867_s2 + $0x450] sm:$0xff] }
 0x31f   :  { %8985 = vmatprep.subr.bf16.mxu1 %v12035_v18 }
 0x320   :  { %1998 = vmatmul.mubr.f32.gmra.mrb[92].mxu0 %v18745_v43  ;;  %v18751_v43 = vld [vmem:[#allocation90_spill] sm:$0xff]  ;;  %8993 = vmatpush3.bf16.msra.mxu1 %v12035_v18 }
 0x321   :  { %2002 = vmatprep.mubr.f32.mxu0 %v18746_v22  ;;  %8986 = vmatprep.subr.bf16.mxu1 %v12049_v21 }
 0x324   :  { %2003 = vmatmul.mubr.f32.gmra.mrb[94].mxu0 %v18747_v58  ;;  %v18752_v58 = vld [vmem:[#allocation45_spill] sm:$0xff]  ;;  %8994 = vmatpush3.bf16.msra.mxu1 %v12049_v21 }
 0x325   :  { %2007 = vmatprep.mubr.f32.mxu0 %v18748_v9 }
 0x328   :  { %2008 = vmatmul.mubr.f32.gmra.mrb[96].mxu0 %v18749_v8  ;;  %v18753_v8 = vld [vmem:[#allocation92_spill] sm:$0xff] }
 0x329   :  { %2012 = vmatprep.mubr.f32.mxu0 %v18750_v4 }
 0x32c   :  { %2013 = vmatmul.mubr.f32.gmra.mrb[98].mxu0 %v18751_v43  ;;  %v18755_v43 = vld [vmem:[#allocation95_spill] sm:$0xff] }
 0x32d   :  { %2017 = vmatprep.mubr.f32.mxu0 %v18752_v58 }
 0x330   :  { %2018 = vmatmul.mubr.f32.gmra.mrb[100].mxu0 %v18753_v8  ;;  %v925_v8 = vld [vmem:[%s17867_s2 + $0x440] sm:$0xff] }
 0x331   :  { %2022 = vmatprep.mubr.f32.mxu0 %v18754_v59  ;;  %v12061_v35 = vpack.c.bf16 %v926_v50, %v925_v8  ;;  %v18758_v50 = vld [vmem:[#allocation100_spill] sm:$0xff] }
 0x332   :  { %v929_v8 = vld [vmem:[%s17867_s2 + $0x460] sm:$0xff] }
 0x333   :  { %8987 = vmatprep.subr.bf16.mxu1 %v12061_v35 }
 0x334   :  { %2023 = vmatmul.mubr.f32.gmra.mrb[102].mxu0 %v18755_v43  ;;  %8995 = vmatpush3.bf16.msra.mxu1 %v12061_v35  ;;  %v928_v43 = vld [vmem:[%s17867_s2 + $0x458] sm:$0xff] }
 0x335   :  { %2027 = vmatprep.mubr.f32.mxu0 %v18756_v60  ;;  %v12073_v33 = vpack.c.bf16 %v928_v43, %v927_v55  ;;  %v18759_v43 = vld [vmem:[#allocation102_spill] sm:$0xff] }
 0x336   :  { %v931_v55 = vld [vmem:[%s17867_s2 + $0x470] sm:$0xff] }
 0x337   :  { %8988 = vmatprep.subr.bf16.mxu1 %v12073_v33 }
 0x338   :  { %2028 = vmatmul.mubr.f32.gmra.mrb[104].mxu0 %v18757_v31  ;;  %8996 = vmatpush3.bf16.msra.mxu1 %v12073_v33  ;;  %v930_v31 = vld [vmem:[%s17867_s2 + $0x468] sm:$0xff] }
 0x339   :  { %2032 = vmatprep.mubr.f32.mxu0 %v11714_v11  ;;  %v12085_v27 = vpack.c.bf16 %v930_v31, %v929_v8  ;;  %v18760_v31 = vld [vmem:[#allocation105_spill] sm:$0xff]  ;;  %v18761_v8 = vld [vmem:[#allocation107_spill] sm:$0xff] }
 0x33b   :  { %8989 = vmatprep.subr.bf16.mxu1 %v12085_v27 }
 0x33c   :  { %2033 = vmatmul.mubr.f32.gmra.mrb[106].mxu0 %v18758_v50  ;;  %8997 = vmatpush3.bf16.msra.mxu1 %v12085_v27  ;;  %v932_v50 = vld [vmem:[%s17867_s2 + $0x478] sm:$0xff] }
 0x33d   :  { %2037 = vmatprep.mubr.f32.mxu0 %v11721_v32  ;;  %v12097_v45 = vpack.c.bf16 %v932_v50, %v931_v55  ;;  %v18762_v50 = vld [vmem:[#allocation108_spill] sm:$0xff]  ;;  %v18763_v55 = vld [vmem:[#allocation49_spill] sm:$0xff] }
 0x33f   :  { %8990 = vmatprep.subr.bf16.mxu1 %v12097_v45 }
 0x340   :  { %2038 = vmatmul.mubr.f32.gmra.mrb[108].mxu0 %v18759_v43  ;;  %8998 = vmatpush3.bf16.msra.mxu1 %v12097_v45  ;;  %v12132_v43 = vld [vmem:[%s17865_s0 + $0x198] sm:$0xff] }
 0x341   :  { %2042 = vmatprep.mubr.f32.mxu0 %v11727_v26  ;;  %8727 = vmatprep.subr.bf16.mxu1 %v18536_v63  ;;  %v18766_v63 = vld [vmem:[#allocation51_spill] sm:$0xff]  ;;  %18768 = vst [vmem:[#allocation59_spill] sm:$0xff] %v12132_v43 }
 0x343   :  { %8188 = vmatmul.mubr.f32.vlgmr.msra.gmra.mrb[0].mxu1 %v11540_v12  ;;  %v18765_v12 = vld [vmem:[#allocation111_spill] sm:$0xff] }
 0x344   :  { %2043 = vmatmul.mubr.f32.gmra.mrb[110].mxu0 %v18760_v31  ;;  %8190 = vmatprep.mubr.f32.mxu1 %v11553_v30  ;;  %v18764_v31 = vld [vmem:[#allocation110_spill] sm:$0xff]  ;;  %v746_v30 = vrot.slane %v11760_v19, 2 }
 0x345   :  { %2047 = vmatprep.mubr.f32.mxu0 %v11734_v40 }
 0x347   :  { %8191 = vmatmul.mubr.f32.gmra.mrb[2].mxu1 %v11564_v61  ;;  %v747_v61 = vrot.slane %v18766_v63, 2 }
 0x348   :  { %2048 = vmatmul.mubr.f32.gmra.mrb[112].mxu0 %v18761_v8  ;;  %8193 = vmatprep.mubr.f32.mxu1 %v11957_v34  ;;  %v171_v34 = vld [vmem:[%s17865_s0 + $0x340] sm:$0x3] }
 0x349   :  { %2052 = vmatprep.mubr.f32.mxu0 %v11740_v36  ;;  %v749_v8 = vrot.slane %v171_v34, 2  ;;  %v735_v37 = vrot.slane %v171_v34, 1 }
 0x34b   :  { %8194 = vmatmul.mubr.f32.gmra.mrb[4].mxu1 %v11965_v15  ;;  %v732_v15 = vrot.slane %v11760_v19, 1  ;;  %v776_v19 = vrot.slane %v12137_v3, 2 }
 0x34c   :  { %2053 = vmatmul.mubr.f32.gmra.mrb[114].mxu0 %v18762_v50  ;;  %v18767_v50 = vld [vmem:[#allocation113_spill] sm:$0xff] }
 0x34d   :  { %2057 = vmatprep.mubr.f32.mxu0 %v18763_v55 }
 0x350   :  { %2058 = vmatmul.mubr.f32.gmra.mrb[116].mxu0 %v18764_v31  ;;  %v733_v31 = vrot.slane %v18766_v63, 1  ;;  %v12144_v63 = vld [vmem:[%s17865_s0 + $0x1a8] sm:$0x3] }
 0x351   :  { %2062 = vmatprep.mubr.f32.mxu0 %v11753_v49  ;;  %v778_v47 = vrot.slane %v12144_v63, 2 }
 0x352   :  { %v12150_v1 = vsel %vm271_vm0, %v732_v15, %v733_v31 }
 0x353   :  { %v779_v3 = vsel %vm496_vm1, %v776_v19, %v778_v47  ;;  %v9780_v47 = vld [vmem:[%s17865_s0 + $0x30] sm:$0xff] }
 0x354   :  { %2063 = vmatmul.mubr.f32.gmra.mrb[118].mxu0 %v18765_v12  ;;  %v12127_v12 = vsel %vm496_vm1, %v746_v30, %v747_v61  ;;  %v18770_v30 = vld [vmem:[#allocation114_spill] sm:$0xff] }
 0x355   :  { %2067 = vmatprep.mubr.f32.mxu0 %v11765_v62 }
 0x358   :  { %2068 = vmatmul.mubr.f32.gmra.mrb[120].mxu0 %v18767_v50  ;;  %v775_v50 = vrot.slane %v12132_v43, 2  ;;  %v12154_v43 = vsel %vm496_vm1, %v747_v61, %v749_v8  ;;  %v12337_v8 = vld [vmem:[%s17865_s0 + $0x350] sm:$0xff]  ;;  %v9809_v61 = vld [vmem:[%s17865_s0 + $0x188] sm:$0xff] }
 0x359   :  { %2072 = vmatprep.mubr.f32.mxu0 %v11776_v13 }
 0x35a   :  { %v777_v13 = vsel %vm496_vm1, %v775_v50, %v776_v19  ;;  %v9799_v19 = vld [vmem:[%s17865_s0 + $0x110] sm:$0xff] }
 0x35b   :  { %8196 = vmatprep.mubr.f32.mxu1 %v777_v13  ;;  %v9800_v13 = vld [vmem:[%s17865_s0 + $0x120] sm:$0xff] }
 0x35c   :  { %2073 = vmatmul.mubr.f32.gmra.mrb[122].mxu0 %v18770_v30  ;;  %8197 = vmatmul.mubr.f32.gmra.mrb[6].mxu1 %v779_v3  ;;  %v12161_v30 = vsel %vm271_vm0, %v733_v31, %v735_v37  ;;  %v9781_v37 = vld [vmem:[%s17865_s0 + $0x38] sm:$0xff]  ;;  %v9782_v3 = vld [vmem:[%s17865_s0 + $0x48] sm:$0xff] }
 0x35d   :  { %2077 = vmatprep.mubr.f32.mxu0 %v12127_v12  ;;  %8199 = vmatprep.mubr.f32.mxu1 %v11591_v41  ;;  %v9783_v41 = vld [vmem:[%s17865_s0 + $0x50] sm:$0xff]  ;;  %v12332_v31 = vld [vmem:[%s17865_s0 + $0x348] sm:$0xff] }
 0x35e   :  { %v780_v50 = vrot.slane %v12332_v31, 2 }
 0x360   :  { %2078 = vmatmul.mubr.f32.gmra.mrb[124].mxu0 %v12150_v1  ;;  %8200 = vmatmul.mubr.f32.gmra.mrb[8].mxu1 %v11597_v2  ;;  %v9784_v2 = vld [vmem:[%s17865_s0 + $0x60] sm:$0xff] }
 0x361   :  { %2082 = vmatprep.mubr.f32.mxu0 %v12154_v43  ;;  %8202 = vmatprep.mubr.f32.mxu1 %v11604_v6  ;;  %v9785_v6 = vld [vmem:[%s17865_s0 + $0x68] sm:$0xff] }
 0x364   :  { %2083 = vmatmul.mubr.f32.gmra.mrb[126].mxu0 %v12161_v30  ;;  %8203 = vmatmul.mubr.f32.gmra.mrb[10].mxu1 %v11610_v10  ;;  %v9786_v10 = vld [vmem:[%s17865_s0 + $0x78] sm:$0xff] }
 0x365   :  { %2152 = vmatprep.mubr.f32.mxu0 %v18701_v17  ;;  %8205 = vmatprep.mubr.f32.mxu1 %v11617_v56  ;;  %v9791_v56 = vld [vmem:[%s17865_s0 + $0xb0] sm:$0xff]  ;;  %v18780_v17 = vld [vmem:[#allocation35_spill] sm:$0xff] }
 0x368   :  { %2153 = vmatmul.mubr.f32.vlgmr.msra.gmra.mrb[0].mxu0 %v9780_v47  ;;  %8206 = vmatmul.mubr.f32.gmra.mrb[12].mxu1 %v11623_v0  ;;  %v18771_v0 = vld [vmem:[#allocation54_spill] sm:$0xff] }
 0x369   :  { %8698 = vmatpush3.bf16.msra.mxu0 %v11982_v7  ;;  %2157 = vmatprep.mubr.f32.mxu0 %v18702_v42  ;;  %v9801_v42 = vld [vmem:[%s17865_s0 + $0x128] sm:$0xff]  ;;  %v9807_v7 = vld [vmem:[%s17865_s0 + $0x170] sm:$0xff] }
 0x36a   :  { %8700 = vmatprep.subr.bf16.mxu0 %v12009_v28  ;;  %8208 = vmatprep.mubr.f32.mxu1 %v11630_v48  ;;  %v9792_v48 = vld [vmem:[%s17865_s0 + $0xc0] sm:$0xff] }
 0x36c   :  { %2158 = vmatmul.mubr.f32.gmra.mrb[2].mxu0 %v9781_v37  ;;  %8209 = vmatmul.mubr.f32.gmra.mrb[14].mxu1 %v11636_v51  ;;  %v18772_v51 = vld [vmem:[#allocation27_spill] sm:$0xff]  ;;  %v18791_v37 = vld [vmem:[#allocation52_spill] sm:$0xff] }
 0x36d   :  { %2162 = vmatprep.mubr.f32.mxu0 %v18703_v57  ;;  %8702 = vmatpush3.bf16.msra.mxu0 %v12009_v28  ;;  %v18781_v57 = vld [vmem:[#allocation36_spill] sm:$0xff]  ;;  %v18789_v28 = vld [vmem:[#allocation63_spill] sm:$0xff] }
 0x36e   :  { %8704 = vmatprep.subr.bf16.mxu0 %v12035_v18  ;;  %8211 = vmatprep.mubr.f32.mxu1 %v11643_v24  ;;  %v9793_v24 = vld [vmem:[%s17865_s0 + $0xc8] sm:$0xff] }
 0x370   :  { %2163 = vmatmul.mubr.f32.gmra.mrb[4].mxu0 %v9782_v3  ;;  %8212 = vmatmul.mubr.f32.gmra.mrb[16].mxu1 %v11649_v53  ;;  %v18773_v53 = vld [vmem:[#allocation28_spill] sm:$0xff] }
 0x371   :  { %2167 = vmatprep.mubr.f32.mxu0 %v18704_v14  ;;  %8706 = vmatpush3.bf16.msra.mxu0 %v12035_v18  ;;  %v9802_v14 = vld [vmem:[%s17865_s0 + $0x138] sm:$0xff]  ;;  %v18787_v18 = vld [vmem:[#allocation58_spill] sm:$0xff]  ;;  %v9810_v3 = vld [vmem:[%s17865_s0 + $0x1e0] sm:$0xff] }
 0x372   :  { %8708 = vmatprep.subr.bf16.mxu0 %v12049_v21  ;;  %8214 = vmatprep.mubr.f32.mxu1 %v11656_v29  ;;  %v18774_v29 = vld [vmem:[#allocation29_spill] sm:$0xff] }
 0x374   :  { %2168 = vmatmul.mubr.f32.gmra.mrb[6].mxu0 %v9783_v41  ;;  %8215 = vmatmul.mubr.f32.gmra.mrb[18].mxu1 %v11662_v44  ;;  %v9795_v44 = vld [vmem:[%s17865_s0 + $0xe0] sm:$0xff]  ;;  %v18792_v41 = vld [vmem:[#allocation55_spill] sm:$0xff] }
 0x375   :  { %2172 = vmatprep.mubr.f32.mxu0 %v18705_v23  ;;  %8710 = vmatpush3.bf16.msra.mxu0 %v12049_v21  ;;  %v18782_v23 = vld [vmem:[#allocation37_spill] sm:$0xff] }
 0x376   :  { %8712 = vmatprep.subr.bf16.mxu0 %v12061_v35  ;;  %8217 = vmatprep.mubr.f32.mxu1 %v11669_v52  ;;  %v18775_v52 = vld [vmem:[#allocation30_spill] sm:$0xff] }
 0x378   :  { %2173 = vmatmul.mubr.f32.gmra.mrb[8].mxu0 %v9784_v2  ;;  %8218 = vmatmul.mubr.f32.gmra.mrb[20].mxu1 %v18746_v22  ;;  %v762_v22 = vrot.slane %v18789_v28, 1  ;;  %v9811_v2 = vld [vmem:[%s17865_s0 + $0x1e8] sm:$0xff] }
 0x379   :  { %2177 = vmatprep.mubr.f32.mxu0 %v18706_v5  ;;  %8714 = vmatpush3.bf16.msra.mxu0 %v12061_v35  ;;  %v9803_v5 = vld [vmem:[%s17865_s0 + $0x140] sm:$0xff]  ;;  %v18786_v35 = vld [vmem:[#allocation42_spill] sm:$0xff] }
 0x37a   :  { %8716 = vmatprep.subr.bf16.mxu0 %v12073_v33  ;;  %8220 = vmatprep.mubr.f32.mxu1 %v18748_v9  ;;  %v9808_v9 = vld [vmem:[%s17865_s0 + $0x180] sm:$0xff] }
 0x37c   :  { %2178 = vmatmul.mubr.f32.gmra.mrb[10].mxu0 %v9785_v6  ;;  %8221 = vmatmul.mubr.f32.gmra.mrb[22].mxu1 %v18750_v4  ;;  %v18793_v6 = vld [vmem:[#allocation57_spill] sm:$0xff] }
 0x37d   :  { %2182 = vmatprep.mubr.f32.mxu0 %v18707_v16  ;;  %8718 = vmatpush3.bf16.msra.mxu0 %v12073_v33  ;;  %v9787_v33 = vld [vmem:[%s17865_s0 + $0x80] sm:$0xff]  ;;  %v18783_v16 = vld [vmem:[#allocation38_spill] sm:$0xff] }
 0x37e   :  { %8720 = vmatprep.subr.bf16.mxu0 %v12085_v27  ;;  %8223 = vmatprep.mubr.f32.mxu1 %v18752_v58  ;;  %v18788_v58 = vld [vmem:[#allocation59_spill] sm:$0xff] }
 0x37f   :  { %v761_v4 = vrot.slane %v18788_v58, 1 }
 0x380   :  { %2183 = vmatmul.mubr.f32.gmra.mrb[12].mxu0 %v9786_v10  ;;  %8224 = vmatmul.mubr.f32.gmra.mrb[24].mxu1 %v18754_v59  ;;  %v18790_v59 = vld [vmem:[#allocation56_spill] sm:$0xff]  ;;  %v9812_v10 = vld [vmem:[%s17865_s0 + $0x1f8] sm:$0xff] }
 0x381   :  { %2187 = vmatprep.mubr.f32.mxu0 %v18708_v46  ;;  %8722 = vmatpush3.bf16.msra.mxu0 %v12085_v27  ;;  %v9788_v27 = vld [vmem:[%s17865_s0 + $0x90] sm:$0xff]  ;;  %v763_v21 = vsel %vm271_vm0, %v761_v4, %v762_v22 }
 0x382   :  { %8724 = vmatprep.subr.bf16.mxu0 %v12097_v45  ;;  %8226 = vmatprep.mubr.f32.mxu1 %v18756_v60  ;;  %v9789_v60 = vld [vmem:[%s17865_s0 + $0x98] sm:$0xff]  ;;  %v9804_v46 = vld [vmem:[%s17865_s0 + $0x150] sm:$0xff] }
 0x384   :  { %2188 = vmatmul.mubr.f32.gmra.mrb[14].mxu0 %v9787_v33  ;;  %8227 = vmatmul.mubr.f32.gmra.mrb[26].mxu1 %v11714_v11  ;;  %v9796_v11 = vld [vmem:[%s17865_s0 + $0xf0] sm:$0xff]  ;;  %v18794_v33 = vld [vmem:[#allocation60_spill] sm:$0xff] }
 0x385   :  { %2192 = vmatprep.mubr.f32.mxu0 %v18709_v39  ;;  %8726 = vmatpush3.bf16.msra.mxu0 %v12097_v45  ;;  %v9790_v45 = vld [vmem:[%s17865_s0 + $0xa8] sm:$0xff]  ;;  %v18784_v39 = vld [vmem:[#allocation39_spill] sm:$0xff] }
 0x386   :  { %8229 = vmatprep.mubr.f32.mxu1 %v11721_v32  ;;  %v18776_v32 = vld [vmem:[#allocation31_spill] sm:$0xff] }
 0x388   :  { %2193 = vmatmul.mubr.f32.gmra.mrb[16].mxu0 %v9788_v27  ;;  %8230 = vmatmul.mubr.f32.gmra.mrb[28].mxu1 %v11727_v26  ;;  %v9797_v26 = vld [vmem:[%s17865_s0 + $0xf8] sm:$0xff]  ;;  %v9813_v27 = vld [vmem:[%s17865_s0 + $0x200] sm:$0xff] }
 0x389   :  { %2197 = vmatprep.mubr.f32.mxu0 %v18710_v25  ;;  %8232 = vmatprep.mubr.f32.mxu1 %v11734_v40  ;;  %v18777_v40 = vld [vmem:[#allocation32_spill] sm:$0xff]  ;;  %v9805_v25 = vld [vmem:[%s17865_s0 + $0x158] sm:$0xff] }
 0x38c   :  { %2198 = vmatmul.mubr.f32.gmra.mrb[18].mxu0 %v9789_v60  ;;  %8233 = vmatmul.mubr.f32.gmra.mrb[30].mxu1 %v11740_v36  ;;  %v9798_v36 = vld [vmem:[%s17865_s0 + $0x108] sm:$0xff]  ;;  %v18795_v60 = vld [vmem:[#allocation62_spill] sm:$0xff] }
 0x38d   :  { %2202 = vmatprep.mubr.f32.mxu0 %v18711_v38  ;;  %8235 = vmatprep.mubr.f32.mxu1 %v18763_v55  ;;  %v18785_v38 = vld [vmem:[#allocation40_spill] sm:$0xff]  ;;  %v781_v55 = vrot.slane %v12337_v8, 2 }
 0x38f   :  { %v782_v15 = vsel %vm496_vm1, %v780_v50, %v781_v55 }
 0x390   :  { %2203 = vmatmul.mubr.f32.gmra.mrb[20].mxu0 %v9790_v45  ;;  %8236 = vmatmul.mubr.f32.gmra.mrb[32].mxu1 %v11753_v49  ;;  %v18778_v49 = vld [vmem:[#allocation33_spill] sm:$0xff]  ;;  %v9814_v45 = vld [vmem:[%s17865_s0 + $0x210] sm:$0xff] }
 0x391   :  { %2207 = vmatprep.mubr.f32.mxu0 %v18712_v54  ;;  %8238 = vmatprep.mubr.f32.mxu1 %v11765_v62  ;;  %v18779_v62 = vld [vmem:[#allocation34_spill] sm:$0xff]  ;;  %v9806_v54 = vld [vmem:[%s17865_s0 + $0x168] sm:$0xff] }
 0x394   :  { %2208 = vmatmul.mubr.f32.gmra.mrb[22].mxu0 %v9791_v56  ;;  %8239 = vmatmul.mubr.f32.gmra.mrb[34].mxu1 %v18771_v0  ;;  %v18796_v56 = vld [vmem:[#allocation65_spill] sm:$0xff]  ;;  %v9815_v0 = vld [vmem:[%s17865_s0 + $0x218] sm:$0xff] }
 0x395   :  { %2212 = vmatprep.mubr.f32.mxu0 %v18713_v20  ;;  %8241 = vmatprep.mubr.f32.mxu1 %v12127_v12  ;;  %v9794_v20 = vld [vmem:[%s17865_s0 + $0xd8] sm:$0xff] }
 0x396   :  { %v12344_v12 = vld [vmem:[%s17865_s0 + $0x358] sm:$0x3] }
 0x397   :  { %v783_v34 = vrot.slane %v12344_v12, 2 }
 0x398   :  { %2213 = vmatmul.mubr.f32.gmra.mrb[24].mxu0 %v9792_v48  ;;  %8242 = vmatmul.mubr.f32.gmra.mrb[36].mxu1 %v12154_v43  ;;  %v764_v43 = vrot.slane %v12144_v63, 1  ;;  %v18797_v48 = vld [vmem:[#allocation67_spill] sm:$0xff] }
 0x399   :  { %2217 = vmatprep.mubr.f32.mxu0 %v18772_v51  ;;  %8244 = vmatprep.mubr.f32.mxu1 %v782_v15  ;;  %v784_v47 = vsel %vm496_vm1, %v781_v55, %v783_v34  ;;  %v9816_v51 = vld [vmem:[%s17865_s0 + $0x228] sm:$0xff]  ;;  %v9831_v34 = vld [vmem:[%s17865_s0 + $0x2d8] sm:$0xff] }
 0x39a   :  { %v765_v63 = vsel %vm271_vm0, %v762_v22, %v764_v43  ;;  %v9829_v22 = vld [vmem:[%s17865_s0 + $0x2c0] sm:$0xff]  ;;  %v18813_v15 = vld [vmem:[#allocation107_spill] sm:$0xff] }
 0x39c   :  { %2218 = vmatmul.mubr.f32.gmra.mrb[26].mxu0 %v9793_v24  ;;  %8245 = vmatmul.mubr.f32.gmra.mrb[38].mxu1 %v784_v47  ;;  %v18798_v24 = vld [vmem:[#allocation70_spill] sm:$0xff] }
 0x39d   :  { %2222 = vmatprep.mubr.f32.mxu0 %v18773_v53  ;;  %v9817_v53 = vld [vmem:[%s17865_s0 + $0x230] sm:$0xff] }
 0x3a0   :  { %2223 = vmatmul.mubr.f32.gmra.mrb[28].mxu0 %v9794_v20  ;;  %v18799_v20 = vld [vmem:[#allocation72_spill] sm:$0xff] }
 0x3a1   :  { %2227 = vmatprep.mubr.f32.mxu0 %v18774_v29  ;;  %v9818_v29 = vld [vmem:[%s17865_s0 + $0x240] sm:$0xff] }
 0x3a4   :  { %2228 = vmatmul.mubr.f32.gmra.mrb[30].mxu0 %v9795_v44  ;;  %v18800_v44 = vld [vmem:[#allocation75_spill] sm:$0xff] }
 0x3a5   :  { %2232 = vmatprep.mubr.f32.mxu0 %v18775_v52  ;;  %v9819_v52 = vld [vmem:[%s17865_s0 + $0x248] sm:$0xff] }
 0x3a8   :  { %2233 = vmatmul.mubr.f32.gmra.mrb[32].mxu0 %v9796_v11  ;;  %v18801_v11 = vld [vmem:[#allocation77_spill] sm:$0xff] }
 0x3a9   :  { %2237 = vmatprep.mubr.f32.mxu0 %v18776_v32  ;;  %v9820_v32 = vld [vmem:[%s17865_s0 + $0x258] sm:$0xff] }
 0x3ac   :  { %2238 = vmatmul.mubr.f32.gmra.mrb[34].mxu0 %v9797_v26  ;;  %v18802_v26 = vld [vmem:[#allocation80_spill] sm:$0xff] }
 0x3ad   :  { %2242 = vmatprep.mubr.f32.mxu0 %v18777_v40  ;;  %v9821_v40 = vld [vmem:[%s17865_s0 + $0x260] sm:$0xff] }
 0x3b0   :  { %2243 = vmatmul.mubr.f32.gmra.mrb[36].mxu0 %v9798_v36  ;;  %v18803_v36 = vld [vmem:[#allocation82_spill] sm:$0xff] }
 0x3b1   :  { %2247 = vmatprep.mubr.f32.mxu0 %v18778_v49  ;;  %v9822_v49 = vld [vmem:[%s17865_s0 + $0x270] sm:$0xff] }
 0x3b4   :  { %2248 = vmatmul.mubr.f32.gmra.mrb[38].mxu0 %v9799_v19  ;;  %v18804_v19 = vld [vmem:[#allocation85_spill] sm:$0xff] }
 0x3b5   :  { %2252 = vmatprep.mubr.f32.mxu0 %v18779_v62 }
 0x3b8   :  { %2253 = vmatmul.mubr.f32.gmra.mrb[40].mxu0 %v9800_v13 }
 0x3b9   :  { %2257 = vmatprep.mubr.f32.mxu0 %v18780_v17  ;;  %v9823_v17 = vld [vmem:[%s17865_s0 + $0x278] sm:$0xff] }
 0x3bc   :  { %2258 = vmatmul.mubr.f32.gmra.mrb[42].mxu0 %v9801_v42  ;;  %v18805_v42 = vld [vmem:[#allocation87_spill] sm:$0xff] }
 0x3bd   :  { %2262 = vmatprep.mubr.f32.mxu0 %v18781_v57  ;;  %v9824_v57 = vld [vmem:[%s17865_s0 + $0x288] sm:$0xff] }
 0x3c0   :  { %2263 = vmatmul.mubr.f32.gmra.mrb[44].mxu0 %v9802_v14  ;;  %v18806_v14 = vld [vmem:[#allocation90_spill] sm:$0xff] }
 0x3c1   :  { %2267 = vmatprep.mubr.f32.mxu0 %v18782_v23 }
 0x3c4   :  { %2268 = vmatmul.mubr.f32.gmra.mrb[46].mxu0 %v9803_v5 }
 0x3c5   :  { %2272 = vmatprep.mubr.f32.mxu0 %v18783_v16  ;;  %v9825_v16 = vld [vmem:[%s17865_s0 + $0x290] sm:$0xff] }
 0x3c8   :  { %2273 = vmatmul.mubr.f32.gmra.mrb[48].mxu0 %v9804_v46  ;;  %v18807_v46 = vld [vmem:[#allocation92_spill] sm:$0xff] }
 0x3c9   :  { %2277 = vmatprep.mubr.f32.mxu0 %v18784_v39  ;;  %v9826_v39 = vld [vmem:[%s17865_s0 + $0x2a0] sm:$0xff] }
 0x3cc   :  { %2278 = vmatmul.mubr.f32.gmra.mrb[50].mxu0 %v9805_v25  ;;  %v18808_v25 = vld [vmem:[#allocation95_spill] sm:$0xff] }
 0x3cd   :  { %2282 = vmatprep.mubr.f32.mxu0 %v18785_v38 }
 0x3d0   :  { %2283 = vmatmul.mubr.f32.gmra.mrb[52].mxu0 %v9806_v54 }
 0x3d1   :  { %2287 = vmatprep.mubr.f32.mxu0 %v18786_v35  ;;  %v9827_v35 = vld [vmem:[%s17865_s0 + $0x2a8] sm:$0xff] }
 0x3d4   :  { %2288 = vmatmul.mubr.f32.gmra.mrb[54].mxu0 %v9807_v7  ;;  %v18809_v7 = vld [vmem:[#allocation97_spill] sm:$0xff] }
 0x3d5   :  { %2292 = vmatprep.mubr.f32.mxu0 %v18787_v18  ;;  %v9828_v18 = vld [vmem:[%s17865_s0 + $0x2b8] sm:$0xff] }
 0x3d8   :  { %2293 = vmatmul.mubr.f32.gmra.mrb[56].mxu0 %v9808_v9  ;;  %v18811_v9 = vld [vmem:[#allocation102_spill] sm:$0xff] }
 0x3d9   :  { %2297 = vmatprep.mubr.f32.mxu0 %v18790_v59  ;;  %v9830_v59 = vld [vmem:[%s17865_s0 + $0x2d0] sm:$0xff] }
 0x3dc   :  { %2298 = vmatmul.mubr.f32.gmra.mrb[58].mxu0 %v9809_v61 }
 0x3dd   :  { %2302 = vmatprep.mubr.f32.mxu0 %v763_v21  ;;  %v18812_v21 = vld [vmem:[#allocation105_spill] sm:$0xff] }
 0x3e0   :  { %2303 = vmatmul.mubr.f32.gmra.mrb[60].mxu0 %v18788_v58  ;;  %v18810_v58 = vld [vmem:[#allocation100_spill] sm:$0xff] }
 0x3e1   :  { %2307 = vmatprep.mubr.f32.mxu0 %v765_v63 }
 0x3e4   :  { %2308 = vmatmul.mubr.f32.gmra.mrb[62].mxu0 %v18789_v28 }
 0x3e5   :  { %2312 = vmatprep.mubr.f32.mxu0 %v18791_v37  ;;  %v9832_v37 = vld [vmem:[%s17865_s0 + $0x2e8] sm:$0xff] }
 0x3e8   :  { %2313 = vmatmul.mubr.f32.gmra.mrb[64].mxu0 %v9810_v3  ;;  %v18814_v3 = vld [vmem:[#allocation108_spill] sm:$0xff] }
 0x3e9   :  { %2317 = vmatprep.mubr.f32.mxu0 %v18792_v41 }
 0x3ec   :  { %2318 = vmatmul.mubr.f32.gmra.mrb[66].mxu0 %v9811_v2 }
 0x3ed   :  { %2322 = vmatprep.mubr.f32.mxu0 %v18793_v6 }
 0x3f0   :  { %2323 = vmatmul.mubr.f32.gmra.mrb[68].mxu0 %v9812_v10 }
 0x3f1   :  { %2327 = vmatprep.mubr.f32.mxu0 %v18794_v33  ;;  %v9833_v33 = vld [vmem:[%s17865_s0 + $0x2f0] sm:$0xff] }
 0x3f4   :  { %2328 = vmatmul.mubr.f32.gmra.mrb[70].mxu0 %v9813_v27  ;;  %v18815_v27 = vld [vmem:[#allocation110_spill] sm:$0xff] }
 0x3f5   :  { %2332 = vmatprep.mubr.f32.mxu0 %v18795_v60 }
 0x3f8   :  { %2333 = vmatmul.mubr.f32.gmra.mrb[72].mxu0 %v9814_v45 }
 0x3f9   :  { %2337 = vmatprep.mubr.f32.mxu0 %v18796_v56  ;;  %v9834_v56 = vld [vmem:[%s17865_s0 + $0x300] sm:$0xff] }
 0x3fc   :  { %2338 = vmatmul.mubr.f32.gmra.mrb[74].mxu0 %v9815_v0  ;;  %v18816_v0 = vld [vmem:[#allocation111_spill] sm:$0xff] }
 0x3fd   :  { %2342 = vmatprep.mubr.f32.mxu0 %v18797_v48 }
 0x400   :  { %2343 = vmatmul.mubr.f32.gmra.mrb[76].mxu0 %v9816_v51 }
 0x401   :  { %2347 = vmatprep.mubr.f32.mxu0 %v18798_v24 }
 0x404   :  { %2348 = vmatmul.mubr.f32.gmra.mrb[78].mxu0 %v9817_v53 }
 0x405   :  { %2352 = vmatprep.mubr.f32.mxu0 %v18799_v20  ;;  %v9835_v20 = vld [vmem:[%s17865_s0 + $0x308] sm:$0xff] }
 0x408   :  { %2353 = vmatmul.mubr.f32.gmra.mrb[80].mxu0 %v9818_v29  ;;  %v18817_v29 = vld [vmem:[#allocation113_spill] sm:$0xff] }
 0x409   :  { %2357 = vmatprep.mubr.f32.mxu0 %v18800_v44 }
 0x40c   :  { %2358 = vmatmul.mubr.f32.gmra.mrb[82].mxu0 %v9819_v52 }
 0x40d   :  { %2362 = vmatprep.mubr.f32.mxu0 %v18801_v11  ;;  %v9836_v11 = vld [vmem:[%s17865_s0 + $0x318] sm:$0xff] }
 0x410   :  { %2363 = vmatmul.mubr.f32.gmra.mrb[84].mxu0 %v9820_v32  ;;  %v18818_v32 = vld [vmem:[#allocation114_spill] sm:$0xff] }
 0x411   :  { %2367 = vmatprep.mubr.f32.mxu0 %v18802_v26 }
 0x414   :  { %2368 = vmatmul.mubr.f32.gmra.mrb[86].mxu0 %v9821_v40 }
 0x415   :  { %2372 = vmatprep.mubr.f32.mxu0 %v18803_v36 }
 0x416   :  { %v12408_v62 = vpop.f32.mrb[0].mxu1 }
 0x417   :  { %v12410_v13 = vpop.f32.mrb[1].mxu1 }
 0x418   :  { %2373 = vmatmul.mubr.f32.gmra.mrb[88].mxu0 %v9822_v49 }
 0x419   :  { %2377 = vmatprep.mubr.f32.mxu0 %v18804_v19  ;;  %v9837_v19 = vld [vmem:[%s17865_s0 + $0x320] sm:$0xff] }
 0x41a   :  { %v12420_v23 = vpop.f32.mrb[2].mxu1 }
 0x41b   :  { %v12422_v5 = vpop.f32.mrb[3].mxu1 }
 0x41c   :  { %2378 = vmatmul.mubr.f32.gmra.mrb[90].mxu0 %v9823_v17  ;;  %v766_v17 = vrot.slane %v12332_v31, 1 }
 0x41d   :  { %2382 = vmatprep.mubr.f32.mxu0 %v18805_v42  ;;  %v767_v42 = vrot.slane %v12337_v8, 1 }
 0x41e   :  { %v12432_v38 = vpop.f32.mrb[4].mxu1 }
 0x41f   :  { %v12434_v54 = vpop.f32.mrb[5].mxu1 }
 0x420   :  { %2383 = vmatmul.mubr.f32.gmra.mrb[92].mxu0 %v9824_v57 }
 0x421   :  { %2387 = vmatprep.mubr.f32.mxu0 %v18806_v14 }
 0x424   :  { %2388 = vmatmul.mubr.f32.gmra.mrb[94].mxu0 %v9825_v16  ;;  %v18819_v16 = vld [vmem:[#allocation53_spill] sm:$0xff] }
 0x425   :  { %2392 = vmatprep.mubr.f32.mxu0 %v18807_v46  ;;  %v768_v46 = vsel %vm271_vm0, %v766_v17, %v767_v42 }
 0x428   :  { %2393 = vmatmul.mubr.f32.gmra.mrb[96].mxu0 %v9826_v39  ;;  %v769_v39 = vrot.slane %v12344_v12, 1 }
 0x429   :  { %2397 = vmatprep.mubr.f32.mxu0 %v18808_v25 }
 0x42c   :  { %2398 = vmatmul.mubr.f32.gmra.mrb[98].mxu0 %v9827_v35 }
 0x42d   :  { %2402 = vmatprep.mubr.f32.mxu0 %v18809_v7 }
 0x42f   :  { %v12444_v4 = vpop.f32.mrb[6].mxu1 }
 0x430   :  { %2403 = vmatmul.mubr.f32.gmra.mrb[100].mxu0 %v9828_v18  ;;  %v12446_v28 = vpop.f32.mrb[7].mxu1  ;;  %v9838_v18 = vld [vmem:[%s17865_s0 + $0x338] sm:$0xff] }
 0x431   :  { %2407 = vmatprep.mubr.f32.mxu0 %v18810_v58  ;;  %v770_v58 = vsel %vm271_vm0, %v767_v42, %v769_v39  ;;  %v18829_v42 = vld [vmem:[#allocation124_spill] sm:$0xff] }
 0x433   :  { %v12456_v43 = vpop.f32.mrb[8].mxu1 }
 0x434   :  { %2408 = vmatmul.mubr.f32.gmra.mrb[102].mxu0 %v9829_v22  ;;  %v12460_v55 = vpop.f32.mrb[9].mxu1 }
 0x435   :  { %2412 = vmatprep.mubr.f32.mxu0 %v18811_v9 }
 0x437   :  { %v12472_v41 = vpop.f32.mrb[10].mxu1 }
 0x438   :  { %2413 = vmatmul.mubr.f32.gmra.mrb[104].mxu0 %v9830_v59  ;;  %v12476_v6 = vpop.f32.mrb[11].mxu1 }
 0x439   :  { %2417 = vmatprep.mubr.f32.mxu0 %v18812_v21 }
 0x43b   :  { %v12458_v50 = vpop.f32.mrb[0].mxu0  ;;  %v12488_v48 = vpop.f32.mrb[12].mxu1 }
 0x43c   :  { %v2156_v61 = vpop.f32.mrb[1].mxu0  ;;  %2418 = vmatmul.mubr.f32.gmra.mrb[106].mxu0 %v9831_v34  ;;  %v12492_v24 = vpop.f32.mrb[13].mxu1 }
 0x43d   :  { %2422 = vmatprep.mubr.f32.mxu0 %v18813_v15  ;;  %v18820_v61 = vld [vmem:[#allocation115_spill] sm:$0xff] }
 0x43f   :  { %v12466_v63 = vpop.f32.mrb[2].mxu0  ;;  %v12504_v26 = vpop.f32.mrb[14].mxu1 }
 0x440   :  { %v2161_v47 = vpop.f32.mrb[3].mxu0  ;;  %2423 = vmatmul.mubr.f32.gmra.mrb[108].mxu0 %v9832_v37  ;;  %v12508_v36 = vpop.f32.mrb[15].mxu1  ;;  %v18822_v37 = vld [vmem:[#allocation117_spill] sm:$0xff] }
 0x441   :  { %2427 = vmatprep.mubr.f32.mxu0 %v18814_v3  ;;  %v18821_v47 = vld [vmem:[#allocation116_spill] sm:$0xff] }
 0x443   :  { %v12474_v2 = vpop.f32.mrb[4].mxu0  ;;  %v12522_v25 = vpop.f32.mrb[16].mxu1 }
 0x444   :  { %v2166_v10 = vpop.f32.mrb[5].mxu0  ;;  %2428 = vmatmul.mubr.f32.gmra.mrb[110].mxu0 %v9833_v33 }
 0x445   :  { %2432 = vmatprep.mubr.f32.mxu0 %v18815_v27  ;;  %v18823_v27 = vld [vmem:[#allocation118_spill] sm:$0xff] }
 0x447   :  { %v12482_v60 = vpop.f32.mrb[6].mxu0 }
 0x448   :  { %v2171_v45 = vpop.f32.mrb[7].mxu0  ;;  %2433 = vmatmul.mubr.f32.gmra.mrb[112].mxu0 %v9834_v56 }
 0x449   :  { %2437 = vmatprep.mubr.f32.mxu0 %v18816_v0  ;;  %v18824_v45 = vld [vmem:[#allocation119_spill] sm:$0xff]  ;;  %v18825_v0 = vld [vmem:[#allocation120_spill] sm:$0xff] }
 0x44b   :  { %v12490_v51 = vpop.f32.mrb[8].mxu0 }
 0x44c   :  { %v2176_v53 = vpop.f32.mrb[9].mxu0  ;;  %2438 = vmatmul.mubr.f32.gmra.mrb[114].mxu0 %v9835_v20 }
 0x44d   :  { %2442 = vmatprep.mubr.f32.mxu0 %v18817_v29  ;;  %v18826_v53 = vld [vmem:[#allocation121_spill] sm:$0xff] }
 0x44f   :  { %v12498_v44 = vpop.f32.mrb[10].mxu0 }
 0x450   :  { %v2181_v52 = vpop.f32.mrb[11].mxu0  ;;  %2443 = vmatmul.mubr.f32.gmra.mrb[116].mxu0 %v9836_v11 }
 0x451   :  { %2447 = vmatprep.mubr.f32.mxu0 %v18818_v32  ;;  %v18827_v32 = vld [vmem:[#allocation122_spill] sm:$0xff] }
 0x453   :  { %v12506_v40 = vpop.f32.mrb[12].mxu0 }
 0x454   :  { %v2186_v49 = vpop.f32.mrb[13].mxu0  ;;  %2448 = vmatmul.mubr.f32.gmra.mrb[118].mxu0 %v9837_v19 }
 0x455   :  { %2452 = vmatprep.mubr.f32.mxu0 %v12150_v1  ;;  %v12526_v1 = vpop.f32.mrb[17].mxu1  ;;  %v18828_v49 = vld [vmem:[#allocation123_spill] sm:$0xff] }
 0x456   :  { %v12535_v12 = vpop.f32.mrb[18].mxu1 }
 0x457   :  { %v12516_v57 = vpop.f32.mrb[14].mxu0  ;;  %v12539_v59 = vpop.f32.mrb[19].mxu1 }
 0x458   :  { %v2191_v14 = vpop.f32.mrb[15].mxu0  ;;  %2453 = vmatmul.mubr.f32.gmra.mrb[120].mxu0 %v18819_v16 }
 0x459   :  { %2457 = vmatprep.mubr.f32.mxu0 %v12161_v30  ;;  %v18830_v14 = vld [vmem:[#allocation125_spill] sm:$0xff] }
 0x45b   :  { %v12524_v35 = vpop.f32.mrb[16].mxu0 }
 0x45c   :  { %v2196_v7 = vpop.f32.mrb[17].mxu0  ;;  %2458 = vmatmul.mubr.f32.gmra.mrb[122].mxu0 %v9838_v18  ;;  %v18832_v18 = vld [vmem:[#allocation126_spill] sm:$0xff] }
 0x45d   :  { %2462 = vmatprep.mubr.f32.mxu0 %v768_v46 }
 0x45f   :  { %v12532_v30 = vpop.f32.mrb[18].mxu0 }
 0x460   :  { %v2201_v22 = vpop.f32.mrb[19].mxu0  ;;  %2463 = vmatmul.mubr.f32.gmra.mrb[124].mxu0 %v12332_v31  ;;  %v12547_v31 = vpop.f32.mrb[20].mxu1 }
 0x461   :  { %2467 = vmatprep.mubr.f32.mxu0 %v770_v58  ;;  %v12551_v10 = vpop.f32.mrb[21].mxu1  ;;  %v18833_v58 = vld [vmem:[#allocation127_spill] sm:$0xff] }
 0x462   :  { %v12559_v20 = vpop.f32.mrb[22].mxu1 }
 0x463   :  { %v12537_v9 = vpop.f32.mrb[20].mxu0  ;;  %v12563_v52 = vpop.f32.mrb[23].mxu1 }
 0x464   :  { %v2206_v21 = vpop.f32.mrb[21].mxu0  ;;  %2468 = vmatmul.mubr.f32.gmra.mrb[126].mxu0 %v12337_v8  ;;  %v12571_v16 = vpop.f32.mrb[24].mxu1 }
 0x465   :  { %8151 = vmatprep.mubr.f32.mxu0 %v18820_v61  ;;  %v12575_v39 = vpop.f32.mrb[25].mxu1  ;;  %v18834_v61 = vld [vmem:[#allocation128_spill] sm:$0xff] }
 0x467   :  { %v12543_v34 = vpop.f32.mrb[22].mxu0 }
 0x468   :  { %v2211_v15 = vpop.f32.mrb[23].mxu0  ;;  %8152 = vmatmul.mubr.f32.vlgmr.msra.gmra.mrb[128].mxu0 %v18821_v47  ;;  %v12583_v47 = vpop.f32.mrb[26].mxu1 }
 0x469   :  { %8154 = vmatprep.mubr.f32.mxu0 %v18822_v37  ;;  %v18835_v15 = vld [vmem:[#allocation129_spill] sm:$0xff] }
 0x46b   :  { %v12549_v3 = vpop.f32.mrb[24].mxu0 }
 0x46c   :  { %v2216_v33 = vpop.f32.mrb[25].mxu0  ;;  %8155 = vmatmul.mubr.f32.gmra.mrb[130].mxu0 %v18823_v27 }
 0x46d   :  { %8157 = vmatprep.mubr.f32.mxu0 %v18824_v45  ;;  %v12587_v33 = vpop.f32.mrb[27].mxu1  ;;  %v18837_v45 = vld [vmem:[#allocation130_spill] sm:$0xff] }
 0x46f   :  { %v12555_v8 = vpop.f32.mrb[26].mxu0 }
 0x470   :  { %v2221_v56 = vpop.f32.mrb[27].mxu0  ;;  %8158 = vmatmul.mubr.f32.gmra.mrb[132].mxu0 %v18825_v0 }
 0x471   :  { %8160 = vmatprep.mubr.f32.mxu0 %v18826_v53  ;;  %v18838_v56 = vld [vmem:[#allocation131_spill] sm:$0xff] }
 0x473   :  { %v12561_v29 = vpop.f32.mrb[28].mxu0 }
 0x474   :  { %v2226_v11 = vpop.f32.mrb[29].mxu0  ;;  %8161 = vmatmul.mubr.f32.gmra.mrb[134].mxu0 %v18827_v32  ;;  %v18841_v32 = vld [vmem:[#allocation133_spill] sm:$0xff] }
 0x475   :  { %8163 = vmatprep.mubr.f32.mxu0 %v18828_v49  ;;  %v18840_v11 = vld [vmem:[#allocation132_spill] sm:$0xff]  ;;  %v12595_v49 = vpop.f32.mrb[28].mxu1 }
 0x477   :  { %v12567_v19 = vpop.f32.mrb[30].mxu0 }
 0x478   :  { %v2231_v17 = vpop.f32.mrb[31].mxu0  ;;  %8164 = vmatmul.mubr.f32.gmra.mrb[136].mxu0 %v18829_v42  ;;  %v12599_v42 = vpop.f32.mrb[29].mxu1 }
 0x479   :  { %8166 = vmatprep.mubr.f32.mxu0 %v18830_v14 }
 0x47b   :  { %v12573_v46 = vpop.f32.mrb[32].mxu0 }
 0x47c   :  { %18831 = vst [vmem:[#allocation61_spill] sm:$0xff] %v12573_v46  ;;  %v2236_v7 = vpop.f32.mrb[33].mxu0  ;;  %8167 = vmatmul.mubr.f32.gmra.mrb[138].mxu0 %v18832_v18  ;;  %v18844_v18 = vld [vmem:[#allocation135_spill] sm:$0xff] }
 0x47d   :  { %8169 = vmatprep.mubr.f32.mxu0 %v18833_v58  ;;  %v18843_v7 = vld [vmem:[#allocation134_spill] sm:$0xff] }
 0x47f   :  { %v12579_v22 = vpop.f32.mrb[34].mxu0 }
 0x480   :  { %v2241_v21 = vpop.f32.mrb[35].mxu0  ;;  %8170 = vmatmul.mubr.f32.gmra.mrb[140].mxu0 %v18834_v61  ;;  %v18846_v61 = vld [vmem:[#allocation136_spill] sm:$0xff] }
 0x481   :  { %8172 = vmatprep.mubr.f32.mxu0 %v18835_v15  ;;  %v18847_v15 = vld [vmem:[#allocation137_spill] sm:$0xff] }
 0x483   :  { %v12585_v37 = vpop.f32.mrb[36].mxu0 }
 0x484   :  { %18836 = vst [vmem:[#allocation64_spill] sm:$0xff] %v12585_v37  ;;  %v2246_v27 = vpop.f32.mrb[37].mxu0  ;;  %8173 = vmatmul.mubr.f32.gmra.mrb[142].mxu0 %v18837_v45 }
 0x485   :  { %8175 = vmatprep.mubr.f32.mxu0 %v18838_v56  ;;  %v12607_v27 = vpop.f32.mrb[30].mxu1 }
 0x486   :  { %v12611_v56 = vpop.f32.mrb[31].mxu1 }
 0x487   :  { %v12591_v0 = vpop.f32.mrb[38].mxu0 }
 0x488   :  { %18839 = vst [vmem:[#allocation68_spill] sm:$0xff] %v12591_v0  ;;  %v2251_v53 = vpop.f32.mrb[39].mxu0  ;;  %8176 = vmatmul.mubr.f32.gmra.mrb[144].mxu0 %v18840_v11  ;;  %v18849_v11 = vld [vmem:[#allocation138_spill] sm:$0xff] }
 0x489   :  { %8178 = vmatprep.mubr.f32.mxu0 %v18841_v32 }
 0x48b   :  { %v12597_v17 = vpop.f32.mrb[40].mxu0 }
 0x48c   :  { %18842 = vst [vmem:[#allocation66_spill] sm:$0xff] %v12597_v17  ;;  %v2256_v14 = vpop.f32.mrb[41].mxu0  ;;  %8179 = vmatmul.mubr.f32.gmra.mrb[146].mxu0 %v18843_v7  ;;  %v12616_v7 = vpop.f32.mrb[32].mxu1 }
 0x48d   :  { %8181 = vmatprep.mubr.f32.mxu0 %v18844_v18 }
 0x48f   :  { %v12603_v58 = vpop.f32.mrb[42].mxu0 }
 0x490   :  { %18845 = vst [vmem:[#allocation69_spill] sm:$0xff] %v12603_v58  ;;  %v2261_v21 = vpop.f32.mrb[43].mxu0  ;;  %8182 = vmatmul.mubr.f32.gmra.mrb[148].mxu0 %v18846_v61 }
 0x491   :  { %8184 = vmatprep.mubr.f32.mxu0 %v18847_v15  ;;  %v12618_v21 = vpop.f32.mrb[33].mxu1 }
 0x493   :  { %v12609_v45 = vpop.f32.mrb[44].mxu0 }
 0x494   :  { %18848 = vst [vmem:[#allocation73_spill] sm:$0xff] %v12609_v45  ;;  %v2266_v53 = vpop.f32.mrb[45].mxu0  ;;  %8185 = vmatmul.mubr.f32.gmra.mrb[150].mxu0 %v18849_v11 }
 0x495   :  { %v12626_v53 = vpop.f32.mrb[34].mxu1 }
 0x496   :  { %v12628_v37 = vpop.f32.mrb[35].mxu1 }
 0x497   :  { %v12614_v32 = vpop.f32.mrb[46].mxu0 }
 0x498   :  { %18850 = vst [vmem:[#allocation71_spill] sm:$0xff] %v12614_v32  ;;  %v2271_v14 = vpop.f32.mrb[47].mxu0 }
 0x49b   :  { %v2274_v18 = vpop.f32.mrb[48].mxu0 }
 0x49c   :  { %v12621_v61 = vadd.f32 %v12410_v13, %v2274_v18  ;;  %v2276_v15 = vpop.f32.mrb[49].mxu0  ;;  %v12636_v18 = vpop.f32.mrb[36].mxu1 }
 0x49e   :  { %18851 = vst [vmem:[#allocation74_spill] sm:$0xff] %v12621_v61 }
 0x49f   :  { %v2279_v17 = vpop.f32.mrb[50].mxu0 }
 0x4a0   :  { %v12624_v45 = vadd.f32 %v12408_v62, %v2279_v17  ;;  %v2281_v58 = vpop.f32.mrb[51].mxu0  ;;  %v12638_v62 = vpop.f32.mrb[37].mxu1 }
 0x4a2   :  { %18852 = vst [vmem:[#allocation78_spill] sm:$0xff] %v12624_v45 }
 0x4a3   :  { %v2284_v11 = vpop.f32.mrb[52].mxu0 }
 0x4a4   :  { %v12631_v14 = vadd.f32 %v12422_v5, %v2284_v11  ;;  %v2286_v32 = vpop.f32.mrb[53].mxu0 }
 0x4a5   :  { %v12646_v32 = vpop.f32.mrb[38].mxu1 }
 0x4a6   :  { %18853 = vst [vmem:[#allocation76_spill] sm:$0xff] %v12631_v14 }
 0x4a7   :  { %v2289_v0 = vpop.f32.mrb[54].mxu0 }
 0x4a8   :  { %v12634_v46 = vadd.f32 %v12420_v23, %v2289_v0  ;;  %v2291_v13 = vpop.f32.mrb[55].mxu0  ;;  %v12648_v23 = vpop.f32.mrb[39].mxu1 }
 0x4aa   :  { %18854 = vst [vmem:[#allocation79_spill] sm:$0xff] %v12634_v46 }
 0x4ab   :  { %v2294_v15 = vpop.f32.mrb[56].mxu0 }
 0x4ac   :  { %v12641_v17 = vadd.f32 %v12434_v54, %v2294_v15  ;;  %v2296_v58 = vpop.f32.mrb[57].mxu0 }
 0x4ae   :  { %18855 = vst [vmem:[#allocation83_spill] sm:$0xff] %v12641_v17 }
 0x4af   :  { %v2299_v45 = vpop.f32.mrb[58].mxu0 }
 0x4b0   :  { %v12644_v61 = vadd.f32 %v12432_v38, %v2299_v45  ;;  %v2301_v5 = vpop.f32.mrb[59].mxu0 }
 0x4b2   :  { %18856 = vst [vmem:[#allocation81_spill] sm:$0xff] %v12644_v61 }
 0x4b3   :  { %v2304_v11 = vpop.f32.mrb[60].mxu0 }
 0x4b4   :  { %v12651_v0 = vadd.f32 %v12446_v28, %v2304_v11  ;;  %v2306_v13 = vpop.f32.mrb[61].mxu0 }
 0x4b7   :  { %v2309_v46 = vpop.f32.mrb[62].mxu0 }
 0x4b8   :  { %v12654_v14 = vadd.f32 %v12444_v4, %v2309_v46  ;;  %v2311_v54 = vpop.f32.mrb[63].mxu0 }
 0x4bb   :  { %v2314_v15 = vpop.f32.mrb[64].mxu0 }
 0x4bc   :  { %v12657_v58 = vadd.f32 %v12460_v55, %v2314_v15  ;;  %v2316_v38 = vpop.f32.mrb[65].mxu0 }
 0x4bf   :  { %v2319_v45 = vpop.f32.mrb[66].mxu0 }
 0x4c0   :  { %v12660_v5 = vadd.f32 %v12456_v43, %v2319_v45  ;;  %v2321_v61 = vpop.f32.mrb[67].mxu0 }
 0x4c3   :  { %v2324_v17 = vpop.f32.mrb[68].mxu0 }
 0x4c4   :  { %v12663_v28 = vadd.f32 %v12476_v6, %v2324_v17  ;;  %v2326_v11 = vpop.f32.mrb[69].mxu0 }
 0x4c7   :  { %v2329_v13 = vpop.f32.mrb[70].mxu0 }
 0x4c8   :  { %v12666_v4 = vadd.f32 %v12472_v41, %v2329_v13  ;;  %v2331_v46 = vpop.f32.mrb[71].mxu0 }
 0x4cb   :  { %v2334_v54 = vpop.f32.mrb[72].mxu0 }
 0x4cc   :  { %v12669_v55 = vadd.f32 %v12492_v24, %v2334_v54  ;;  %v2336_v15 = vpop.f32.mrb[73].mxu0 }
 0x4cf   :  { %v2339_v38 = vpop.f32.mrb[74].mxu0 }
 0x4d0   :  { %v12672_v43 = vadd.f32 %v12488_v48, %v2339_v38  ;;  %v2341_v61 = vpop.f32.mrb[75].mxu0 }
 0x4d3   :  { %v2344_v45 = vpop.f32.mrb[76].mxu0 }
 0x4d4   :  { %v12675_v6 = vadd.f32 %v12508_v36, %v2344_v45  ;;  %v2346_v17 = vpop.f32.mrb[77].mxu0 }
 0x4d7   :  { %v2349_v11 = vpop.f32.mrb[78].mxu0 }
 0x4d8   :  { %v12678_v41 = vadd.f32 %v12504_v26, %v2349_v11  ;;  %v2351_v13 = vpop.f32.mrb[79].mxu0 }
 0x4db   :  { %v2354_v46 = vpop.f32.mrb[80].mxu0 }
 0x4dc   :  { %v12681_v24 = vadd.f32 %v12526_v1, %v2354_v46  ;;  %v2356_v54 = vpop.f32.mrb[81].mxu0 }
 0x4df   :  { %v2359_v15 = vpop.f32.mrb[82].mxu0 }
 0x4e0   :  { %v12684_v48 = vadd.f32 %v12522_v25, %v2359_v15  ;;  %v2361_v38 = vpop.f32.mrb[83].mxu0 }
 0x4e3   :  { %v2364_v61 = vpop.f32.mrb[84].mxu0 }
 0x4e4   :  { %v12687_v36 = vadd.f32 %v12539_v59, %v2364_v61  ;;  %v2366_v45 = vpop.f32.mrb[85].mxu0 }
 0x4e7   :  { %v2369_v17 = vpop.f32.mrb[86].mxu0 }
 0x4e8   :  { %v12690_v26 = vadd.f32 %v12535_v12, %v2369_v17  ;;  %v2371_v11 = vpop.f32.mrb[87].mxu0 }
 0x4eb   :  { %v2374_v13 = vpop.f32.mrb[88].mxu0 }
 0x4ec   :  { %v12693_v1 = vadd.f32 %v12551_v10, %v2374_v13  ;;  %v2376_v46 = vpop.f32.mrb[89].mxu0 }
 0x4ef   :  { %v2379_v54 = vpop.f32.mrb[90].mxu0 }
 0x4f0   :  { %v12696_v25 = vadd.f32 %v12547_v31, %v2379_v54  ;;  %v2381_v15 = vpop.f32.mrb[91].mxu0 }
 0x4f3   :  { %v2384_v38 = vpop.f32.mrb[92].mxu0 }
 0x4f4   :  { %v12699_v59 = vadd.f32 %v12563_v52, %v2384_v38  ;;  %v2386_v61 = vpop.f32.mrb[93].mxu0 }
 0x4f7   :  { %v2389_v45 = vpop.f32.mrb[94].mxu0 }
 0x4f8   :  { %v12702_v12 = vadd.f32 %v12559_v20, %v2389_v45  ;;  %v2391_v17 = vpop.f32.mrb[95].mxu0 }
 0x4fb   :  { %v2394_v11 = vpop.f32.mrb[96].mxu0 }
 0x4fc   :  { %v12705_v10 = vadd.f32 %v12575_v39, %v2394_v11  ;;  %v2396_v13 = vpop.f32.mrb[97].mxu0 }
 0x4ff   :  { %v2399_v46 = vpop.f32.mrb[98].mxu0 }
 0x500   :  { %v12708_v31 = vadd.f32 %v12571_v16, %v2399_v46  ;;  %v2401_v54 = vpop.f32.mrb[99].mxu0 }
 0x503   :  { %v2404_v15 = vpop.f32.mrb[100].mxu0 }
 0x504   :  { %v12711_v52 = vadd.f32 %v12587_v33, %v2404_v15  ;;  %v2406_v38 = vpop.f32.mrb[101].mxu0 }
 0x507   :  { %v2409_v61 = vpop.f32.mrb[102].mxu0 }
 0x508   :  { %v12714_v20 = vadd.f32 %v12583_v47, %v2409_v61  ;;  %v2411_v45 = vpop.f32.mrb[103].mxu0 }
 0x50b   :  { %v2414_v17 = vpop.f32.mrb[104].mxu0 }
 0x50c   :  { %v12717_v39 = vadd.f32 %v12599_v42, %v2414_v17  ;;  %v2416_v11 = vpop.f32.mrb[105].mxu0 }
 0x50e   :  { %18857 = vst [vmem:[#allocation84_spill] sm:$0xff] %v12717_v39 }
 0x50f   :  { %v2419_v13 = vpop.f32.mrb[106].mxu0 }
 0x510   :  { %v12720_v16 = vadd.f32 %v12595_v49, %v2419_v13  ;;  %v2421_v46 = vpop.f32.mrb[107].mxu0 }
 0x513   :  { %v2424_v54 = vpop.f32.mrb[108].mxu0 }
 0x514   :  { %v12723_v33 = vadd.f32 %v12611_v56, %v2424_v54  ;;  %v2426_v15 = vpop.f32.mrb[109].mxu0 }
 0x517   :  { %v2429_v38 = vpop.f32.mrb[110].mxu0 }
 0x518   :  { %v12726_v47 = vadd.f32 %v12607_v27, %v2429_v38  ;;  %v2431_v61 = vpop.f32.mrb[111].mxu0 }
 0x51b   :  { %v2434_v45 = vpop.f32.mrb[112].mxu0 }
 0x51c   :  { %v12729_v42 = vadd.f32 %v12618_v21, %v2434_v45  ;;  %v2436_v17 = vpop.f32.mrb[113].mxu0 }
 0x51f   :  { %v2439_v11 = vpop.f32.mrb[114].mxu0 }
 0x520   :  { %v12732_v49 = vadd.f32 %v12616_v7, %v2439_v11  ;;  %v2441_v13 = vpop.f32.mrb[115].mxu0 }
 0x522   :  { %18858 = vst [vmem:[#allocation88_spill] sm:$0xff] %v12732_v49 }
 0x523   :  { %v2444_v46 = vpop.f32.mrb[116].mxu0 }
 0x524   :  { %v12735_v56 = vadd.f32 %v12628_v37, %v2444_v46  ;;  %v2446_v54 = vpop.f32.mrb[117].mxu0 }
 0x527   :  { %v2449_v15 = vpop.f32.mrb[118].mxu0 }
 0x528   :  { %v12738_v27 = vadd.f32 %v12626_v53, %v2449_v15  ;;  %v2451_v38 = vpop.f32.mrb[119].mxu0 }
 0x52b   :  { %v2454_v61 = vpop.f32.mrb[120].mxu0 }
 0x52c   :  { %v12741_v21 = vadd.f32 %v12638_v62, %v2454_v61  ;;  %v2456_v45 = vpop.f32.mrb[121].mxu0 }
 0x52e   :  { %18859 = vst [vmem:[#allocation86_spill] sm:$0xff] %v12741_v21 }
 0x52f   :  { %v2459_v17 = vpop.f32.mrb[122].mxu0 }
 0x530   :  { %v12744_v7 = vadd.f32 %v12636_v18, %v2459_v17  ;;  %v2461_v11 = vpop.f32.mrb[123].mxu0 }
 0x532   :  { %18860 = vst [vmem:[#allocation89_spill] sm:$0xff] %v12744_v7 }
 0x533   :  { %v2464_v13 = vpop.f32.mrb[124].mxu0 }
 0x534   :  { %v12747_v37 = vadd.f32 %v12648_v23, %v2464_v13  ;;  %v2466_v46 = vpop.f32.mrb[125].mxu0 }
 0x536   :  { %18861 = vst [vmem:[#allocation93_spill] sm:$0xff] %v12747_v37 }
 0x537   :  { %v2469_v54 = vpop.f32.mrb[126].mxu0 }
 0x538   :  { %v12750_v53 = vadd.f32 %v12646_v32, %v2469_v54  ;;  %v2471_v15 = vpop.f32.mrb[127].mxu0 }
 0x53a   :  { %18862 = vst [vmem:[#allocation91_spill] sm:$0xff] %v12750_v53 }
 0x53b   :  { %v8153_v38 = vpop.f32.mrb[128].mxu0 }
 0x53c   :  { %v12753_v62 = vadd.f32 %v8153_v38, %v12466_v63  ;;  %v2539_v61 = vpop.f32.mrb[129].mxu0 }
 0x53d   :  { %v12756_v45 = vadd.f32 %v2539_v61, %v12458_v50 }
 0x53e   :  { %18863 = vst [vmem:[#allocation94_spill] sm:$0xff] %v12753_v62  ;;  %v2930_v18 = vmul.f32 %v12753_v62, %v12753_v62 }
 0x53f   :  { %v2929_v23 = vmul.f32 %v12756_v45, %v12756_v45  ;;  %v8156_v17 = vpop.f32.mrb[130].mxu0  ;;  %v2860_v13 = vadd.f32 %v12753_v62, %v12756_v45 }
 0x540   :  { %v12763_v11 = vadd.f32 %v8156_v17, %v12482_v60  ;;  %v2549_v32 = vpop.f32.mrb[131].mxu0 }
 0x541   :  { %v12768_v63 = vadd.f32 %v2549_v32, %v12474_v2  ;;  %v2993_v46 = vadd.f32 %v2930_v18, %v2929_v23 }
 0x542   :  { %v2932_v60 = vmul.f32 %v12763_v11, %v12763_v11 }
 0x543   :  { %18864 = vst [vmem:[#allocation98_spill] sm:$0xff] %v12768_v63  ;;  %v2861_v50 = vadd.f32 %v2860_v13, %v12768_v63  ;;  %v2931_v54 = vmul.f32 %v12768_v63, %v12768_v63  ;;  %v8159_v15 = vpop.f32.mrb[132].mxu0 }
 0x544   :  { %v12774_v38 = vadd.f32 %v8159_v15, %v12498_v44  ;;  %v2559_v61 = vpop.f32.mrb[133].mxu0 }
 0x545   :  { %v2994_v17 = vadd.f32 %v2993_v46, %v2931_v54  ;;  %v12779_v62 = vadd.f32 %v2559_v61, %v12490_v51  ;;  %v2862_v2 = vadd.f32 %v2861_v50, %v12763_v11 }
 0x546   :  { %v2934_v63 = vmul.f32 %v12774_v38, %v12774_v38 }
 0x547   :  { %v2863_v18 = vadd.f32 %v2862_v2, %v12779_v62  ;;  %v2933_v23 = vmul.f32 %v12779_v62, %v12779_v62  ;;  %v2995_v32 = vadd.f32 %v2994_v17, %v2932_v60  ;;  %v8162_v13 = vpop.f32.mrb[134].mxu0 }
 0x548   :  { %v12786_v44 = vadd.f32 %v8162_v13, %v12516_v57  ;;  %v2569_v15 = vpop.f32.mrb[135].mxu0 }
 0x549   :  { %v2996_v46 = vadd.f32 %v2995_v32, %v2933_v23  ;;  %v12791_v51 = vadd.f32 %v2569_v15, %v12506_v40  ;;  %v2864_v50 = vadd.f32 %v2863_v18, %v12774_v38 }
 0x54a   :  { %v2936_v13 = vmul.f32 %v12786_v44, %v12786_v44 }
 0x54b   :  { %v2865_v54 = vadd.f32 %v2864_v50, %v12791_v51  ;;  %v2935_v61 = vmul.f32 %v12791_v51, %v12791_v51  ;;  %v2997_v60 = vadd.f32 %v2996_v46, %v2934_v63  ;;  %v8165_v17 = vpop.f32.mrb[136].mxu0 }
 0x54c   :  { %v12798_v57 = vadd.f32 %v8165_v17, %v12532_v30  ;;  %v2579_v2 = vpop.f32.mrb[137].mxu0 }
 0x54d   :  { %v2998_v23 = vadd.f32 %v2997_v60, %v2935_v61  ;;  %v12803_v40 = vadd.f32 %v2579_v2, %v12524_v35  ;;  %v2866_v18 = vadd.f32 %v2865_v54, %v12786_v44 }
 0x54e   :  { %v2938_v17 = vmul.f32 %v12798_v57, %v12798_v57 }
 0x54f   :  { %v2867_v32 = vadd.f32 %v2866_v18, %v12803_v40  ;;  %v2937_v15 = vmul.f32 %v12803_v40, %v12803_v40  ;;  %v2999_v63 = vadd.f32 %v2998_v23, %v2936_v13  ;;  %v8168_v46 = vpop.f32.mrb[138].mxu0 }
 0x550   :  { %v12810_v30 = vadd.f32 %v8168_v46, %v12543_v34  ;;  %v2589_v50 = vpop.f32.mrb[139].mxu0 }
 0x551   :  { %v3000_v61 = vadd.f32 %v2999_v63, %v2937_v15  ;;  %v12815_v35 = vadd.f32 %v2589_v50, %v12537_v9  ;;  %v2868_v54 = vadd.f32 %v2867_v32, %v12798_v57 }
 0x552   :  { %18865 = vst [vmem:[#allocation96_spill] sm:$0xff] %v12810_v30  ;;  %v2940_v46 = vmul.f32 %v12810_v30, %v12810_v30 }
 0x553   :  { %18866 = vst [vmem:[#allocation99_spill] sm:$0xff] %v12815_v35  ;;  %v2869_v60 = vadd.f32 %v2868_v54, %v12815_v35  ;;  %v2939_v2 = vmul.f32 %v12815_v35, %v12815_v35  ;;  %v3001_v13 = vadd.f32 %v3000_v61, %v2938_v17  ;;  %v8171_v23 = vpop.f32.mrb[140].mxu0 }
 0x554   :  { %v12822_v34 = vadd.f32 %v8171_v23, %v12555_v8  ;;  %v2599_v18 = vpop.f32.mrb[141].mxu0 }
 0x555   :  { %v3002_v15 = vadd.f32 %v3001_v13, %v2939_v2  ;;  %v12827_v9 = vadd.f32 %v2599_v18, %v12549_v3  ;;  %v2870_v32 = vadd.f32 %v2869_v60, %v12810_v30 }
 0x556   :  { %18867 = vst [vmem:[#allocation103_spill] sm:$0xff] %v12822_v34  ;;  %v2942_v23 = vmul.f32 %v12822_v34, %v12822_v34 }
 0x557   :  { %18868 = vst [vmem:[#allocation101_spill] sm:$0xff] %v12827_v9  ;;  %v2871_v63 = vadd.f32 %v2870_v32, %v12827_v9  ;;  %v2941_v50 = vmul.f32 %v12827_v9, %v12827_v9  ;;  %v3003_v17 = vadd.f32 %v3002_v15, %v2940_v46  ;;  %v8174_v61 = vpop.f32.mrb[142].mxu0 }
 0x558   :  { %v12834_v8 = vadd.f32 %v8174_v61, %v12567_v19  ;;  %v2609_v54 = vpop.f32.mrb[143].mxu0 }
 0x559   :  { %v3004_v2 = vadd.f32 %v3003_v17, %v2941_v50  ;;  %v12839_v3 = vadd.f32 %v2609_v54, %v12561_v29  ;;  %v2872_v60 = vadd.f32 %v2871_v63, %v12822_v34  ;;  %v18872_v17 = vld [vmem:[#allocation61_spill] sm:$0xff] }
 0x55a   :  { %18869 = vst [vmem:[#allocation104_spill] sm:$0xff] %v12834_v8  ;;  %v2944_v61 = vmul.f32 %v12834_v8, %v12834_v8 }
 0x55b   :  { %18870 = vst [vmem:[#allocation106_spill] sm:$0xff] %v12839_v3  ;;  %v2873_v13 = vadd.f32 %v2872_v60, %v12839_v3  ;;  %v2943_v18 = vmul.f32 %v12839_v3, %v12839_v3  ;;  %v3005_v46 = vadd.f32 %v3004_v2, %v2942_v23  ;;  %v8177_v15 = vpop.f32.mrb[144].mxu0  ;;  %v18874_v3 = vld [vmem:[#allocation68_spill] sm:$0xff] }
 0x55c   :  { %v12846_v19 = vadd.f32 %v8177_v15, %v12579_v22  ;;  %v2619_v32 = vpop.f32.mrb[145].mxu0 }
 0x55d   :  { %v3006_v50 = vadd.f32 %v3005_v46, %v2943_v18  ;;  %v12851_v29 = vadd.f32 %v2619_v32, %v18872_v17  ;;  %v2874_v63 = vadd.f32 %v2873_v13, %v12834_v8  ;;  %v18876_v46 = vld [vmem:[#allocation64_spill] sm:$0xff] }
 0x55e   :  { %18871 = vst [vmem:[#allocation109_spill] sm:$0xff] %v12846_v19  ;;  %v2946_v34 = vmul.f32 %v12846_v19, %v12846_v19 }
 0x55f   :  { %18873 = vst [vmem:[#allocation112_spill] sm:$0xff] %v12851_v29  ;;  %v2875_v54 = vadd.f32 %v2874_v63, %v12851_v29  ;;  %v2945_v60 = vmul.f32 %v12851_v29, %v12851_v29  ;;  %v3007_v23 = vadd.f32 %v3006_v50, %v2944_v61  ;;  %v8180_v2 = vpop.f32.mrb[146].mxu0  ;;  %v18878_v29 = vld [vmem:[#allocation69_spill] sm:$0xff] }
 0x560   :  { %v12858_v22 = vadd.f32 %v8180_v2, %v18874_v3  ;;  %v2629_v15 = vpop.f32.mrb[147].mxu0 }
 0x561   :  { %v3008_v18 = vadd.f32 %v3007_v23, %v2945_v60  ;;  %v12863_v32 = vadd.f32 %v2629_v15, %v18876_v46  ;;  %v2876_v13 = vadd.f32 %v2875_v54, %v12846_v19  ;;  %v18880_v23 = vld [vmem:[#allocation66_spill] sm:$0xff] }
 0x562   :  { %18875 = vst [vmem:[#allocation12_spill] sm:$0xff] %v12858_v22  ;;  %v2948_v8 = vmul.f32 %v12858_v22, %v12858_v22 }
 0x563   :  { %18877 = vst [vmem:[#allocation13_spill] sm:$0xff] %v12863_v32  ;;  %v2877_v17 = vadd.f32 %v2876_v13, %v12863_v32  ;;  %v2947_v63 = vmul.f32 %v12863_v32, %v12863_v32  ;;  %v3009_v61 = vadd.f32 %v3008_v18, %v2946_v34  ;;  %v8183_v50 = vpop.f32.mrb[148].mxu0  ;;  %v18882_v32 = vld [vmem:[#allocation71_spill] sm:$0xff] }
 0x564   :  { %v12870_v3 = vadd.f32 %v8183_v50, %v18878_v29  ;;  %v2639_v2 = vpop.f32.mrb[149].mxu0 }
 0x565   :  { %v3010_v60 = vadd.f32 %v3009_v61, %v2947_v63  ;;  %v12875_v15 = vadd.f32 %v2639_v2, %v18880_v23  ;;  %v2878_v54 = vadd.f32 %v2877_v17, %v12858_v22  ;;  %v18883_v61 = vld [vmem:[#allocation73_spill] sm:$0xff]  ;;  %v18886_v22 = vld [vmem:[#allocation76_spill] sm:$0xff] }
 0x566   :  { %18879 = vst [vmem:[#allocation14_spill] sm:$0xff] %v12870_v3  ;;  %v2950_v19 = vmul.f32 %v12870_v3, %v12870_v3 }
 0x567   :  { %18881 = vst [vmem:[#allocation15_spill] sm:$0xff] %v12875_v15  ;;  %v2879_v46 = vadd.f32 %v2878_v54, %v12875_v15  ;;  %v2949_v13 = vmul.f32 %v12875_v15, %v12875_v15  ;;  %v3011_v34 = vadd.f32 %v3010_v60, %v2948_v8  ;;  %v8186_v18 = vpop.f32.mrb[150].mxu0  ;;  %v18884_v15 = vld [vmem:[#allocation74_spill] sm:$0xff] }
 0x568   :  { %v12882_v29 = vadd.f32 %v8186_v18, %v18882_v32  ;;  %v2649_v50 = vpop.f32.mrb[151].mxu0 }
 0x569   :  { %v3012_v63 = vadd.f32 %v3011_v34, %v2949_v13  ;;  %v12887_v2 = vadd.f32 %v2649_v50, %v18883_v61  ;;  %v2880_v17 = vadd.f32 %v2879_v46, %v12870_v3  ;;  %v2953_v13 = vmul.f32 %v18884_v15, %v18884_v15  ;;  %v18885_v61 = vld [vmem:[#allocation78_spill] sm:$0xff] }
 0x56a   :  { %v2952_v32 = vmul.f32 %v12882_v29, %v12882_v29  ;;  %v2954_v46 = vmul.f32 %v18885_v61, %v18885_v61 }
 0x56b   :  { %v2881_v23 = vadd.f32 %v2880_v17, %v12887_v2  ;;  %v2951_v54 = vmul.f32 %v12887_v2, %v12887_v2  ;;  %v3013_v8 = vadd.f32 %v3012_v63, %v2950_v19  ;;  %v2955_v19 = vmul.f32 %v18886_v22, %v18886_v22 }
 0x56d   :  { %v2882_v60 = vadd.f32 %v2881_v23, %v12882_v29  ;;  %v3014_v18 = vadd.f32 %v3013_v8, %v2951_v54  ;;  %v18887_v23 = vld [vmem:[#allocation79_spill] sm:$0xff] }
 0x56e   :  { %v2956_v54 = vmul.f32 %v18887_v23, %v18887_v23 }
 0x56f   :  { %v2883_v34 = vadd.f32 %v2882_v60, %v18884_v15  ;;  %v3015_v50 = vadd.f32 %v3014_v18, %v2952_v32  ;;  %v18888_v60 = vld [vmem:[#allocation83_spill] sm:$0xff] }
 0x570   :  { %v2957_v32 = vmul.f32 %v18888_v60, %v18888_v60 }
 0x571   :  { %v2884_v17 = vadd.f32 %v2883_v34, %v18885_v61  ;;  %v3016_v3 = vadd.f32 %v3015_v50, %v2953_v13  ;;  %v4427_v34 = vld [vmem:[#allocation6] sm:$0xff]  ;;  %v4428_v13 = vld [vmem:[#allocation6 + $0x8] sm:$0xff] }
 0x572   :  { %v8728_v50 = vpack.c.bf16 %v4428_v13, %v4427_v34  ;;  %v18889_v61 = vld [vmem:[#allocation81_spill] sm:$0xff]  ;;  %v2960_v34 = vmul.f32 %v12654_v14, %v12654_v14 }
 0x573   :  { %v2885_v63 = vadd.f32 %v2884_v17, %v18886_v22  ;;  %v3017_v9 = vadd.f32 %v3016_v3, %v2954_v46  ;;  %v2958_v35 = vmul.f32 %v18889_v61, %v18889_v61  ;;  %v2959_v17 = vmul.f32 %v12651_v0, %v12651_v0 }
 0x574   :  { %8729 = vmatpush1.bf16.msra.mxu1 %v8728_v50  ;;  %v4432_v50 = vld [vmem:[#allocation6 + $0x28] sm:$0xff] }
 0x575   :  { %v2886_v8 = vadd.f32 %v2885_v63, %v18887_v23  ;;  %v3018_v30 = vadd.f32 %v3017_v9, %v2955_v19  ;;  %v18890_v63 = vmov 0.0|0.0  }
 0x576   :  { %8730 = vmatprep.subr.bf16.mxu1 %v18890_v63 }
 0x577   :  { %v2887_v18 = vadd.f32 %v2886_v8, %v18888_v60  ;;  %v3019_v15 = vadd.f32 %v3018_v30, %v2956_v54  ;;  %v4429_v8 = vld [vmem:[#allocation6 + $0x10] sm:$0xff]  ;;  %v4430_v30 = vld [vmem:[#allocation6 + $0x18] sm:$0xff] }
 0x578   :  { %v8731_v54 = vpack.c.bf16 %v4430_v30, %v4429_v8 }
 0x579   :  { %v2888_v3 = vadd.f32 %v2887_v18, %v18889_v61  ;;  %v3020_v46 = vadd.f32 %v3019_v15, %v2957_v32  ;;  %v2961_v15 = vmul.f32 %v12657_v58, %v12657_v58 }
 0x57a   :  { %8732 = vmatpush1.bf16.msra.mxu1 %v8731_v54  ;;  %v4434_v54 = vld [vmem:[#allocation6 + $0x38] sm:$0xff] }
 0x57b   :  { %v2889_v9 = vadd.f32 %v2888_v3, %v12651_v0  ;;  %v3021_v19 = vadd.f32 %v3020_v46, %v2958_v35  ;;  %8733 = vmatprep.subr.bf16.mxu1 %v18890_v63  ;;  %v4431_v35 = vld [vmem:[#allocation6 + $0x20] sm:$0xff]  ;;  %v2962_v46 = vmul.f32 %v12660_v5, %v12660_v5 }
 0x57c   :  { %v8734_v3 = vpack.c.bf16 %v4432_v50, %v4431_v35 }
 0x57d   :  { %v2890_v13 = vadd.f32 %v2889_v9, %v12654_v14  ;;  %v3022_v60 = vadd.f32 %v3021_v19, %v2959_v17  ;;  %v2963_v17 = vmul.f32 %v12663_v28, %v12663_v28 }
 0x57e   :  { %8735 = vmatpush1.bf16.msra.mxu1 %v8734_v3  ;;  %v4435_v3 = vld [vmem:[#allocation6 + $0x40] sm:$0xff] }
 0x57f   :  { %v2891_v32 = vadd.f32 %v2890_v13, %v12657_v58  ;;  %v3023_v18 = vadd.f32 %v3022_v60, %v2960_v34  ;;  %8736 = vmatprep.subr.bf16.mxu1 %v18890_v63  ;;  %v4433_v60 = vld [vmem:[#allocation6 + $0x30] sm:$0xff]  ;;  %v2964_v13 = vmul.f32 %v12666_v4, %v12666_v4 }
 0x580   :  { %v8737_v34 = vpack.c.bf16 %v4434_v54, %v4433_v60 }
 0x581   :  { %v2892_v8 = vadd.f32 %v2891_v32, %v12660_v5  ;;  %v3024_v30 = vadd.f32 %v3023_v18, %v2961_v15  ;;  %v2965_v15 = vmul.f32 %v12669_v55, %v12669_v55 }
 0x582   :  { %8738 = vmatpush1.bf16.msra.mxu1 %v8737_v34  ;;  %v4437_v34 = vld [vmem:[#allocation6 + $0x50] sm:$0xff] }
 0x583   :  { %v2893_v9 = vadd.f32 %v2892_v8, %v12663_v28  ;;  %v3025_v19 = vadd.f32 %v3024_v30, %v2962_v46  ;;  %8739 = vmatprep.subr.bf16.mxu1 %v18890_v63  ;;  %v4436_v46 = vld [vmem:[#allocation6 + $0x48] sm:$0xff]  ;;  %v2966_v30 = vmul.f32 %v12672_v43, %v12672_v43 }
 0x584   :  { %v8740_v8 = vpack.c.bf16 %v4436_v46, %v4435_v3 }
 0x585   :  { %v2894_v35 = vadd.f32 %v2893_v9, %v12666_v4  ;;  %v3026_v50 = vadd.f32 %v3025_v19, %v2963_v17  ;;  %v2967_v17 = vmul.f32 %v12675_v6, %v12675_v6 }
 0x586   :  { %8741 = vmatpush1.bf16.msra.mxu1 %v8740_v8  ;;  %v4439_v8 = vld [vmem:[#allocation6 + $0x60] sm:$0xff] }
 0x587   :  { %v2895_v32 = vadd.f32 %v2894_v35, %v12669_v55  ;;  %v3027_v18 = vadd.f32 %v3026_v50, %v2964_v13  ;;  %8742 = vmatprep.subr.bf16.mxu1 %v18890_v63  ;;  %v4438_v13 = vld [vmem:[#allocation6 + $0x58] sm:$0xff]  ;;  %v2968_v50 = vmul.f32 %v12678_v41, %v12678_v41 }
 0x588   :  { %v8743_v35 = vpack.c.bf16 %v4438_v13, %v4437_v34 }
 0x589   :  { %v2896_v60 = vadd.f32 %v2895_v32, %v12672_v43  ;;  %v3028_v54 = vadd.f32 %v3027_v18, %v2965_v15  ;;  %v2969_v15 = vmul.f32 %v12681_v24, %v12681_v24 }
 0x58a   :  { %8744 = vmatpush1.bf16.msra.mxu1 %v8743_v35  ;;  %v4441_v35 = vld [vmem:[#allocation6 + $0x70] sm:$0xff] }
 0x58b   :  { %v2897_v9 = vadd.f32 %v2896_v60, %v12675_v6  ;;  %v3029_v19 = vadd.f32 %v3028_v54, %v2966_v30  ;;  %8745 = vmatprep.subr.bf16.mxu1 %v18890_v63  ;;  %v4440_v30 = vld [vmem:[#allocation6 + $0x68] sm:$0xff]  ;;  %v2970_v54 = vmul.f32 %v12684_v48, %v12684_v48 }
 0x58c   :  { %v8746_v60 = vpack.c.bf16 %v4440_v30, %v4439_v8 }
 0x58d   :  { %v2898_v3 = vadd.f32 %v2897_v9, %v12678_v41  ;;  %v3030_v46 = vadd.f32 %v3029_v19, %v2967_v17  ;;  %v2971_v17 = vmul.f32 %v12687_v36, %v12687_v36 }
 0x58e   :  { %8747 = vmatpush1.bf16.msra.mxu1 %v8746_v60  ;;  %v4443_v60 = vld [vmem:[#allocation6 + $0x80] sm:$0xff] }
 0x58f   :  { %v2899_v32 = vadd.f32 %v2898_v3, %v12681_v24  ;;  %v3031_v18 = vadd.f32 %v3030_v46, %v2968_v50  ;;  %8748 = vmatprep.subr.bf16.mxu1 %v18890_v63  ;;  %v4442_v50 = vld [vmem:[#allocation6 + $0x78] sm:$0xff]  ;;  %v2972_v46 = vmul.f32 %v12690_v26, %v12690_v26 }
 0x590   :  { %v8749_v3 = vpack.c.bf16 %v4442_v50, %v4441_v35 }
 0x591   :  { %v2900_v34 = vadd.f32 %v2899_v32, %v12684_v48  ;;  %v3032_v13 = vadd.f32 %v3031_v18, %v2969_v15  ;;  %v2973_v15 = vmul.f32 %v12693_v1, %v12693_v1 }
 0x592   :  { %8750 = vmatpush1.bf16.msra.mxu1 %v8749_v3  ;;  %v4445_v3 = vld [vmem:[#allocation6 + $0x90] sm:$0xff] }
 0x593   :  { %v2901_v9 = vadd.f32 %v2900_v34, %v12687_v36  ;;  %v3033_v19 = vadd.f32 %v3032_v13, %v2970_v54  ;;  %8751 = vmatprep.subr.bf16.mxu1 %v18890_v63  ;;  %v4444_v54 = vld [vmem:[#allocation6 + $0x88] sm:$0xff]  ;;  %v2974_v13 = vmul.f32 %v12696_v25, %v12696_v25 }
 0x594   :  { %v8752_v34 = vpack.c.bf16 %v4444_v54, %v4443_v60 }
 0x595   :  { %v2902_v8 = vadd.f32 %v2901_v9, %v12690_v26  ;;  %v3034_v30 = vadd.f32 %v3033_v19, %v2971_v17  ;;  %v2975_v17 = vmul.f32 %v12699_v59, %v12699_v59 }
 0x596   :  { %8753 = vmatpush1.bf16.msra.mxu1 %v8752_v34  ;;  %v4447_v34 = vld [vmem:[#allocation6 + $0xa0] sm:$0xff] }
 0x597   :  { %v2903_v32 = vadd.f32 %v2902_v8, %v12693_v1  ;;  %v3035_v18 = vadd.f32 %v3034_v30, %v2972_v46  ;;  %8754 = vmatprep.subr.bf16.mxu1 %v18890_v63  ;;  %v4446_v46 = vld [vmem:[#allocation6 + $0x98] sm:$0xff]  ;;  %v2976_v30 = vmul.f32 %v12702_v12, %v12702_v12 }
 0x598   :  { %v8755_v8 = vpack.c.bf16 %v4446_v46, %v4445_v3 }
 0x599   :  { %v2904_v35 = vadd.f32 %v2903_v32, %v12696_v25  ;;  %v3036_v50 = vadd.f32 %v3035_v18, %v2973_v15  ;;  %v2977_v15 = vmul.f32 %v12705_v10, %v12705_v10 }
 0x59a   :  { %8756 = vmatpush1.bf16.msra.mxu1 %v8755_v8  ;;  %v4449_v8 = vld [vmem:[#allocation6 + $0xb0] sm:$0xff] }
 0x59b   :  { %v2905_v9 = vadd.f32 %v2904_v35, %v12699_v59  ;;  %v3037_v19 = vadd.f32 %v3036_v50, %v2974_v13  ;;  %8757 = vmatprep.subr.bf16.mxu1 %v18890_v63  ;;  %v4448_v13 = vld [vmem:[#allocation6 + $0xa8] sm:$0xff]  ;;  %v2978_v50 = vmul.f32 %v12708_v31, %v12708_v31 }
 0x59c   :  { %v8758_v35 = vpack.c.bf16 %v4448_v13, %v4447_v34 }
 0x59d   :  { %v2906_v60 = vadd.f32 %v2905_v9, %v12702_v12  ;;  %v3038_v54 = vadd.f32 %v3037_v19, %v2975_v17  ;;  %v2979_v17 = vmul.f32 %v12711_v52, %v12711_v52 }
 0x59e   :  { %8759 = vmatpush1.bf16.msra.mxu1 %v8758_v35  ;;  %v2981_v35 = vmul.f32 %v12717_v39, %v12717_v39 }
 0x59f   :  { %v2907_v32 = vadd.f32 %v2906_v60, %v12705_v10  ;;  %v3039_v18 = vadd.f32 %v3038_v54, %v2976_v30  ;;  %8760 = vmatprep.subr.bf16.mxu1 %v18890_v63  ;;  %v4450_v30 = vld [vmem:[#allocation6 + $0xb8] sm:$0xff]  ;;  %v2980_v54 = vmul.f32 %v12714_v20, %v12714_v20 }
 0x5a0   :  { %v8761_v60 = vpack.c.bf16 %v4450_v30, %v4449_v8  ;;  %v4452_v8 = vld [vmem:[#allocation6 + $0xc8] sm:$0xff] }
 0x5a1   :  { %v2908_v3 = vadd.f32 %v2907_v32, %v12708_v31  ;;  %v3040_v46 = vadd.f32 %v3039_v18, %v2977_v15  ;;  %v4555_v32 = vld [vmem:[#allocation6 + $0x400] sm:$0xff]  ;;  %v4556_v15 = vld [vmem:[#allocation6 + $0x408] sm:$0xff] }
 0x5a2   :  { %8762 = vmatpush1.bf16.msra.mxu1 %v8761_v60  ;;  %v8919_v18 = vpack.c.bf16 %v4556_v15, %v4555_v32  ;;  %v4557_v60 = vld [vmem:[#allocation6 + $0x410] sm:$0xff]  ;;  %v4558_v32 = vld [vmem:[#allocation6 + $0x418] sm:$0xff] }
 0x5a3   :  { %v2909_v9 = vadd.f32 %v2908_v3, %v12711_v52  ;;  %v3041_v19 = vadd.f32 %v3040_v46, %v2978_v50  ;;  %8763 = vmatprep.subr.bf16.mxu1 %v18890_v63  ;;  %v4451_v46 = vld [vmem:[#allocation6 + $0xc0] sm:$0xff]  ;;  %v8923_v15 = vpack.c.bf16 %v4558_v32, %v4557_v60 }
 0x5a4   :  { %8920 = vmatprep.subr.bf16.mxu0 %v8919_v18  ;;  %v8764_v30 = vpack.c.bf16 %v4452_v8, %v4451_v46  ;;  %v4453_v46 = vld [vmem:[#allocation6 + $0xd0] sm:$0xff]  ;;  %v4454_v8 = vld [vmem:[#allocation6 + $0xd8] sm:$0xff]  ;;  %v4455_v32 = vld [vmem:[#allocation6 + $0xe0] sm:$0xff] }
 0x5a5   :  { %v2910_v34 = vadd.f32 %v2909_v9, %v12714_v20  ;;  %v3042_v13 = vadd.f32 %v3041_v19, %v2979_v17  ;;  %v2982_v9 = vmul.f32 %v12720_v16, %v12720_v16  ;;  %8922 = vmatpush3.bf16.msra.mxu0 %v8919_v18 }
 0x5a6   :  { %8765 = vmatpush1.bf16.msra.mxu1 %v8764_v30  ;;  %8924 = vmatprep.subr.bf16.mxu0 %v8923_v15  ;;  %v4560_v30 = vld [vmem:[#allocation6 + $0x428] sm:$0xff] }
 0x5a7   :  { %v2911_v50 = vadd.f32 %v2910_v34, %v12717_v39  ;;  %v3043_v3 = vadd.f32 %v3042_v13, %v2980_v54  ;;  %v2983_v54 = vmul.f32 %v12723_v33, %v12723_v33  ;;  %8766 = vmatprep.subr.bf16.mxu1 %v18890_v63  ;;  %v8767_v39 = vpack.c.bf16 %v4454_v8, %v4453_v46  ;;  %v4456_v46 = vld [vmem:[#allocation6 + $0xe8] sm:$0xff] }
 0x5a8   :  { %v8770_v8 = vpack.c.bf16 %v4456_v46, %v4455_v32 }
 0x5a9   :  { %v2912_v17 = vadd.f32 %v2911_v50, %v12720_v16  ;;  %v3044_v19 = vadd.f32 %v3043_v3, %v2981_v35  ;;  %v2984_v35 = vmul.f32 %v12726_v47, %v12726_v47  ;;  %8926 = vmatpush3.bf16.msra.mxu0 %v8923_v15  ;;  %v4559_v3 = vld [vmem:[#allocation6 + $0x420] sm:$0xff] }
 0x5aa   :  { %v8927_v60 = vpack.c.bf16 %v4560_v30, %v4559_v3  ;;  %8768 = vmatpush1.bf16.msra.mxu1 %v8767_v39  ;;  %v4561_v39 = vld [vmem:[#allocation6 + $0x430] sm:$0xff]  ;;  %v10026_v3 = vmov 0.0  }
 0x5ab   :  { %v2913_v34 = vadd.f32 %v2912_v17, %v12723_v33  ;;  %v3045_v13 = vadd.f32 %v3044_v19, %v2982_v9  ;;  %v2985_v9 = vmul.f32 %v12729_v42, %v12729_v42  ;;  %8769 = vmatprep.subr.bf16.mxu1 %v18890_v63  ;;  %3597 = vst [vmem:[#allocation2] sm:$0xff] %v10026_v3  ;;  %3599 = vst [vmem:[#allocation2 + $0x10] sm:$0x3] %v10026_v3 }
 0x5ac   :  { %8928 = vmatprep.subr.bf16.mxu0 %v8927_v60  ;;  %3602 = vst [vmem:[#allocation2 + $0x1c0] sm:$0x3] %v10026_v3  ;;  %3606 = vst [vmem:[#allocation2 + $0x1a8] sm:$0x3] %v10026_v3 }
 0x5ad   :  { %v2914_v18 = vadd.f32 %v2913_v34, %v12726_v47  ;;  %v3046_v50 = vadd.f32 %v3045_v13, %v2983_v54  ;;  %v2986_v54 = vmul.f32 %v12732_v49, %v12732_v49  ;;  %8930 = vmatpush3.bf16.msra.mxu0 %v8927_v60  ;;  %v4562_v13 = vld [vmem:[#allocation6 + $0x438] sm:$0xff]  ;;  %3609 = vst [vmem:[#allocation2 + $0x358] sm:$0x3] %v10026_v3 }
 0x5ae   :  { %8771 = vmatpush1.bf16.msra.mxu1 %v8770_v8  ;;  %v4458_v60 = vld [vmem:[#allocation6 + $0xf8] sm:$0xff]  ;;  %v4563_v8 = vld [vmem:[#allocation6 + $0x440] sm:$0xff] }
 0x5af   :  { %v2915_v17 = vadd.f32 %v2914_v18, %v12729_v42  ;;  %v3047_v19 = vadd.f32 %v3046_v50, %v2984_v35  ;;  %v8931_v35 = vpack.c.bf16 %v4562_v13, %v4561_v39  ;;  %v2987_v18 = vmul.f32 %v12735_v56, %v12735_v56  ;;  %8772 = vmatprep.subr.bf16.mxu1 %v18890_v63  ;;  %v4564_v39 = vld [vmem:[#allocation6 + $0x448] sm:$0xff] }
 0x5b0   :  { %v3911_v13 = vrot.slane %v10026_v3, 1 }
 0x5b1   :  { %v2916_v15 = vadd.f32 %v2915_v17, %v12732_v49  ;;  %v3048_v34 = vadd.f32 %v3047_v19, %v2985_v9  ;;  %v4457_v9 = vld [vmem:[#allocation6 + $0xf0] sm:$0xff]  ;;  %8932 = vmatprep.subr.bf16.mxu0 %v8931_v35  ;;  %v2988_v19 = vmul.f32 %v12738_v27, %v12738_v27  ;;  %v8935_v49 = vpack.c.bf16 %v4564_v39, %v4563_v8 }
 0x5b2   :  { %v8773_v17 = vpack.c.bf16 %v4458_v60, %v4457_v9  ;;  %8934 = vmatpush3.bf16.msra.mxu0 %v8931_v35  ;;  %4635 = vmatprep.mubr.f32.mxu1 %v3911_v13  ;;  %v3709_v9 = vld [vmem:[#allocation2 + $0x10] sm:$0x3]  ;;  %v4566_v60 = vld [vmem:[#allocation6 + $0x458] sm:$0xff] }
 0x5b3   :  { %v2917_v50 = vadd.f32 %v2916_v15, %v12735_v56  ;;  %v3049_v30 = vadd.f32 %v3048_v34, %v2986_v54  ;;  %v2989_v54 = vmul.f32 %v12741_v21, %v12741_v21  ;;  %8936 = vmatprep.subr.bf16.mxu0 %v8935_v49 }
 0x5b4   :  { %8774 = vmatpush1.bf16.msra.mxu1 %v8773_v17  ;;  %v3914_v17 = vrot.slane %v3709_v9, 1  ;;  %v4568_v9 = vld [vmem:[#allocation6 + $0x468] sm:$0xff] }
 0x5b5   :  { %v2918_v32 = vadd.f32 %v2917_v50, %v12738_v27  ;;  %v3050_v46 = vadd.f32 %v3049_v30, %v2987_v18  ;;  %8775 = vmatprep.subr.bf16.mxu1 %v18890_v63  ;;  %v2990_v18 = vmul.f32 %v12744_v7, %v12744_v7  ;;  %v4565_v30 = vld [vmem:[#allocation6 + $0x450] sm:$0xff] }
 0x5b6   :  { %8938 = vmatpush3.bf16.msra.mxu0 %v8935_v49  ;;  %v8939_v8 = vpack.c.bf16 %v4566_v60, %v4565_v30  ;;  %v3915_v39 = vsel %vm271_vm0, %v3911_v13, %v3914_v17  ;;  %v4459_v30 = vld [vmem:[#allocation6 + $0x100] sm:$0xff] }
 0x5b7   :  { %v2919_v15 = vadd.f32 %v2918_v32, %v12741_v21  ;;  %v3051_v34 = vadd.f32 %v3050_v46, %v2988_v19  ;;  %4636 = vmatmul.mubr.f32.vlgmr.msra.gmra.mrb[40].mxu1 %v10026_v3  ;;  %v2991_v19 = vmul.f32 %v12747_v37, %v12747_v37  ;;  %v4569_v21 = vld [vmem:[#allocation6 + $0x470] sm:$0xff] }
 0x5b8   :  { %8940 = vmatprep.subr.bf16.mxu0 %v8939_v8  ;;  %4640 = vmatprep.mubr.f32.mxu1 %v3915_v39 }
 0x5b9   :  { %v2920_v35 = vadd.f32 %v2919_v15, %v12744_v7  ;;  %v3052_v50 = vadd.f32 %v3051_v34, %v2989_v54  ;;  %v2992_v15 = vmul.f32 %v12750_v53, %v12750_v53  ;;  %v4567_v34 = vld [vmem:[#allocation6 + $0x460] sm:$0xff]  ;;  %v4460_v7 = vld [vmem:[#allocation6 + $0x108] sm:$0xff] }
 0x5ba   :  { %8942 = vmatpush3.bf16.msra.mxu0 %v8939_v8  ;;  %v8943_v60 = vpack.c.bf16 %v4568_v9, %v4567_v34  ;;  %v8776_v13 = vpack.c.bf16 %v4460_v7, %v4459_v30  ;;  %v4462_v7 = vld [vmem:[#allocation6 + $0x118] sm:$0xff] }
 0x5bb   :  { %v2921_v32 = vadd.f32 %v2920_v35, %v12747_v37  ;;  %v3053_v46 = vadd.f32 %v3052_v50, %v2990_v18  ;;  %4641 = vmatmul.mubr.f32.gmra.mrb[42].mxu1 %v10026_v3  ;;  %v4570_v35 = vld [vmem:[#allocation6 + $0x478] sm:$0xff] }
 0x5bc   :  { %v8947_v17 = vpack.c.bf16 %v4570_v35, %v4569_v21  ;;  %8944 = vmatprep.subr.bf16.mxu0 %v8943_v60  ;;  %8777 = vmatpush1.bf16.msra.mxu1 %v8776_v13  ;;  %v4463_v13 = vld [vmem:[#allocation6 + $0x120] sm:$0xff] }
 0x5bd   :  { %v2922_v49 = vadd.f32 %v2921_v32, %v12750_v53  ;;  %v3054_v54 = vadd.f32 %v3053_v46, %v2991_v19  ;;  %8778 = vmatprep.subr.bf16.mxu1 %v18890_v63 }
 0x5be   :  { %8946 = vmatpush3.bf16.msra.mxu0 %v8943_v60 }
 0x5bf   :  { %v2923_v18 = vrot.slane %v2922_v49, 4  ;;  %v3055_v50 = vadd.f32 %v3054_v54, %v2992_v15  ;;  %8948 = vmatprep.subr.bf16.mxu0 %v8947_v17  ;;  %v4461_v15 = vld [vmem:[#allocation6 + $0x110] sm:$0xff] }
 0x5c0   :  { %v8779_v21 = vpack.c.bf16 %v4462_v7, %v4461_v15 }
 0x5c1   :  { %v2924_v39 = vadd.f32 %v2923_v18, %v2922_v49  ;;  %v3056_v37 = vrot.slane %v3055_v50, 4 }
 0x5c2   :  { %8950 = vmatpush3.bf16.msra.mxu0 %v8947_v17  ;;  %8780 = vmatpush1.bf16.msra.mxu1 %v8779_v21  ;;  %v4464_v17 = vld [vmem:[#allocation6 + $0x128] sm:$0xff] }
 0x5c3   :  { %v2925_v8 = vrot.slane %v2924_v39, 2  ;;  %v3057_v19 = vadd.f32 %v3056_v37, %v3055_v50  ;;  %8781 = vmatprep.subr.bf16.mxu1 %v18890_v63  ;;  %v3073_v50 = vlaneseq }
 0x5c5   :  { %v2926_v32 = vadd.f32 %v2925_v8, %v2924_v39  ;;  %v3058_v3 = vrot.slane %v3057_v19, 2  ;;  %v3074_v39 = vshrl.u32 %v3073_v50, 7  ;;  %v8782_v8 = vpack.c.bf16 %v4464_v17, %v4463_v13  ;;  %v18894_v13 = vld [vmem:[#allocation99_spill] sm:$0xff]  ;;  %v18895_v17 = vld [vmem:[#allocation96_spill] sm:$0xff] }
 0x5c7   :  { %v2927_v46 = vrot.slane %v2926_v32, 1  ;;  %v3059_v34 = vadd.f32 %v3058_v3, %v3057_v19  ;;  %8783 = vmatpush1.bf16.msra.mxu1 %v8782_v8  ;;  %v13039_v19 = vsub.s32 0, %v3074_v39  ;;  %v18896_v8 = vld [vmem:[#allocation101_spill] sm:$0xff] }
 0x5c8   :  { %8784 = vmatprep.subr.bf16.mxu1 %v18890_v63 }
 0x5c9   :  { %v2928_v9 = vadd.f32 %v2927_v46, %v2926_v32  ;;  %v3060_v53 = vrot.slane %v3059_v34, 1  ;;  %18891 = vst [vmem:[#allocation16_spill] sm:$0xff] %v13039_v19  ;;  %v2859_v46 = vld [vmem:[%s17869_s4] sm:$0x1] }
 0x5cb   :  { %v3061_v54 = vadd.f32 %v3060_v53, %v3059_v34  ;;  %v3062_v49 = vmul.f32 0.001953125, %v2928_v9  ;;  %v2858_v53 = vld [vmem:[%s17868_s3] sm:$0x1] }
 0x5cd   :  { %v3063_v30 = vmul.f32 0.001953125, %v3061_v54  ;;  %v3064_v60 = vmul.f32 %v3062_v49, %v3062_v49 }
 0x5cf   :  { %v3065_v35 = vsub.f32 %v3063_v30, %v3064_v60  ;;  %v18892_v30 = vld [vmem:[#allocation94_spill] sm:$0xff] }
 0x5d1   :  { %v3066_v18 = vmax.f32 %v3065_v35, 0.0 }
 0x5d3   :  { %v3067_v37 = vadd.f32 1e-05, %v3066_v18 }
 0x5d5   :  { %9774 = vrsqrt.f32 %v3067_v37 }
 0x5df   :  { %v9775_v32 = vpop.eup %9774 }
 0x5e0   :  { %v3069_v3 = vmul.f32 %v9775_v32, %v2858_v53  ;;  %v18897_v53 = vld [vmem:[#allocation103_spill] sm:$0xff]  ;;  %v18898_v32 = vld [vmem:[#allocation106_spill] sm:$0xff] }
 0x5e2   :  { %v3070_v34 = vmul.f32 %v3069_v3, %v3062_v49  ;;  %v13045_v9 = vrot.slane %v3069_v3, %v13039_v19  ;;  %v18893_v49 = vld [vmem:[#allocation98_spill] sm:$0xff] }
 0x5e4   :  { %v3071_v15 = vsub.f32 %v2859_v46, %v3070_v34  ;;  %v3100_v7 = vmul.f32 %v13045_v9, %v12887_v2  ;;  %v3101_v21 = vmul.f32 %v13045_v9, %v12882_v29  ;;  %v13053_v54 = vmul.f32 %v13045_v9, %v12756_v45  ;;  %v18899_v46 = vld [vmem:[#allocation104_spill] sm:$0xff] }
 0x5e5   :  { %v13057_v60 = vmul.f32 %v13045_v9, %v18892_v30  ;;  %v13061_v35 = vmul.f32 %v13045_v9, %v18893_v49  ;;  %v13065_v18 = vmul.f32 %v13045_v9, %v12763_v11  ;;  %v13069_v2 = vmul.f32 %v13045_v9, %v12779_v62 }
 0x5e6   :  { %v13072_v29 = vrot.slane %v3071_v15, %v13039_v19  ;;  %v13076_v45 = vmul.f32 %v13045_v9, %v12774_v38  ;;  %v13080_v37 = vmul.f32 %v13045_v9, %v12791_v51  ;;  %v13084_v50 = vmul.f32 %v13045_v9, %v12786_v44  ;;  %v18900_v15 = vld [vmem:[#allocation112_spill] sm:$0xff] }
 0x5e7   :  { %v13088_v11 = vmul.f32 %v13045_v9, %v12803_v40  ;;  %v13092_v62 = vmul.f32 %v13045_v9, %v12798_v57  ;;  %v13096_v38 = vmul.f32 %v13045_v9, %v18894_v13  ;;  %v13100_v51 = vmul.f32 %v13045_v9, %v18895_v17  ;;  %v18903_v17 = vld [vmem:[#allocation13_spill] sm:$0xff] }
 0x5e8   :  { %v3170_v39 = vadd.f32 %v13072_v29, %v3100_v7  ;;  %v3171_v44 = vadd.f32 %v13072_v29, %v3101_v21  ;;  %v13106_v40 = vmul.f32 %v13045_v9, %v18896_v8  ;;  %v13110_v57 = vmul.f32 %v13045_v9, %v18897_v53  ;;  %v18901_v21 = vld [vmem:[#allocation109_spill] sm:$0xff]  ;;  %v18905_v53 = vld [vmem:[#allocation12_spill] sm:$0xff] }
 0x5e9   :  { %v13114_v3 = vmul.f32 %v13045_v9, %v18898_v32  ;;  %v13118_v34 = vmul.f32 %v13045_v9, %v18899_v46  ;;  %v13122_v7 = vmul.f32 %v13045_v9, %v18900_v15  ;;  %v13126_v30 = vmul.f32 %v13045_v9, %v18901_v21  ;;  %v18906_v46 = vld [vmem:[#allocation15_spill] sm:$0xff]  ;;  %v18907_v15 = vld [vmem:[#allocation14_spill] sm:$0xff] }
 0x5ea   :  { %v3234_v49 = vmax.f32 %v3170_v39, 0.0  ;;  %v3235_v13 = vmax.f32 %v3171_v44, 0.0  ;;  %v13130_v8 = vmul.f32 %v13045_v9, %v18903_v17  ;;  %v13134_v32 = vmul.f32 %v13045_v9, %v18905_v53  ;;  %v18909_v21 = vld [vmem:[#allocation74_spill] sm:$0xff] }
 0x5eb   :  { %18902 = vst [vmem:[#allocation17_spill] sm:$0xff] %v13126_v30  ;;  %v13138_v19 = vmul.f32 %v13045_v9, %v18906_v46  ;;  %v13142_v63 = vmul.f32 %v13045_v9, %v18907_v15  ;;  %v13146_v39 = vmul.f32 %v13045_v9, %v18909_v21  ;;  %v18910_v44 = vld [vmem:[#allocation78_spill] sm:$0xff]  ;;  %v13154_v53 = vmul.f32 %v13045_v9, %v18886_v22  ;;  %v18911_v15 = vld [vmem:[#allocation83_spill] sm:$0xff] }
 0x5ec   :  { %18904 = vst [vmem:[#allocation18_spill] sm:$0xff] %v13130_v8  ;;  %v13150_v17 = vmul.f32 %v13045_v9, %v18910_v44  ;;  %v3374_v8 = vrot.slane %v3234_v49, 7  ;;  %v3375_v30 = vrot.slane %v3235_v13, 7  ;;  %v13158_v46 = vmul.f32 %v13045_v9, %v18887_v23 }
 0x5ed   :  { %18908 = vst [vmem:[#allocation19_spill] sm:$0xff] %v13142_v63  ;;  %v13162_v63 = vmul.f32 %v13045_v9, %v18911_v15  ;;  %v13166_v21 = vmul.f32 %v13045_v9, %v18889_v61  ;;  %v13170_v49 = vmul.f32 %v13045_v9, %v12651_v0  ;;  %v13174_v22 = vmul.f32 %v13045_v9, %v12654_v14  ;;  %v18912_v15 = vld [vmem:[#allocation84_spill] sm:$0xff] }
 0x5ee   :  { %v3376_v13 = vsel %vm3340_vm2, %v3374_v8, %v3375_v30  ;;  %v3544_v23 = vsel %vm3340_vm2, 0.0, %v3374_v8  ;;  %v13180_v44 = vmul.f32 %v13045_v9, %v12657_v58  ;;  %v13184_v61 = vmul.f32 %v13045_v9, %v12660_v5 }
 0x5ef   :  { %3644 = vst [vmem:[#allocation2 + $0x120] sm:$0xff] %v3544_v23  ;;  %3645 = vst [vmem:[#allocation2 + $0x128] sm:$0xff] %v3376_v13  ;;  %v13188_v0 = vmul.f32 %v13045_v9, %v12663_v28  ;;  %v13192_v14 = vmul.f32 %v13045_v9, %v12666_v4  ;;  %v13196_v8 = vmul.f32 %v13045_v9, %v12669_v55  ;;  %v18915_v13 = vld [vmem:[#allocation88_spill] sm:$0xff] }
 0x5f0   :  { %v13200_v58 = vmul.f32 %v13045_v9, %v12672_v43  ;;  %v13204_v5 = vmul.f32 %v13045_v9, %v12675_v6  ;;  %v13208_v28 = vmul.f32 %v13045_v9, %v12678_v41  ;;  %v13212_v4 = vmul.f32 %v13045_v9, %v12681_v24 }
 0x5f1   :  { %v13216_v55 = vmul.f32 %v13045_v9, %v12684_v48  ;;  %v13220_v43 = vmul.f32 %v13045_v9, %v12687_v36  ;;  %v13224_v6 = vmul.f32 %v13045_v9, %v12690_v26  ;;  %v13228_v41 = vmul.f32 %v13045_v9, %v12693_v1 }
 0x5f2   :  { %v13232_v24 = vmul.f32 %v13045_v9, %v12696_v25  ;;  %v13236_v48 = vmul.f32 %v13045_v9, %v12699_v59  ;;  %v13240_v36 = vmul.f32 %v13045_v9, %v12702_v12  ;;  %v13244_v26 = vmul.f32 %v13045_v9, %v12705_v10 }
 0x5f3   :  { %v13248_v1 = vmul.f32 %v13045_v9, %v12708_v31  ;;  %v13252_v25 = vmul.f32 %v13045_v9, %v12711_v52  ;;  %v13256_v59 = vmul.f32 %v13045_v9, %v12714_v20  ;;  %v13260_v12 = vmul.f32 %v13045_v9, %v18912_v15  ;;  %v18918_v15 = vld [vmem:[#allocation86_spill] sm:$0xff] }
 0x5f4   :  { %v13264_v10 = vmul.f32 %v13045_v9, %v12720_v16  ;;  %v13268_v31 = vmul.f32 %v13045_v9, %v12723_v33  ;;  %v13272_v52 = vmul.f32 %v13045_v9, %v12726_v47  ;;  %v13276_v20 = vmul.f32 %v13045_v9, %v12729_v42 }
 0x5f5   :  { %v13280_v23 = vmul.f32 %v13045_v9, %v18915_v13  ;;  %v13284_v16 = vmul.f32 %v13045_v9, %v12735_v56  ;;  %v13288_v33 = vmul.f32 %v13045_v9, %v12738_v27  ;;  %v13292_v47 = vmul.f32 %v13045_v9, %v18918_v15 }
 0x5f6   :  { %18913 = vst [vmem:[#allocation20_spill] sm:$0xff] %v13272_v52  ;;  %18914 = vst [vmem:[#allocation21_spill] sm:$0xff] %v13276_v20  ;;  %v18919_v52 = vld [vmem:[#allocation89_spill] sm:$0xff]  ;;  %v13309_v27 = vadd.f32 %v13072_v29, %v13053_v54  ;;  %v13313_v15 = vadd.f32 %v13072_v29, %v13057_v60  ;;  %v13329_v54 = vadd.f32 %v13072_v29, %v13076_v45 }
 0x5f7   :  { %18916 = vst [vmem:[#allocation22_spill] sm:$0xff] %v13280_v23  ;;  %18917 = vst [vmem:[#allocation23_spill] sm:$0xff] %v13284_v16  ;;  %v13296_v42 = vmul.f32 %v13045_v9, %v18919_v52  ;;  %v18920_v20 = vld [vmem:[#allocation93_spill] sm:$0xff]  ;;  %v18921_v23 = vld [vmem:[#allocation91_spill] sm:$0xff]  ;;  %v3576_v16 = vsel %vm3340_vm2, %v3375_v30, 0.0  ;;  %v13317_v52 = vadd.f32 %v13072_v29, %v13061_v35  ;;  %v13333_v60 = vadd.f32 %v13072_v29, %v13080_v37 }
 0x5f8   :  { %v13300_v13 = vmul.f32 %v13045_v9, %v18920_v20  ;;  %v13304_v56 = vmul.f32 %v13045_v9, %v18921_v23  ;;  %v13321_v20 = vadd.f32 %v13072_v29, %v13065_v18  ;;  %v13325_v9 = vadd.f32 %v13072_v29, %v13069_v2  ;;  %3646 = vst [vmem:[#allocation2 + $0x130] sm:$0x3] %v3576_v16  ;;  %v18922_v30 = vld [vmem:[#allocation17_spill] sm:$0xff]  ;;  %v18923_v23 = vld [vmem:[#allocation18_spill] sm:$0xff]  ;;  %v18924_v16 = vld [vmem:[#allocation19_spill] sm:$0xff] }
 0x5f9   :  { %v13337_v35 = vadd.f32 %v13072_v29, %v13084_v50  ;;  %v13341_v18 = vadd.f32 %v13072_v29, %v13088_v11  ;;  %v13345_v2 = vadd.f32 %v13072_v29, %v13092_v62  ;;  %v13349_v45 = vadd.f32 %v13072_v29, %v13096_v38 }
 0x5fa   :  { %v13353_v37 = vadd.f32 %v13072_v29, %v13100_v51  ;;  %v13357_v50 = vadd.f32 %v13072_v29, %v13106_v40  ;;  %v13361_v11 = vadd.f32 %v13072_v29, %v13110_v57  ;;  %v13365_v62 = vadd.f32 %v13072_v29, %v13114_v3 }
 0x5fb   :  { %v13369_v38 = vadd.f32 %v13072_v29, %v13118_v34  ;;  %v13373_v51 = vadd.f32 %v13072_v29, %v13122_v7  ;;  %v13377_v40 = vadd.f32 %v13072_v29, %v18922_v30  ;;  %v13381_v57 = vadd.f32 %v13072_v29, %v18923_v23 }
 0x5fc   :  { %v13385_v3 = vadd.f32 %v13072_v29, %v13134_v32  ;;  %v13389_v34 = vadd.f32 %v13072_v29, %v13138_v19  ;;  %v13393_v7 = vadd.f32 %v13072_v29, %v18924_v16  ;;  %v13397_v30 = vadd.f32 %v13072_v29, %v13146_v39 }
 0x5fd   :  { %v13401_v23 = vadd.f32 %v13072_v29, %v13150_v17  ;;  %v13405_v32 = vadd.f32 %v13072_v29, %v13154_v53  ;;  %v13409_v19 = vadd.f32 %v13072_v29, %v13158_v46  ;;  %v13413_v16 = vadd.f32 %v13072_v29, %v13162_v63 }
 0x5fe   :  { %v13417_v39 = vadd.f32 %v13072_v29, %v13166_v21  ;;  %v13421_v17 = vadd.f32 %v13072_v29, %v13170_v49  ;;  %v13425_v53 = vadd.f32 %v13072_v29, %v13174_v22  ;;  %v13429_v46 = vadd.f32 %v13072_v29, %v13180_v44 }
 0x5ff   :  { %v13433_v63 = vadd.f32 %v13072_v29, %v13184_v61  ;;  %v13437_v21 = vadd.f32 %v13072_v29, %v13188_v0  ;;  %v13441_v49 = vadd.f32 %v13072_v29, %v13192_v14  ;;  %v13445_v22 = vadd.f32 %v13072_v29, %v13196_v8 }
 0x600   :  { %v13449_v44 = vadd.f32 %v13072_v29, %v13200_v58  ;;  %v13453_v61 = vadd.f32 %v13072_v29, %v13204_v5  ;;  %v13457_v0 = vadd.f32 %v13072_v29, %v13208_v28  ;;  %v13461_v14 = vadd.f32 %v13072_v29, %v13212_v4 }
 0x601   :  { %v13465_v8 = vadd.f32 %v13072_v29, %v13216_v55  ;;  %v13469_v58 = vadd.f32 %v13072_v29, %v13220_v43  ;;  %v13473_v5 = vadd.f32 %v13072_v29, %v13224_v6  ;;  %v13477_v28 = vadd.f32 %v13072_v29, %v13228_v41 }
 0x602   :  { %18925 = vst [vmem:[#allocation24_spill] sm:$0xff] %v13457_v0  ;;  %18926 = vst [vmem:[#allocation25_spill] sm:$0xff] %v13461_v14  ;;  %v13481_v4 = vadd.f32 %v13072_v29, %v13232_v24  ;;  %v13485_v55 = vadd.f32 %v13072_v29, %v13236_v48  ;;  %v13489_v43 = vadd.f32 %v13072_v29, %v13240_v36 }
 0x603   :  { %18927 = vst [vmem:[#allocation26_spill] sm:$0xff] %v13465_v8  ;;  %v13493_v6 = vadd.f32 %v13072_v29, %v13244_v26  ;;  %v13497_v41 = vadd.f32 %v13072_v29, %v13248_v1  ;;  %v13501_v24 = vadd.f32 %v13072_v29, %v13252_v25  ;;  %v13505_v48 = vadd.f32 %v13072_v29, %v13256_v59 }
 0x604   :  { %18928 = vst [vmem:[#allocation47_spill] sm:$0xff] %v13489_v43  ;;  %v13509_v36 = vadd.f32 %v13072_v29, %v13260_v12  ;;  %v13513_v26 = vadd.f32 %v13072_v29, %v13264_v10  ;;  %v13517_v1 = vadd.f32 %v13072_v29, %v13268_v31  ;;  %v13537_v31 = vadd.f32 %v13072_v29, %v13288_v33 }
 0x605   :  { %18929 = vst [vmem:[#allocation50_spill] sm:$0xff] %v13493_v6  ;;  %18930 = vst [vmem:[#allocation41_spill] sm:$0xff] %v13497_v41  ;;  %v18935_v41 = vld [vmem:[#allocation20_spill] sm:$0xff]  ;;  %v3213_v33 = vmax.f32 %v13313_v15, 0.0 }
 0x606   :  { %18931 = vst [vmem:[#allocation44_spill] sm:$0xff] %v13501_v24  ;;  %18932 = vst [vmem:[#allocation43_spill] sm:$0xff] %v13505_v48  ;;  %v13521_v25 = vadd.f32 %v13072_v29, %v18935_v41  ;;  %v18936_v24 = vld [vmem:[#allocation21_spill] sm:$0xff]  ;;  %v18937_v48 = vld [vmem:[#allocation22_spill] sm:$0xff]  ;;  %v13541_v41 = vadd.f32 %v13072_v29, %v13292_v47  ;;  %v3215_v47 = vmax.f32 %v13321_v20, 0.0 }
 0x607   :  { %18933 = vst [vmem:[#allocation45_spill] sm:$0xff] %v13509_v36  ;;  %18934 = vst [vmem:[#allocation48_spill] sm:$0xff] %v13513_v26  ;;  %v13525_v59 = vadd.f32 %v13072_v29, %v18936_v24  ;;  %v13529_v12 = vadd.f32 %v13072_v29, %v18937_v48  ;;  %v18938_v36 = vld [vmem:[#allocation23_spill] sm:$0xff]  ;;  %v13545_v24 = vadd.f32 %v13072_v29, %v13296_v42  ;;  %v3217_v42 = vmax.f32 %v13329_v54, 0.0 }
 0x608   :  { %v13533_v10 = vadd.f32 %v13072_v29, %v18938_v36  ;;  %18940 = vst [vmem:[#allocation49_spill] sm:$0xff] %v13537_v31  ;;  %18941 = vst [vmem:[#allocation51_spill] sm:$0xff] %v13541_v41  ;;  %v13549_v48 = vadd.f32 %v13072_v29, %v13300_v13  ;;  %v13553_v36 = vadd.f32 %v13072_v29, %v13304_v56  ;;  %v3214_v31 = vmax.f32 %v13317_v52, 0.0 }
 0x609   :  { %18942 = vst [vmem:[#allocation54_spill] sm:$0xff] %v13545_v24  ;;  %v3216_v41 = vmax.f32 %v13325_v9, 0.0  ;;  %v3218_v24 = vmax.f32 %v13333_v60, 0.0  ;;  %v3219_v13 = vmax.f32 %v13337_v35, 0.0  ;;  %v13619_v15 = vrot.slane %v3213_v33, 7 }
 0x60a   :  { %18939 = vst [vmem:[#allocation46_spill] sm:$0xff] %v13533_v10  ;;  %18943 = vst [vmem:[#allocation27_spill] sm:$0xff] %v13549_v48  ;;  %v3212_v10 = vmax.f32 %v13309_v27, 0.0  ;;  %v3220_v48 = vmax.f32 %v13341_v18, 0.0  ;;  %v13621_v52 = vrot.slane %v3214_v31, 7  ;;  %v13623_v20 = vrot.slane %v3215_v47, 7 }
 0x60b   :  { %v13625_v9 = vrot.slane %v3216_v41, 7  ;;  %v13627_v54 = vrot.slane %v3217_v42, 7  ;;  %v13629_v60 = vrot.slane %v3218_v24, 7  ;;  %v13631_v35 = vrot.slane %v3219_v13, 7 }
 0x60c   :  { %v13617_v26 = vrot.slane %v3212_v10, 7  ;;  %v13633_v18 = vrot.slane %v3220_v48, 7  ;;  %v13643_v31 = vsel %vm3340_vm2, %v13621_v52, %v13623_v20  ;;  %v18955_v41 = vmax.f32 %v13345_v2, 0.0 }
 0x60d   :  { %18954 = vst [vmem:[#allocation29_spill] sm:$0xff] %v13643_v31  ;;  %v18956_v24 = vmax.f32 %v13349_v45, 0.0  ;;  %v13656_v48 = vsel %vm3340_vm2, %v13625_v9, %v13627_v54  ;;  %v13661_v42 = vsel %vm3340_vm2, %v13629_v60, %v13631_v35  ;;  %v18959_v13 = vmax.f32 %v13353_v37, 0.0  ;;  %3615 = vst [vmem:[#allocation2 + $0x38] sm:$0xff] %v13643_v31 }
 0x60e   :  { %v18947_v8 = vld [vmem:[#allocation45_spill] sm:$0xff]  ;;  %v13638_v10 = vsel %vm3340_vm2, %v13617_v26, %v13619_v15  ;;  %v13647_v33 = vrot.slane %v18955_v41, 7  ;;  %18957 = vst [vmem:[#allocation30_spill] sm:$0xff] %v13656_v48  ;;  %18958 = vst [vmem:[#allocation31_spill] sm:$0xff] %v13661_v42  ;;  %v18960_v2 = vmax.f32 %v13357_v50, 0.0  ;;  %v18964_v37 = vmax.f32 %v13365_v62, 0.0 }
 0x60f   :  { %v18949_v6 = vld [vmem:[#allocation49_spill] sm:$0xff]  ;;  %v18950_v29 = vld [vmem:[#allocation51_spill] sm:$0xff]  ;;  %18953 = vst [vmem:[#allocation28_spill] sm:$0xff] %v13638_v10  ;;  %v13651_v47 = vrot.slane %v18956_v24, 7  ;;  %v13665_v27 = vrot.slane %v18959_v13, 7  ;;  %3612 = vst [vmem:[#allocation2 + $0x20] sm:$0xff] %v13638_v10 }
 0x610   :  { %v18951_v0 = vld [vmem:[#allocation54_spill] sm:$0xff]  ;;  %v13669_v41 = vrot.slane %v18960_v2, 7  ;;  %v13676_v45 = vsel %vm3340_vm2, %v13633_v18, %v13647_v33  ;;  %v18963_v24 = vmax.f32 %v13361_v11, 0.0  ;;  %v13684_v13 = vrot.slane %v18964_v37, 7  ;;  %3618 = vst [vmem:[#allocation2 + $0x50] sm:$0xff] %v13656_v48  ;;  %3621 = vst [vmem:[#allocation2 + $0x68] sm:$0xff] %v13661_v42 }
 0x611   :  { %v18948_v43 = vld [vmem:[#allocation46_spill] sm:$0xff]  ;;  %v18952_v14 = vld [vmem:[#allocation27_spill] sm:$0xff]  ;;  %18962 = vst [vmem:[#allocation33_spill] sm:$0xff] %v13676_v45  ;;  %v18966_v50 = vmax.f32 %v13369_v38, 0.0  ;;  %v13695_v31 = vsel %vm3340_vm2, %v13651_v47, %v13665_v27  ;;  %v18968_v11 = vmax.f32 %v13373_v51, 0.0  ;;  %v18969_v62 = vmax.f32 %v13377_v40, 0.0 }
 0x612   :  { %18961 = vst [vmem:[#allocation32_spill] sm:$0xff] %v13669_v41  ;;  %v13680_v56 = vrot.slane %v18963_v24, 7  ;;  %18965 = vst [vmem:[#allocation34_spill] sm:$0xff] %v13684_v13  ;;  %v18970_v38 = vmax.f32 %v13381_v57, 0.0  ;;  %v18974_v40 = vmax.f32 %v13385_v3, 0.0  ;;  %v18975_v57 = vmax.f32 %v13389_v34, 0.0 }
 0x613   :  { %v13688_v2 = vrot.slane %v18966_v50, 7  ;;  %18967 = vst [vmem:[#allocation35_spill] sm:$0xff] %v13695_v31  ;;  %v13699_v24 = vrot.slane %v18968_v11, 7  ;;  %v13703_v37 = vrot.slane %v18969_v62, 7  ;;  %3624 = vst [vmem:[#allocation2 + $0x80] sm:$0xff] %v13676_v45  ;;  %v18978_v45 = vmax.f32 %v13393_v7, 0.0 }
 0x614   :  { %v13707_v50 = vrot.slane %v18970_v38, 7  ;;  %v13713_v42 = vsel %vm3340_vm2, %v13669_v41, %v13680_v56  ;;  %v13722_v11 = vrot.slane %v18974_v40, 7  ;;  %v13726_v62 = vrot.slane %v18975_v57, 7  ;;  %3627 = vst [vmem:[#allocation2 + $0x98] sm:$0xff] %v13695_v31 }
 0x615   :  { %18972 = vst [vmem:[#allocation37_spill] sm:$0xff] %v13713_v42  ;;  %v13718_v51 = vsel %vm3340_vm2, %v13684_v13, %v13688_v2  ;;  %v13732_v38 = vsel %vm3340_vm2, %v13699_v24, %v13703_v37  ;;  %v13736_v48 = vrot.slane %v18978_v45, 7  ;;  %v18979_v10 = vmax.f32 %v13397_v30, 0.0  ;;  %3630 = vst [vmem:[#allocation2 + $0xb0] sm:$0xff] %v13713_v42 }
 0x616   :  { %18971 = vst [vmem:[#allocation36_spill] sm:$0xff] %v13707_v50  ;;  %18973 = vst [vmem:[#allocation38_spill] sm:$0xff] %v13718_v51  ;;  %v18981_v40 = vmax.f32 %v13401_v23, 0.0  ;;  %v13751_v57 = vsel %vm3340_vm2, %v13707_v50, %v13722_v11  ;;  %v18983_v7 = vmax.f32 %v13405_v32, 0.0  ;;  %v18984_v30 = vmax.f32 %v13409_v19, 0.0 }
 0x617   :  { %18976 = vst [vmem:[#allocation39_spill] sm:$0xff] %v13726_v62  ;;  %18977 = vst [vmem:[#allocation40_spill] sm:$0xff] %v13732_v38  ;;  %v13740_v3 = vrot.slane %v18979_v10, 7  ;;  %v18985_v23 = vmax.f32 %v13413_v16, 0.0  ;;  %v18988_v19 = vmax.f32 %v13417_v39, 0.0  ;;  %v18990_v16 = vmax.f32 %v13421_v17, 0.0 }
 0x618   :  { %v13744_v34 = vrot.slane %v18981_v40, 7  ;;  %3633 = vst [vmem:[#allocation2 + $0xc8] sm:$0xff] %v13718_v51  ;;  %18982 = vst [vmem:[#allocation58_spill] sm:$0xff] %v13751_v57  ;;  %v13755_v45 = vrot.slane %v18983_v7, 7  ;;  %v13759_v10 = vrot.slane %v18984_v30, 7  ;;  %v13769_v51 = vsel %vm3340_vm2, %v13726_v62, %v13736_v48 }
 0x619   :  { %18980 = vst [vmem:[#allocation42_spill] sm:$0xff] %v13740_v3  ;;  %v13763_v40 = vrot.slane %v18985_v23, 7  ;;  %3636 = vst [vmem:[#allocation2 + $0xe0] sm:$0xff] %v13732_v38  ;;  %v13778_v7 = vrot.slane %v18988_v19, 7  ;;  %v13782_v30 = vrot.slane %v18990_v16, 7  ;;  %v18992_v38 = vmax.f32 %v13425_v53, 0.0 }
 0x61a   :  { %18986 = vst [vmem:[#allocation59_spill] sm:$0xff] %v13769_v51  ;;  %v13774_v32 = vsel %vm3340_vm2, %v13740_v3, %v13744_v34  ;;  %3639 = vst [vmem:[#allocation2 + $0xf8] sm:$0xff] %v13751_v57  ;;  %v13788_v23 = vsel %vm3340_vm2, %v13755_v45, %v13759_v10  ;;  %v18994_v31 = vmax.f32 %v13429_v46, 0.0  ;;  %v18995_v19 = vmax.f32 %v13433_v63, 0.0 }
 0x61b   :  { %18987 = vst [vmem:[#allocation63_spill] sm:$0xff] %v13774_v32  ;;  %18989 = vst [vmem:[#allocation56_spill] sm:$0xff] %v13778_v7  ;;  %v13792_v42 = vrot.slane %v18992_v38, 7  ;;  %v13807_v16 = vsel %vm3340_vm2, %v13763_v40, %v13778_v7  ;;  %v18998_v53 = vmax.f32 %v13437_v21, 0.0  ;;  %v18999_v46 = vmax.f32 %v13441_v49, 0.0 }
 0x61c   :  { %18991 = vst [vmem:[#allocation52_spill] sm:$0xff] %v13788_v23  ;;  %v13796_v39 = vrot.slane %v18994_v31, 7  ;;  %v13800_v17 = vrot.slane %v18995_v19, 7  ;;  %3642 = vst [vmem:[#allocation2 + $0x110] sm:$0xff] %v13769_v51  ;;  %v19000_v63 = vmax.f32 %v13445_v22, 0.0 }
 0x61d   :  { %18993 = vst [vmem:[#allocation55_spill] sm:$0xff] %v13792_v42  ;;  %3648 = vst [vmem:[#allocation2 + $0x140] sm:$0xff] %v13774_v32  ;;  %v13811_v38 = vrot.slane %v18998_v53, 7  ;;  %v13815_v31 = vrot.slane %v18999_v46, 7  ;;  %v13825_v32 = vsel %vm3340_vm2, %v13782_v30, %v13792_v42  ;;  %v19002_v53 = vmax.f32 %v13449_v44, 0.0 }
 0x61e   :  { %18996 = vst [vmem:[#allocation57_spill] sm:$0xff] %v13800_v17  ;;  %18997 = vst [vmem:[#allocation60_spill] sm:$0xff] %v13807_v16  ;;  %v13819_v19 = vrot.slane %v19000_v63, 7  ;;  %v3391_v21 = vsel %vm3340_vm2, %v13796_v39, %v13800_v17  ;;  %v19004_v46 = vmax.f32 %v13453_v61, 0.0  ;;  %v19009_v17 = vld [vmem:[#allocation25_spill] sm:$0xff] }
 0x61f   :  { %3651 = vst [vmem:[#allocation2 + $0x158] sm:$0xff] %v13788_v23  ;;  %19001 = vst [vmem:[#allocation62_spill] sm:$0xff] %v13825_v32  ;;  %v13832_v49 = vrot.slane %v19002_v53, 7  ;;  %v13842_v63 = vsel %vm3340_vm2, %v13811_v38, %v13815_v31  ;;  %v19006_v23 = vld [vmem:[#allocation24_spill] sm:$0xff]  ;;  %v19010_v42 = vmax.f32 %v19009_v17, 0.0  ;;  %v19011_v53 = vld [vmem:[#allocation26_spill] sm:$0xff] }
 0x620   :  { %v13836_v22 = vrot.slane %v19004_v46, 7  ;;  %3654 = vst [vmem:[#allocation2 + $0x170] sm:$0xff] %v13807_v16  ;;  %19005 = vst [vmem:[#allocation67_spill] sm:$0xff] %v13842_v63  ;;  %v19007_v51 = vmax.f32 %v19006_v23, 0.0  ;;  %v19012_v7 = vmax.f32 %v19011_v53, 0.0  ;;  %v19015_v23 = vmax.f32 %v13469_v58, 0.0 }
 0x621   :  { %19003 = vst [vmem:[#allocation65_spill] sm:$0xff] %v13832_v49  ;;  %v13850_v44 = vrot.slane %v19010_v42, 7  ;;  %3657 = vst [vmem:[#allocation2 + $0x188] sm:$0xff] %v13825_v32  ;;  %v13860_v46 = vsel %vm3340_vm2, %v13819_v19, %v13832_v49  ;;  %v19016_v17 = vmax.f32 %v13473_v5, 0.0  ;;  %v19018_v53 = vmax.f32 %v13477_v28, 0.0 }
 0x622   :  { %v13846_v57 = vrot.slane %v19007_v51, 7  ;;  %v13854_v61 = vrot.slane %v19012_v7, 7  ;;  %3660 = vst [vmem:[#allocation2 + $0x1d0] sm:$0xff] %v3391_v21  ;;  %19014 = vst [vmem:[#allocation75_spill] sm:$0xff] %v13860_v46  ;;  %v13864_v51 = vrot.slane %v19015_v23, 7  ;;  %v19021_v5 = vmax.f32 %v13481_v4, 0.0 }
 0x623   :  { %v13868_v42 = vrot.slane %v19016_v17, 7  ;;  %v13872_v7 = vrot.slane %v19018_v53, 7  ;;  %3663 = vst [vmem:[#allocation2 + $0x1e8] sm:$0xff] %v13842_v63  ;;  %v19023_v28 = vmax.f32 %v13485_v55, 0.0  ;;  %3666 = vst [vmem:[#allocation2 + $0x200] sm:$0xff] %v13860_v46  ;;  %v19025_v63 = vld [vmem:[#allocation47_spill] sm:$0xff] }
 0x624   :  { %19008 = vst [vmem:[#allocation70_spill] sm:$0xff] %v13846_v57  ;;  %19013 = vst [vmem:[#allocation72_spill] sm:$0xff] %v13854_v61  ;;  %v13878_v21 = vsel %vm3340_vm2, %v13836_v22, %v13846_v57  ;;  %v13883_v58 = vsel %vm3340_vm2, %v13850_v44, %v13854_v61  ;;  %v13887_v23 = vrot.slane %v19021_v5, 7  ;;  %v19026_v32 = vmax.f32 %v19025_v63, 0.0  ;;  %v19028_v61 = vld [vmem:[#allocation50_spill] sm:$0xff]  ;;  %v19030_v5 = vld [vmem:[#allocation41_spill] sm:$0xff] }
 0x625   :  { %19017 = vst [vmem:[#allocation77_spill] sm:$0xff] %v13868_v42  ;;  %19019 = vst [vmem:[#allocation80_spill] sm:$0xff] %v13878_v21  ;;  %v13891_v17 = vrot.slane %v19023_v28, 7  ;;  %v13897_v53 = vsel %vm3340_vm2, %v13864_v51, %v13868_v42  ;;  %v19029_v57 = vmax.f32 %v19028_v61, 0.0  ;;  %v19031_v49 = vmax.f32 %v19030_v5, 0.0  ;;  %v19033_v46 = vld [vmem:[#allocation44_spill] sm:$0xff] }
 0x626   :  { %19020 = vst [vmem:[#allocation82_spill] sm:$0xff] %v13883_v58  ;;  %19022 = vst [vmem:[#allocation85_spill] sm:$0xff] %v13887_v23  ;;  %v13901_v16 = vrot.slane %v19026_v32, 7  ;;  %v3409_v28 = vsel %vm3340_vm2, %v13872_v7, %v13887_v23  ;;  %v19034_v63 = vmax.f32 %v19033_v46, 0.0  ;;  %v19035_v42 = vld [vmem:[#allocation43_spill] sm:$0xff]  ;;  %v19037_v5 = vmax.f32 %v18947_v8, 0.0 }
 0x627   :  { %19024 = vst [vmem:[#allocation87_spill] sm:$0xff] %v13897_v53  ;;  %v13905_v4 = vrot.slane %v19029_v57, 7  ;;  %v13909_v55 = vrot.slane %v19031_v49, 7  ;;  %3669 = vst [vmem:[#allocation2 + $0x218] sm:$0xff] %v13878_v21  ;;  %v19036_v61 = vmax.f32 %v19035_v42, 0.0  ;;  %v19040_v42 = vmax.f32 %v13517_v1, 0.0 }
 0x628   :  { %19027 = vst [vmem:[#allocation90_spill] sm:$0xff] %v13901_v16  ;;  %3672 = vst [vmem:[#allocation2 + $0x230] sm:$0xff] %v13883_v58  ;;  %v13918_v32 = vrot.slane %v19034_v63, 7  ;;  %v13926_v49 = vrot.slane %v19037_v5, 7  ;;  %v3412_v58 = vsel %vm3340_vm2, %v13891_v17, %v13901_v16  ;;  %v19038_v63 = vld [vmem:[#allocation48_spill] sm:$0xff]  ;;  %v19041_v5 = vmax.f32 %v13521_v25, 0.0 }
 0x629   :  { %19032 = vst [vmem:[#allocation92_spill] sm:$0xff] %v13909_v55  ;;  %v13922_v57 = vrot.slane %v19036_v61, 7  ;;  %3675 = vst [vmem:[#allocation2 + $0x248] sm:$0xff] %v13897_v53  ;;  %v3415_v46 = vsel %vm3340_vm2, %v13905_v4, %v13909_v55  ;;  %v19039_v21 = vmax.f32 %v19038_v63, 0.0  ;;  %v13941_v61 = vrot.slane %v19040_v42, 7 }
 0x62a   :  { %3678 = vst [vmem:[#allocation2 + $0x260] sm:$0xff] %v3409_v28  ;;  %v13948_v53 = vrot.slane %v19041_v5, 7  ;;  %v19042_v16 = vmax.f32 %v13525_v59, 0.0  ;;  %3681 = vst [vmem:[#allocation2 + $0x278] sm:$0xff] %v3412_v58  ;;  %v19044_v28 = vmax.f32 %v18948_v43, 0.0  ;;  %v19045_v25 = vmax.f32 %v18949_v6, 0.0 }
 0x62b   :  { %v13937_v23 = vrot.slane %v19039_v21, 7  ;;  %v3418_v8 = vsel %vm3340_vm2, %v13918_v32, %v13922_v57  ;;  %v19043_v21 = vmax.f32 %v13529_v12, 0.0  ;;  %3684 = vst [vmem:[#allocation2 + $0x290] sm:$0xff] %v3415_v46  ;;  %v19046_v59 = vmax.f32 %v18950_v29, 0.0 }
 0x62c   :  { %v13952_v55 = vrot.slane %v19042_v16, 7  ;;  %v13963_v42 = vrot.slane %v19044_v28, 7  ;;  %v13967_v5 = vrot.slane %v19045_v25, 7  ;;  %3687 = vst [vmem:[#allocation2 + $0x2a8] sm:$0xff] %v3418_v8  ;;  %v3424_v12 = vsel %vm3340_vm2, %v13941_v61, %v13948_v53 }
 0x62d   :  { %v13956_v63 = vrot.slane %v19043_v21, 7  ;;  %v3421_v1 = vsel %vm3340_vm2, %v13926_v49, %v13937_v23  ;;  %v13971_v16 = vrot.slane %v19046_v59, 7  ;;  %v19047_v43 = vmax.f32 %v18951_v0, 0.0  ;;  %3693 = vst [vmem:[#allocation2 + $0x2d8] sm:$0xff] %v3424_v12 }
 0x62e   :  { %v19048_v6 = vmax.f32 %v18952_v14, 0.0  ;;  %3690 = vst [vmem:[#allocation2 + $0x2c0] sm:$0xff] %v3421_v1  ;;  %v3430_v29 = vsel %vm3340_vm2, %v13963_v42, %v13967_v5  ;;  %v19049_v8 = vmax.f32 %v13553_v36, 0.0  ;;  %v13996_v25 = vsel %vm3340_vm2, 0.0, %v13617_v26 }
 0x62f   :  { %v3427_v58 = vsel %vm3340_vm2, %v13952_v55, %v13956_v63  ;;  %v13981_v46 = vrot.slane %v19047_v43, 7  ;;  %v14000_v0 = vsel %vm3340_vm2, 0.0, %v13621_v52  ;;  %v14007_v1 = vsel %vm3340_vm2, 0.0, %v13625_v9  ;;  %3611 = vst [vmem:[#allocation2 + $0x18] sm:$0xff] %v13996_v25  ;;  %3699 = vst [vmem:[#allocation2 + $0x308] sm:$0xff] %v3430_v29 }
 0x630   :  { %v13985_v21 = vrot.slane %v19048_v6, 7  ;;  %v13992_v28 = vrot.slane %v19049_v8, 7  ;;  %3696 = vst [vmem:[#allocation2 + $0x2f0] sm:$0xff] %v3427_v58  ;;  %v14011_v36 = vsel %vm3340_vm2, 0.0, %v13629_v60  ;;  %v14015_v59 = vsel %vm3340_vm2, 0.0, %v13633_v18  ;;  %3614 = vst [vmem:[#allocation2 + $0x30] sm:$0xff] %v14000_v0 }
 0x631   :  { %v3433_v14 = vsel %vm3340_vm2, %v13971_v16, %v13981_v46  ;;  %v14024_v58 = vsel %vm3340_vm2, 0.0, %v13651_v47  ;;  %v14028_v43 = vsel %vm3340_vm2, 0.0, %v13669_v41  ;;  %v14032_v6 = vsel %vm3340_vm2, 0.0, %v13684_v13  ;;  %3617 = vst [vmem:[#allocation2 + $0x48] sm:$0xff] %v14007_v1  ;;  %3620 = vst [vmem:[#allocation2 + $0x60] sm:$0xff] %v14011_v36 }
 0x632   :  { %v3436_v12 = vsel %vm3340_vm2, %v13985_v21, %v13992_v28  ;;  %3623 = vst [vmem:[#allocation2 + $0x78] sm:$0xff] %v14015_v59  ;;  %3702 = vst [vmem:[#allocation2 + $0x320] sm:$0xff] %v3433_v14  ;;  %v14039_v29 = vsel %vm3340_vm2, 0.0, %v13699_v24  ;;  %v14043_v8 = vsel %vm3340_vm2, 0.0, %v13707_v50  ;;  %v14047_v41 = vsel %vm3340_vm2, 0.0, %v13726_v62 }
 0x633   :  { %v14051_v13 = vsel %vm3340_vm2, 0.0, %v13740_v3  ;;  %3626 = vst [vmem:[#allocation2 + $0x90] sm:$0xff] %v14024_v58  ;;  %3629 = vst [vmem:[#allocation2 + $0xa8] sm:$0xff] %v14028_v43  ;;  %v14058_v14 = vsel %vm3340_vm2, 0.0, %v13755_v45  ;;  %v14062_v50 = vsel %vm3340_vm2, 0.0, %v13763_v40  ;;  %v14066_v62 = vsel %vm3340_vm2, 0.0, %v13782_v30 }
 0x634   :  { %3632 = vst [vmem:[#allocation2 + $0xc0] sm:$0xff] %v14032_v6  ;;  %3705 = vst [vmem:[#allocation2 + $0x338] sm:$0xff] %v3436_v12  ;;  %v3549_v3 = vsel %vm3340_vm2, 0.0, %v13796_v39  ;;  %v14076_v12 = vsel %vm3340_vm2, 0.0, %v13811_v38  ;;  %v14080_v40 = vsel %vm3340_vm2, 0.0, %v13819_v19  ;;  %v14084_v30 = vsel %vm3340_vm2, 0.0, %v13836_v22 }
 0x635   :  { %3635 = vst [vmem:[#allocation2 + $0xd8] sm:$0xff] %v14039_v29  ;;  %3638 = vst [vmem:[#allocation2 + $0xf0] sm:$0xff] %v14043_v8  ;;  %v14088_v39 = vsel %vm3340_vm2, 0.0, %v13850_v44  ;;  %v14095_v38 = vsel %vm3340_vm2, 0.0, %v13864_v51  ;;  %v3555_v19 = vsel %vm3340_vm2, 0.0, %v13872_v7  ;;  %v3556_v22 = vsel %vm3340_vm2, 0.0, %v13891_v17 }
 0x636   :  { %3641 = vst [vmem:[#allocation2 + $0x108] sm:$0xff] %v14047_v41  ;;  %3647 = vst [vmem:[#allocation2 + $0x138] sm:$0xff] %v14051_v13  ;;  %v3557_v44 = vsel %vm3340_vm2, 0.0, %v13905_v4  ;;  %v3559_v51 = vsel %vm3340_vm2, 0.0, %v13926_v49  ;;  %v3560_v7 = vsel %vm3340_vm2, 0.0, %v13941_v61  ;;  %v3561_v17 = vsel %vm3340_vm2, 0.0, %v13952_v55 }
 0x637   :  { %3650 = vst [vmem:[#allocation2 + $0x150] sm:$0xff] %v14058_v14  ;;  %3653 = vst [vmem:[#allocation2 + $0x168] sm:$0xff] %v14062_v50  ;;  %v3562_v4 = vsel %vm3340_vm2, 0.0, %v13963_v42  ;;  %v3564_v49 = vsel %vm3340_vm2, 0.0, %v13985_v21  ;;  %v3565_v61 = vsel %vm3340_vm2, %v13619_v15, 0.0  ;;  %v3566_v55 = vsel %vm3340_vm2, %v13623_v20, 0.0 }
 0x638   :  { %3656 = vst [vmem:[#allocation2 + $0x180] sm:$0xff] %v14066_v62  ;;  %3659 = vst [vmem:[#allocation2 + $0x1c8] sm:$0xff] %v3549_v3  ;;  %v3558_v3 = vsel %vm3340_vm2, 0.0, %v13918_v32  ;;  %v3563_v32 = vsel %vm3340_vm2, 0.0, %v13971_v16  ;;  %v3568_v42 = vsel %vm3340_vm2, %v13631_v35, 0.0  ;;  %v3569_v16 = vsel %vm3340_vm2, %v13647_v33, 0.0 }
 0x639   :  { %3662 = vst [vmem:[#allocation2 + $0x1e0] sm:$0xff] %v14076_v12  ;;  %3665 = vst [vmem:[#allocation2 + $0x1f8] sm:$0xff] %v14080_v40  ;;  %v3570_v15 = vsel %vm3340_vm2, %v13665_v27, 0.0  ;;  %v3571_v21 = vsel %vm3340_vm2, %v13680_v56, 0.0  ;;  %v3572_v20 = vsel %vm3340_vm2, %v13688_v2, 0.0  ;;  %v3574_v35 = vsel %vm3340_vm2, %v13722_v11, 0.0 }
 0x63a   :  { %3668 = vst [vmem:[#allocation2 + $0x210] sm:$0xff] %v14084_v30  ;;  %3671 = vst [vmem:[#allocation2 + $0x228] sm:$0xff] %v14088_v39  ;;  %v3575_v33 = vsel %vm3340_vm2, %v13736_v48, 0.0  ;;  %v3577_v27 = vsel %vm3340_vm2, %v13744_v34, 0.0  ;;  %v3578_v56 = vsel %vm3340_vm2, %v13759_v10, 0.0  ;;  %v19050_v2 = vld [vmem:[#allocation56_spill] sm:$0xff] }
 0x63b   :  { %3674 = vst [vmem:[#allocation2 + $0x240] sm:$0xff] %v14095_v38  ;;  %3677 = vst [vmem:[#allocation2 + $0x258] sm:$0xff] %v3555_v19  ;;  %v3567_v19 = vsel %vm3340_vm2, %v13627_v54, 0.0  ;;  %v3573_v54 = vsel %vm3340_vm2, %v13703_v37, 0.0  ;;  %v3579_v37 = vsel %vm3340_vm2, %v19050_v2, 0.0  ;;  %v19052_v11 = vld [vmem:[#allocation57_spill] sm:$0xff] }
 0x63c   :  { %3680 = vst [vmem:[#allocation2 + $0x270] sm:$0xff] %v3556_v22  ;;  %3683 = vst [vmem:[#allocation2 + $0x288] sm:$0xff] %v3557_v44  ;;  %v19051_v22 = vld [vmem:[#allocation55_spill] sm:$0xff]  ;;  %v3582_v48 = vsel %vm3340_vm2, %v13815_v31, 0.0  ;;  %v19053_v34 = vld [vmem:[#allocation65_spill] sm:$0xff] }
 0x63d   :  { %3686 = vst [vmem:[#allocation2 + $0x2a0] sm:$0xff] %v3558_v3  ;;  %3689 = vst [vmem:[#allocation2 + $0x2b8] sm:$0xff] %v3559_v51  ;;  %v3580_v44 = vsel %vm3340_vm2, %v19051_v22, 0.0  ;;  %v3581_v3 = vsel %vm3340_vm2, %v19052_v11, 0.0  ;;  %v3583_v10 = vsel %vm3340_vm2, %v19053_v34, 0.0  ;;  %v19054_v51 = vld [vmem:[#allocation70_spill] sm:$0xff] }
 0x63e   :  { %3692 = vst [vmem:[#allocation2 + $0x2d0] sm:$0xff] %v3560_v7  ;;  %3695 = vst [vmem:[#allocation2 + $0x2e8] sm:$0xff] %v3561_v17  ;;  %v3584_v7 = vsel %vm3340_vm2, %v19054_v51, 0.0  ;;  %v19055_v17 = vld [vmem:[#allocation72_spill] sm:$0xff]  ;;  %v19057_v31 = vld [vmem:[#allocation85_spill] sm:$0xff]  ;;  %v4150_v22 = vrot.slane %v14007_v1, 2 }
 0x63f   :  { %3613 = vst [vmem:[#allocation2 + $0x28] sm:$0x3] %v3565_v61  ;;  %3698 = vst [vmem:[#allocation2 + $0x300] sm:$0xff] %v3562_v4  ;;  %v3585_v4 = vsel %vm3340_vm2, %v19055_v17, 0.0  ;;  %v3587_v61 = vsel %vm3340_vm2, %v19057_v31, 0.0  ;;  %v19063_v11 = vld [vmem:[#allocation30_spill] sm:$0xff] }
 0x640   :  { %3701 = vst [vmem:[#allocation2 + $0x318] sm:$0xff] %v3563_v32  ;;  %3704 = vst [vmem:[#allocation2 + $0x330] sm:$0xff] %v3564_v49  ;;  %v19056_v32 = vld [vmem:[#allocation77_spill] sm:$0xff]  ;;  %v3921_v17 = vrot.slane %v14000_v0, 1  ;;  %v19067_v31 = vld [vmem:[#allocation31_spill] sm:$0xff] }
 0x641   :  { %3616 = vst [vmem:[#allocation2 + $0x40] sm:$0x3] %v3566_v55  ;;  %3619 = vst [vmem:[#allocation2 + $0x58] sm:$0x3] %v3567_v19  ;;  %v3586_v49 = vsel %vm3340_vm2, %v19056_v32, 0.0  ;;  %v19058_v55 = vld [vmem:[#allocation90_spill] sm:$0xff] }
 0x642   :  { %3622 = vst [vmem:[#allocation2 + $0x70] sm:$0x3] %v3568_v42  ;;  %3625 = vst [vmem:[#allocation2 + $0x88] sm:$0x3] %v3569_v16  ;;  %v3588_v19 = vsel %vm3340_vm2, %v19058_v55, 0.0  ;;  %v19059_v42 = vld [vmem:[#allocation92_spill] sm:$0xff] }
 0x643   :  { %3628 = vst [vmem:[#allocation2 + $0xa0] sm:$0x3] %v3570_v15  ;;  %3631 = vst [vmem:[#allocation2 + $0xb8] sm:$0x3] %v3571_v21  ;;  %v3589_v16 = vsel %vm3340_vm2, %v19059_v42, 0.0  ;;  %v3590_v15 = vsel %vm3340_vm2, %v13922_v57, 0.0 }
 0x644   :  { %3634 = vst [vmem:[#allocation2 + $0xd0] sm:$0x3] %v3572_v20  ;;  %3637 = vst [vmem:[#allocation2 + $0xe8] sm:$0x3] %v3573_v54  ;;  %v3591_v21 = vsel %vm3340_vm2, %v13937_v23, 0.0  ;;  %v3592_v20 = vsel %vm3340_vm2, %v13948_v53, 0.0 }
 0x645   :  { %3640 = vst [vmem:[#allocation2 + $0x100] sm:$0x3] %v3574_v35  ;;  %3643 = vst [vmem:[#allocation2 + $0x118] sm:$0x3] %v3575_v33  ;;  %v3593_v54 = vsel %vm3340_vm2, %v13956_v63, 0.0  ;;  %v3594_v35 = vsel %vm3340_vm2, %v13967_v5, 0.0 }
 0x646   :  { %3649 = vst [vmem:[#allocation2 + $0x148] sm:$0x3] %v3577_v27  ;;  %3652 = vst [vmem:[#allocation2 + $0x160] sm:$0x3] %v3578_v56  ;;  %v3595_v57 = vsel %vm3340_vm2, %v13981_v46, 0.0  ;;  %v3596_v33 = vsel %vm3340_vm2, %v13992_v28, 0.0 }
 0x647   :  { %3655 = vst [vmem:[#allocation2 + $0x178] sm:$0x3] %v3579_v37  ;;  %3658 = vst [vmem:[#allocation2 + $0x190] sm:$0x3] %v3580_v44  ;;  %v3916_v23 = vrot.slane %v13996_v25, 1  ;;  %v19060_v53 = vld [vmem:[#allocation28_spill] sm:$0xff] }
 0x648   :  { %3661 = vst [vmem:[#allocation2 + $0x1d8] sm:$0x3] %v3581_v3  ;;  %3664 = vst [vmem:[#allocation2 + $0x1f0] sm:$0x3] %v3582_v48  ;;  %v3917_v63 = vrot.slane %v19060_v53, 1  ;;  %v4145_v5 = vrot.slane %v14000_v0, 2 }
 0x649   :  { %3667 = vst [vmem:[#allocation2 + $0x208] sm:$0x3] %v3583_v10  ;;  %3670 = vst [vmem:[#allocation2 + $0x220] sm:$0x3] %v3584_v7  ;;  %v3712_v27 = vld [vmem:[#allocation2 + $0x28] sm:$0x3] }
 0x64a   :  { %3673 = vst [vmem:[#allocation2 + $0x238] sm:$0x3] %v3585_v4  ;;  %3676 = vst [vmem:[#allocation2 + $0x250] sm:$0x3] %v3586_v49  ;;  %v19061_v56 = vld [vmem:[#allocation29_spill] sm:$0xff]  ;;  %v3919_v46 = vrot.slane %v3712_v27, 1  ;;  %v14190_v28 = vsel %vm271_vm0, %v3916_v23, %v3917_v63 }
 0x64b   :  { %3679 = vst [vmem:[#allocation2 + $0x268] sm:$0x3] %v3587_v61  ;;  %3682 = vst [vmem:[#allocation2 + $0x280] sm:$0x3] %v3588_v19  ;;  %v4146_v2 = vrot.slane %v19061_v56, 2  ;;  %v4151_v3 = vrot.slane %v19063_v11, 2  ;;  %4645 = vmatprep.mubr.f32.mxu1 %v14190_v28 }
 0x64c   :  { %3685 = vst [vmem:[#allocation2 + $0x298] sm:$0x3] %v3589_v16  ;;  %3688 = vst [vmem:[#allocation2 + $0x2b0] sm:$0x3] %v3590_v15  ;;  %v3715_v37 = vld [vmem:[#allocation2 + $0x40] sm:$0x3]  ;;  %v14200_v34 = vsel %vm271_vm0, %v3917_v63, %v3919_v46  ;;  %9924 = vmatmul.mubr.msk.f32.gmra.mrb[44].mxu1 %vm14204_vm3, %v13617_v26 }
 0x64d   :  { %3691 = vst [vmem:[#allocation2 + $0x2c8] sm:$0x3] %v3591_v21  ;;  %3694 = vst [vmem:[#allocation2 + $0x2e0] sm:$0x3] %v3592_v20  ;;  %v4148_v44 = vrot.slane %v3715_v37, 2  ;;  %v14197_v48 = vsel %vm496_vm1, %v4145_v5, %v4146_v2  ;;  %v3922_v4 = vrot.slane %v19061_v56, 1  ;;  %4650 = vmatprep.mubr.f32.mxu1 %v14200_v34  ;;  %v14220_v32 = vsel %vm496_vm1, %v4150_v22, %v4151_v3 }
 0x64e   :  { %3697 = vst [vmem:[#allocation2 + $0x2f8] sm:$0x3] %v3593_v54  ;;  %3700 = vst [vmem:[#allocation2 + $0x310] sm:$0x3] %v3594_v35  ;;  %v14193_v25 = vld [vmem:[#allocation2 + $0x58] sm:$0x3]  ;;  %8279 = vmatprep.mubr.f32.mxu0 %v14197_v48 }
 0x64f   :  { %3703 = vst [vmem:[#allocation2 + $0x328] sm:$0x3] %v3595_v57  ;;  %3706 = vst [vmem:[#allocation2 + $0x340] sm:$0x3] %v3596_v33  ;;  %v14212_v51 = vsel %vm496_vm1, %v4146_v2, %v4148_v44  ;;  %v4153_v7 = vrot.slane %v14193_v25, 2  ;;  %v4155_v49 = vrot.slane %v14011_v36, 2  ;;  %v14232_v55 = vsel %vm271_vm0, %v3921_v17, %v3922_v4 }
 0x650   :  { %19062 = vst [vmem:[#allocation95_spill] sm:$0xff] %v14190_v28  ;;  %19064 = vst [vmem:[#allocation97_spill] sm:$0xff] %v14200_v34  ;;  %8280 = vmatmul.mubr.f32.vlgmr.msra.gmra.mrb[152].mxu0 %v14212_v51  ;;  %v4156_v26 = vrot.slane %v19067_v31, 2  ;;  %v14224_v61 = vld [vmem:[#allocation2 + $0x70] sm:$0x3]  ;;  %4651 = vmatmul.mubr.f32.gmra.mrb[46].mxu1 %v19060_v53  ;;  %v3924_v42 = vrot.slane %v3715_v37, 1 }
 0x651   :  { %8282 = vmatprep.mubr.f32.mxu0 %v14220_v32  ;;  %v14229_v0 = vsel %vm496_vm1, %v4151_v3, %v4153_v7  ;;  %19068 = vst [vmem:[#allocation100_spill] sm:$0xff] %v14232_v55  ;;  %v4158_v19 = vrot.slane %v14224_v61, 2  ;;  %v14235_v16 = vld [vmem:[#allocation2 + $0x88] sm:$0x3]  ;;  %4655 = vmatprep.mubr.f32.mxu1 %v14232_v55  ;;  %v4160_v21 = vrot.slane %v14015_v59, 2  ;;  %v3926_v23 = vrot.slane %v14007_v1, 1 }
 0x652   :  { %v14240_v15 = vsel %vm496_vm1, %v4155_v49, %v4156_v26  ;;  %v19069_v20 = vld [vmem:[#allocation33_spill] sm:$0xff]  ;;  %v4163_v35 = vrot.slane %v14235_v16, 2  ;;  %v14253_v33 = vsel %vm271_vm0, %v3922_v4, %v3924_v42  ;;  %v3927_v53 = vrot.slane %v19063_v11, 1  ;;  %v14264_v2 = vld [vmem:[#allocation2 + $0xa0] sm:$0x3]  ;;  %v4465_v4 = vld [vmem:[#allocation6 + $0x130] sm:$0xff] }
 0x653   :  { %v4161_v54 = vrot.slane %v19069_v20, 2  ;;  %v14250_v57 = vsel %vm496_vm1, %v4156_v26, %v4158_v19  ;;  %19070 = vst [vmem:[#allocation102_spill] sm:$0xff] %v14253_v33  ;;  %v4165_v27 = vrot.slane %v14024_v58, 2  ;;  %v4168_v46 = vrot.slane %v14264_v2, 2  ;;  %v14276_v44 = vld [vmem:[#allocation2 + $0xb8] sm:$0x3] }
 0x654   :  { %8283 = vmatmul.mubr.f32.gmra.mrb[154].mxu0 %v14229_v0  ;;  %9926 = vmatmul.mubr.msk.f32.gmra.mrb[48].mxu1 %vm14204_vm3, %v13621_v52  ;;  %v19071_v52 = vld [vmem:[#allocation35_spill] sm:$0xff]  ;;  %v14272_v37 = vsel %vm271_vm0, %v3926_v23, %v3927_v53  ;;  %v3929_v22 = vrot.slane %v14193_v25, 1  ;;  %v19073_v7 = vld [vmem:[#allocation37_spill] sm:$0xff]  ;;  %v4173_v26 = vrot.slane %v14276_v44, 2  ;;  %v3931_v25 = vrot.slane %v14011_v36, 1  ;;  %v19075_v23 = vld [vmem:[#allocation38_spill] sm:$0xff] }
 0x655   :  { %8285 = vmatprep.mubr.f32.mxu0 %v14240_v15  ;;  %4660 = vmatprep.mubr.f32.mxu1 %v14253_v33  ;;  %v14260_v63 = vsel %vm496_vm1, %v4160_v21, %v4161_v54  ;;  %v4166_v5 = vrot.slane %v19071_v52, 2  ;;  %v14269_v1 = vsel %vm496_vm1, %v4161_v54, %v4163_v35  ;;  %19072 = vst [vmem:[#allocation105_spill] sm:$0xff] %v14272_v37  ;;  %v4171_v17 = vrot.slane %v19073_v7, 2  ;;  %v4466_v49 = vld [vmem:[#allocation6 + $0x138] sm:$0xff]  ;;  %v14298_v54 = vld [vmem:[#allocation2 + $0xd0] sm:$0x3] }
 0x656   :  { %v14295_v42 = vsel %vm271_vm0, %v3927_v53, %v3929_v22  ;;  %v3932_v21 = vrot.slane %v19067_v31, 1  ;;  %v8785_v35 = vpack.c.bf16 %v4466_v49, %v4465_v4  ;;  %v4178_v53 = vrot.slane %v14298_v54, 2  ;;  %v14318_v4 = vld [vmem:[#allocation2 + $0xe8] sm:$0x3]  ;;  %v14340_v33 = vld [vmem:[#allocation2 + $0x100] sm:$0x3] }
 0x657   :  { %v14281_v3 = vsel %vm496_vm1, %v4165_v27, %v4166_v5  ;;  %v14292_v19 = vsel %vm496_vm1, %v4166_v5, %v4168_v46  ;;  %19074 = vst [vmem:[#allocation107_spill] sm:$0xff] %v14295_v42  ;;  %v4176_v27 = vrot.slane %v19075_v23, 2  ;;  %v19076_v5 = vmov 0.0|0.0  }
 0x658   :  { %8286 = vmatmul.mubr.f32.gmra.mrb[156].mxu0 %v14250_v57  ;;  %4661 = vmatmul.mubr.f32.gmra.mrb[50].mxu1 %v19061_v56  ;;  %v4170_v56 = vrot.slane %v14028_v43, 2  ;;  %v14312_v46 = vsel %vm496_vm1, %v4171_v17, %v4173_v26  ;;  %v14315_v22 = vsel %vm271_vm0, %v3931_v25, %v3932_v21  ;;  %v4468_v26 = vld [vmem:[#allocation6 + $0x148] sm:$0xff] }
 0x659   :  { %8288 = vmatprep.mubr.f32.mxu0 %v14260_v63  ;;  %4665 = vmatprep.mubr.f32.mxu1 %v14272_v37  ;;  %19077 = vst [vmem:[#allocation108_spill] sm:$0xff] %v14312_v46  ;;  %19078 = vst [vmem:[#allocation110_spill] sm:$0xff] %v14315_v22  ;;  %v14329_v25 = vsel %vm496_vm1, %v4176_v27, %v4178_v53  ;;  %v3937_v37 = vrot.slane %v19069_v20, 1  ;;  %v4185_v53 = vrot.slane %v14043_v8, 2 }
 0x65a   :  { %v14303_v36 = vsel %vm496_vm1, %v4170_v56, %v4171_v17  ;;  %8786 = vmatpush1.bf16.msra.mxu1 %v8785_v35  ;;  %v3934_v56 = vrot.slane %v14224_v61, 1  ;;  %v4180_v35 = vrot.slane %v14039_v29, 2  ;;  %v4467_v17 = vld [vmem:[#allocation6 + $0x140] sm:$0xff]  ;;  %19081 = vst [vmem:[#allocation113_spill] sm:$0xff] %v14329_v25  ;;  %v4183_v61 = vrot.slane %v14318_v4, 2 }
 0x65b   :  { %8787 = vmatprep.subr.bf16.mxu1 %v19076_v5  ;;  %v8788_v55 = vpack.c.bf16 %v4468_v26, %v4467_v17  ;;  %v14360_v17 = vld [vmem:[#allocation2 + $0x118] sm:$0x3]  ;;  %v4190_v26 = vrot.slane %v14047_v41, 2 }
 0x65c   :  { %8289 = vmatmul.mubr.f32.gmra.mrb[158].mxu0 %v14269_v1  ;;  %9928 = vmatmul.mubr.msk.f32.gmra.mrb[52].mxu1 %vm14204_vm3, %v13625_v9  ;;  %v4175_v9 = vrot.slane %v14032_v6, 2 }
 0x65d   :  { %8291 = vmatprep.mubr.f32.mxu0 %v14281_v3  ;;  %4670 = vmatprep.mubr.f32.mxu1 %v14295_v42 }
 0x65e   :  { %v14323_v49 = vsel %vm496_vm1, %v4175_v9, %v4176_v27  ;;  %v14336_v9 = vsel %vm271_vm0, %v3932_v21, %v3934_v56  ;;  %8789 = vmatpush1.bf16.msra.mxu1 %v8788_v55 }
 0x65f   :  { %19079 = vst [vmem:[#allocation111_spill] sm:$0xff] %v14323_v49  ;;  %19082 = vst [vmem:[#allocation114_spill] sm:$0xff] %v14336_v9  ;;  %8790 = vmatprep.subr.bf16.mxu1 %v19076_v5 }
 0x660   :  { %8292 = vmatmul.mubr.f32.gmra.mrb[160].mxu0 %v14292_v19  ;;  %4671 = vmatmul.mubr.f32.gmra.mrb[54].mxu1 %v19063_v11  ;;  %v19080_v11 = vld [vmem:[#allocation40_spill] sm:$0xff] }
 0x661   :  { %8294 = vmatprep.mubr.f32.mxu0 %v14303_v36  ;;  %4675 = vmatprep.mubr.f32.mxu1 %v14315_v22  ;;  %v4181_v42 = vrot.slane %v19080_v11, 2  ;;  %v3936_v22 = vrot.slane %v14015_v59, 1  ;;  %v4188_v59 = vrot.slane %v14340_v33, 2 }
 0x663   :  { %v14345_v27 = vsel %vm496_vm1, %v4180_v35, %v4181_v42  ;;  %v14354_v21 = vsel %vm496_vm1, %v4181_v42, %v4183_v61  ;;  %v14357_v56 = vsel %vm271_vm0, %v3936_v22, %v3937_v37  ;;  %v3939_v35 = vrot.slane %v14235_v16, 1  ;;  %v4469_v42 = vld [vmem:[#allocation6 + $0x150] sm:$0xff]  ;;  %v4470_v61 = vld [vmem:[#allocation6 + $0x158] sm:$0xff]  ;;  %v14370_v22 = vld [vmem:[#allocation2 + $0x120] sm:$0xff] }
 0x664   :  { %8295 = vmatmul.mubr.f32.gmra.mrb[162].mxu0 %v14312_v46  ;;  %9930 = vmatmul.mubr.msk.f32.gmra.mrb[56].mxu1 %vm14204_vm3, %v13629_v60  ;;  %19083 = vst [vmem:[#allocation53_spill] sm:$0xff] %v14345_v27  ;;  %v19084_v60 = vld [vmem:[#allocation58_spill] sm:$0xff]  ;;  %19085 = vst [vmem:[#allocation115_spill] sm:$0xff] %v14354_v21  ;;  %v14372_v16 = vld [vmem:[#allocation2 + $0x128] sm:$0xff] }
 0x665   :  { %8297 = vmatprep.mubr.f32.mxu0 %v14323_v49  ;;  %4680 = vmatprep.mubr.f32.mxu1 %v14336_v9  ;;  %v4186_v34 = vrot.slane %v19084_v60, 2  ;;  %19086 = vst [vmem:[#allocation116_spill] sm:$0xff] %v14357_v56 }
 0x667   :  { %v14365_v55 = vsel %vm496_vm1, %v4185_v53, %v4186_v34  ;;  %v14375_v28 = vsel %vm496_vm1, %v4186_v34, %v4188_v59  ;;  %v14382_v53 = vsel %vm271_vm0, %v3937_v37, %v3939_v35  ;;  %v4195_v59 = vrot.slane %v14370_v22, 2 }
 0x668   :  { %8298 = vmatmul.mubr.f32.gmra.mrb[164].mxu0 %v14329_v25  ;;  %4681 = vmatmul.mubr.f32.gmra.mrb[58].mxu1 %v19067_v31  ;;  %19087 = vst [vmem:[#allocation117_spill] sm:$0xff] %v14365_v55  ;;  %v19088_v31 = vld [vmem:[#allocation59_spill] sm:$0xff]  ;;  %19089 = vst [vmem:[#allocation118_spill] sm:$0xff] %v14375_v28  ;;  %v4196_v25 = vrot.slane %v14372_v16, 2 }
 0x669   :  { %8300 = vmatprep.mubr.f32.mxu0 %v14345_v27  ;;  %4685 = vmatprep.mubr.f32.mxu1 %v14357_v56  ;;  %v4191_v9 = vrot.slane %v19088_v31, 2  ;;  %v4193_v56 = vrot.slane %v14360_v17, 2  ;;  %19090 = vst [vmem:[#allocation119_spill] sm:$0xff] %v14382_v53  ;;  %v8791_v27 = vpack.c.bf16 %v4470_v61, %v4469_v42  ;;  %v14406_v42 = vld [vmem:[#allocation2 + $0x148] sm:$0x3]  ;;  %v4471_v61 = vld [vmem:[#allocation6 + $0x160] sm:$0xff] }
 0x66b   :  { %v14389_v34 = vsel %vm496_vm1, %v4190_v26, %v4191_v9  ;;  %8792 = vmatpush1.bf16.msra.mxu1 %v8791_v27  ;;  %v3944_v26 = vrot.slane %v14264_v2, 1  ;;  %v19095_v27 = vld [vmem:[#allocation63_spill] sm:$0xff] }
 0x66c   :  { %8301 = vmatmul.mubr.f32.gmra.mrb[166].mxu0 %v14354_v21  ;;  %9932 = vmatmul.mubr.msk.f32.gmra.mrb[60].mxu1 %vm14204_vm3, %v13633_v18  ;;  %v3941_v21 = vrot.slane %v14024_v58, 1  ;;  %19091 = vst [vmem:[#allocation120_spill] sm:$0xff] %v14389_v34  ;;  %v14393_v18 = vld [vmem:[#allocation2 + $0x130] sm:$0x3]  ;;  %v14399_v58 = vsel %vm496_vm1, %v4191_v9, %v4193_v56  ;;  %v4200_v9 = vrot.slane %v14051_v13, 2  ;;  %v4203_v56 = vrot.slane %v14406_v42, 2 }
 0x66d   :  { %8303 = vmatprep.mubr.f32.mxu0 %v14365_v55  ;;  %v3942_v55 = vrot.slane %v19071_v52, 1  ;;  %4690 = vmatprep.mubr.f32.mxu1 %v14382_v53  ;;  %19092 = vst [vmem:[#allocation121_spill] sm:$0xff] %v14399_v58  ;;  %v4198_v35 = vrot.slane %v14393_v18, 2  ;;  %v4472_v53 = vld [vmem:[#allocation6 + $0x168] sm:$0xff] }
 0x66e   :  { %8793 = vmatprep.subr.bf16.mxu1 %v19076_v5  ;;  %v8794_v2 = vpack.c.bf16 %v4472_v53, %v4471_v61  ;;  %v4205_v61 = vrot.slane %v14058_v14, 2 }
 0x66f   :  { %v14402_v37 = vsel %vm271_vm0, %v3941_v21, %v3942_v55  ;;  %v4201_v21 = vrot.slane %v19095_v27, 2 }
 0x670   :  { %8304 = vmatmul.mubr.f32.gmra.mrb[168].mxu0 %v14375_v28  ;;  %4691 = vmatmul.mubr.f32.gmra.mrb[62].mxu1 %v19069_v20  ;;  %19093 = vst [vmem:[#allocation122_spill] sm:$0xff] %v14402_v37  ;;  %v14411_v20 = vsel %vm496_vm1, %v4195_v59, %v4196_v25  ;;  %v3946_v59 = vrot.slane %v14028_v43, 1  ;;  %v14809_v28 = vld [vmem:[#allocation2 + $0x320] sm:$0xff] }
 0x671   :  { %8306 = vmatprep.mubr.f32.mxu0 %v14389_v34  ;;  %4695 = vmatprep.mubr.f32.mxu1 %v14402_v37  ;;  %19094 = vst [vmem:[#allocation123_spill] sm:$0xff] %v14411_v20  ;;  %v14424_v37 = vsel %vm271_vm0, %v3942_v55, %v3944_v26  ;;  %v3947_v34 = vrot.slane %v19073_v7, 1  ;;  %v14431_v53 = vsel %vm496_vm1, %v4200_v9, %v4201_v21  ;;  %v3949_v26 = vrot.slane %v14276_v44, 1  ;;  %v14448_v9 = vld [vmem:[#allocation2 + $0x178] sm:$0x3] }
 0x672   :  { %19097 = vst [vmem:[#allocation125_spill] sm:$0xff] %v14424_v37  ;;  %19098 = vst [vmem:[#allocation126_spill] sm:$0xff] %v14431_v53  ;;  %8795 = vmatpush1.bf16.msra.mxu1 %v8794_v2  ;;  %v14441_v43 = vsel %vm496_vm1, %v4201_v21, %v4203_v56  ;;  %v4210_v21 = vrot.slane %v14062_v50, 2  ;;  %v19103_v56 = vld [vmem:[#allocation60_spill] sm:$0xff]  ;;  %v3952_v50 = vrot.slane %v19075_v23, 1  ;;  %v3989_v49 = vrot.slane %v14448_v9, 1 }
 0x673   :  { %8796 = vmatprep.subr.bf16.mxu1 %v19076_v5  ;;  %19100 = vst [vmem:[#allocation127_spill] sm:$0xff] %v14441_v43  ;;  %v14444_v55 = vsel %vm271_vm0, %v3946_v59, %v3947_v34  ;;  %v4211_v2 = vrot.slane %v19103_v56, 2  ;;  %v4213_v59 = vrot.slane %v14448_v9, 2 }
 0x674   :  { %8307 = vmatmul.mubr.f32.gmra.mrb[170].mxu0 %v14399_v58  ;;  %9934 = vmatmul.mubr.msk.f32.gmra.mrb[64].mxu1 %vm14204_vm3, %v13651_v47  ;;  %v14421_v58 = vsel %vm496_vm1, %v4196_v25, %v4198_v35  ;;  %v19099_v47 = vld [vmem:[#allocation52_spill] sm:$0xff]  ;;  %19101 = vst [vmem:[#allocation128_spill] sm:$0xff] %v14444_v55 }
 0x675   :  { %8309 = vmatprep.mubr.f32.mxu0 %v14411_v20  ;;  %19096 = vst [vmem:[#allocation124_spill] sm:$0xff] %v14421_v58  ;;  %4700 = vmatprep.mubr.f32.mxu1 %v14424_v37  ;;  %v4206_v27 = vrot.slane %v19099_v47, 2  ;;  %v14435_v25 = vld [vmem:[#allocation2 + $0x160] sm:$0x3]  ;;  %v4473_v47 = vld [vmem:[#allocation6 + $0x170] sm:$0xff]  ;;  %v4474_v37 = vld [vmem:[#allocation6 + $0x178] sm:$0xff] }
 0x676   :  { %v4208_v35 = vrot.slane %v14435_v25, 2  ;;  %v8797_v44 = vpack.c.bf16 %v4474_v37, %v4473_v47  ;;  %v14473_v37 = vsel %vm496_vm1, %v4210_v21, %v4211_v2  ;;  %v4379_v47 = vrot.slane %v14066_v62, 2  ;;  %v14807_v20 = vld [vmem:[#allocation2 + $0x318] sm:$0xff] }
 0x677   :  { %19107 = vst [vmem:[#allocation132_spill] sm:$0xff] %v14473_v37  ;;  %v14486_v62 = vsel %vm496_vm1, %v4211_v2, %v4213_v59  ;;  %v4478_v2 = vld [vmem:[#allocation6 + $0x198] sm:$0xff]  ;;  %v19112_v59 = vld [vmem:[#allocation34_spill] sm:$0xff] }
 0x678   :  { %8310 = vmatmul.mubr.f32.gmra.mrb[172].mxu0 %v14421_v58  ;;  %4701 = vmatmul.mubr.f32.gmra.mrb[66].mxu1 %v19071_v52  ;;  %v14453_v52 = vsel %vm496_vm1, %v4205_v61, %v4206_v27  ;;  %v3951_v61 = vrot.slane %v14032_v6, 1  ;;  %19109 = vst [vmem:[#allocation133_spill] sm:$0xff] %v14486_v62  ;;  %v14794_v58 = vld [vmem:[#allocation2 + $0x170] sm:$0xff] }
 0x679   :  { %8312 = vmatprep.mubr.f32.mxu0 %v14431_v53  ;;  %4705 = vmatprep.mubr.f32.mxu1 %v14444_v55  ;;  %19102 = vst [vmem:[#allocation129_spill] sm:$0xff] %v14453_v52  ;;  %v19104_v53 = vld [vmem:[#allocation32_spill] sm:$0xff]  ;;  %v14466_v55 = vsel %vm271_vm0, %v3947_v34, %v3949_v26 }
 0x67a   :  { %19106 = vst [vmem:[#allocation131_spill] sm:$0xff] %v14466_v55  ;;  %8798 = vmatpush1.bf16.msra.mxu1 %v8797_v44  ;;  %v14478_v34 = vld [vmem:[#allocation2] sm:$0xff]  ;;  %v14489_v21 = vsel %vm271_vm0, %v3951_v61, %v3952_v50  ;;  %v3954_v44 = vrot.slane %v14298_v54, 1 }
 0x67b   :  { %v14481_v6 = vrot.slane %v14478_v34, 2  ;;  %8799 = vmatprep.subr.bf16.mxu1 %v19076_v5  ;;  %v4475_v26 = vld [vmem:[#allocation6 + $0x180] sm:$0xff]  ;;  %19110 = vst [vmem:[#allocation134_spill] sm:$0xff] %v14489_v21  ;;  %v3991_v9 = vrot.slane %v14478_v34, 1 }
 0x67c   :  { %8313 = vmatmul.mubr.f32.gmra.mrb[174].mxu0 %v14441_v43  ;;  %9936 = vmatmul.mubr.msk.f32.gmra.mrb[68].mxu1 %vm14204_vm3, %v19104_v53  ;;  %v14463_v43 = vsel %vm496_vm1, %v4206_v27, %v4208_v35  ;;  %v19108_v53 = vld [vmem:[#allocation62_spill] sm:$0xff]  ;;  %v3760_v35 = vld [vmem:[#allocation2 + $0x1a8] sm:$0x3]  ;;  %v14505_v54 = vsel %vm271_vm0, %v3952_v50, %v3954_v44 }
 0x67d   :  { %8315 = vmatprep.mubr.f32.mxu0 %v14453_v52  ;;  %19105 = vst [vmem:[#allocation130_spill] sm:$0xff] %v14463_v43  ;;  %4710 = vmatprep.mubr.f32.mxu1 %v14466_v55  ;;  %v4380_v56 = vrot.slane %v19108_v53, 2  ;;  %v3757_v27 = vld [vmem:[#allocation2 + $0x190] sm:$0x3]  ;;  %v4476_v55 = vld [vmem:[#allocation6 + $0x188] sm:$0xff]  ;;  %19114 = vst [vmem:[#allocation137_spill] sm:$0xff] %v14505_v54 }
 0x67e   :  { %v4382_v53 = vrot.slane %v3757_v27, 2  ;;  %v4477_v52 = vld [vmem:[#allocation6 + $0x190] sm:$0xff]  ;;  %v3956_v27 = vrot.slane %v14039_v29, 1  ;;  %v4480_v44 = vld [vmem:[#allocation6 + $0x1a8] sm:$0xff] }
 0x680   :  { %8316 = vmatmul.mubr.f32.gmra.mrb[176].mxu0 %v14463_v43  ;;  %4711 = vmatmul.mubr.f32.gmra.mrb[70].mxu1 %v19073_v7  ;;  %v4416_v43 = vrot.slane %v3760_v35, 2  ;;  %v8800_v7 = vpack.c.bf16 %v4476_v55, %v4475_v26  ;;  %v14502_v61 = vsel %vm496_vm1, %v4380_v56, %v4382_v53  ;;  %v4225_v55 = vrot.slane %v14076_v12, 2  ;;  %v19115_v35 = vld [vmem:[#allocation67_spill] sm:$0xff]  ;;  %v4479_v53 = vld [vmem:[#allocation6 + $0x1a0] sm:$0xff] }
 0x681   :  { %8318 = vmatprep.mubr.f32.mxu0 %v14473_v37  ;;  %4715 = vmatprep.mubr.f32.mxu1 %v14489_v21  ;;  %v14495_v37 = vsel %vm496_vm1, %v4379_v47, %v4380_v56  ;;  %19113 = vst [vmem:[#allocation136_spill] sm:$0xff] %v14502_v61  ;;  %v3957_v47 = vrot.slane %v19080_v11, 1  ;;  %v14509_v21 = vld [vmem:[#allocation2 + $0x1f0] sm:$0x3]  ;;  %v4226_v26 = vrot.slane %v19115_v35, 2  ;;  %v8803_v56 = vpack.c.bf16 %v4478_v2, %v4477_v52 }
 0x682   :  { %19111 = vst [vmem:[#allocation135_spill] sm:$0xff] %v14495_v37  ;;  %v4417_v50 = vsel %vm496_vm1, %v14481_v6, %v4416_v43  ;;  %8801 = vmatpush1.bf16.msra.mxu1 %v8800_v7  ;;  %v4228_v29 = vrot.slane %v14509_v21, 2  ;;  %v3959_v12 = vrot.slane %v14318_v4, 1  ;;  %v4230_v52 = vrot.slane %v14080_v40, 2  ;;  %v19118_v7 = vld [vmem:[#allocation75_spill] sm:$0xff]  ;;  %v4481_v4 = vld [vmem:[#allocation6 + $0x1b0] sm:$0xff] }
 0x683   :  { %8802 = vmatprep.subr.bf16.mxu1 %v19076_v5  ;;  %v14527_v43 = vsel %vm496_vm1, %v4225_v55, %v4226_v26  ;;  %v4231_v2 = vrot.slane %v19118_v7, 2  ;;  %v14531_v35 = vld [vmem:[#allocation2 + $0x208] sm:$0x3]  ;;  %v3961_v7 = vrot.slane %v14043_v8, 1 }
 0x684   :  { %8319 = vmatmul.mubr.f32.gmra.mrb[178].mxu0 %v14486_v62  ;;  %9938 = vmatmul.mubr.msk.f32.gmra.mrb[72].mxu1 %vm14204_vm3, %v19112_v59  ;;  %v14522_v59 = vsel %vm271_vm0, %v3956_v27, %v3957_v47  ;;  %19117 = vst [vmem:[#allocation61_spill] sm:$0xff] %v14527_v43  ;;  %v14535_v27 = vsel %vm496_vm1, %v4226_v26, %v4228_v29  ;;  %v4233_v55 = vrot.slane %v14531_v35, 2  ;;  %v19122_v29 = vld [vmem:[#allocation80_spill] sm:$0xff] }
 0x685   :  { %8321 = vmatprep.mubr.f32.mxu0 %v14495_v37  ;;  %4720 = vmatprep.mubr.f32.mxu1 %v14505_v54  ;;  %19116 = vst [vmem:[#allocation138_spill] sm:$0xff] %v14522_v59  ;;  %19119 = vst [vmem:[#allocation68_spill] sm:$0xff] %v14535_v27  ;;  %v14542_v40 = vsel %vm271_vm0, %v3957_v47, %v3959_v12  ;;  %v14552_v26 = vsel %vm496_vm1, %v4230_v52, %v4231_v2  ;;  %v4236_v47 = vrot.slane %v19122_v29, 2  ;;  %v4483_v12 = vld [vmem:[#allocation6 + $0x1c0] sm:$0xff] }
 0x686   :  { %8804 = vmatpush1.bf16.msra.mxu1 %v8803_v56  ;;  %19120 = vst [vmem:[#allocation64_spill] sm:$0xff] %v14542_v40  ;;  %v3962_v56 = vrot.slane %v19084_v60, 1  ;;  %19121 = vst [vmem:[#allocation69_spill] sm:$0xff] %v14552_v26  ;;  %v14561_v37 = vsel %vm496_vm1, %v4231_v2, %v4233_v55 }
 0x687   :  { %8805 = vmatprep.subr.bf16.mxu1 %v19076_v5  ;;  %19123 = vst [vmem:[#allocation66_spill] sm:$0xff] %v14561_v37 }
 0x688   :  { %8322 = vmatmul.mubr.f32.gmra.mrb[180].mxu0 %v14502_v61  ;;  %4721 = vmatmul.mubr.f32.gmra.mrb[74].mxu1 %v19075_v23  ;;  %v8806_v23 = vpack.c.bf16 %v4480_v44, %v4479_v53  ;;  %v14547_v53 = vld [vmem:[#allocation2 + $0x220] sm:$0x3]  ;;  %v4484_v61 = vld [vmem:[#allocation6 + $0x1c8] sm:$0xff]  ;;  %v14564_v52 = vsel %vm271_vm0, %v3961_v7, %v3962_v56 }
 0x689   :  { %8324 = vmatprep.mubr.f32.mxu0 %v14481_v6  ;;  %4725 = vmatprep.mubr.f32.mxu1 %v14522_v59  ;;  %v4238_v8 = vrot.slane %v14547_v53, 2  ;;  %19124 = vst [vmem:[#allocation71_spill] sm:$0xff] %v14564_v52  ;;  %v8812_v2 = vpack.c.bf16 %v4484_v61, %v4483_v12  ;;  %v14597_v12 = vld [vmem:[#allocation2 + $0x250] sm:$0x3] }
 0x68a   :  { %8807 = vmatpush1.bf16.msra.mxu1 %v8806_v23 }
 0x68b   :  { %8808 = vmatprep.subr.bf16.mxu1 %v19076_v5  ;;  %v14578_v55 = vsel %vm496_vm1, %v4236_v47, %v4238_v8 }
 0x68c   :  { %8325 = vmatmul.mubr.f32.gmra.mrb[182].mxu0 %v4417_v50  ;;  %v4482_v50 = vld [vmem:[#allocation6 + $0x1b8] sm:$0xff]  ;;  %9940 = vmatmul.mubr.msk.f32.gmra.mrb[76].mxu1 %vm14204_vm3, %v13699_v24  ;;  %v4235_v24 = vrot.slane %v14084_v30, 2  ;;  %v3964_v30 = vrot.slane %v14340_v33, 1  ;;  %19127 = vst [vmem:[#allocation76_spill] sm:$0xff] %v14578_v55  ;;  %v19128_v33 = vld [vmem:[#allocation36_spill] sm:$0xff] }
 0x68d   :  { %8327 = vmatprep.mubr.f32.mxu0 %v14527_v43  ;;  %4730 = vmatprep.mubr.f32.mxu1 %v14542_v40  ;;  %v8809_v44 = vpack.c.bf16 %v4482_v50, %v4481_v4  ;;  %v4240_v4 = vrot.slane %v14088_v39, 2  ;;  %v19126_v50 = vld [vmem:[#allocation82_spill] sm:$0xff]  ;;  %v3972_v40 = vrot.slane %v14372_v16, 1  ;;  %v14767_v43 = vld [vmem:[#allocation2 + $0x2f8] sm:$0x3] }
 0x68e   :  { %v14570_v23 = vsel %vm496_vm1, %v4235_v24, %v4236_v47  ;;  %v4241_v29 = vrot.slane %v19126_v50, 2  ;;  %v14585_v7 = vsel %vm271_vm0, %v3962_v56, %v3964_v30  ;;  %v3966_v24 = vrot.slane %v14047_v41, 1  ;;  %v4485_v56 = vld [vmem:[#allocation6 + $0x1d0] sm:$0xff]  ;;  %v4486_v30 = vld [vmem:[#allocation6 + $0x1d8] sm:$0xff] }
 0x68f   :  { %19125 = vst [vmem:[#allocation73_spill] sm:$0xff] %v14570_v23  ;;  %8810 = vmatpush1.bf16.msra.mxu1 %v8809_v44  ;;  %19129 = vst [vmem:[#allocation79_spill] sm:$0xff] %v14585_v7  ;;  %v3967_v50 = vrot.slane %v19088_v31, 1  ;;  %v4245_v47 = vrot.slane %v14095_v38, 2  ;;  %v19131_v44 = vld [vmem:[#allocation87_spill] sm:$0xff]  ;;  %v14602_v31 = vld [vmem:[#allocation2 + $0x260] sm:$0xff] }
 0x690   :  { %8328 = vmatmul.mubr.f32.gmra.mrb[184].mxu0 %v14535_v27  ;;  %4731 = vmatmul.mubr.f32.gmra.mrb[78].mxu1 %v19080_v11  ;;  %v14574_v11 = vld [vmem:[#allocation2 + $0x238] sm:$0x3]  ;;  %v14593_v61 = vsel %vm496_vm1, %v4240_v4, %v4241_v29  ;;  %v4246_v8 = vrot.slane %v19131_v44, 2  ;;  %v4248_v44 = vrot.slane %v14597_v12, 2  ;;  %v14715_v27 = vld [vmem:[#allocation2 + $0x2c8] sm:$0x3] }
 0x691   :  { %8330 = vmatprep.mubr.f32.mxu0 %v14552_v26  ;;  %4735 = vmatprep.mubr.f32.mxu1 %v14564_v52  ;;  %v4243_v39 = vrot.slane %v14574_v11, 2  ;;  %19130 = vst [vmem:[#allocation81_spill] sm:$0xff] %v14593_v61  ;;  %v14600_v41 = vld [vmem:[#allocation2 + $0x258] sm:$0xff]  ;;  %v14610_v4 = vsel %vm271_vm0, %v3966_v24, %v3967_v50  ;;  %v14614_v52 = vld [vmem:[#allocation2 + $0x268] sm:$0x3]  ;;  %v3979_v26 = vrot.slane %v14406_v42, 1 }
 0x692   :  { %8811 = vmatprep.subr.bf16.mxu1 %v19076_v5  ;;  %19133 = vst [vmem:[#allocation98_spill] sm:$0xff] %v14610_v4  ;;  %v14626_v24 = vld [vmem:[#allocation2 + $0x278] sm:$0xff]  ;;  %v4273_v42 = vrot.slane %v14715_v27, 2 }
 0x693   :  { %8813 = vmatpush1.bf16.msra.mxu1 %v8812_v2  ;;  %v14607_v38 = vsel %vm496_vm1, %v4241_v29, %v4243_v39  ;;  %v14619_v2 = vsel %vm496_vm1, %v4245_v47, %v4246_v8  ;;  %v4251_v29 = vrot.slane %v14602_v31, 2  ;;  %v14624_v39 = vld [vmem:[#allocation2 + $0x270] sm:$0xff]  ;;  %v14634_v47 = vsel %vm496_vm1, %v4246_v8, %v4248_v44  ;;  %v14648_v8 = vld [vmem:[#allocation2 + $0x280] sm:$0x3] }
 0x694   :  { %8331 = vmatmul.mubr.f32.gmra.mrb[186].mxu0 %v14561_v37  ;;  %9942 = vmatmul.mubr.msk.f32.gmra.mrb[80].mxu1 %vm14204_vm3, %v19128_v33  ;;  %v8815_v33 = vpack.c.bf16 %v4486_v30, %v4485_v56  ;;  %19132 = vst [vmem:[#allocation94_spill] sm:$0xff] %v14607_v38  ;;  %19134 = vst [vmem:[#allocation99_spill] sm:$0xff] %v14619_v2  ;;  %v19135_v56 = vld [vmem:[#allocation39_spill] sm:$0xff]  ;;  %v4255_v59 = vrot.slane %v14624_v39, 2  ;;  %v14655_v44 = vld [vmem:[#allocation2 + $0x110] sm:$0xff]  ;;  %v4258_v54 = vrot.slane %v14648_v8, 2 }
 0x695   :  { %8333 = vmatprep.mubr.f32.mxu0 %v14570_v23  ;;  %4740 = vmatprep.mubr.f32.mxu1 %v14585_v7  ;;  %v3969_v7 = vrot.slane %v14360_v17, 1  ;;  %v4253_v17 = vrot.slane %v14614_v52, 2  ;;  %19136 = vst [vmem:[#allocation96_spill] sm:$0xff] %v14634_v47  ;;  %19139 = vst [vmem:[#allocation106_spill] sm:$0xff] %v14655_v44  ;;  %v14704_v23 = vld [vmem:[#allocation2 + $0x2c0] sm:$0xff] }
 0x696   :  { %8814 = vmatprep.subr.bf16.mxu1 %v19076_v5 }
 0x697   :  { %8816 = vmatpush1.bf16.msra.mxu1 %v8815_v33  ;;  %v14637_v30 = vsel %vm271_vm0, %v3967_v50, %v3969_v7  ;;  %v14651_v7 = vld [vmem:[#allocation2 + $0x288] sm:$0xff]  ;;  %v14653_v50 = vld [vmem:[#allocation2 + $0x290] sm:$0xff] }
 0x698   :  { %8334 = vmatmul.mubr.f32.gmra.mrb[188].mxu0 %v14578_v55  ;;  %4741 = vmatmul.mubr.f32.gmra.mrb[82].mxu1 %v19084_v60  ;;  %v4250_v60 = vrot.slane %v14600_v41, 2  ;;  %19137 = vst [vmem:[#allocation101_spill] sm:$0xff] %v14637_v30 }
 0x699   :  { %8336 = vmatprep.mubr.f32.mxu0 %v14593_v61  ;;  %4745 = vmatprep.mubr.f32.mxu1 %v14610_v4  ;;  %v3971_v4 = vrot.slane %v14370_v22, 1  ;;  %v14689_v61 = vld [vmem:[#allocation2 + $0x140] sm:$0xff] }
 0x69a   :  { %8817 = vmatprep.subr.bf16.mxu1 %v19076_v5  ;;  %v14644_v33 = vsel %vm496_vm1, %v4250_v60, %v4251_v29  ;;  %19145 = vst [vmem:[#allocation15_spill] sm:$0xff] %v14689_v61 }
 0x69b   :  { %19138 = vst [vmem:[#allocation103_spill] sm:$0xff] %v14644_v33  ;;  %v14662_v60 = vsel %vm271_vm0, %v3971_v4, %v3972_v40  ;;  %v14676_v4 = vld [vmem:[#allocation2 + $0x2a0] sm:$0xff] }
 0x69c   :  { %8337 = vmatmul.mubr.f32.gmra.mrb[190].mxu0 %v14607_v38  ;;  %9944 = vmatmul.mubr.msk.f32.gmra.mrb[84].mxu1 %vm14204_vm3, %v19135_v56  ;;  %v4256_v56 = vrot.slane %v14626_v24, 2  ;;  %19141 = vst [vmem:[#allocation112_spill] sm:$0xff] %v14662_v60  ;;  %v4260_v38 = vrot.slane %v14651_v7, 2 }
 0x69d   :  { %8339 = vmatprep.mubr.f32.mxu0 %v14619_v2  ;;  %4750 = vmatprep.mubr.f32.mxu1 %v14637_v30  ;;  %v14659_v30 = vsel %vm496_vm1, %v4251_v29, %v4253_v17  ;;  %v14666_v2 = vld [vmem:[#allocation2 + $0x298] sm:$0x3]  ;;  %v4261_v29 = vrot.slane %v14653_v50, 2  ;;  %v14678_v17 = vld [vmem:[#allocation2 + $0x2a8] sm:$0xff] }
 0x69e   :  { %19140 = vst [vmem:[#allocation104_spill] sm:$0xff] %v14659_v30 }
 0x69f   :  { %v14695_v55 = vsel %vm496_vm1, %v4260_v38, %v4261_v29 }
 0x6a0   :  { %8340 = vmatmul.mubr.f32.gmra.mrb[192].mxu0 %v14634_v47  ;;  %4751 = vmatmul.mubr.f32.gmra.mrb[86].mxu1 %v14655_v44  ;;  %v3974_v47 = vrot.slane %v14393_v18, 1  ;;  %v4263_v18 = vrot.slane %v14666_v2, 2  ;;  %19146 = vst [vmem:[#allocation14_spill] sm:$0xff] %v14695_v55 }
 0x6a1   :  { %8342 = vmatprep.mubr.f32.mxu0 %v14644_v33  ;;  %4755 = vmatprep.mubr.f32.mxu1 %v14662_v60  ;;  %v14671_v33 = vsel %vm496_vm1, %v4255_v59, %v4256_v56  ;;  %v3976_v60 = vrot.slane %v14051_v13, 1  ;;  %v14702_v13 = vld [vmem:[#allocation2 + $0x2b8] sm:$0xff] }
 0x6a2   :  { %19142 = vst [vmem:[#allocation109_spill] sm:$0xff] %v14671_v33  ;;  %v14686_v59 = vsel %vm271_vm0, %v3972_v40, %v3974_v47  ;;  %v4487_v40 = vld [vmem:[#allocation6 + $0x1e0] sm:$0xff]  ;;  %v4488_v47 = vld [vmem:[#allocation6 + $0x1e8] sm:$0xff]  ;;  %v14708_v38 = vsel %vm496_vm1, %v4261_v29, %v4263_v18  ;;  %v4271_v29 = vrot.slane %v14704_v23, 2  ;;  %v14727_v18 = vld [vmem:[#allocation2 + $0x2d8] sm:$0xff] }
 0x6a3   :  { %19144 = vst [vmem:[#allocation12_spill] sm:$0xff] %v14686_v59  ;;  %19147 = vst [vmem:[#allocation74_spill] sm:$0xff] %v14708_v38 }
 0x6a4   :  { %8343 = vmatmul.mubr.f32.gmra.mrb[194].mxu0 %v14659_v30  ;;  %4756 = vmatmul.mubr.f32.gmra.mrb[88].mxu1 %v14370_v22  ;;  %v14683_v30 = vsel %vm496_vm1, %v4256_v56, %v4258_v54  ;;  %v4265_v22 = vrot.slane %v14676_v4, 2  ;;  %v4266_v54 = vrot.slane %v14678_v17, 2  ;;  %v14699_v56 = vld [vmem:[#allocation2 + $0x2b0] sm:$0x3] }
 0x6a5   :  { %8345 = vmatprep.mubr.f32.mxu0 %v14671_v33  ;;  %19143 = vst [vmem:[#allocation13_spill] sm:$0xff] %v14683_v30  ;;  %v3977_v33 = vrot.slane %v14689_v61, 1  ;;  %4760 = vmatprep.mubr.f32.mxu1 %v14686_v59  ;;  %v4268_v37 = vrot.slane %v14699_v56, 2 }
 0x6a7   :  { %v14711_v59 = vsel %vm271_vm0, %v3976_v60, %v3977_v33  ;;  %v14725_v60 = vld [vmem:[#allocation2 + $0x2d0] sm:$0xff] }
 0x6a8   :  { %8346 = vmatmul.mubr.f32.gmra.mrb[196].mxu0 %v14683_v30  ;;  %v8818_v30 = vpack.c.bf16 %v4488_v47, %v4487_v40  ;;  %4761 = vmatmul.mubr.f32.gmra.mrb[90].mxu1 %v14372_v16  ;;  %19148 = vst [vmem:[#allocation78_spill] sm:$0xff] %v14711_v59  ;;  %v14720_v40 = vsel %vm496_vm1, %v4265_v22, %v4266_v54  ;;  %v4270_v16 = vrot.slane %v14702_v13, 2  ;;  %v19150_v47 = vld [vmem:[#allocation42_spill] sm:$0xff] }
 0x6a9   :  { %8348 = vmatprep.mubr.f32.mxu0 %v14695_v55  ;;  %4765 = vmatprep.mubr.f32.mxu1 %v14711_v59  ;;  %19149 = vst [vmem:[#allocation83_spill] sm:$0xff] %v14720_v40  ;;  %v14735_v22 = vsel %vm496_vm1, %v4266_v54, %v4268_v37  ;;  %v14738_v59 = vsel %vm271_vm0, %v3977_v33, %v3979_v26  ;;  %v4276_v37 = vrot.slane %v14727_v18, 2  ;;  %v14751_v54 = vld [vmem:[#allocation2 + $0x2e0] sm:$0x3]  ;;  %v14756_v26 = vld [vmem:[#allocation2 + $0x2f0] sm:$0xff] }
 0x6aa   :  { %8819 = vmatpush1.bf16.msra.mxu1 %v8818_v30  ;;  %19151 = vst [vmem:[#allocation84_spill] sm:$0xff] %v14735_v22  ;;  %19152 = vst [vmem:[#allocation88_spill] sm:$0xff] %v14738_v59  ;;  %v14747_v55 = vsel %vm496_vm1, %v4270_v16, %v4271_v29  ;;  %v14760_v33 = vsel %vm496_vm1, %v4271_v29, %v4273_v42  ;;  %v4281_v29 = vrot.slane %v14756_v26, 2  ;;  %v14779_v42 = vld [vmem:[#allocation2 + $0x308] sm:$0xff] }
 0x6ab   :  { %8820 = vmatprep.subr.bf16.mxu1 %v19076_v5  ;;  %19154 = vst [vmem:[#allocation89_spill] sm:$0xff] %v14747_v55  ;;  %19155 = vst [vmem:[#allocation93_spill] sm:$0xff] %v14760_v33 }
 0x6ac   :  { %8349 = vmatmul.mubr.f32.gmra.mrb[198].mxu0 %v14708_v38  ;;  %9946 = vmatmul.mubr.msk.f32.gmra.mrb[92].mxu1 %vm14204_vm3, %v19150_v47  ;;  %v14741_v38 = vld [vmem:[#allocation2 + $0x158] sm:$0xff]  ;;  %v4275_v47 = vrot.slane %v14725_v60, 2 }
 0x6ad   :  { %8351 = vmatprep.mubr.f32.mxu0 %v14720_v40  ;;  %v3981_v40 = vrot.slane %v14058_v14, 1  ;;  %19153 = vst [vmem:[#allocation86_spill] sm:$0xff] %v14741_v38  ;;  %v3982_v30 = vrot.slane %v14741_v38, 1  ;;  %4770 = vmatprep.mubr.f32.mxu1 %v14738_v59  ;;  %v14754_v14 = vld [vmem:[#allocation2 + $0x2e8] sm:$0xff]  ;;  %v4278_v59 = vrot.slane %v14751_v54, 2 }
 0x6ae   :  { %v4280_v62 = vrot.slane %v14754_v14, 2 }
 0x6af   :  { %v14763_v16 = vsel %vm271_vm0, %v3981_v40, %v3982_v30  ;;  %v14777_v40 = vld [vmem:[#allocation2 + $0x300] sm:$0xff] }
 0x6b0   :  { %8352 = vmatmul.mubr.f32.gmra.mrb[200].mxu0 %v14735_v22  ;;  %4771 = vmatmul.mubr.f32.gmra.mrb[94].mxu1 %v14689_v61  ;;  %19156 = vst [vmem:[#allocation91_spill] sm:$0xff] %v14763_v16  ;;  %v3984_v22 = vrot.slane %v14435_v25, 1  ;;  %v4283_v25 = vrot.slane %v14767_v43, 2  ;;  %v3987_v61 = vrot.slane %v14794_v58, 1  ;;  %v4285_v10 = vrot.slane %v14777_v40, 2 }
 0x6b1   :  { %8354 = vmatprep.mubr.f32.mxu0 %v14747_v55  ;;  %4775 = vmatprep.mubr.f32.mxu1 %v14763_v16  ;;  %v14772_v55 = vsel %vm496_vm1, %v4275_v47, %v4276_v37  ;;  %v14786_v16 = vsel %vm496_vm1, %v4276_v37, %v4278_v59  ;;  %v4286_v59 = vrot.slane %v14779_v42, 2  ;;  %v4490_v37 = vld [vmem:[#allocation6 + $0x1f8] sm:$0xff] }
 0x6b2   :  { %19157 = vst [vmem:[#allocation17_spill] sm:$0xff] %v14772_v55  ;;  %19158 = vst [vmem:[#allocation18_spill] sm:$0xff] %v14786_v16  ;;  %v14789_v47 = vsel %vm271_vm0, %v3982_v30, %v3984_v22  ;;  %v14804_v22 = vld [vmem:[#allocation2 + $0x310] sm:$0x3] }
 0x6b3   :  { %19159 = vst [vmem:[#allocation19_spill] sm:$0xff] %v14789_v47  ;;  %v4489_v30 = vld [vmem:[#allocation6 + $0x1f0] sm:$0xff]  ;;  %v4288_v44 = vrot.slane %v14804_v22, 2 }
 0x6b4   :  { %8355 = vmatmul.mubr.f32.gmra.mrb[202].mxu0 %v14760_v33  ;;  %9948 = vmatmul.mubr.msk.f32.gmra.mrb[96].mxu1 %vm14204_vm3, %v13755_v45  ;;  %v14791_v33 = vld [vmem:[#allocation2 + $0x168] sm:$0xff]  ;;  %v14800_v45 = vsel %vm496_vm1, %v4280_v62, %v4281_v29  ;;  %v14813_v62 = vsel %vm496_vm1, %v4281_v29, %v4283_v25  ;;  %v14832_v25 = vld [vmem:[#allocation2 + $0x338] sm:$0xff] }
 0x6b5   :  { %8357 = vmatprep.mubr.f32.mxu0 %v14772_v55  ;;  %19160 = vst [vmem:[#allocation20_spill] sm:$0xff] %v14791_v33  ;;  %v3986_v55 = vrot.slane %v14791_v33, 1  ;;  %4780 = vmatprep.mubr.f32.mxu1 %v14789_v47  ;;  %19161 = vst [vmem:[#allocation21_spill] sm:$0xff] %v14800_v45  ;;  %v14827_v29 = vld [vmem:[#allocation2 + $0x328] sm:$0x3]  ;;  %v4385_v46 = vrot.slane %v14832_v25, 2 }
 0x6b6   :  { %19162 = vst [vmem:[#allocation22_spill] sm:$0xff] %v14813_v62  ;;  %19166 = vst [vmem:[#allocation49_spill] sm:$0xff] %v14832_v25 }
 0x6b7   :  { %v14816_v47 = vsel %vm271_vm0, %v3986_v55, %v3987_v61  ;;  %v14830_v55 = vld [vmem:[#allocation2 + $0x330] sm:$0xff] }
 0x6b8   :  { %8358 = vmatmul.mubr.f32.gmra.mrb[204].mxu0 %v14786_v16  ;;  %v8821_v16 = vpack.c.bf16 %v4490_v37, %v4489_v30  ;;  %4781 = vmatmul.mubr.f32.gmra.mrb[98].mxu1 %v14741_v38  ;;  %19163 = vst [vmem:[#allocation23_spill] sm:$0xff] %v14816_v47  ;;  %v4290_v30 = vrot.slane %v14807_v20, 2  ;;  %v4291_v37 = vrot.slane %v14809_v28, 2  ;;  %19165 = vst [vmem:[#allocation46_spill] sm:$0xff] %v14830_v55  ;;  %v4384_v38 = vrot.slane %v14830_v55, 2  ;;  %v14942_v55 = vld [vmem:[#allocation2 + $0x230] sm:$0xff] }
 0x6b9   :  { %8360 = vmatprep.mubr.f32.mxu0 %v14800_v45  ;;  %4785 = vmatprep.mubr.f32.mxu1 %v14816_v47  ;;  %v14823_v45 = vsel %vm496_vm1, %v4285_v10, %v4286_v59  ;;  %v14840_v10 = vsel %vm496_vm1, %v4286_v59, %v4288_v44  ;;  %v14843_v47 = vsel %vm271_vm0, %v3987_v61, %v3989_v49 }
 0x6ba   :  { %19164 = vst [vmem:[#allocation45_spill] sm:$0xff] %v14823_v45  ;;  %8822 = vmatpush1.bf16.msra.mxu1 %v8821_v16  ;;  %19167 = vst [vmem:[#allocation51_spill] sm:$0xff] %v14840_v10  ;;  %v14849_v16 = vsel %vm496_vm1, %v4290_v30, %v4291_v37  ;;  %v14861_v59 = vsel %vm496_vm1, %v4384_v38, %v4385_v46  ;;  %v14863_v30 = vld [vmem:[#allocation2 + $0x1c8] sm:$0xff]  ;;  %v14876_v38 = vld [vmem:[#allocation2 + $0x1d8] sm:$0x3] }
 0x6bb   :  { %8823 = vmatprep.subr.bf16.mxu1 %v19076_v5  ;;  %19168 = vst [vmem:[#allocation54_spill] sm:$0xff] %v14843_v47  ;;  %19169 = vst [vmem:[#allocation27_spill] sm:$0xff] %v14849_v16 }
 0x6bc   :  { %8361 = vmatmul.mubr.f32.gmra.mrb[206].mxu0 %v14813_v62  ;;  %v14835_v62 = vld [vmem:[#allocation2 + $0x1c0] sm:$0x3]  ;;  %4786 = vmatmul.mubr.f32.gmra.mrb[100].mxu1 %v14791_v33  ;;  %19171 = vst [vmem:[#allocation25_spill] sm:$0xff] %v14861_v59 }
 0x6bd   :  { %8363 = vmatprep.mubr.f32.mxu0 %v14823_v45  ;;  %v4293_v45 = vrot.slane %v14827_v29, 2  ;;  %4790 = vmatprep.mubr.f32.mxu1 %v14843_v47  ;;  %v3811_v33 = vld [vmem:[#allocation2 + $0x340] sm:$0x3]  ;;  %v3994_v44 = vrot.slane %v14835_v62, 1  ;;  %v14865_v47 = vld [vmem:[#allocation2 + $0x1d0] sm:$0xff] }
 0x6be   :  { %v4387_v61 = vrot.slane %v3811_v33, 2  ;;  %v3996_v33 = vrot.slane %v14863_v30, 1 }
 0x6bf   :  { %v14857_v49 = vsel %vm496_vm1, %v4291_v37, %v4293_v45  ;;  %v3995_v25 = vsel %vm271_vm0, %v3991_v9, %v3994_v44  ;;  %v3997_v37 = vrot.slane %v14865_v47, 1  ;;  %v14888_v44 = vld [vmem:[#allocation2 + $0x1e0] sm:$0xff] }
 0x6c0   :  { %8364 = vmatmul.mubr.f32.gmra.mrb[208].mxu0 %v14840_v10  ;;  %4791 = vmatmul.mubr.f32.gmra.mrb[102].mxu1 %v14794_v58  ;;  %19170 = vst [vmem:[#allocation24_spill] sm:$0xff] %v14857_v49  ;;  %v14871_v45 = vsel %vm496_vm1, %v4385_v46, %v4387_v61  ;;  %v14891_v61 = vld [vmem:[#allocation2 + $0x1e8] sm:$0xff] }
 0x6c1   :  { %8366 = vmatprep.mubr.f32.mxu0 %v14849_v16  ;;  %4795 = vmatprep.mubr.f32.mxu1 %v3991_v9  ;;  %19172 = vst [vmem:[#allocation26_spill] sm:$0xff] %v14871_v45  ;;  %v3999_v9 = vrot.slane %v14876_v38, 1  ;;  %v14925_v16 = vld [vmem:[#allocation2 + $0x218] sm:$0xff]  ;;  %v14959_v10 = vld [vmem:[#allocation2 + $0x248] sm:$0xff] }
 0x6c3   :  { %v14886_v46 = vsel %vm271_vm0, %v3997_v37, %v3999_v9  ;;  %v14905_v9 = vld [vmem:[#allocation2 + $0x1f8] sm:$0xff] }
 0x6c4   :  { %8367 = vmatmul.mubr.f32.gmra.mrb[210].mxu0 %v14857_v49  ;;  %4796 = vmatmul.mubr.f32.gmra.mrb[104].mxu1 %v14478_v34  ;;  %19174 = vst [vmem:[#allocation50_spill] sm:$0xff] %v14886_v46  ;;  %v14908_v49 = vld [vmem:[#allocation2 + $0x200] sm:$0xff] }
 0x6c5   :  { %8369 = vmatprep.mubr.f32.mxu0 %v14861_v59  ;;  %4800 = vmatprep.mubr.f32.mxu1 %v3995_v25  ;;  %v14880_v59 = vsel %vm271_vm0, %v3996_v33, %v3997_v37  ;;  %v4001_v25 = vrot.slane %v14888_v44, 1 }
 0x6c6   :  { %19173 = vst [vmem:[#allocation47_spill] sm:$0xff] %v14880_v59 }
 0x6c8   :  { %8370 = vmatmul.mubr.f32.gmra.mrb[212].mxu0 %v14871_v45  ;;  %4801 = vmatmul.mubr.f32.gmra.mrb[106].mxu1 %v14478_v34  ;;  %v4002_v34 = vrot.slane %v14891_v61, 1  ;;  %v4004_v45 = vrot.slane %v14509_v21, 1 }
 0x6c9   :  { %4805 = vmatprep.mubr.f32.mxu1 %v14880_v59  ;;  %v4006_v59 = vrot.slane %v14905_v9, 1 }
 0x6ca   :  { %v14897_v33 = vsel %vm271_vm0, %v4001_v25, %v4002_v34  ;;  %v14903_v37 = vsel %vm271_vm0, %v4002_v34, %v4004_v45  ;;  %v4009_v25 = vrot.slane %v14531_v35, 1  ;;  %v14922_v34 = vld [vmem:[#allocation2 + $0x210] sm:$0xff] }
 0x6cb   :  { %19175 = vst [vmem:[#allocation41_spill] sm:$0xff] %v14897_v33  ;;  %19176 = vst [vmem:[#allocation44_spill] sm:$0xff] %v14903_v37 }
 0x6cc   :  { %4806 = vmatmul.mubr.f32.gmra.mrb[108].mxu1 %v14863_v30 }
 0x6cd   :  { %4810 = vmatprep.mubr.f32.mxu1 %v14886_v46  ;;  %v4007_v46 = vrot.slane %v14908_v49, 1 }
 0x6cf   :  { %v14914_v21 = vsel %vm271_vm0, %v4006_v59, %v4007_v46  ;;  %v14920_v45 = vsel %vm271_vm0, %v4007_v46, %v4009_v25  ;;  %v4014_v59 = vrot.slane %v14547_v53, 1  ;;  %v14939_v25 = vld [vmem:[#allocation2 + $0x228] sm:$0xff] }
 0x6d0   :  { %4811 = vmatmul.mubr.f32.gmra.mrb[110].mxu1 %v14865_v47  ;;  %19177 = vst [vmem:[#allocation43_spill] sm:$0xff] %v14914_v21  ;;  %19178 = vst [vmem:[#allocation48_spill] sm:$0xff] %v14920_v45 }
 0x6d1   :  { %4815 = vmatprep.mubr.f32.mxu1 %v14897_v33  ;;  %v4011_v33 = vrot.slane %v14922_v34, 1 }
 0x6d4   :  { %4816 = vmatmul.mubr.f32.gmra.mrb[112].mxu1 %v14888_v44 }
 0x6d5   :  { %4820 = vmatprep.mubr.f32.mxu1 %v14903_v37  ;;  %v4012_v37 = vrot.slane %v14925_v16, 1 }
 0x6d7   :  { %v14931_v35 = vsel %vm271_vm0, %v4011_v33, %v4012_v37  ;;  %v14937_v46 = vsel %vm271_vm0, %v4012_v37, %v4014_v59  ;;  %v4019_v33 = vrot.slane %v14574_v11, 1  ;;  %v14956_v59 = vld [vmem:[#allocation2 + $0x240] sm:$0xff] }
 0x6d8   :  { %4821 = vmatmul.mubr.f32.gmra.mrb[114].mxu1 %v14891_v61  ;;  %19179 = vst [vmem:[#allocation56_spill] sm:$0xff] %v14931_v35  ;;  %19180 = vst [vmem:[#allocation55_spill] sm:$0xff] %v14937_v46 }
 0x6d9   :  { %4825 = vmatprep.mubr.f32.mxu1 %v14914_v21  ;;  %v4016_v21 = vrot.slane %v14939_v25, 1 }
 0x6dc   :  { %4826 = vmatmul.mubr.f32.gmra.mrb[116].mxu1 %v14905_v9 }
 0x6dd   :  { %4830 = vmatprep.mubr.f32.mxu1 %v14920_v45  ;;  %v4017_v45 = vrot.slane %v14942_v55, 1 }
 0x6df   :  { %v14948_v53 = vsel %vm271_vm0, %v4016_v21, %v4017_v45  ;;  %v14954_v37 = vsel %vm271_vm0, %v4017_v45, %v4019_v33  ;;  %v4024_v21 = vrot.slane %v14597_v12, 1  ;;  %v4026_v33 = vrot.slane %v14600_v41, 1 }
 0x6e0   :  { %4831 = vmatmul.mubr.f32.gmra.mrb[118].mxu1 %v14908_v49  ;;  %19181 = vst [vmem:[#allocation57_spill] sm:$0xff] %v14948_v53  ;;  %19182 = vst [vmem:[#allocation65_spill] sm:$0xff] %v14954_v37  ;;  %v4029_v12 = vrot.slane %v14614_v52, 1  ;;  %v4034_v52 = vrot.slane %v14648_v8, 1  ;;  %v4039_v8 = vrot.slane %v14666_v2, 1  ;;  %v4044_v2 = vrot.slane %v14699_v56, 1 }
 0x6e1   :  { %4835 = vmatprep.mubr.f32.mxu1 %v14931_v35  ;;  %v4021_v35 = vrot.slane %v14956_v59, 1  ;;  %v4049_v56 = vrot.slane %v14715_v27, 1  ;;  %v4054_v27 = vrot.slane %v14751_v54, 1 }
 0x6e4   :  { %4836 = vmatmul.mubr.f32.gmra.mrb[120].mxu1 %v14922_v34 }
 0x6e5   :  { %4840 = vmatprep.mubr.f32.mxu1 %v14937_v46  ;;  %v4022_v46 = vrot.slane %v14959_v10, 1 }
 0x6e7   :  { %v14965_v11 = vsel %vm271_vm0, %v4021_v35, %v4022_v46  ;;  %v14971_v45 = vsel %vm271_vm0, %v4022_v46, %v4024_v21  ;;  %v4031_v21 = vrot.slane %v14624_v39, 1 }
 0x6e8   :  { %4841 = vmatmul.mubr.f32.gmra.mrb[122].mxu1 %v14925_v16  ;;  %19183 = vst [vmem:[#allocation70_spill] sm:$0xff] %v14965_v11  ;;  %19184 = vst [vmem:[#allocation72_spill] sm:$0xff] %v14971_v45 }
 0x6e9   :  { %4845 = vmatprep.mubr.f32.mxu1 %v14948_v53  ;;  %v4027_v53 = vrot.slane %v14602_v31, 1 }
 0x6eb   :  { %v14978_v35 = vsel %vm271_vm0, %v4026_v33, %v4027_v53  ;;  %v14984_v46 = vsel %vm271_vm0, %v4027_v53, %v4029_v12  ;;  %v4036_v53 = vrot.slane %v14651_v7, 1  ;;  %v4037_v12 = vrot.slane %v14653_v50, 1 }
 0x6ec   :  { %4846 = vmatmul.mubr.f32.gmra.mrb[124].mxu1 %v14939_v25  ;;  %19185 = vst [vmem:[#allocation77_spill] sm:$0xff] %v14978_v35  ;;  %19186 = vst [vmem:[#allocation85_spill] sm:$0xff] %v14984_v46 }
 0x6ed   :  { %4850 = vmatprep.mubr.f32.mxu1 %v14954_v37  ;;  %v4223_v37 = vrot.slane %v14876_v38, 2  ;;  %v19313_v38 = vld [vmem:[#allocation69_spill] sm:$0xff] }
 0x6f0   :  { %4851 = vmatmul.mubr.f32.gmra.mrb[126].mxu1 %v14942_v55 }
 0x6f1   :  { %4855 = vmatprep.mubr.f32.mxu1 %v14965_v11  ;;  %v4032_v11 = vrot.slane %v14626_v24, 1 }
 0x6f3   :  { %v14991_v33 = vsel %vm271_vm0, %v4031_v21, %v4032_v11  ;;  %v4042_v21 = vrot.slane %v14678_v17, 1 }
 0x6f4   :  { %4856 = vmatmul.mubr.f32.gmra.mrb[128].mxu1 %v14956_v59  ;;  %19187 = vst [vmem:[#allocation90_spill] sm:$0xff] %v14991_v33 }
 0x6f5   :  { %4860 = vmatprep.mubr.f32.mxu1 %v14971_v45  ;;  %v4221_v45 = vrot.slane %v14865_v47, 2 }
 0x6f8   :  { %4861 = vmatmul.mubr.f32.gmra.mrb[130].mxu1 %v14959_v10 }
 0x6f9   :  { %4865 = vmatprep.mubr.f32.mxu1 %v14978_v35  ;;  %v4220_v35 = vrot.slane %v14863_v30, 2 }
 0x6fc   :  { %4866 = vmatmul.mubr.f32.gmra.mrb[132].mxu1 %v14600_v41  ;;  %v14997_v41 = vsel %vm271_vm0, %v4032_v11, %v4034_v52  ;;  %v4041_v11 = vrot.slane %v14676_v4, 1  ;;  %v4046_v52 = vrot.slane %v14702_v13, 1 }
 0x6fd   :  { %4870 = vmatprep.mubr.f32.mxu1 %v14984_v46  ;;  %19188 = vst [vmem:[#allocation92_spill] sm:$0xff] %v14997_v41  ;;  %v19306_v46 = vld [vmem:[#allocation130_spill] sm:$0xff] }
 0x700   :  { %4871 = vmatmul.mubr.f32.gmra.mrb[134].mxu1 %v14602_v31  ;;  %v15004_v31 = vsel %vm271_vm0, %v4036_v53, %v4037_v12  ;;  %v4047_v53 = vrot.slane %v14704_v23, 1 }
 0x701   :  { %4875 = vmatprep.mubr.f32.mxu1 %v14991_v33  ;;  %19189 = vst [vmem:[#allocation28_spill] sm:$0xff] %v15004_v31 }
 0x704   :  { %4876 = vmatmul.mubr.f32.gmra.mrb[136].mxu1 %v14624_v39  ;;  %v15010_v39 = vsel %vm271_vm0, %v4037_v12, %v4039_v8  ;;  %v4051_v12 = vrot.slane %v14725_v60, 1  ;;  %v4052_v8 = vrot.slane %v14727_v18, 1 }
 0x705   :  { %4880 = vmatprep.mubr.f32.mxu1 %v14997_v41  ;;  %19190 = vst [vmem:[#allocation29_spill] sm:$0xff] %v15010_v39  ;;  %v19304_v41 = vld [vmem:[#allocation20_spill] sm:$0xff] }
 0x708   :  { %4881 = vmatmul.mubr.f32.gmra.mrb[138].mxu1 %v14626_v24  ;;  %v15017_v24 = vsel %vm271_vm0, %v4041_v11, %v4042_v21 }
 0x709   :  { %4885 = vmatprep.mubr.f32.mxu1 %v15004_v31  ;;  %19191 = vst [vmem:[#allocation30_spill] sm:$0xff] %v15017_v24  ;;  %v19302_v31 = vld [vmem:[#allocation86_spill] sm:$0xff] }
 0x70c   :  { %4886 = vmatmul.mubr.f32.gmra.mrb[140].mxu1 %v14651_v7  ;;  %v15023_v7 = vsel %vm271_vm0, %v4042_v21, %v4044_v2 }
 0x70d   :  { %4890 = vmatprep.mubr.f32.mxu1 %v15010_v39  ;;  %19192 = vst [vmem:[#allocation31_spill] sm:$0xff] %v15023_v7  ;;  %v15331_v39 = vld [vmem:[#allocation2 + $0x150] sm:$0xff] }
 0x710   :  { %4891 = vmatmul.mubr.f32.gmra.mrb[142].mxu1 %v14653_v50  ;;  %v15030_v50 = vsel %vm271_vm0, %v4046_v52, %v4047_v53  ;;  %v15055_v52 = vsel %vm271_vm0, %v4052_v8, %v4054_v27 }
 0x711   :  { %4895 = vmatprep.mubr.f32.mxu1 %v15017_v24  ;;  %19193 = vst [vmem:[#allocation33_spill] sm:$0xff] %v15030_v50  ;;  %19199 = vst [vmem:[#allocation59_spill] sm:$0xff] %v15055_v52  ;;  %v15316_v24 = vld [vmem:[#allocation2 + $0x120] sm:$0xff] }
 0x712   :  { %19292 = vst [vmem:[#allocation201_spill] sm:$0xff] %v15316_v24 }
 0x714   :  { %4896 = vmatmul.mubr.f32.gmra.mrb[144].mxu1 %v14676_v4  ;;  %v15036_v4 = vsel %vm271_vm0, %v4047_v53, %v4049_v56  ;;  %v4056_v53 = vrot.slane %v14754_v14, 1  ;;  %v4057_v56 = vrot.slane %v14756_v26, 1 }
 0x715   :  { %4900 = vmatprep.mubr.f32.mxu1 %v15023_v7  ;;  %19194 = vst [vmem:[#allocation35_spill] sm:$0xff] %v15036_v4  ;;  %v19290_v7 = vld [vmem:[#allocation118_spill] sm:$0xff] }
 0x718   :  { %4901 = vmatmul.mubr.f32.gmra.mrb[146].mxu1 %v14678_v17  ;;  %v15045_v17 = vsel %vm271_vm0, %v4051_v12, %v4052_v8  ;;  %v15066_v12 = vsel %vm271_vm0, %v4056_v53, %v4057_v56 }
 0x719   :  { %4905 = vmatprep.mubr.f32.mxu1 %v15030_v50  ;;  %19196 = vst [vmem:[#allocation38_spill] sm:$0xff] %v15045_v17  ;;  %19202 = vst [vmem:[#allocation60_spill] sm:$0xff] %v15066_v12  ;;  %v15140_v50 = vld [vmem:[#allocation2 + $0x30] sm:$0xff] }
 0x71a   :  { %19225 = vst [vmem:[#allocation150_spill] sm:$0xff] %v15140_v50 }
 0x71c   :  { %4906 = vmatmul.mubr.f32.gmra.mrb[148].mxu1 %v14702_v13 }
 0x71d   :  { %4910 = vmatprep.mubr.f32.mxu1 %v15036_v4 }
 0x720   :  { %4911 = vmatmul.mubr.f32.gmra.mrb[150].mxu1 %v14704_v23 }
 0x721   :  { %4915 = vmatprep.mubr.f32.mxu1 %v15045_v17 }
 0x723   :  { %v15041_v11 = vpop.f32.mrb[152].mxu0 }
 0x724   :  { %19195 = vst [vmem:[#allocation37_spill] sm:$0xff] %v15041_v11  ;;  %v15048_v21 = vpop.f32.mrb[153].mxu0  ;;  %4916 = vmatmul.mubr.f32.gmra.mrb[152].mxu1 %v14725_v60 }
 0x725   :  { %19197 = vst [vmem:[#allocation40_spill] sm:$0xff] %v15048_v21  ;;  %4920 = vmatprep.mubr.f32.mxu1 %v15055_v52 }
 0x727   :  { %v15051_v2 = vpop.f32.mrb[154].mxu0 }
 0x728   :  { %19198 = vst [vmem:[#allocation58_spill] sm:$0xff] %v15051_v2  ;;  %v15059_v11 = vpop.f32.mrb[155].mxu0  ;;  %4921 = vmatmul.mubr.f32.gmra.mrb[154].mxu1 %v14727_v18  ;;  %v4059_v2 = vrot.slane %v14767_v43, 1 }
 0x729   :  { %19200 = vst [vmem:[#allocation63_spill] sm:$0xff] %v15059_v11  ;;  %4925 = vmatprep.mubr.f32.mxu1 %v15066_v12  ;;  %v4062_v11 = vrot.slane %v14779_v42, 1  ;;  %v4493_v12 = vld [vmem:[#allocation6 + $0x210] sm:$0xff] }
 0x72a   :  { %v15076_v27 = vsel %vm271_vm0, %v4057_v56, %v4059_v2 }
 0x72b   :  { %v15062_v54 = vpop.f32.mrb[156].mxu0  ;;  %19205 = vst [vmem:[#allocation34_spill] sm:$0xff] %v15076_v27 }
 0x72c   :  { %19201 = vst [vmem:[#allocation52_spill] sm:$0xff] %v15062_v54  ;;  %v15069_v21 = vpop.f32.mrb[157].mxu0  ;;  %4926 = vmatmul.mubr.f32.gmra.mrb[156].mxu1 %v14754_v14  ;;  %v4061_v54 = vrot.slane %v14777_v40, 1 }
 0x72d   :  { %19203 = vst [vmem:[#allocation32_spill] sm:$0xff] %v15069_v21  ;;  %4930 = vmatprep.mubr.f32.mxu1 %v15076_v27 }
 0x72e   :  { %v15087_v53 = vsel %vm271_vm0, %v4061_v54, %v4062_v11 }
 0x72f   :  { %v15072_v8 = vpop.f32.mrb[158].mxu0  ;;  %19208 = vst [vmem:[#allocation80_spill] sm:$0xff] %v15087_v53 }
 0x730   :  { %19204 = vst [vmem:[#allocation62_spill] sm:$0xff] %v15072_v8  ;;  %v15080_v52 = vpop.f32.mrb[159].mxu0  ;;  %4931 = vmatmul.mubr.f32.gmra.mrb[158].mxu1 %v14756_v26  ;;  %v4064_v8 = vrot.slane %v14804_v22, 1 }
 0x731   :  { %19206 = vst [vmem:[#allocation67_spill] sm:$0xff] %v15080_v52  ;;  %4935 = vmatprep.mubr.f32.mxu1 %v15087_v53  ;;  %v4067_v52 = vrot.slane %v14809_v28, 1 }
 0x732   :  { %v15097_v56 = vsel %vm271_vm0, %v4062_v11, %v4064_v8 }
 0x733   :  { %v15083_v43 = vpop.f32.mrb[160].mxu0  ;;  %19211 = vst [vmem:[#allocation87_spill] sm:$0xff] %v15097_v56 }
 0x734   :  { %19207 = vst [vmem:[#allocation75_spill] sm:$0xff] %v15083_v43  ;;  %v15090_v21 = vpop.f32.mrb[161].mxu0  ;;  %4936 = vmatmul.mubr.f32.gmra.mrb[160].mxu1 %v14777_v40  ;;  %v4066_v43 = vrot.slane %v14807_v20, 1 }
 0x735   :  { %19209 = vst [vmem:[#allocation82_spill] sm:$0xff] %v15090_v21  ;;  %4940 = vmatprep.mubr.f32.mxu1 %v15097_v56 }
 0x736   :  { %v15108_v54 = vsel %vm271_vm0, %v4066_v43, %v4067_v52  ;;  %v4492_v43 = vld [vmem:[#allocation6 + $0x208] sm:$0xff] }
 0x737   :  { %v15093_v2 = vpop.f32.mrb[162].mxu0  ;;  %19214 = vst [vmem:[#allocation139_spill] sm:$0xff] %v15108_v54 }
 0x738   :  { %19210 = vst [vmem:[#allocation36_spill] sm:$0xff] %v15093_v2  ;;  %v15101_v27 = vpop.f32.mrb[163].mxu0  ;;  %4941 = vmatmul.mubr.f32.gmra.mrb[162].mxu1 %v14779_v42  ;;  %v4069_v2 = vrot.slane %v14827_v29, 1 }
 0x739   :  { %19212 = vst [vmem:[#allocation39_spill] sm:$0xff] %v15101_v27  ;;  %4945 = vmatprep.mubr.f32.mxu1 %v15108_v54  ;;  %v9856_v54 = vld [vmem:[#allocation2 + $0x10] sm:$0x3] }
 0x73a   :  { %v15118_v8 = vsel %vm271_vm0, %v4067_v52, %v4069_v2  ;;  %v4138_v53 = vrot.slane %v9856_v54, 2  ;;  %v4494_v52 = vld [vmem:[#allocation6 + $0x218] sm:$0xff] }
 0x73b   :  { %v15104_v22 = vpop.f32.mrb[164].mxu0  ;;  %19217 = vst [vmem:[#allocation142_spill] sm:$0xff] %v15118_v8 }
 0x73c   :  { %19213 = vst [vmem:[#allocation42_spill] sm:$0xff] %v15104_v22  ;;  %v15111_v21 = vpop.f32.mrb[165].mxu0  ;;  %4946 = vmatmul.mubr.f32.gmra.mrb[164].mxu1 %v14807_v20  ;;  %v4491_v22 = vld [vmem:[#allocation6 + $0x200] sm:$0xff] }
 0x73d   :  { %19215 = vst [vmem:[#allocation140_spill] sm:$0xff] %v15111_v21  ;;  %4950 = vmatprep.mubr.f32.mxu1 %v15118_v8  ;;  %v9855_v21 = vld [vmem:[#allocation2 + $0x18] sm:$0xff]  ;;  %v9857_v8 = vld [vmem:[#allocation2 + $0x20] sm:$0xff] }
 0x73e   :  { %v4140_v54 = vrot.slane %v9855_v21, 2  ;;  %v4141_v17 = vrot.slane %v9857_v8, 2 }
 0x73f   :  { %v15114_v11 = vpop.f32.mrb[166].mxu0 }
 0x740   :  { %19216 = vst [vmem:[#allocation141_spill] sm:$0xff] %v15114_v11  ;;  %v15120_v27 = vpop.f32.mrb[167].mxu0  ;;  %4951 = vmatmul.mubr.f32.gmra.mrb[166].mxu1 %v14809_v28  ;;  %v8824_v11 = vpack.c.bf16 %v4492_v43, %v4491_v22  ;;  %v4495_v22 = vld [vmem:[#allocation6 + $0x220] sm:$0xff]  ;;  %v4496_v43 = vld [vmem:[#allocation6 + $0x228] sm:$0xff] }
 0x741   :  { %19218 = vst [vmem:[#allocation143_spill] sm:$0xff] %v15120_v27  ;;  %5020 = vmatprep.mubr.f32.mxu1 %v9855_v21  ;;  %v9859_v21 = vld [vmem:[#allocation2 + $0x28] sm:$0x3] }
 0x743   :  { %v15123_v56 = vpop.f32.mrb[168].mxu0 }
 0x744   :  { %19219 = vst [vmem:[#allocation144_spill] sm:$0xff] %v15123_v56  ;;  %v15126_v29 = vpop.f32.mrb[169].mxu0  ;;  %5021 = vmatmul.mubr.f32.vlgmr.msra.gmra.mrb[40].mxu1 %v14481_v6  ;;  %v4139_v56 = vsel %vm496_vm1, %v14481_v6, %v4138_v53  ;;  %v4497_v6 = vld [vmem:[#allocation6 + $0x230] sm:$0xff]  ;;  %v15145_v53 = vsel %vm496_vm1, %v4140_v54, %v4141_v17 }
 0x745   :  { %19220 = vst [vmem:[#allocation145_spill] sm:$0xff] %v15126_v29  ;;  %5025 = vmatprep.mubr.f32.mxu1 %v9857_v8  ;;  %8825 = vmatpush1.bf16.msra.mxu1 %v8824_v11  ;;  %v8827_v29 = vpack.c.bf16 %v4494_v52, %v4493_v12  ;;  %v8830_v11 = vpack.c.bf16 %v4496_v43, %v4495_v22  ;;  %v4498_v12 = vld [vmem:[#allocation6 + $0x238] sm:$0xff]  ;;  %v4143_v8 = vrot.slane %v9859_v21, 2  ;;  %v4499_v22 = vld [vmem:[#allocation6 + $0x240] sm:$0xff]  ;;  %v4500_v43 = vld [vmem:[#allocation6 + $0x248] sm:$0xff] }
 0x746   :  { %8826 = vmatprep.subr.bf16.mxu1 %v19076_v5 }
 0x747   :  { %v15128_v2 = vpop.f32.mrb[170].mxu0  ;;  %v15157_v54 = vsel %vm496_vm1, %v4141_v17, %v4143_v8  ;;  %v15173_v8 = vld [vmem:[#allocation2 + $0x50] sm:$0xff] }
 0x748   :  { %19221 = vst [vmem:[#allocation146_spill] sm:$0xff] %v15128_v2  ;;  %v15131_v27 = vpop.f32.mrb[171].mxu0  ;;  %5026 = vmatmul.mubr.f32.gmra.mrb[42].mxu1 %v4139_v56  ;;  %19234 = vst [vmem:[#allocation159_spill] sm:$0xff] %v15173_v8 }
 0x749   :  { %19222 = vst [vmem:[#allocation147_spill] sm:$0xff] %v15131_v27  ;;  %5030 = vmatprep.mubr.f32.mxu1 %v15140_v50  ;;  %8828 = vmatpush1.bf16.msra.mxu1 %v8827_v29  ;;  %v8833_v29 = vpack.c.bf16 %v4498_v12, %v4497_v6  ;;  %v4501_v6 = vld [vmem:[#allocation6 + $0x250] sm:$0xff]  ;;  %v4502_v12 = vld [vmem:[#allocation6 + $0x258] sm:$0xff]  ;;  %v15189_v27 = vld [vmem:[#allocation2 + $0x68] sm:$0xff] }
 0x74a   :  { %8829 = vmatprep.subr.bf16.mxu1 %v19076_v5  ;;  %19239 = vst [vmem:[#allocation164_spill] sm:$0xff] %v15189_v27 }
 0x74b   :  { %v15136_v4 = vpop.f32.mrb[172].mxu0 }
 0x74c   :  { %19223 = vst [vmem:[#allocation148_spill] sm:$0xff] %v15136_v4  ;;  %v15138_v2 = vpop.f32.mrb[173].mxu0  ;;  %5031 = vmatmul.mubr.f32.gmra.mrb[44].mxu1 %v15145_v53  ;;  %v15152_v4 = vld [vmem:[#allocation2 + $0x38] sm:$0xff] }
 0x74d   :  { %19224 = vst [vmem:[#allocation149_spill] sm:$0xff] %v15138_v2  ;;  %19228 = vst [vmem:[#allocation153_spill] sm:$0xff] %v15152_v4  ;;  %5035 = vmatprep.mubr.f32.mxu1 %v15152_v4  ;;  %8831 = vmatpush1.bf16.msra.mxu1 %v8830_v11  ;;  %v8836_v11 = vpack.c.bf16 %v4500_v43, %v4499_v22  ;;  %v4504_v22 = vld [vmem:[#allocation6 + $0x268] sm:$0xff]  ;;  %v4517_v4 = vld [vmem:[#allocation6 + $0x2d0] sm:$0xff] }
 0x74e   :  { %8832 = vmatprep.subr.bf16.mxu1 %v19076_v5 }
 0x74f   :  { %v15147_v52 = vpop.f32.mrb[174].mxu0 }
 0x750   :  { %19226 = vst [vmem:[#allocation151_spill] sm:$0xff] %v15147_v52  ;;  %v15150_v56 = vpop.f32.mrb[175].mxu0  ;;  %5036 = vmatmul.mubr.f32.gmra.mrb[46].mxu1 %v15157_v54 }
 0x751   :  { %19227 = vst [vmem:[#allocation152_spill] sm:$0xff] %v15150_v56  ;;  %v15164_v56 = vld [vmem:[#allocation2 + $0x48] sm:$0xff]  ;;  %8834 = vmatpush1.bf16.msra.mxu1 %v8833_v29  ;;  %v4503_v29 = vld [vmem:[#allocation6 + $0x260] sm:$0xff] }
 0x752   :  { %19231 = vst [vmem:[#allocation156_spill] sm:$0xff] %v15164_v56  ;;  %5040 = vmatprep.mubr.f32.mxu1 %v15164_v56  ;;  %8835 = vmatprep.subr.bf16.mxu1 %v19076_v5 }
 0x753   :  { %v15159_v21 = vpop.f32.mrb[176].mxu0 }
 0x754   :  { %19229 = vst [vmem:[#allocation154_spill] sm:$0xff] %v15159_v21  ;;  %v15162_v52 = vpop.f32.mrb[177].mxu0  ;;  %5041 = vmatmul.mubr.f32.gmra.mrb[48].mxu1 %v14197_v48  ;;  %v8839_v21 = vpack.c.bf16 %v4502_v12, %v4501_v6  ;;  %v4506_v6 = vld [vmem:[#allocation6 + $0x278] sm:$0xff] }
 0x755   :  { %19230 = vst [vmem:[#allocation155_spill] sm:$0xff] %v15162_v52  ;;  %5045 = vmatprep.mubr.f32.mxu1 %v15173_v8  ;;  %8837 = vmatpush1.bf16.msra.mxu1 %v8836_v11  ;;  %v4505_v11 = vld [vmem:[#allocation6 + $0x270] sm:$0xff]  ;;  %v15200_v8 = vld [vmem:[#allocation2 + $0x78] sm:$0xff] }
 0x756   :  { %8838 = vmatprep.subr.bf16.mxu1 %v19076_v5  ;;  %19243 = vst [vmem:[#allocation168_spill] sm:$0xff] %v15200_v8 }
 0x757   :  { %v15168_v2 = vpop.f32.mrb[178].mxu0 }
 0x758   :  { %19232 = vst [vmem:[#allocation157_spill] sm:$0xff] %v15168_v2  ;;  %v15171_v17 = vpop.f32.mrb[179].mxu0  ;;  %5046 = vmatmul.mubr.f32.gmra.mrb[50].mxu1 %v14212_v51  ;;  %v15182_v2 = vld [vmem:[#allocation2 + $0x60] sm:$0xff] }
 0x759   :  { %19233 = vst [vmem:[#allocation158_spill] sm:$0xff] %v15171_v17  ;;  %19237 = vst [vmem:[#allocation162_spill] sm:$0xff] %v15182_v2  ;;  %5050 = vmatprep.mubr.f32.mxu1 %v15182_v2  ;;  %8840 = vmatpush1.bf16.msra.mxu1 %v8839_v21  ;;  %v8842_v17 = vpack.c.bf16 %v4504_v22, %v4503_v29  ;;  %v4507_v21 = vld [vmem:[#allocation6 + $0x280] sm:$0xff]  ;;  %v4508_v29 = vld [vmem:[#allocation6 + $0x288] sm:$0xff] }
 0x75a   :  { %8841 = vmatprep.subr.bf16.mxu1 %v19076_v5 }
 0x75b   :  { %v15177_v43 = vpop.f32.mrb[180].mxu0 }
 0x75c   :  { %19235 = vst [vmem:[#allocation160_spill] sm:$0xff] %v15177_v43  ;;  %v15180_v52 = vpop.f32.mrb[181].mxu0  ;;  %5051 = vmatmul.mubr.f32.gmra.mrb[52].mxu1 %v14220_v32 }
 0x75d   :  { %19236 = vst [vmem:[#allocation161_spill] sm:$0xff] %v15180_v52  ;;  %5055 = vmatprep.mubr.f32.mxu1 %v15189_v27  ;;  %8843 = vmatpush1.bf16.msra.mxu1 %v8842_v17  ;;  %v8845_v52 = vpack.c.bf16 %v4506_v6, %v4505_v11  ;;  %v4509_v17 = vld [vmem:[#allocation6 + $0x290] sm:$0xff]  ;;  %v4510_v11 = vld [vmem:[#allocation6 + $0x298] sm:$0xff] }
 0x75e   :  { %8844 = vmatprep.subr.bf16.mxu1 %v19076_v5 }
 0x75f   :  { %v15187_v12 = vpop.f32.mrb[182].mxu0 }
 0x760   :  { %19238 = vst [vmem:[#allocation163_spill] sm:$0xff] %v15187_v12  ;;  %v15192_v43 = vpop.f32.mrb[183].mxu0  ;;  %5056 = vmatmul.mubr.f32.gmra.mrb[54].mxu1 %v14229_v0  ;;  %v8848_v12 = vpack.c.bf16 %v4508_v29, %v4507_v21  ;;  %v4512_v21 = vld [vmem:[#allocation6 + $0x2a8] sm:$0xff] }
 0x761   :  { %19240 = vst [vmem:[#allocation165_spill] sm:$0xff] %v15192_v43  ;;  %5060 = vmatprep.mubr.f32.mxu1 %v15200_v8  ;;  %8846 = vmatpush1.bf16.msra.mxu1 %v8845_v52  ;;  %v4511_v52 = vld [vmem:[#allocation6 + $0x2a0] sm:$0xff] }
 0x762   :  { %8847 = vmatprep.subr.bf16.mxu1 %v19076_v5 }
 0x763   :  { %v15195_v22 = vpop.f32.mrb[184].mxu0 }
 0x764   :  { %19241 = vst [vmem:[#allocation166_spill] sm:$0xff] %v15195_v22  ;;  %v15198_v2 = vpop.f32.mrb[185].mxu0  ;;  %5061 = vmatmul.mubr.f32.gmra.mrb[56].mxu1 %v14240_v15  ;;  %v15209_v22 = vld [vmem:[#allocation2 + $0x80] sm:$0xff] }
 0x765   :  { %19242 = vst [vmem:[#allocation167_spill] sm:$0xff] %v15198_v2  ;;  %19246 = vst [vmem:[#allocation171_spill] sm:$0xff] %v15209_v22  ;;  %5065 = vmatprep.mubr.f32.mxu1 %v15209_v22  ;;  %8849 = vmatpush1.bf16.msra.mxu1 %v8848_v12  ;;  %v8851_v2 = vpack.c.bf16 %v4510_v11, %v4509_v17  ;;  %v15227_v11 = vld [vmem:[#allocation2 + $0x98] sm:$0xff] }
 0x766   :  { %8850 = vmatprep.subr.bf16.mxu1 %v19076_v5  ;;  %19252 = vst [vmem:[#allocation177_spill] sm:$0xff] %v15227_v11 }
 0x767   :  { %v15204_v6 = vpop.f32.mrb[186].mxu0 }
 0x768   :  { %19244 = vst [vmem:[#allocation169_spill] sm:$0xff] %v15204_v6  ;;  %v15207_v43 = vpop.f32.mrb[187].mxu0  ;;  %5066 = vmatmul.mubr.f32.gmra.mrb[58].mxu1 %v14250_v57  ;;  %v15218_v6 = vld [vmem:[#allocation2 + $0x90] sm:$0xff] }
 0x769   :  { %19245 = vst [vmem:[#allocation170_spill] sm:$0xff] %v15207_v43  ;;  %19249 = vst [vmem:[#allocation174_spill] sm:$0xff] %v15218_v6  ;;  %5070 = vmatprep.mubr.f32.mxu1 %v15218_v6  ;;  %8852 = vmatpush1.bf16.msra.mxu1 %v8851_v2  ;;  %v8854_v43 = vpack.c.bf16 %v4512_v21, %v4511_v52  ;;  %v15236_v52 = vld [vmem:[#allocation2 + $0xa8] sm:$0xff] }
 0x76a   :  { %8853 = vmatprep.subr.bf16.mxu1 %v19076_v5  ;;  %19255 = vst [vmem:[#allocation180_spill] sm:$0xff] %v15236_v52 }
 0x76b   :  { %v15213_v29 = vpop.f32.mrb[188].mxu0 }
 0x76c   :  { %19247 = vst [vmem:[#allocation172_spill] sm:$0xff] %v15213_v29  ;;  %v15216_v8 = vpop.f32.mrb[189].mxu0  ;;  %5071 = vmatmul.mubr.f32.gmra.mrb[60].mxu1 %v14260_v63 }
 0x76d   :  { %19248 = vst [vmem:[#allocation173_spill] sm:$0xff] %v15216_v8  ;;  %5075 = vmatprep.mubr.f32.mxu1 %v15227_v11  ;;  %8855 = vmatpush1.bf16.msra.mxu1 %v8854_v43  ;;  %v4513_v43 = vld [vmem:[#allocation6 + $0x2b0] sm:$0xff] }
 0x76e   :  { %8856 = vmatprep.subr.bf16.mxu1 %v19076_v5 }
 0x76f   :  { %v15222_v12 = vpop.f32.mrb[190].mxu0 }
 0x770   :  { %19250 = vst [vmem:[#allocation175_spill] sm:$0xff] %v15222_v12  ;;  %v15225_v17 = vpop.f32.mrb[191].mxu0  ;;  %5076 = vmatmul.mubr.f32.gmra.mrb[62].mxu1 %v14269_v1 }
 0x771   :  { %19251 = vst [vmem:[#allocation176_spill] sm:$0xff] %v15225_v17  ;;  %5080 = vmatprep.mubr.f32.mxu1 %v15236_v52  ;;  %v15244_v17 = vld [vmem:[#allocation2 + $0xb0] sm:$0xff]  ;;  %v15252_v52 = vld [vmem:[#allocation2 + $0xc0] sm:$0xff] }
 0x772   :  { %19258 = vst [vmem:[#allocation183_spill] sm:$0xff] %v15244_v17  ;;  %19261 = vst [vmem:[#allocation186_spill] sm:$0xff] %v15252_v52 }
 0x773   :  { %v15231_v29 = vpop.f32.mrb[192].mxu0 }
 0x774   :  { %19253 = vst [vmem:[#allocation178_spill] sm:$0xff] %v15231_v29  ;;  %v15234_v2 = vpop.f32.mrb[193].mxu0  ;;  %5081 = vmatmul.mubr.f32.gmra.mrb[64].mxu1 %v14281_v3  ;;  %v4514_v29 = vld [vmem:[#allocation6 + $0x2b8] sm:$0xff] }
 0x775   :  { %19254 = vst [vmem:[#allocation179_spill] sm:$0xff] %v15234_v2  ;;  %5085 = vmatprep.mubr.f32.mxu1 %v15244_v17  ;;  %v8857_v8 = vpack.c.bf16 %v4514_v29, %v4513_v43  ;;  %v15261_v29 = vld [vmem:[#allocation2 + $0xc8] sm:$0xff] }
 0x776   :  { %19264 = vst [vmem:[#allocation189_spill] sm:$0xff] %v15261_v29 }
 0x777   :  { %v15239_v21 = vpop.f32.mrb[194].mxu0  ;;  %8858 = vmatpush1.bf16.msra.mxu1 %v8857_v8 }
 0x778   :  { %19256 = vst [vmem:[#allocation181_spill] sm:$0xff] %v15239_v21  ;;  %v15242_v12 = vpop.f32.mrb[195].mxu0  ;;  %5086 = vmatmul.mubr.f32.gmra.mrb[66].mxu1 %v14292_v19  ;;  %8859 = vmatprep.subr.bf16.mxu1 %v19076_v5 }
 0x779   :  { %19257 = vst [vmem:[#allocation182_spill] sm:$0xff] %v15242_v12  ;;  %5090 = vmatprep.mubr.f32.mxu1 %v15252_v52  ;;  %v15269_v52 = vld [vmem:[#allocation2 + $0xd8] sm:$0xff] }
 0x77a   :  { %19268 = vst [vmem:[#allocation191_spill] sm:$0xff] %v15269_v52 }
 0x77b   :  { %v15247_v11 = vpop.f32.mrb[196].mxu0 }
 0x77c   :  { %19259 = vst [vmem:[#allocation184_spill] sm:$0xff] %v15247_v11  ;;  %v15250_v2 = vpop.f32.mrb[197].mxu0  ;;  %5091 = vmatmul.mubr.f32.gmra.mrb[68].mxu1 %v14303_v36  ;;  %v19266_v11 = vld [vmem:[#allocation108_spill] sm:$0xff] }
 0x77d   :  { %19260 = vst [vmem:[#allocation185_spill] sm:$0xff] %v15250_v2  ;;  %5095 = vmatprep.mubr.f32.mxu1 %v15261_v29  ;;  %v4515_v29 = vld [vmem:[#allocation6 + $0x2c0] sm:$0xff] }
 0x77f   :  { %v15256_v21 = vpop.f32.mrb[198].mxu0 }
 0x780   :  { %19262 = vst [vmem:[#allocation187_spill] sm:$0xff] %v15256_v21  ;;  %v15259_v12 = vpop.f32.mrb[199].mxu0  ;;  %5096 = vmatmul.mubr.f32.gmra.mrb[70].mxu1 %v19266_v11  ;;  %v19270_v21 = vld [vmem:[#allocation111_spill] sm:$0xff] }
 0x781   :  { %19263 = vst [vmem:[#allocation188_spill] sm:$0xff] %v15259_v12  ;;  %5100 = vmatprep.mubr.f32.mxu1 %v15269_v52  ;;  %v15277_v12 = vld [vmem:[#allocation2 + $0xe0] sm:$0xff]  ;;  %v15285_v52 = vld [vmem:[#allocation2 + $0xf0] sm:$0xff] }
 0x782   :  { %19272 = vst [vmem:[#allocation193_spill] sm:$0xff] %v15277_v12  ;;  %19276 = vst [vmem:[#allocation195_spill] sm:$0xff] %v15285_v52 }
 0x783   :  { %v15264_v43 = vpop.f32.mrb[200].mxu0 }
 0x784   :  { %19265 = vst [vmem:[#allocation190_spill] sm:$0xff] %v15264_v43  ;;  %v15267_v2 = vpop.f32.mrb[201].mxu0  ;;  %5101 = vmatmul.mubr.f32.gmra.mrb[72].mxu1 %v19270_v21  ;;  %v4516_v43 = vld [vmem:[#allocation6 + $0x2c8] sm:$0xff] }
 0x785   :  { %19267 = vst [vmem:[#allocation108_spill] sm:$0xff] %v15267_v2  ;;  %5105 = vmatprep.mubr.f32.mxu1 %v15277_v12  ;;  %v8860_v6 = vpack.c.bf16 %v4516_v43, %v4515_v29  ;;  %v19274_v2 = vld [vmem:[#allocation113_spill] sm:$0xff]  ;;  %v15294_v29 = vld [vmem:[#allocation2 + $0xf8] sm:$0xff] }
 0x786   :  { %19280 = vst [vmem:[#allocation197_spill] sm:$0xff] %v15294_v29 }
 0x787   :  { %v15272_v8 = vpop.f32.mrb[202].mxu0  ;;  %8861 = vmatpush1.bf16.msra.mxu1 %v8860_v6 }
 0x788   :  { %19269 = vst [vmem:[#allocation192_spill] sm:$0xff] %v15272_v8  ;;  %v15275_v17 = vpop.f32.mrb[203].mxu0  ;;  %5106 = vmatmul.mubr.f32.gmra.mrb[74].mxu1 %v19274_v2  ;;  %8862 = vmatprep.subr.bf16.mxu1 %v19076_v5 }
 0x789   :  { %19271 = vst [vmem:[#allocation111_spill] sm:$0xff] %v15275_v17  ;;  %5110 = vmatprep.mubr.f32.mxu1 %v15285_v52  ;;  %v19278_v17 = vld [vmem:[#allocation53_spill] sm:$0xff] }
 0x78a   :  { %v15302_v52 = vld [vmem:[#allocation2 + $0x108] sm:$0xff] }
 0x78b   :  { %v15280_v22 = vpop.f32.mrb[204].mxu0  ;;  %19284 = vst [vmem:[#allocation199_spill] sm:$0xff] %v15302_v52 }
 0x78c   :  { %19273 = vst [vmem:[#allocation194_spill] sm:$0xff] %v15280_v22  ;;  %v15283_v27 = vpop.f32.mrb[205].mxu0  ;;  %5111 = vmatmul.mubr.f32.gmra.mrb[76].mxu1 %v19278_v17  ;;  %v19282_v22 = vld [vmem:[#allocation115_spill] sm:$0xff] }
 0x78d   :  { %19275 = vst [vmem:[#allocation113_spill] sm:$0xff] %v15283_v27  ;;  %5115 = vmatprep.mubr.f32.mxu1 %v15294_v29  ;;  %v4518_v29 = vld [vmem:[#allocation6 + $0x2d8] sm:$0xff] }
 0x78e   :  { %v8863_v50 = vpack.c.bf16 %v4518_v29, %v4517_v4  ;;  %v19295_v4 = vld [vmem:[#allocation121_spill] sm:$0xff]  ;;  %v19297_v29 = vld [vmem:[#allocation123_spill] sm:$0xff] }
 0x78f   :  { %v15289_v8 = vpop.f32.mrb[206].mxu0  ;;  %19300 = vst [vmem:[#allocation123_spill] sm:$0xff] %v15331_v39 }
 0x790   :  { %19277 = vst [vmem:[#allocation196_spill] sm:$0xff] %v15289_v8  ;;  %v15292_v12 = vpop.f32.mrb[207].mxu0  ;;  %5116 = vmatmul.mubr.f32.gmra.mrb[78].mxu1 %v19282_v22  ;;  %v19286_v8 = vld [vmem:[#allocation117_spill] sm:$0xff] }
 0x791   :  { %19279 = vst [vmem:[#allocation53_spill] sm:$0xff] %v15292_v12  ;;  %5120 = vmatprep.mubr.f32.mxu1 %v15302_v52  ;;  %v19288_v12 = vld [vmem:[#allocation106_spill] sm:$0xff]  ;;  %8864 = vmatpush1.bf16.msra.mxu1 %v8863_v50  ;;  %v4520_v50 = vld [vmem:[#allocation6 + $0x2e8] sm:$0xff]  ;;  %v19299_v52 = vld [vmem:[#allocation124_spill] sm:$0xff] }
 0x792   :  { %8865 = vmatprep.subr.bf16.mxu1 %v19076_v5 }
 0x793   :  { %v15297_v43 = vpop.f32.mrb[208].mxu0 }
 0x794   :  { %19281 = vst [vmem:[#allocation198_spill] sm:$0xff] %v15297_v43  ;;  %v15300_v27 = vpop.f32.mrb[209].mxu0  ;;  %5121 = vmatmul.mubr.f32.gmra.mrb[80].mxu1 %v19286_v8 }
 0x795   :  { %19283 = vst [vmem:[#allocation115_spill] sm:$0xff] %v15300_v27  ;;  %5125 = vmatprep.mubr.f32.mxu1 %v19288_v12  ;;  %v15325_v12 = vld [vmem:[#allocation2 + $0x138] sm:$0xff] }
 0x796   :  { %19296 = vst [vmem:[#allocation121_spill] sm:$0xff] %v15325_v12 }
 0x797   :  { %v15305_v6 = vpop.f32.mrb[210].mxu0 }
 0x798   :  { %19285 = vst [vmem:[#allocation200_spill] sm:$0xff] %v15305_v6  ;;  %v15308_v56 = vpop.f32.mrb[211].mxu0  ;;  %5126 = vmatmul.mubr.f32.gmra.mrb[82].mxu1 %v19290_v7  ;;  %v19293_v6 = vld [vmem:[#allocation120_spill] sm:$0xff] }
 0x799   :  { %19287 = vst [vmem:[#allocation117_spill] sm:$0xff] %v15308_v56  ;;  %5130 = vmatprep.mubr.f32.mxu1 %v15316_v24  ;;  %v15321_v56 = vld [vmem:[#allocation2 + $0x128] sm:$0xff] }
 0x79a   :  { %19294 = vst [vmem:[#allocation120_spill] sm:$0xff] %v15321_v56 }
 0x79b   :  { %v15311_v43 = vpop.f32.mrb[212].mxu0 }
 0x79c   :  { %19289 = vst [vmem:[#allocation106_spill] sm:$0xff] %v15311_v43  ;;  %v15314_v27 = vpop.f32.mrb[213].mxu0  ;;  %5131 = vmatmul.mubr.f32.gmra.mrb[84].mxu1 %v19293_v6  ;;  %v19298_v43 = vld [vmem:[#allocation15_spill] sm:$0xff] }
 0x79d   :  { %19291 = vst [vmem:[#allocation118_spill] sm:$0xff] %v15314_v27  ;;  %5135 = vmatprep.mubr.f32.mxu1 %v15321_v56  ;;  %v4519_v27 = vld [vmem:[#allocation6 + $0x2e0] sm:$0xff]  ;;  %v19301_v56 = vld [vmem:[#allocation126_spill] sm:$0xff] }
 0x79e   :  { %v8866_v24 = vpack.c.bf16 %v4520_v50, %v4519_v27  ;;  %v4521_v27 = vld [vmem:[#allocation6 + $0x2f0] sm:$0xff]  ;;  %v4522_v50 = vld [vmem:[#allocation6 + $0x2f8] sm:$0xff] }
 0x79f   :  { %v8869_v33 = vpack.c.bf16 %v4522_v50, %v4521_v27  ;;  %v19310_v27 = vld [vmem:[#allocation133_spill] sm:$0xff]  ;;  %v4218_v50 = vrot.slane %v14835_v62, 2  ;;  %v15372_v62 = vsel %vm496_vm1, %v4221_v45, %v4223_v37  ;;  %v15391_v37 = vld [vmem:[#allocation2 + $0x258] sm:$0xff] }
 0x7a0   :  { %5136 = vmatmul.mubr.f32.gmra.mrb[86].mxu1 %v19295_v4  ;;  %19319 = vst [vmem:[#allocation126_spill] sm:$0xff] %v15391_v37 }
 0x7a1   :  { %5140 = vmatprep.mubr.f32.mxu1 %v15325_v12  ;;  %8867 = vmatpush1.bf16.msra.mxu1 %v8866_v24  ;;  %v19303_v12 = vld [vmem:[#allocation127_spill] sm:$0xff]  ;;  %v15342_v24 = vld [vmem:[#allocation2 + $0x180] sm:$0xff] }
 0x7a2   :  { %8868 = vmatprep.subr.bf16.mxu1 %v19076_v5 }
 0x7a4   :  { %5141 = vmatmul.mubr.f32.gmra.mrb[88].mxu1 %v19297_v29 }
 0x7a5   :  { %5145 = vmatprep.mubr.f32.mxu1 %v19298_v43  ;;  %v19305_v43 = vld [vmem:[#allocation129_spill] sm:$0xff]  ;;  %8870 = vmatpush1.bf16.msra.mxu1 %v8869_v33 }
 0x7a6   :  { %8871 = vmatprep.subr.bf16.mxu1 %v19076_v5 }
 0x7a8   :  { %5146 = vmatmul.mubr.f32.gmra.mrb[90].mxu1 %v19299_v52 }
 0x7a9   :  { %5150 = vmatprep.mubr.f32.mxu1 %v15331_v39  ;;  %v15347_v39 = vld [vmem:[#allocation2 + $0x188] sm:$0xff] }
 0x7ac   :  { %5151 = vmatmul.mubr.f32.gmra.mrb[92].mxu1 %v19301_v56 }
 0x7ad   :  { %5155 = vmatprep.mubr.f32.mxu1 %v19302_v31  ;;  %v19307_v31 = vld [vmem:[#allocation132_spill] sm:$0xff] }
 0x7b0   :  { %5156 = vmatmul.mubr.f32.gmra.mrb[94].mxu1 %v19303_v12 }
 0x7b1   :  { %5160 = vmatprep.mubr.f32.mxu1 %v19304_v41  ;;  %v15350_v41 = vld [vmem:[#allocation2] sm:$0xff] }
 0x7b2   :  { %19308 = vst [vmem:[#allocation15_spill] sm:$0xff] %v15350_v41 }
 0x7b4   :  { %5161 = vmatmul.mubr.f32.gmra.mrb[96].mxu1 %v19305_v43 }
 0x7b5   :  { %5165 = vmatprep.mubr.f32.mxu1 %v14794_v58  ;;  %v15353_v58 = vrot.slane %v15350_v41, 2  ;;  %v15366_v41 = vsel %vm496_vm1, %v4220_v35, %v4221_v45  ;;  %v15399_v45 = vld [vmem:[#allocation2 + $0x270] sm:$0xff]  ;;  %v19326_v35 = vld [vmem:[#allocation104_spill] sm:$0xff] }
 0x7b6   :  { %19323 = vst [vmem:[#allocation127_spill] sm:$0xff] %v15399_v45 }
 0x7b7   :  { %19309 = vst [vmem:[#allocation124_spill] sm:$0xff] %v15353_v58  ;;  %v4219_v33 = vsel %vm496_vm1, %v15353_v58, %v4218_v50  ;;  %v15407_v50 = vld [vmem:[#allocation2 + $0x288] sm:$0xff] }
 0x7b8   :  { %5166 = vmatmul.mubr.f32.gmra.mrb[98].mxu1 %v19306_v46  ;;  %19327 = vst [vmem:[#allocation129_spill] sm:$0xff] %v15407_v50 }
 0x7b9   :  { %5170 = vmatprep.mubr.f32.mxu1 %v15342_v24 }
 0x7bc   :  { %5171 = vmatmul.mubr.f32.gmra.mrb[100].mxu1 %v19307_v31 }
 0x7bd   :  { %5175 = vmatprep.mubr.f32.mxu1 %v15347_v39 }
 0x7c0   :  { %5176 = vmatmul.mubr.f32.gmra.mrb[102].mxu1 %v19310_v27 }
 0x7c1   :  { %5180 = vmatprep.mubr.f32.mxu1 %v14863_v30  ;;  %v19312_v30 = vld [vmem:[#allocation68_spill] sm:$0xff] }
 0x7c4   :  { %5181 = vmatmul.mubr.f32.gmra.mrb[104].mxu1 %v15353_v58  ;;  %v19332_v58 = vld [vmem:[#allocation14_spill] sm:$0xff] }
 0x7c5   :  { %5185 = vmatprep.mubr.f32.mxu1 %v14865_v47  ;;  %v19311_v47 = vld [vmem:[#allocation61_spill] sm:$0xff] }
 0x7c8   :  { %5186 = vmatmul.mubr.f32.gmra.mrb[106].mxu1 %v4219_v33  ;;  %v19328_v33 = vld [vmem:[#allocation109_spill] sm:$0xff] }
 0x7c9   :  { %5190 = vmatprep.mubr.f32.mxu1 %v14888_v44  ;;  %v19314_v44 = vld [vmem:[#allocation66_spill] sm:$0xff] }
 0x7cc   :  { %5191 = vmatmul.mubr.f32.gmra.mrb[108].mxu1 %v15366_v41 }
 0x7cd   :  { %5195 = vmatprep.mubr.f32.mxu1 %v14891_v61  ;;  %v19315_v61 = vld [vmem:[#allocation73_spill] sm:$0xff] }
 0x7d0   :  { %5196 = vmatmul.mubr.f32.gmra.mrb[110].mxu1 %v15372_v62 }
 0x7d1   :  { %5200 = vmatprep.mubr.f32.mxu1 %v14905_v9  ;;  %v19316_v9 = vld [vmem:[#allocation76_spill] sm:$0xff] }
 0x7d4   :  { %5201 = vmatmul.mubr.f32.gmra.mrb[112].mxu1 %v19311_v47 }
 0x7d5   :  { %5205 = vmatprep.mubr.f32.mxu1 %v14908_v49  ;;  %v19317_v49 = vld [vmem:[#allocation81_spill] sm:$0xff] }
 0x7d8   :  { %5206 = vmatmul.mubr.f32.gmra.mrb[114].mxu1 %v19312_v30 }
 0x7d9   :  { %5210 = vmatprep.mubr.f32.mxu1 %v14922_v34  ;;  %v19318_v34 = vld [vmem:[#allocation94_spill] sm:$0xff] }
 0x7dc   :  { %5211 = vmatmul.mubr.f32.gmra.mrb[116].mxu1 %v19313_v38 }
 0x7dd   :  { %5215 = vmatprep.mubr.f32.mxu1 %v14925_v16  ;;  %v19320_v16 = vld [vmem:[#allocation99_spill] sm:$0xff] }
 0x7e0   :  { %5216 = vmatmul.mubr.f32.gmra.mrb[118].mxu1 %v19314_v44 }
 0x7e1   :  { %5220 = vmatprep.mubr.f32.mxu1 %v14939_v25  ;;  %v15395_v25 = vld [vmem:[#allocation2 + $0x260] sm:$0xff] }
 0x7e2   :  { %19321 = vst [vmem:[#allocation86_spill] sm:$0xff] %v15395_v25 }
 0x7e4   :  { %5221 = vmatmul.mubr.f32.gmra.mrb[120].mxu1 %v19315_v61 }
 0x7e5   :  { %5225 = vmatprep.mubr.f32.mxu1 %v14942_v55  ;;  %v19322_v55 = vld [vmem:[#allocation96_spill] sm:$0xff] }
 0x7e8   :  { %5226 = vmatmul.mubr.f32.gmra.mrb[122].mxu1 %v19316_v9 }
 0x7e9   :  { %5230 = vmatprep.mubr.f32.mxu1 %v14956_v59  ;;  %v19324_v59 = vld [vmem:[#allocation103_spill] sm:$0xff] }
 0x7ec   :  { %5231 = vmatmul.mubr.f32.gmra.mrb[124].mxu1 %v19317_v49 }
 0x7ed   :  { %5235 = vmatprep.mubr.f32.mxu1 %v14959_v10  ;;  %v15403_v10 = vld [vmem:[#allocation2 + $0x278] sm:$0xff] }
 0x7ee   :  { %19325 = vst [vmem:[#allocation20_spill] sm:$0xff] %v15403_v10 }
 0x7f0   :  { %5236 = vmatmul.mubr.f32.gmra.mrb[126].mxu1 %v19318_v34 }
 0x7f1   :  { %5240 = vmatprep.mubr.f32.mxu1 %v15391_v37  ;;  %v19330_v37 = vld [vmem:[#allocation13_spill] sm:$0xff] }
 0x7f4   :  { %5241 = vmatmul.mubr.f32.gmra.mrb[128].mxu1 %v19320_v16 }
 0x7f5   :  { %5245 = vmatprep.mubr.f32.mxu1 %v15395_v25  ;;  %v15411_v25 = vld [vmem:[#allocation2 + $0x290] sm:$0xff] }
 0x7f6   :  { %19329 = vst [vmem:[#allocation130_spill] sm:$0xff] %v15411_v25 }
 0x7f8   :  { %5246 = vmatmul.mubr.f32.gmra.mrb[130].mxu1 %v19322_v55 }
 0x7f9   :  { %5250 = vmatprep.mubr.f32.mxu1 %v15399_v45  ;;  %v15415_v45 = vld [vmem:[#allocation2 + $0x2a0] sm:$0xff] }
 0x7fa   :  { %19331 = vst [vmem:[#allocation132_spill] sm:$0xff] %v15415_v45 }
 0x7fc   :  { %5251 = vmatmul.mubr.f32.gmra.mrb[132].mxu1 %v19324_v59 }
 0x7fd   :  { %5255 = vmatprep.mubr.f32.mxu1 %v15403_v10  ;;  %v15419_v10 = vld [vmem:[#allocation2 + $0x2a8] sm:$0xff] }
 0x7fe   :  { %19333 = vst [vmem:[#allocation133_spill] sm:$0xff] %v15419_v10 }
 0x800   :  { %5256 = vmatmul.mubr.f32.gmra.mrb[134].mxu1 %v19326_v35  ;;  %v19334_v35 = vld [vmem:[#allocation74_spill] sm:$0xff] }
 0x801   :  { %5260 = vmatprep.mubr.f32.mxu1 %v15407_v50  ;;  %v19335_v50 = vld [vmem:[#allocation83_spill] sm:$0xff] }
 0x804   :  { %5261 = vmatmul.mubr.f32.gmra.mrb[136].mxu1 %v19328_v33 }
 0x805   :  { %5265 = vmatprep.mubr.f32.mxu1 %v15411_v25  ;;  %v19336_v25 = vld [vmem:[#allocation84_spill] sm:$0xff] }
 0x808   :  { %5266 = vmatmul.mubr.f32.gmra.mrb[138].mxu1 %v19330_v37  ;;  %v19337_v37 = vld [vmem:[#allocation89_spill] sm:$0xff] }
 0x809   :  { %5270 = vmatprep.mubr.f32.mxu1 %v15415_v45  ;;  %v19338_v45 = vld [vmem:[#allocation93_spill] sm:$0xff] }
 0x80c   :  { %5271 = vmatmul.mubr.f32.gmra.mrb[140].mxu1 %v19332_v58 }
 0x80d   :  { %5275 = vmatprep.mubr.f32.mxu1 %v15419_v10  ;;  %v19339_v10 = vld [vmem:[#allocation17_spill] sm:$0xff] }
 0x810   :  { %5276 = vmatmul.mubr.f32.gmra.mrb[142].mxu1 %v19334_v35 }
 0x811   :  { %5280 = vmatprep.mubr.f32.mxu1 %v14702_v13  ;;  %v19340_v13 = vld [vmem:[#allocation18_spill] sm:$0xff] }
 0x814   :  { %5281 = vmatmul.mubr.f32.gmra.mrb[144].mxu1 %v19335_v50 }
 0x815   :  { %5285 = vmatprep.mubr.f32.mxu1 %v14704_v23  ;;  %v19341_v23 = vld [vmem:[#allocation21_spill] sm:$0xff] }
 0x818   :  { %5286 = vmatmul.mubr.f32.gmra.mrb[146].mxu1 %v19336_v25 }
 0x819   :  { %5290 = vmatprep.mubr.f32.mxu1 %v14725_v60  ;;  %v19342_v60 = vld [vmem:[#allocation22_spill] sm:$0xff] }
 0x81c   :  { %5291 = vmatmul.mubr.f32.gmra.mrb[148].mxu1 %v19337_v37 }
 0x81d   :  { %5295 = vmatprep.mubr.f32.mxu1 %v14727_v18  ;;  %v19343_v18 = vld [vmem:[#allocation45_spill] sm:$0xff] }
 0x820   :  { %5296 = vmatmul.mubr.f32.gmra.mrb[150].mxu1 %v19338_v45  ;;  %v19348_v45 = vld [vmem:[#allocation24_spill] sm:$0xff] }
 0x821   :  { %5300 = vmatprep.mubr.f32.mxu1 %v14754_v14  ;;  %v19344_v14 = vld [vmem:[#allocation51_spill] sm:$0xff] }
 0x824   :  { %5301 = vmatmul.mubr.f32.gmra.mrb[152].mxu1 %v19339_v10  ;;  %v19345_v10 = vld [vmem:[#allocation46_spill] sm:$0xff] }
 0x825   :  { %5305 = vmatprep.mubr.f32.mxu1 %v14756_v26  ;;  %v19346_v26 = vld [vmem:[#allocation27_spill] sm:$0xff] }
 0x828   :  { %5306 = vmatmul.mubr.f32.gmra.mrb[154].mxu1 %v19340_v13  ;;  %v19347_v13 = vld [vmem:[#allocation49_spill] sm:$0xff] }
 0x829   :  { %5310 = vmatprep.mubr.f32.mxu1 %v14777_v40  ;;  %v4523_v40 = vld [vmem:[#allocation6 + $0x300] sm:$0xff] }
 0x82c   :  { %5311 = vmatmul.mubr.f32.gmra.mrb[156].mxu1 %v19341_v23  ;;  %v4524_v23 = vld [vmem:[#allocation6 + $0x308] sm:$0xff] }
 0x82d   :  { %5315 = vmatprep.mubr.f32.mxu1 %v14779_v42  ;;  %v8872_v42 = vpack.c.bf16 %v4524_v23, %v4523_v40  ;;  %v4530_v23 = vld [vmem:[#allocation6 + $0x338] sm:$0xff]  ;;  %v19351_v40 = vld [vmem:[#allocation100_spill] sm:$0xff] }
 0x830   :  { %5316 = vmatmul.mubr.f32.gmra.mrb[158].mxu1 %v19342_v60  ;;  %v4526_v60 = vld [vmem:[#allocation6 + $0x318] sm:$0xff] }
 0x831   :  { %5320 = vmatprep.mubr.f32.mxu1 %v14807_v20  ;;  %v4525_v20 = vld [vmem:[#allocation6 + $0x310] sm:$0xff] }
 0x834   :  { %5321 = vmatmul.mubr.f32.gmra.mrb[160].mxu1 %v19343_v18  ;;  %v19349_v18 = vld [vmem:[#allocation95_spill] sm:$0xff] }
 0x835   :  { %5325 = vmatprep.mubr.f32.mxu1 %v14809_v28  ;;  %v8875_v28 = vpack.c.bf16 %v4526_v60, %v4525_v20  ;;  %v4531_v60 = vld [vmem:[#allocation6 + $0x340] sm:$0xff]  ;;  %v4534_v20 = vld [vmem:[#allocation6 + $0x358] sm:$0xff] }
 0x838   :  { %5326 = vmatmul.mubr.f32.gmra.mrb[162].mxu1 %v19344_v14 }
 0x839   :  { %5330 = vmatprep.mubr.f32.mxu1 %v19345_v10  ;;  %v4527_v10 = vld [vmem:[#allocation6 + $0x320] sm:$0xff] }
 0x83c   :  { %5331 = vmatmul.mubr.f32.gmra.mrb[164].mxu1 %v19346_v26  ;;  %v4528_v26 = vld [vmem:[#allocation6 + $0x328] sm:$0xff] }
 0x83d   :  { %5335 = vmatprep.mubr.f32.mxu1 %v19347_v13  ;;  %v19350_v13 = vld [vmem:[#allocation97_spill] sm:$0xff] }
 0x840   :  { %5336 = vmatmul.mubr.f32.gmra.mrb[166].mxu1 %v19348_v45  ;;  %v8878_v45 = vpack.c.bf16 %v4528_v26, %v4527_v10  ;;  %v4533_v26 = vld [vmem:[#allocation6 + $0x350] sm:$0xff]  ;;  %v4536_v10 = vld [vmem:[#allocation6 + $0x368] sm:$0xff] }
 0x841   :  { %5405 = vmatprep.mubr.f32.mxu1 %v15145_v53  ;;  %v4529_v53 = vld [vmem:[#allocation6 + $0x330] sm:$0xff] }
 0x844   :  { %5406 = vmatmul.mubr.f32.vlgmr.msra.gmra.mrb[40].mxu1 %v19349_v18  ;;  %v4532_v18 = vld [vmem:[#allocation6 + $0x348] sm:$0xff] }
 0x845   :  { %5410 = vmatprep.mubr.f32.mxu1 %v15157_v54  ;;  %8873 = vmatpush1.bf16.msra.mxu1 %v8872_v42  ;;  %v8881_v54 = vpack.c.bf16 %v4530_v23, %v4529_v53  ;;  %v19352_v42 = vld [vmem:[#allocation102_spill] sm:$0xff]  ;;  %v4538_v23 = vld [vmem:[#allocation6 + $0x378] sm:$0xff] }
 0x846   :  { %8874 = vmatprep.subr.bf16.mxu1 %v19076_v5  ;;  %v4537_v53 = vld [vmem:[#allocation6 + $0x370] sm:$0xff] }
 0x848   :  { %5411 = vmatmul.mubr.f32.gmra.mrb[42].mxu1 %v19350_v13  ;;  %v19354_v13 = vld [vmem:[#allocation107_spill] sm:$0xff] }
 0x849   :  { %5415 = vmatprep.mubr.f32.mxu1 %v14197_v48  ;;  %8876 = vmatpush1.bf16.msra.mxu1 %v8875_v28  ;;  %v8884_v48 = vpack.c.bf16 %v4532_v18, %v4531_v60  ;;  %v19353_v28 = vld [vmem:[#allocation105_spill] sm:$0xff]  ;;  %v4539_v60 = vld [vmem:[#allocation6 + $0x380] sm:$0xff] }
 0x84a   :  { %8877 = vmatprep.subr.bf16.mxu1 %v19076_v5  ;;  %v4540_v18 = vld [vmem:[#allocation6 + $0x388] sm:$0xff] }
 0x84c   :  { %5416 = vmatmul.mubr.f32.gmra.mrb[44].mxu1 %v19351_v40 }
 0x84d   :  { %5420 = vmatprep.mubr.f32.mxu1 %v14212_v51  ;;  %8879 = vmatpush1.bf16.msra.mxu1 %v8878_v45  ;;  %v8887_v51 = vpack.c.bf16 %v4534_v20, %v4533_v26  ;;  %v4535_v45 = vld [vmem:[#allocation6 + $0x360] sm:$0xff]  ;;  %v4541_v26 = vld [vmem:[#allocation6 + $0x390] sm:$0xff]  ;;  %v4542_v20 = vld [vmem:[#allocation6 + $0x398] sm:$0xff] }
 0x84e   :  { %8880 = vmatprep.subr.bf16.mxu1 %v19076_v5 }
 0x850   :  { %5421 = vmatmul.mubr.f32.gmra.mrb[46].mxu1 %v19352_v42 }
 0x851   :  { %5425 = vmatprep.mubr.f32.mxu1 %v14220_v32  ;;  %8882 = vmatpush1.bf16.msra.mxu1 %v8881_v54  ;;  %v8890_v32 = vpack.c.bf16 %v4536_v10, %v4535_v45  ;;  %v19355_v54 = vld [vmem:[#allocation110_spill] sm:$0xff]  ;;  %v4543_v45 = vld [vmem:[#allocation6 + $0x3a0] sm:$0xff]  ;;  %v4544_v10 = vld [vmem:[#allocation6 + $0x3a8] sm:$0xff] }
 0x852   :  { %8883 = vmatprep.subr.bf16.mxu1 %v19076_v5 }
 0x854   :  { %5426 = vmatmul.mubr.f32.gmra.mrb[48].mxu1 %v19353_v28 }
 0x855   :  { %5430 = vmatprep.mubr.f32.mxu1 %v14229_v0  ;;  %8885 = vmatpush1.bf16.msra.mxu1 %v8884_v48  ;;  %v8893_v0 = vpack.c.bf16 %v4538_v23, %v4537_v53  ;;  %v19356_v48 = vld [vmem:[#allocation114_spill] sm:$0xff]  ;;  %v19361_v23 = vld [vmem:[#allocation128_spill] sm:$0xff] }
 0x856   :  { %8886 = vmatprep.subr.bf16.mxu1 %v19076_v5  ;;  %v19359_v53 = vld [vmem:[#allocation122_spill] sm:$0xff] }
 0x858   :  { %5431 = vmatmul.mubr.f32.gmra.mrb[50].mxu1 %v19354_v13 }
 0x859   :  { %5435 = vmatprep.mubr.f32.mxu1 %v14240_v15  ;;  %8888 = vmatpush1.bf16.msra.mxu1 %v8887_v51  ;;  %v8896_v15 = vpack.c.bf16 %v4540_v18, %v4539_v60  ;;  %v19357_v51 = vld [vmem:[#allocation116_spill] sm:$0xff]  ;;  %v19362_v18 = vld [vmem:[#allocation131_spill] sm:$0xff] }
 0x85a   :  { %8889 = vmatprep.subr.bf16.mxu1 %v19076_v5 }
 0x85c   :  { %5436 = vmatmul.mubr.f32.gmra.mrb[52].mxu1 %v19355_v54 }
 0x85d   :  { %5440 = vmatprep.mubr.f32.mxu1 %v14250_v57  ;;  %8891 = vmatpush1.bf16.msra.mxu1 %v8890_v32  ;;  %v8899_v57 = vpack.c.bf16 %v4542_v20, %v4541_v26  ;;  %v19358_v32 = vld [vmem:[#allocation119_spill] sm:$0xff]  ;;  %v4548_v26 = vld [vmem:[#allocation6 + $0x3c8] sm:$0xff] }
 0x85e   :  { %8892 = vmatprep.subr.bf16.mxu1 %v19076_v5 }
 0x860   :  { %5441 = vmatmul.mubr.f32.gmra.mrb[54].mxu1 %v19356_v48 }
 0x861   :  { %5445 = vmatprep.mubr.f32.mxu1 %v14260_v63  ;;  %8894 = vmatpush1.bf16.msra.mxu1 %v8893_v0  ;;  %v8902_v63 = vpack.c.bf16 %v4544_v10, %v4543_v45  ;;  %v4546_v0 = vld [vmem:[#allocation6 + $0x3b8] sm:$0xff] }
 0x862   :  { %8895 = vmatprep.subr.bf16.mxu1 %v19076_v5  ;;  %v4550_v45 = vld [vmem:[#allocation6 + $0x3d8] sm:$0xff] }
 0x864   :  { %5446 = vmatmul.mubr.f32.gmra.mrb[56].mxu1 %v19357_v51 }
 0x865   :  { %5450 = vmatprep.mubr.f32.mxu1 %v14269_v1  ;;  %8897 = vmatpush1.bf16.msra.mxu1 %v8896_v15  ;;  %v19360_v1 = vld [vmem:[#allocation125_spill] sm:$0xff] }
 0x866   :  { %8898 = vmatprep.subr.bf16.mxu1 %v19076_v5  ;;  %v19364_v15 = vld [vmem:[#allocation137_spill] sm:$0xff] }
 0x868   :  { %5451 = vmatmul.mubr.f32.gmra.mrb[58].mxu1 %v19358_v32 }
 0x869   :  { %5455 = vmatprep.mubr.f32.mxu1 %v14281_v3  ;;  %8900 = vmatpush1.bf16.msra.mxu1 %v8899_v57  ;;  %v4545_v3 = vld [vmem:[#allocation6 + $0x3b0] sm:$0xff]  ;;  %v19366_v57 = vld [vmem:[#allocation64_spill] sm:$0xff] }
 0x86a   :  { %8901 = vmatprep.subr.bf16.mxu1 %v19076_v5  ;;  %v8905_v60 = vpack.c.bf16 %v4546_v0, %v4545_v3  ;;  %v4552_v3 = vld [vmem:[#allocation6 + $0x3e8] sm:$0xff] }
 0x86c   :  { %5456 = vmatmul.mubr.f32.gmra.mrb[60].mxu1 %v19359_v53 }
 0x86d   :  { %5460 = vmatprep.mubr.f32.mxu1 %v14292_v19  ;;  %8903 = vmatpush1.bf16.msra.mxu1 %v8902_v63  ;;  %v19363_v19 = vld [vmem:[#allocation134_spill] sm:$0xff]  ;;  %v19370_v63 = vld [vmem:[#allocation101_spill] sm:$0xff] }
 0x86e   :  { %8904 = vmatprep.subr.bf16.mxu1 %v19076_v5 }
 0x870   :  { %5461 = vmatmul.mubr.f32.gmra.mrb[62].mxu1 %v19360_v1 }
 0x871   :  { %5465 = vmatprep.mubr.f32.mxu1 %v14303_v36  ;;  %8906 = vmatpush1.bf16.msra.mxu1 %v8905_v60  ;;  %v19365_v36 = vld [vmem:[#allocation138_spill] sm:$0xff]  ;;  %v19374_v60 = vld [vmem:[#allocation88_spill] sm:$0xff] }
 0x872   :  { %8907 = vmatprep.subr.bf16.mxu1 %v19076_v5 }
 0x874   :  { %5466 = vmatmul.mubr.f32.gmra.mrb[64].mxu1 %v19361_v23 }
 0x875   :  { %5470 = vmatprep.mubr.f32.mxu1 %v19266_v11  ;;  %v4547_v11 = vld [vmem:[#allocation6 + $0x3c0] sm:$0xff] }
 0x876   :  { %v8908_v20 = vpack.c.bf16 %v4548_v26, %v4547_v11  ;;  %v4554_v11 = vld [vmem:[#allocation6 + $0x3f8] sm:$0xff] }
 0x878   :  { %5471 = vmatmul.mubr.f32.gmra.mrb[66].mxu1 %v19362_v18 }
 0x879   :  { %5475 = vmatprep.mubr.f32.mxu1 %v19270_v21  ;;  %8909 = vmatpush1.bf16.msra.mxu1 %v8908_v20  ;;  %v19367_v21 = vld [vmem:[#allocation71_spill] sm:$0xff]  ;;  %v4366_v20 = vrot.slane %v15347_v39, 1 }
 0x87a   :  { %8910 = vmatprep.subr.bf16.mxu1 %v19076_v5 }
 0x87c   :  { %5476 = vmatmul.mubr.f32.gmra.mrb[68].mxu1 %v19363_v19 }
 0x87d   :  { %5480 = vmatprep.mubr.f32.mxu1 %v19274_v2  ;;  %v19368_v2 = vld [vmem:[#allocation79_spill] sm:$0xff] }
 0x880   :  { %5481 = vmatmul.mubr.f32.gmra.mrb[70].mxu1 %v19364_v15 }
 0x881   :  { %5485 = vmatprep.mubr.f32.mxu1 %v19278_v17  ;;  %v19369_v17 = vld [vmem:[#allocation98_spill] sm:$0xff] }
 0x884   :  { %5486 = vmatmul.mubr.f32.gmra.mrb[72].mxu1 %v19365_v36 }
 0x885   :  { %5490 = vmatprep.mubr.f32.mxu1 %v19282_v22  ;;  %v4549_v22 = vld [vmem:[#allocation6 + $0x3d0] sm:$0xff] }
 0x886   :  { %v8911_v10 = vpack.c.bf16 %v4550_v45, %v4549_v22  ;;  %v19379_v22 = vld [vmem:[#allocation135_spill] sm:$0xff] }
 0x888   :  { %5491 = vmatmul.mubr.f32.gmra.mrb[74].mxu1 %v19366_v57 }
 0x889   :  { %5495 = vmatprep.mubr.f32.mxu1 %v19286_v8  ;;  %8912 = vmatpush1.bf16.msra.mxu1 %v8911_v10  ;;  %v19371_v8 = vld [vmem:[#allocation112_spill] sm:$0xff] }
 0x88a   :  { %8913 = vmatprep.subr.bf16.mxu1 %v19076_v5 }
 0x88c   :  { %5496 = vmatmul.mubr.f32.gmra.mrb[76].mxu1 %v19367_v21 }
 0x88d   :  { %5500 = vmatprep.mubr.f32.mxu1 %v19290_v7  ;;  %v19372_v7 = vld [vmem:[#allocation12_spill] sm:$0xff] }
 0x890   :  { %5501 = vmatmul.mubr.f32.gmra.mrb[78].mxu1 %v19368_v2 }
 0x891   :  { %5505 = vmatprep.mubr.f32.mxu1 %v19293_v6  ;;  %v19373_v6 = vld [vmem:[#allocation78_spill] sm:$0xff] }
 0x894   :  { %5506 = vmatmul.mubr.f32.gmra.mrb[80].mxu1 %v19369_v17 }
 0x895   :  { %5510 = vmatprep.mubr.f32.mxu1 %v19295_v4  ;;  %v4551_v4 = vld [vmem:[#allocation6 + $0x3e0] sm:$0xff] }
 0x896   :  { %v8914_v0 = vpack.c.bf16 %v4552_v3, %v4551_v4  ;;  %v19381_v4 = vld [vmem:[#allocation47_spill] sm:$0xff]  ;;  %v6914_v3 = vld [vmem:[%s17873_s8] sm:$0xff] }
 0x898   :  { %5511 = vmatmul.mubr.f32.gmra.mrb[82].mxu1 %v19370_v63 }
 0x899   :  { %5515 = vmatprep.mubr.f32.mxu1 %v19297_v29  ;;  %8915 = vmatpush1.bf16.msra.mxu1 %v8914_v0  ;;  %v19375_v29 = vld [vmem:[#allocation91_spill] sm:$0xff]  ;;  %v6915_v0 = vld [vmem:[%s17873_s8 + $0x8] sm:$0xff] }
 0x89a   :  { %8916 = vmatprep.subr.bf16.mxu1 %v19076_v5  ;;  %v19378_v5 = vld [vmem:[#allocation54_spill] sm:$0xff] }
 0x89c   :  { %5516 = vmatmul.mubr.f32.gmra.mrb[84].mxu1 %v19371_v8 }
 0x89d   :  { %5520 = vmatprep.mubr.f32.mxu1 %v19299_v52  ;;  %v19376_v52 = vld [vmem:[#allocation19_spill] sm:$0xff] }
 0x8a0   :  { %5521 = vmatmul.mubr.f32.gmra.mrb[86].mxu1 %v19372_v7 }
 0x8a1   :  { %5525 = vmatprep.mubr.f32.mxu1 %v19301_v56  ;;  %v19377_v56 = vld [vmem:[#allocation23_spill] sm:$0xff] }
 0x8a4   :  { %5526 = vmatmul.mubr.f32.gmra.mrb[88].mxu1 %v19373_v6 }
 0x8a5   :  { %5530 = vmatprep.mubr.f32.mxu1 %v19303_v12  ;;  %v4553_v12 = vld [vmem:[#allocation6 + $0x3f0] sm:$0xff] }
 0x8a6   :  { %v8917_v26 = vpack.c.bf16 %v4554_v11, %v4553_v12  ;;  %v15543_v12 = vpack.c.bf16 %v6915_v0, %v6914_v3  ;;  %v19382_v11 = vld [vmem:[#allocation50_spill] sm:$0xff]  ;;  %v19406_v3 = vld [vmem:[#allocation17_spill] sm:$0xff] }
 0x8a7   :  { %v19408_v0 = vld [vmem:[#allocation18_spill] sm:$0xff] }
 0x8a8   :  { %5531 = vmatmul.mubr.f32.gmra.mrb[90].mxu1 %v19374_v60 }
 0x8a9   :  { %5535 = vmatprep.mubr.f32.mxu1 %v19305_v43  ;;  %v4365_v43 = vrot.slane %v15342_v24, 1  ;;  %8918 = vmatpush1.bf16.msra.mxu1 %v8917_v26  ;;  %v19384_v26 = vld [vmem:[#allocation44_spill] sm:$0xff] }
 0x8aa   :  { %8952 = vmatprep.subr.bf16.mxu1 %v15543_v12 }
 0x8ac   :  { %5536 = vmatmul.mubr.f32.gmra.mrb[92].mxu1 %v19375_v29 }
 0x8ad   :  { %5540 = vmatprep.mubr.f32.mxu1 %v19306_v46  ;;  %v15526_v46 = vsel %vm271_vm0, %v4365_v43, %v4366_v20  ;;  %v19385_v43 = vld [vmem:[#allocation43_spill] sm:$0xff] }
 0x8b0   :  { %5541 = vmatmul.mubr.f32.gmra.mrb[94].mxu1 %v19376_v52 }
 0x8b1   :  { %5545 = vmatprep.mubr.f32.mxu1 %v19307_v31  ;;  %v9893_v31 = vld [vmem:[#allocation2 + $0x190] sm:$0x3] }
 0x8b2   :  { %v4368_v45 = vrot.slane %v9893_v31, 1  ;;  %v19397_v31 = vld [vmem:[#allocation13_spill] sm:$0xff] }
 0x8b4   :  { %5546 = vmatmul.mubr.f32.gmra.mrb[96].mxu1 %v19377_v56  ;;  %v15531_v10 = vsel %vm271_vm0, %v4366_v20, %v4368_v45  ;;  %v19387_v20 = vld [vmem:[#allocation56_spill] sm:$0xff]  ;;  %v19401_v45 = vld [vmem:[#allocation30_spill] sm:$0xff] }
 0x8b5   :  { %5550 = vmatprep.mubr.f32.mxu1 %v19310_v27  ;;  %v19380_v27 = vld [vmem:[#allocation136_spill] sm:$0xff] }
 0x8b8   :  { %5551 = vmatmul.mubr.f32.gmra.mrb[98].mxu1 %v19378_v5 }
 0x8b9   :  { %5555 = vmatprep.mubr.f32.mxu1 %v19379_v22  ;;  %v19394_v22 = vld [vmem:[#allocation104_spill] sm:$0xff] }
 0x8bc   :  { %5556 = vmatmul.mubr.f32.gmra.mrb[100].mxu1 %v15526_v46 }
 0x8bd   :  { %5560 = vmatprep.mubr.f32.mxu1 %v19380_v27  ;;  %v19403_v27 = vld [vmem:[#allocation33_spill] sm:$0xff] }
 0x8c0   :  { %5561 = vmatmul.mubr.f32.gmra.mrb[102].mxu1 %v15531_v10 }
 0x8c1   :  { %5565 = vmatprep.mubr.f32.mxu1 %v15366_v41  ;;  %v19383_v41 = vld [vmem:[#allocation41_spill] sm:$0xff] }
 0x8c4   :  { %5566 = vmatmul.mubr.f32.gmra.mrb[104].mxu1 %v19381_v4  ;;  %v19404_v4 = vld [vmem:[#allocation93_spill] sm:$0xff] }
 0x8c5   :  { %5570 = vmatprep.mubr.f32.mxu1 %v15372_v62  ;;  %v19386_v62 = vld [vmem:[#allocation48_spill] sm:$0xff] }
 0x8c8   :  { %5571 = vmatmul.mubr.f32.gmra.mrb[106].mxu1 %v19382_v11  ;;  %v19410_v11 = vld [vmem:[#allocation21_spill] sm:$0xff] }
 0x8c9   :  { %5575 = vmatprep.mubr.f32.mxu1 %v19311_v47  ;;  %v19388_v47 = vld [vmem:[#allocation55_spill] sm:$0xff] }
 0x8cc   :  { %5576 = vmatmul.mubr.f32.gmra.mrb[108].mxu1 %v19383_v41 }
 0x8cd   :  { %5580 = vmatprep.mubr.f32.mxu1 %v19312_v30  ;;  %v19389_v30 = vld [vmem:[#allocation57_spill] sm:$0xff] }
 0x8d0   :  { %5581 = vmatmul.mubr.f32.gmra.mrb[110].mxu1 %v19384_v26 }
 0x8d1   :  { %5585 = vmatprep.mubr.f32.mxu1 %v19313_v38  ;;  %v19390_v38 = vld [vmem:[#allocation65_spill] sm:$0xff] }
 0x8d4   :  { %5586 = vmatmul.mubr.f32.gmra.mrb[112].mxu1 %v19385_v43 }
 0x8d5   :  { %5590 = vmatprep.mubr.f32.mxu1 %v19314_v44  ;;  %v19391_v44 = vld [vmem:[#allocation70_spill] sm:$0xff] }
 0x8d8   :  { %5591 = vmatmul.mubr.f32.gmra.mrb[114].mxu1 %v19386_v62 }
 0x8d9   :  { %5595 = vmatprep.mubr.f32.mxu1 %v19315_v61  ;;  %v19392_v61 = vld [vmem:[#allocation72_spill] sm:$0xff] }
 0x8dc   :  { %5596 = vmatmul.mubr.f32.gmra.mrb[116].mxu1 %v19387_v20 }
 0x8dd   :  { %5600 = vmatprep.mubr.f32.mxu1 %v19316_v9  ;;  %v19393_v9 = vld [vmem:[#allocation77_spill] sm:$0xff] }
 0x8e0   :  { %5601 = vmatmul.mubr.f32.gmra.mrb[118].mxu1 %v19388_v47 }
 0x8e1   :  { %5605 = vmatprep.mubr.f32.mxu1 %v19317_v49  ;;  %v19395_v49 = vld [vmem:[#allocation85_spill] sm:$0xff] }
 0x8e4   :  { %5606 = vmatmul.mubr.f32.gmra.mrb[120].mxu1 %v19389_v30 }
 0x8e5   :  { %5610 = vmatprep.mubr.f32.mxu1 %v19318_v34  ;;  %v19396_v34 = vld [vmem:[#allocation90_spill] sm:$0xff] }
 0x8e8   :  { %5611 = vmatmul.mubr.f32.gmra.mrb[122].mxu1 %v19390_v38 }
 0x8e9   :  { %5615 = vmatprep.mubr.f32.mxu1 %v19320_v16  ;;  %v19398_v16 = vld [vmem:[#allocation92_spill] sm:$0xff] }
 0x8ec   :  { %5616 = vmatmul.mubr.f32.gmra.mrb[124].mxu1 %v19391_v44 }
 0x8ed   :  { %5620 = vmatprep.mubr.f32.mxu1 %v19322_v55  ;;  %v19399_v55 = vld [vmem:[#allocation28_spill] sm:$0xff] }
 0x8f0   :  { %5621 = vmatmul.mubr.f32.gmra.mrb[126].mxu1 %v19392_v61 }
 0x8f1   :  { %5625 = vmatprep.mubr.f32.mxu1 %v19324_v59  ;;  %v19400_v59 = vld [vmem:[#allocation29_spill] sm:$0xff] }
 0x8f4   :  { %5626 = vmatmul.mubr.f32.gmra.mrb[128].mxu1 %v19393_v9 }
 0x8f5   :  { %5630 = vmatprep.mubr.f32.mxu1 %v19394_v22  ;;  %v19412_v22 = vld [vmem:[#allocation22_spill] sm:$0xff] }
 0x8f8   :  { %5631 = vmatmul.mubr.f32.gmra.mrb[130].mxu1 %v19395_v49 }
 0x8f9   :  { %5635 = vmatprep.mubr.f32.mxu1 %v19328_v33  ;;  %v19402_v33 = vld [vmem:[#allocation31_spill] sm:$0xff] }
 0x8fc   :  { %5636 = vmatmul.mubr.f32.gmra.mrb[132].mxu1 %v19396_v34 }
 0x8fd   :  { %5640 = vmatprep.mubr.f32.mxu1 %v19397_v31  ;;  %v19414_v31 = vld [vmem:[#allocation45_spill] sm:$0xff] }
 0x900   :  { %5641 = vmatmul.mubr.f32.gmra.mrb[134].mxu1 %v19398_v16 }
 0x901   :  { %5645 = vmatprep.mubr.f32.mxu1 %v19332_v58  ;;  %v19405_v58 = vld [vmem:[#allocation35_spill] sm:$0xff] }
 0x904   :  { %5646 = vmatmul.mubr.f32.gmra.mrb[136].mxu1 %v19399_v55 }
 0x905   :  { %5650 = vmatprep.mubr.f32.mxu1 %v19334_v35  ;;  %v19407_v35 = vld [vmem:[#allocation38_spill] sm:$0xff] }
 0x908   :  { %5651 = vmatmul.mubr.f32.gmra.mrb[138].mxu1 %v19400_v59 }
 0x909   :  { %5655 = vmatprep.mubr.f32.mxu1 %v19335_v50  ;;  %v19409_v50 = vld [vmem:[#allocation59_spill] sm:$0xff] }
 0x90c   :  { %5656 = vmatmul.mubr.f32.gmra.mrb[140].mxu1 %v19401_v45 }
 0x90d   :  { %5660 = vmatprep.mubr.f32.mxu1 %v19336_v25  ;;  %v19411_v25 = vld [vmem:[#allocation60_spill] sm:$0xff] }
 0x910   :  { %5661 = vmatmul.mubr.f32.gmra.mrb[142].mxu1 %v19402_v33 }
 0x911   :  { %5665 = vmatprep.mubr.f32.mxu1 %v19337_v37  ;;  %v19413_v37 = vld [vmem:[#allocation34_spill] sm:$0xff] }
 0x914   :  { %5666 = vmatmul.mubr.f32.gmra.mrb[144].mxu1 %v19403_v27 }
 0x915   :  { %5670 = vmatprep.mubr.f32.mxu1 %v19404_v4  ;;  %v19415_v4 = vld [vmem:[#allocation80_spill] sm:$0xff] }
 0x918   :  { %5671 = vmatmul.mubr.f32.gmra.mrb[146].mxu1 %v19405_v58 }
 0x919   :  { %5675 = vmatprep.mubr.f32.mxu1 %v19406_v3  ;;  %v19416_v3 = vld [vmem:[#allocation87_spill] sm:$0xff] }
 0x91c   :  { %5676 = vmatmul.mubr.f32.gmra.mrb[148].mxu1 %v19407_v35  ;;  %v19417_v35 = vld [vmem:[#allocation27_spill] sm:$0xff] }
 0x91d   :  { %5680 = vmatprep.mubr.f32.mxu1 %v19408_v0  ;;  %v19418_v0 = vld [vmem:[#allocation139_spill] sm:$0xff] }
 0x920   :  { %5681 = vmatmul.mubr.f32.gmra.mrb[150].mxu1 %v19409_v50  ;;  %v19419_v50 = vld [vmem:[#allocation24_spill] sm:$0xff] }
 0x921   :  { %5685 = vmatprep.mubr.f32.mxu1 %v19410_v11  ;;  %v15602_v11 = vld [vmem:[#allocation2 + $0x330] sm:$0xff] }
 0x924   :  { %5686 = vmatmul.mubr.f32.gmra.mrb[152].mxu1 %v19411_v25  ;;  %v15605_v25 = vld [vmem:[#allocation2 + $0x338] sm:$0xff] }
 0x925   :  { %5690 = vmatprep.mubr.f32.mxu1 %v19412_v22  ;;  %v4370_v22 = vrot.slane %v15602_v11, 1  ;;  %19420 = vst [vmem:[#allocation61_spill] sm:$0xff] %v15605_v25 }
 0x928   :  { %5691 = vmatmul.mubr.f32.gmra.mrb[154].mxu1 %v19413_v37  ;;  %v19421_v37 = vld [vmem:[#allocation142_spill] sm:$0xff] }
 0x929   :  { %5695 = vmatprep.mubr.f32.mxu1 %v19414_v31  ;;  %v4371_v31 = vrot.slane %v15605_v25, 1  ;;  %v6916_v25 = vld [vmem:[%s17873_s8 + $0x10] sm:$0xff] }
 0x92c   :  { %5696 = vmatmul.mubr.f32.gmra.mrb[156].mxu1 %v19415_v4  ;;  %v19422_v4 = vld [vmem:[#allocation25_spill] sm:$0xff] }
 0x92d   :  { %5700 = vmatprep.mubr.f32.mxu1 %v19344_v14  ;;  %v15611_v14 = vsel %vm271_vm0, %v4370_v22, %v4371_v31 }
 0x930   :  { %5701 = vmatmul.mubr.f32.gmra.mrb[158].mxu1 %v19416_v3 }
 0x931   :  { %5705 = vmatprep.mubr.f32.mxu1 %v19417_v35  ;;  %v9896_v35 = vld [vmem:[#allocation2 + $0x340] sm:$0x3] }
 0x932   :  { %v4373_v3 = vrot.slane %v9896_v35, 1  ;;  %v6918_v35 = vld [vmem:[%s17873_s8 + $0x20] sm:$0xff] }
 0x934   :  { %5706 = vmatmul.mubr.f32.gmra.mrb[160].mxu1 %v19418_v0  ;;  %v15616_v0 = vsel %vm271_vm0, %v4371_v31, %v4373_v3  ;;  %v6919_v3 = vld [vmem:[%s17873_s8 + $0x28] sm:$0xff]  ;;  %v19424_v31 = vld [vmem:[#allocation150_spill] sm:$0xff] }
 0x935   :  { %5710 = vmatprep.mubr.f32.mxu1 %v19419_v50  ;;  %v19423_v50 = vld [vmem:[#allocation26_spill] sm:$0xff] }
 0x938   :  { %5711 = vmatmul.mubr.f32.gmra.mrb[162].mxu1 %v19421_v37 }
 0x939   :  { %5715 = vmatprep.mubr.f32.mxu1 %v19422_v4  ;;  %v6917_v4 = vld [vmem:[%s17873_s8 + $0x18] sm:$0xff] }
 0x93a   :  { %v8955_v22 = vpack.c.bf16 %v6917_v4, %v6916_v25  ;;  %v6921_v25 = vld [vmem:[%s17873_s8 + $0x38] sm:$0xff]  ;;  %v19425_v4 = vld [vmem:[#allocation153_spill] sm:$0xff] }
 0x93c   :  { %5716 = vmatmul.mubr.f32.gmra.mrb[164].mxu1 %v15611_v14 }
 0x93d   :  { %5720 = vmatprep.mubr.f32.mxu1 %v19423_v50  ;;  %v8959_v50 = vpack.c.bf16 %v6919_v3, %v6918_v35  ;;  %v19426_v35 = vld [vmem:[#allocation156_spill] sm:$0xff] }
 0x940   :  { %5721 = vmatmul.mubr.f32.gmra.mrb[166].mxu1 %v15616_v0 }
 0x941   :  { %5790 = vmatprep.mubr.f32.mxu1 %v19351_v40  ;;  %v6920_v40 = vld [vmem:[%s17873_s8 + $0x30] sm:$0xff] }
 0x944   :  { %5791 = vmatmul.mubr.f32.vlgmr.msra.gmra.mrb[40].mxu1 %v19424_v31  ;;  %v8963_v31 = vpack.c.bf16 %v6921_v25, %v6920_v40  ;;  %v19430_v40 = vld [vmem:[#allocation168_spill] sm:$0xff]  ;;  %v19433_v25 = vld [vmem:[#allocation177_spill] sm:$0xff] }
 0x945   :  { %5795 = vmatprep.mubr.f32.mxu1 %v19352_v42  ;;  %8954 = vmatpush3.bf16.msra.mxu1 %v15543_v12  ;;  %v6922_v42 = vld [vmem:[%s17873_s8 + $0x40] sm:$0xff]  ;;  %v6923_v12 = vld [vmem:[%s17873_s8 + $0x48] sm:$0xff] }
 0x946   :  { %8956 = vmatprep.subr.bf16.mxu1 %v8955_v22  ;;  %v8967_v3 = vpack.c.bf16 %v6923_v12, %v6922_v42  ;;  %v19438_v42 = vld [vmem:[#allocation191_spill] sm:$0xff]  ;;  %v19441_v12 = vld [vmem:[#allocation197_spill] sm:$0xff] }
 0x948   :  { %5796 = vmatmul.mubr.f32.gmra.mrb[42].mxu1 %v19425_v4  ;;  %v19427_v4 = vld [vmem:[#allocation159_spill] sm:$0xff] }
 0x949   :  { %5800 = vmatprep.mubr.f32.mxu1 %v19353_v28  ;;  %8958 = vmatpush3.bf16.msra.mxu1 %v8955_v22  ;;  %v19428_v28 = vld [vmem:[#allocation162_spill] sm:$0xff]  ;;  %v19429_v22 = vld [vmem:[#allocation164_spill] sm:$0xff] }
 0x94a   :  { %8960 = vmatprep.subr.bf16.mxu1 %v8959_v50 }
 0x94c   :  { %5801 = vmatmul.mubr.f32.gmra.mrb[44].mxu1 %v19426_v35  ;;  %v19443_v35 = vld [vmem:[#allocation201_spill] sm:$0xff] }
 0x94d   :  { %5805 = vmatprep.mubr.f32.mxu1 %v19354_v13  ;;  %8962 = vmatpush3.bf16.msra.mxu1 %v8959_v50  ;;  %v19431_v13 = vld [vmem:[#allocation171_spill] sm:$0xff]  ;;  %v6924_v50 = vld [vmem:[%s17873_s8 + $0x50] sm:$0xff] }
 0x94e   :  { %8964 = vmatprep.subr.bf16.mxu1 %v8963_v31 }
 0x950   :  { %5806 = vmatmul.mubr.f32.gmra.mrb[46].mxu1 %v19427_v4  ;;  %v9900_v4 = vld [vmem:[#allocation2 + $0x168] sm:$0xff] }
 0x951   :  { %5810 = vmatprep.mubr.f32.mxu1 %v19355_v54  ;;  %8966 = vmatpush3.bf16.msra.mxu1 %v8963_v31  ;;  %v19432_v54 = vld [vmem:[#allocation174_spill] sm:$0xff] }
 0x952   :  { %8968 = vmatprep.subr.bf16.mxu1 %v8967_v3  ;;  %v19436_v31 = vld [vmem:[#allocation186_spill] sm:$0xff] }
 0x954   :  { %5811 = vmatmul.mubr.f32.gmra.mrb[48].mxu1 %v19428_v28 }
 0x955   :  { %5815 = vmatprep.mubr.f32.mxu1 %v19356_v48  ;;  %8970 = vmatpush3.bf16.msra.mxu1 %v8967_v3  ;;  %v6925_v48 = vld [vmem:[%s17873_s8 + $0x58] sm:$0xff]  ;;  %v19445_v3 = vld [vmem:[#allocation121_spill] sm:$0xff] }
 0x958   :  { %5816 = vmatmul.mubr.f32.gmra.mrb[50].mxu1 %v19429_v22  ;;  %v9902_v22 = vld [vmem:[#allocation2 + $0x1a8] sm:$0x3] }
 0x959   :  { %5820 = vmatprep.mubr.f32.mxu1 %v19357_v51  ;;  %v8971_v51 = vpack.c.bf16 %v6925_v48, %v6924_v50  ;;  %v9906_v50 = vld [vmem:[#allocation2 + $0x200] sm:$0xff]  ;;  %v9908_v48 = vld [vmem:[#allocation2 + $0x218] sm:$0xff] }
 0x95b   :  { %8972 = vmatprep.subr.bf16.mxu1 %v8971_v51 }
 0x95c   :  { %5821 = vmatmul.mubr.f32.gmra.mrb[52].mxu1 %v19430_v40  ;;  %v15726_v40 = vld [vmem:[#allocation2 + $0x358] sm:$0x3] }
 0x95d   :  { %5825 = vmatprep.mubr.f32.mxu1 %v19358_v32  ;;  %8974 = vmatpush3.bf16.msra.mxu1 %v8971_v51  ;;  %v19434_v32 = vld [vmem:[#allocation180_spill] sm:$0xff]  ;;  %v19457_v51 = vld [vmem:[#allocation38_spill] sm:$0xff] }
 0x960   :  { %5826 = vmatmul.mubr.f32.gmra.mrb[54].mxu1 %v19431_v13  ;;  %v9904_v13 = vld [vmem:[#allocation2 + $0x1e8] sm:$0xff] }
 0x961   :  { %5830 = vmatprep.mubr.f32.mxu1 %v19359_v53  ;;  %v19435_v53 = vld [vmem:[#allocation183_spill] sm:$0xff] }
 0x964   :  { %5831 = vmatmul.mubr.f32.gmra.mrb[56].mxu1 %v19432_v54  ;;  %v9905_v54 = vld [vmem:[#allocation2 + $0x1f8] sm:$0xff] }
 0x965   :  { %5835 = vmatprep.mubr.f32.mxu1 %v19360_v1  ;;  %v19437_v1 = vld [vmem:[#allocation189_spill] sm:$0xff] }
 0x968   :  { %5836 = vmatmul.mubr.f32.gmra.mrb[58].mxu1 %v19433_v25  ;;  %v19458_v25 = vld [vmem:[#allocation59_spill] sm:$0xff] }
 0x969   :  { %5840 = vmatprep.mubr.f32.mxu1 %v19361_v23  ;;  %v19439_v23 = vld [vmem:[#allocation193_spill] sm:$0xff] }
 0x96c   :  { %5841 = vmatmul.mubr.f32.gmra.mrb[60].mxu1 %v19434_v32  ;;  %v19459_v32 = vld [vmem:[#allocation40_spill] sm:$0xff] }
 0x96d   :  { %5845 = vmatprep.mubr.f32.mxu1 %v19362_v18  ;;  %v19440_v18 = vld [vmem:[#allocation195_spill] sm:$0xff] }
 0x970   :  { %5846 = vmatmul.mubr.f32.gmra.mrb[62].mxu1 %v19435_v53 }
 0x971   :  { %5850 = vmatprep.mubr.f32.mxu1 %v19363_v19  ;;  %v6926_v19 = vld [vmem:[%s17873_s8 + $0x60] sm:$0xff] }
 0x974   :  { %5851 = vmatmul.mubr.f32.gmra.mrb[64].mxu1 %v19436_v31  ;;  %v9916_v31 = vld [vmem:[#allocation2 + $0x2d8] sm:$0xff] }
 0x975   :  { %5855 = vmatprep.mubr.f32.mxu1 %v19364_v15  ;;  %v6927_v15 = vld [vmem:[%s17873_s8 + $0x68] sm:$0xff] }
 0x978   :  { %5856 = vmatmul.mubr.f32.gmra.mrb[66].mxu1 %v19437_v1 }
 0x979   :  { %5860 = vmatprep.mubr.f32.mxu1 %v19365_v36  ;;  %v8975_v36 = vpack.c.bf16 %v6927_v15, %v6926_v19  ;;  %v19462_v19 = vld [vmem:[#allocation34_spill] sm:$0xff] }
 0x97b   :  { %8976 = vmatprep.subr.bf16.mxu1 %v8975_v36 }
 0x97c   :  { %5861 = vmatmul.mubr.f32.gmra.mrb[68].mxu1 %v19438_v42  ;;  %v19461_v42 = vld [vmem:[#allocation37_spill] sm:$0xff] }
 0x97d   :  { %5865 = vmatprep.mubr.f32.mxu1 %v19366_v57  ;;  %8978 = vmatpush3.bf16.msra.mxu1 %v8975_v36  ;;  %v19442_v57 = vld [vmem:[#allocation199_spill] sm:$0xff] }
 0x97e   :  { %v19463_v36 = vld [vmem:[#allocation63_spill] sm:$0xff] }
 0x980   :  { %5866 = vmatmul.mubr.f32.gmra.mrb[70].mxu1 %v19439_v23 }
 0x981   :  { %5870 = vmatprep.mubr.f32.mxu1 %v19367_v21  ;;  %v9897_v21 = vld [vmem:[#allocation2 + $0x110] sm:$0xff] }
 0x984   :  { %5871 = vmatmul.mubr.f32.gmra.mrb[72].mxu1 %v19440_v18  ;;  %v9917_v18 = vld [vmem:[#allocation2 + $0x2e8] sm:$0xff] }
 0x985   :  { %5875 = vmatprep.mubr.f32.mxu1 %v19368_v2  ;;  %v19444_v2 = vld [vmem:[#allocation120_spill] sm:$0xff] }
 0x988   :  { %5876 = vmatmul.mubr.f32.gmra.mrb[74].mxu1 %v19441_v12 }
 0x989   :  { %5880 = vmatprep.mubr.f32.mxu1 %v19369_v17  ;;  %v9898_v17 = vld [vmem:[#allocation2 + $0x140] sm:$0xff] }
 0x98c   :  { %5881 = vmatmul.mubr.f32.gmra.mrb[76].mxu1 %v19442_v57 }
 0x98d   :  { %5885 = vmatprep.mubr.f32.mxu1 %v19370_v63  ;;  %v19446_v63 = vld [vmem:[#allocation123_spill] sm:$0xff] }
 0x990   :  { %5886 = vmatmul.mubr.f32.gmra.mrb[78].mxu1 %v9897_v21  ;;  %v9918_v21 = vld [vmem:[#allocation2 + $0x2f0] sm:$0xff] }
 0x991   :  { %5890 = vmatprep.mubr.f32.mxu1 %v19371_v8  ;;  %v9899_v8 = vld [vmem:[#allocation2 + $0x158] sm:$0xff] }
 0x994   :  { %5891 = vmatmul.mubr.f32.gmra.mrb[80].mxu1 %v19443_v35  ;;  %v19464_v35 = vld [vmem:[#allocation80_spill] sm:$0xff] }
 0x995   :  { %5895 = vmatprep.mubr.f32.mxu1 %v19372_v7  ;;  %v6928_v7 = vld [vmem:[%s17873_s8 + $0x70] sm:$0xff] }
 0x998   :  { %5896 = vmatmul.mubr.f32.gmra.mrb[82].mxu1 %v19444_v2 }
 0x999   :  { %5900 = vmatprep.mubr.f32.mxu1 %v19373_v6  ;;  %v6929_v6 = vld [vmem:[%s17873_s8 + $0x78] sm:$0xff] }
 0x99c   :  { %5901 = vmatmul.mubr.f32.gmra.mrb[84].mxu1 %v19445_v3  ;;  %v19465_v3 = vld [vmem:[#allocation58_spill] sm:$0xff] }
 0x99d   :  { %5905 = vmatprep.mubr.f32.mxu1 %v19374_v60  ;;  %v8979_v60 = vpack.c.bf16 %v6929_v6, %v6928_v7  ;;  %v19466_v7 = vld [vmem:[#allocation87_spill] sm:$0xff] }
 0x99f   :  { %8980 = vmatprep.subr.bf16.mxu1 %v8979_v60 }
 0x9a0   :  { %5906 = vmatmul.mubr.f32.gmra.mrb[86].mxu1 %v9898_v17 }
 0x9a1   :  { %5910 = vmatprep.mubr.f32.mxu1 %v19375_v29  ;;  %8982 = vmatpush3.bf16.msra.mxu1 %v8979_v60  ;;  %v9901_v29 = vld [vmem:[#allocation2 + $0x170] sm:$0xff]  ;;  %v19467_v60 = vld [vmem:[#allocation32_spill] sm:$0xff] }
 0x9a4   :  { %5911 = vmatmul.mubr.f32.gmra.mrb[88].mxu1 %v19446_v63 }
 0x9a5   :  { %5915 = vmatprep.mubr.f32.mxu1 %v19376_v52  ;;  %v19447_v52 = vld [vmem:[#allocation15_spill] sm:$0xff] }
 0x9a6   :  { %v15715_v28 = vrot.slane %v19447_v52, 1 }
 0x9a8   :  { %5916 = vmatmul.mubr.f32.gmra.mrb[90].mxu1 %v9899_v8  ;;  %v9919_v8 = vld [vmem:[#allocation2 + $0x300] sm:$0xff] }
 0x9a9   :  { %5920 = vmatprep.mubr.f32.mxu1 %v19377_v56  ;;  %v4402_v56 = vrot.slane %v9902_v22, 1  ;;  %v9920_v22 = vld [vmem:[#allocation2 + $0x308] sm:$0xff] }
 0x9ac   :  { %5921 = vmatmul.mubr.f32.gmra.mrb[92].mxu1 %v9900_v4 }
 0x9ad   :  { %5925 = vmatprep.mubr.f32.mxu1 %v19378_v5  ;;  %v4403_v5 = vsel %vm271_vm0, %v15715_v28, %v4402_v56  ;;  %v19468_v56 = vld [vmem:[#allocation139_spill] sm:$0xff] }
 0x9b0   :  { %5926 = vmatmul.mubr.f32.gmra.mrb[94].mxu1 %v9901_v29 }
 0x9b1   :  { %5930 = vmatprep.mubr.f32.mxu1 %v15526_v46  ;;  %v19448_v46 = vld [vmem:[#allocation124_spill] sm:$0xff] }
 0x9b2   :  { %8372 = vmatprep.mubr.f32.mxu0 %v19448_v46 }
 0x9b4   :  { %5931 = vmatmul.mubr.f32.gmra.mrb[96].mxu1 %v15342_v24  ;;  %v4421_v24 = vrot.slane %v15726_v40, 2 }
 0x9b5   :  { %5935 = vmatprep.mubr.f32.mxu1 %v15531_v10  ;;  %v9903_v10 = vld [vmem:[#allocation2 + $0x1e0] sm:$0xff] }
 0x9b8   :  { %5936 = vmatmul.mubr.f32.gmra.mrb[98].mxu1 %v15347_v39  ;;  %v4422_v39 = vsel %vm496_vm1, %v19448_v46, %v4421_v24  ;;  %v19469_v46 = vld [vmem:[#allocation52_spill] sm:$0xff] }
 0x9b9   :  { %5940 = vmatprep.mubr.f32.mxu1 %v15715_v28  ;;  %8373 = vmatmul.mubr.f32.gmra.mrb[214].mxu0 %v4422_v39 }
 0x9bc   :  { %5941 = vmatmul.mubr.f32.gmra.mrb[100].mxu1 %v19447_v52 }
 0x9bd   :  { %5945 = vmatprep.mubr.f32.mxu1 %v4403_v5 }
 0x9c0   :  { %5946 = vmatmul.mubr.f32.gmra.mrb[102].mxu1 %v19447_v52 }
 0x9c1   :  { %5950 = vmatprep.mubr.f32.mxu1 %v19383_v41  ;;  %v9907_v41 = vld [vmem:[#allocation2 + $0x210] sm:$0xff] }
 0x9c4   :  { %5951 = vmatmul.mubr.f32.gmra.mrb[104].mxu1 %v9903_v10  ;;  %v9921_v10 = vld [vmem:[#allocation2 + $0x318] sm:$0xff] }
 0x9c5   :  { %5955 = vmatprep.mubr.f32.mxu1 %v19384_v26  ;;  %v9909_v26 = vld [vmem:[#allocation2 + $0x228] sm:$0xff] }
 0x9c8   :  { %5956 = vmatmul.mubr.f32.gmra.mrb[106].mxu1 %v9904_v13 }
 0x9c9   :  { %5960 = vmatprep.mubr.f32.mxu1 %v19385_v43  ;;  %v9910_v43 = vld [vmem:[#allocation2 + $0x230] sm:$0xff] }
 0x9cc   :  { %5961 = vmatmul.mubr.f32.gmra.mrb[108].mxu1 %v9905_v54  ;;  %v19470_v54 = vld [vmem:[#allocation67_spill] sm:$0xff] }
 0x9cd   :  { %5965 = vmatprep.mubr.f32.mxu1 %v19386_v62  ;;  %v9911_v62 = vld [vmem:[#allocation2 + $0x240] sm:$0xff] }
 0x9d0   :  { %5966 = vmatmul.mubr.f32.gmra.mrb[110].mxu1 %v9906_v50 }
 0x9d1   :  { %5970 = vmatprep.mubr.f32.mxu1 %v19387_v20  ;;  %v9912_v20 = vld [vmem:[#allocation2 + $0x248] sm:$0xff] }
 0x9d4   :  { %5971 = vmatmul.mubr.f32.gmra.mrb[112].mxu1 %v9907_v41 }
 0x9d5   :  { %5975 = vmatprep.mubr.f32.mxu1 %v19388_v47  ;;  %v19449_v47 = vld [vmem:[#allocation126_spill] sm:$0xff] }
 0x9d8   :  { %5976 = vmatmul.mubr.f32.gmra.mrb[114].mxu1 %v9908_v48  ;;  %v9922_v48 = vld [vmem:[#allocation2 + $0x320] sm:$0xff] }
 0x9d9   :  { %5980 = vmatprep.mubr.f32.mxu1 %v19389_v30  ;;  %v19450_v30 = vld [vmem:[#allocation86_spill] sm:$0xff] }
 0x9dc   :  { %5981 = vmatmul.mubr.f32.gmra.mrb[116].mxu1 %v9909_v26 }
 0x9dd   :  { %5985 = vmatprep.mubr.f32.mxu1 %v19390_v38  ;;  %v19451_v38 = vld [vmem:[#allocation127_spill] sm:$0xff] }
 0x9e0   :  { %5986 = vmatmul.mubr.f32.gmra.mrb[118].mxu1 %v9910_v43  ;;  %v19471_v43 = vld [vmem:[#allocation62_spill] sm:$0xff] }
 0x9e1   :  { %5990 = vmatprep.mubr.f32.mxu1 %v19391_v44  ;;  %v19452_v44 = vld [vmem:[#allocation20_spill] sm:$0xff] }
 0x9e4   :  { %5991 = vmatmul.mubr.f32.gmra.mrb[120].mxu1 %v9911_v62 }
 0x9e5   :  { %5995 = vmatprep.mubr.f32.mxu1 %v19392_v61  ;;  %v19453_v61 = vld [vmem:[#allocation129_spill] sm:$0xff] }
 0x9e8   :  { %5996 = vmatmul.mubr.f32.gmra.mrb[122].mxu1 %v9912_v20 }
 0x9e9   :  { %6000 = vmatprep.mubr.f32.mxu1 %v19393_v9  ;;  %v19454_v9 = vld [vmem:[#allocation130_spill] sm:$0xff] }
 0x9ec   :  { %6001 = vmatmul.mubr.f32.gmra.mrb[124].mxu1 %v19449_v47 }
 0x9ed   :  { %6005 = vmatprep.mubr.f32.mxu1 %v19395_v49  ;;  %v19455_v49 = vld [vmem:[#allocation132_spill] sm:$0xff] }
 0x9f0   :  { %6006 = vmatmul.mubr.f32.gmra.mrb[126].mxu1 %v19450_v30  ;;  %v19472_v30 = vld [vmem:[#allocation82_spill] sm:$0xff] }
 0x9f1   :  { %6010 = vmatprep.mubr.f32.mxu1 %v19396_v34  ;;  %v19456_v34 = vld [vmem:[#allocation133_spill] sm:$0xff] }
 0x9f4   :  { %6011 = vmatmul.mubr.f32.gmra.mrb[128].mxu1 %v19451_v38 }
 0x9f5   :  { %6015 = vmatprep.mubr.f32.mxu1 %v19398_v16  ;;  %v9913_v16 = vld [vmem:[#allocation2 + $0x2b8] sm:$0xff] }
 0x9f8   :  { %6016 = vmatmul.mubr.f32.gmra.mrb[130].mxu1 %v19452_v44 }
 0x9f9   :  { %6020 = vmatprep.mubr.f32.mxu1 %v19399_v55  ;;  %v9914_v55 = vld [vmem:[#allocation2 + $0x2c0] sm:$0xff] }
 0x9fc   :  { %6021 = vmatmul.mubr.f32.gmra.mrb[132].mxu1 %v19453_v61  ;;  %v19473_v61 = vld [vmem:[#allocation61_spill] sm:$0xff] }
 0x9fd   :  { %6025 = vmatprep.mubr.f32.mxu1 %v19400_v59  ;;  %v9915_v59 = vld [vmem:[#allocation2 + $0x2d0] sm:$0xff] }
 0xa00   :  { %6026 = vmatmul.mubr.f32.gmra.mrb[134].mxu1 %v19454_v9 }
 0xa01   :  { %6030 = vmatprep.mubr.f32.mxu1 %v19401_v45 }
 0xa04   :  { %6031 = vmatmul.mubr.f32.gmra.mrb[136].mxu1 %v19455_v49  ;;  %v19474_v49 = vld [vmem:[#allocation75_spill] sm:$0xff] }
 0xa05   :  { %6035 = vmatprep.mubr.f32.mxu1 %v19402_v33 }
 0xa08   :  { %6036 = vmatmul.mubr.f32.gmra.mrb[138].mxu1 %v19456_v34 }
 0xa09   :  { %6040 = vmatprep.mubr.f32.mxu1 %v19403_v27  ;;  %v19460_v27 = vld [vmem:[#allocation60_spill] sm:$0xff] }
 0xa0c   :  { %6041 = vmatmul.mubr.f32.gmra.mrb[140].mxu1 %v9913_v16  ;;  %v19475_v16 = vld [vmem:[#allocation39_spill] sm:$0xff] }
 0xa0d   :  { %6045 = vmatprep.mubr.f32.mxu1 %v19405_v58 }
 0xa10   :  { %6046 = vmatmul.mubr.f32.gmra.mrb[142].mxu1 %v9914_v55 }
 0xa11   :  { %6050 = vmatprep.mubr.f32.mxu1 %v19457_v51 }
 0xa14   :  { %6051 = vmatmul.mubr.f32.gmra.mrb[144].mxu1 %v9915_v59  ;;  %v6851_v59 = vld [vmem:[#allocation3 + $0x8] sm:$0xff] }
 0xa15   :  { %6055 = vmatprep.mubr.f32.mxu1 %v19458_v25  ;;  %v6852_v25 = vld [vmem:[#allocation3 + $0x10] sm:$0xff] }
 0xa17   :  { %v5792_v45 = vpop.f32.mrb[40].mxu1 }
 0xa18   :  { %v15762_v53 = vadd.f32 %v19459_v32, %v5792_v45  ;;  %v5794_v33 = vpop.f32.mrb[41].mxu1  ;;  %6056 = vmatmul.mubr.f32.gmra.mrb[146].mxu1 %v9916_v31  ;;  %v19476_v45 = vld [vmem:[#allocation36_spill] sm:$0xff]  ;;  %v6853_v31 = vld [vmem:[#allocation3 + $0x18] sm:$0xff] }
 0xa19   :  { %6060 = vmatprep.mubr.f32.mxu1 %v19460_v27  ;;  %v6854_v27 = vld [vmem:[#allocation3 + $0x20] sm:$0xff] }
 0xa1b   :  { %v5797_v1 = vpop.f32.mrb[42].mxu1 }
 0xa1c   :  { %v15766_v58 = vadd.f32 %v19461_v42, %v5797_v1  ;;  %v5799_v23 = vpop.f32.mrb[43].mxu1  ;;  %6061 = vmatmul.mubr.f32.gmra.mrb[148].mxu1 %v9917_v18  ;;  %v19477_v42 = vld [vmem:[#allocation140_spill] sm:$0xff] }
 0xa1d   :  { %6065 = vmatprep.mubr.f32.mxu1 %v19462_v19  ;;  %v6856_v19 = vld [vmem:[#allocation3 + $0x30] sm:$0xff] }
 0xa1f   :  { %v5802_v15 = vpop.f32.mrb[44].mxu1 }
 0xa20   :  { %v15770_v12 = vadd.f32 %v19463_v36, %v5802_v15  ;;  %v5804_v57 = vpop.f32.mrb[45].mxu1  ;;  %6066 = vmatmul.mubr.f32.gmra.mrb[150].mxu1 %v9918_v21  ;;  %v19478_v36 = vld [vmem:[#allocation42_spill] sm:$0xff] }
 0xa21   :  { %6070 = vmatprep.mubr.f32.mxu1 %v19464_v35  ;;  %v6857_v35 = vld [vmem:[#allocation3 + $0x38] sm:$0xff] }
 0xa23   :  { %v5807_v2 = vpop.f32.mrb[46].mxu1 }
 0xa24   :  { %v15774_v17 = vadd.f32 %v19465_v3, %v5807_v2  ;;  %v5809_v63 = vpop.f32.mrb[47].mxu1  ;;  %6071 = vmatmul.mubr.f32.gmra.mrb[152].mxu1 %v9919_v8  ;;  %v6858_v2 = vld [vmem:[#allocation3 + $0x40] sm:$0xff] }
 0xa25   :  { %6075 = vmatprep.mubr.f32.mxu1 %v19466_v7  ;;  %v19479_v63 = vld [vmem:[#allocation143_spill] sm:$0xff] }
 0xa27   :  { %v5812_v6 = vpop.f32.mrb[48].mxu1 }
 0xa28   :  { %v15778_v4 = vadd.f32 %v19467_v60, %v5812_v6  ;;  %v5814_v29 = vpop.f32.mrb[49].mxu1  ;;  %6076 = vmatmul.mubr.f32.gmra.mrb[154].mxu1 %v9920_v22  ;;  %v6859_v6 = vld [vmem:[#allocation3 + $0x48] sm:$0xff]  ;;  %v6860_v60 = vld [vmem:[#allocation3 + $0x50] sm:$0xff] }
 0xa29   :  { %6080 = vmatprep.mubr.f32.mxu1 %v19468_v56  ;;  %v19480_v22 = vld [vmem:[#allocation141_spill] sm:$0xff] }
 0xa2b   :  { %v5817_v5 = vpop.f32.mrb[50].mxu1 }
 0xa2c   :  { %v15782_v24 = vadd.f32 %v19469_v46, %v5817_v5  ;;  %v5819_v39 = vpop.f32.mrb[51].mxu1  ;;  %6081 = vmatmul.mubr.f32.gmra.mrb[156].mxu1 %v9921_v10  ;;  %v6861_v46 = vld [vmem:[#allocation3 + $0x58] sm:$0xff] }
 0xa2d   :  { %6085 = vmatprep.mubr.f32.mxu1 %v19421_v37  ;;  %v4407_v37 = vrot.slane %v15726_v40, 1  ;;  %v6862_v39 = vld [vmem:[#allocation3 + $0x60] sm:$0xff] }
 0xa2f   :  { %v5822_v13 = vpop.f32.mrb[52].mxu1 }
 0xa30   :  { %v15786_v50 = vadd.f32 %v19470_v54, %v5822_v13  ;;  %v5824_v41 = vpop.f32.mrb[53].mxu1  ;;  %6086 = vmatmul.mubr.f32.gmra.mrb[158].mxu1 %v9922_v48  ;;  %v19481_v13 = vld [vmem:[#allocation145_spill] sm:$0xff] }
 0xa31   :  { %6090 = vmatprep.mubr.f32.mxu1 %v15611_v14  ;;  %v4408_v14 = vsel %vm271_vm0, %v15715_v28, %v4407_v37  ;;  %v6863_v48 = vld [vmem:[#allocation3 + $0x68] sm:$0xff] }
 0xa33   :  { %v5827_v26 = vpop.f32.mrb[54].mxu1 }
 0xa34   :  { %v15790_v62 = vadd.f32 %v19471_v43, %v5827_v26  ;;  %v5829_v20 = vpop.f32.mrb[55].mxu1  ;;  %6091 = vmatmul.mubr.f32.gmra.mrb[160].mxu1 %v15602_v11  ;;  %v6864_v26 = vld [vmem:[#allocation3 + $0x70] sm:$0xff] }
 0xa35   :  { %6095 = vmatprep.mubr.f32.mxu1 %v15616_v0  ;;  %v6850_v0 = vld [vmem:[#allocation3] sm:$0xff] }
 0xa36   :  { %v19482_v20 = vld [vmem:[#allocation144_spill] sm:$0xff] }
 0xa37   :  { %v5832_v47 = vpop.f32.mrb[56].mxu1 }
 0xa38   :  { %v15796_v38 = vadd.f32 %v19472_v30, %v5832_v47  ;;  %v5834_v44 = vpop.f32.mrb[57].mxu1  ;;  %6096 = vmatmul.mubr.f32.gmra.mrb[162].mxu1 %v19473_v61  ;;  %v6865_v30 = vld [vmem:[#allocation3 + $0x78] sm:$0xff] }
 0xa39   :  { %6100 = vmatprep.mubr.f32.mxu1 %v15715_v28  ;;  %v6866_v44 = vld [vmem:[#allocation3 + $0x80] sm:$0xff] }
 0xa3b   :  { %v5837_v9 = vpop.f32.mrb[58].mxu1 }
 0xa3c   :  { %v15803_v34 = vadd.f32 %v19474_v49, %v5837_v9  ;;  %v5839_v11 = vpop.f32.mrb[59].mxu1  ;;  %6101 = vmatmul.mubr.f32.gmra.mrb[164].mxu1 %v19447_v52 }
 0xa3d   :  { %6105 = vmatprep.mubr.f32.mxu1 %v4408_v14  ;;  %v19483_v14 = vld [vmem:[#allocation147_spill] sm:$0xff]  ;;  %v6867_v11 = vld [vmem:[#allocation3 + $0x88] sm:$0xff] }
 0xa3f   :  { %v5842_v40 = vpop.f32.mrb[60].mxu1 }
 0xa40   :  { %v15807_v55 = vadd.f32 %v19475_v16, %v5842_v40  ;;  %v5844_v51 = vpop.f32.mrb[61].mxu1  ;;  %6106 = vmatmul.mubr.f32.gmra.mrb[166].mxu1 %v19447_v52  ;;  %v6855_v52 = vld [vmem:[#allocation3 + $0x28] sm:$0xff]  ;;  %v19484_v16 = vld [vmem:[#allocation146_spill] sm:$0xff] }
 0xa41   :  { %8407 = vmatprep.mubr.f32.mxu1 %v6850_v0  ;;  %v6868_v0 = vld [vmem:[#allocation3 + $0x90] sm:$0xff] }
 0xa43   :  { %v5847_v28 = vpop.f32.mrb[62].mxu1 }
 0xa44   :  { %v15811_v32 = vadd.f32 %v19476_v45, %v5847_v28  ;;  %v5849_v33 = vpop.f32.mrb[63].mxu1  ;;  %8408 = vmatmul.mubr.f32.vlgmr.msra.gmra.mrb[168].mxu1 %v6851_v59  ;;  %v6870_v28 = vld [vmem:[#allocation3 + $0xa0] sm:$0xff] }
 0xa45   :  { %8410 = vmatprep.mubr.f32.mxu1 %v6852_v25  ;;  %v6869_v25 = vld [vmem:[#allocation3 + $0x98] sm:$0xff]  ;;  %v19485_v33 = vld [vmem:[#allocation149_spill] sm:$0xff] }
 0xa47   :  { %v5852_v1 = vpop.f32.mrb[64].mxu1 }
 0xa48   :  { %v15814_v23 = vadd.f32 %v19477_v42, %v5852_v1  ;;  %v5854_v18 = vpop.f32.mrb[65].mxu1  ;;  %8411 = vmatmul.mubr.f32.gmra.mrb[170].mxu1 %v6853_v31  ;;  %v6871_v1 = vld [vmem:[#allocation3 + $0xa8] sm:$0xff]  ;;  %v6872_v42 = vld [vmem:[#allocation3 + $0xb0] sm:$0xff] }
 0xa49   :  { %8413 = vmatprep.mubr.f32.mxu1 %v6854_v27 }
 0xa4b   :  { %v5857_v15 = vpop.f32.mrb[66].mxu1 }
 0xa4c   :  { %v15817_v57 = vadd.f32 %v19478_v36, %v5857_v15  ;;  %v5859_v21 = vpop.f32.mrb[67].mxu1  ;;  %8414 = vmatmul.mubr.f32.gmra.mrb[172].mxu1 %v6855_v52  ;;  %v19486_v52 = vld [vmem:[#allocation148_spill] sm:$0xff]  ;;  %v6873_v36 = vld [vmem:[#allocation3 + $0xb8] sm:$0xff] }
 0xa4d   :  { %8416 = vmatprep.mubr.f32.mxu1 %v6856_v19  ;;  %v6874_v21 = vld [vmem:[#allocation3 + $0xc0] sm:$0xff] }
 0xa4f   :  { %v5862_v3 = vpop.f32.mrb[68].mxu1 }
 0xa50   :  { %v15820_v8 = vadd.f32 %v19479_v63, %v5862_v3  ;;  %v5864_v7 = vpop.f32.mrb[69].mxu1  ;;  %8417 = vmatmul.mubr.f32.gmra.mrb[174].mxu1 %v6857_v35 }
 0xa51   :  { %8419 = vmatprep.mubr.f32.mxu1 %v6858_v2  ;;  %v19487_v2 = vld [vmem:[#allocation152_spill] sm:$0xff]  ;;  %v6875_v7 = vld [vmem:[#allocation3 + $0xc8] sm:$0xff] }
 0xa53   :  { %v5867_v29 = vpop.f32.mrb[70].mxu1 }
 0xa54   :  { %v15823_v56 = vadd.f32 %v19480_v22, %v5867_v29  ;;  %v5869_v5 = vpop.f32.mrb[71].mxu1  ;;  %8420 = vmatmul.mubr.f32.gmra.mrb[176].mxu1 %v6859_v6  ;;  %v6876_v6 = vld [vmem:[#allocation3 + $0xd0] sm:$0xff]  ;;  %v19488_v29 = vld [vmem:[#allocation151_spill] sm:$0xff] }
 0xa55   :  { %8422 = vmatprep.mubr.f32.mxu1 %v6860_v60 }
 0xa57   :  { %v5872_v10 = vpop.f32.mrb[72].mxu1 }
 0xa58   :  { %v15826_v54 = vadd.f32 %v19481_v13, %v5872_v10  ;;  %v5874_v41 = vpop.f32.mrb[73].mxu1  ;;  %8423 = vmatmul.mubr.f32.gmra.mrb[178].mxu1 %v6861_v46  ;;  %v6877_v46 = vld [vmem:[#allocation3 + $0xd8] sm:$0xff] }
 0xa59   :  { %8425 = vmatprep.mubr.f32.mxu1 %v6862_v39  ;;  %v6878_v39 = vld [vmem:[#allocation3 + $0xe0] sm:$0xff]  ;;  %v19489_v13 = vld [vmem:[#allocation155_spill] sm:$0xff] }
 0xa5b   :  { %v5877_v43 = vpop.f32.mrb[74].mxu1 }
 0xa5c   :  { %v15829_v37 = vadd.f32 %v19482_v20, %v5877_v43  ;;  %v5879_v47 = vpop.f32.mrb[75].mxu1  ;;  %8426 = vmatmul.mubr.f32.gmra.mrb[180].mxu1 %v6863_v48  ;;  %v6880_v43 = vld [vmem:[#allocation3 + $0xf0] sm:$0xff] }
 0xa5d   :  { %8428 = vmatprep.mubr.f32.mxu1 %v6864_v26  ;;  %v6879_v26 = vld [vmem:[#allocation3 + $0xe8] sm:$0xff]  ;;  %v19490_v47 = vld [vmem:[#allocation154_spill] sm:$0xff] }
 0xa5f   :  { %v5882_v61 = vpop.f32.mrb[76].mxu1 }
 0xa60   :  { %v15832_v9 = vadd.f32 %v19483_v14, %v5882_v61  ;;  %v5884_v49 = vpop.f32.mrb[77].mxu1  ;;  %8429 = vmatmul.mubr.f32.gmra.mrb[182].mxu1 %v6865_v30  ;;  %v6881_v61 = vld [vmem:[#allocation3 + $0xf8] sm:$0xff]  ;;  %v6882_v14 = vld [vmem:[#allocation3 + $0x100] sm:$0xff] }
 0xa61   :  { %8431 = vmatprep.mubr.f32.mxu1 %v6866_v44 }
 0xa63   :  { %v5887_v40 = vpop.f32.mrb[78].mxu1 }
 0xa64   :  { %v15835_v51 = vadd.f32 %v19484_v16, %v5887_v40  ;;  %v5889_v59 = vpop.f32.mrb[79].mxu1  ;;  %8432 = vmatmul.mubr.f32.gmra.mrb[184].mxu1 %v6867_v11  ;;  %v19491_v11 = vld [vmem:[#allocation158_spill] sm:$0xff]  ;;  %v6883_v16 = vld [vmem:[#allocation3 + $0x108] sm:$0xff] }
 0xa65   :  { %8434 = vmatprep.mubr.f32.mxu1 %v6868_v0  ;;  %v6884_v59 = vld [vmem:[#allocation3 + $0x110] sm:$0xff] }
 0xa67   :  { %v5892_v45 = vpop.f32.mrb[80].mxu1 }
 0xa68   :  { %v15838_v31 = vadd.f32 %v19485_v33, %v5892_v45  ;;  %v5894_v27 = vpop.f32.mrb[81].mxu1  ;;  %8435 = vmatmul.mubr.f32.gmra.mrb[186].mxu1 %v6869_v25 }
 0xa69   :  { %8437 = vmatprep.mubr.f32.mxu1 %v6870_v28  ;;  %v19492_v28 = vld [vmem:[#allocation157_spill] sm:$0xff]  ;;  %v6885_v27 = vld [vmem:[#allocation3 + $0x118] sm:$0xff] }
 0xa6b   :  { %v5897_v18 = vpop.f32.mrb[82].mxu1 }
 0xa6c   :  { %v15841_v19 = vadd.f32 %v19486_v52, %v5897_v18  ;;  %v5899_v15 = vpop.f32.mrb[83].mxu1  ;;  %8438 = vmatmul.mubr.f32.gmra.mrb[188].mxu1 %v6871_v1  ;;  %v6886_v1 = vld [vmem:[#allocation3 + $0x120] sm:$0xff]  ;;  %v19494_v18 = vld [vmem:[#allocation161_spill] sm:$0xff] }
 0xa6d   :  { %8440 = vmatprep.mubr.f32.mxu1 %v6872_v42 }
 0xa6f   :  { %v5902_v35 = vpop.f32.mrb[84].mxu1 }
 0xa70   :  { %v15844_v3 = vadd.f32 %v19487_v2, %v5902_v35  ;;  %v5904_v63 = vpop.f32.mrb[85].mxu1  ;;  %8441 = vmatmul.mubr.f32.gmra.mrb[190].mxu1 %v6873_v36  ;;  %v6887_v36 = vld [vmem:[#allocation3 + $0x128] sm:$0xff]  ;;  %v19495_v2 = vld [vmem:[#allocation160_spill] sm:$0xff] }
 0xa71   :  { %8443 = vmatprep.mubr.f32.mxu1 %v6874_v21  ;;  %v6888_v21 = vld [vmem:[#allocation3 + $0x130] sm:$0xff] }
 0xa73   :  { %v5907_v60 = vpop.f32.mrb[86].mxu1 }
 0xa74   :  { %v15847_v22 = vadd.f32 %v19488_v29, %v5907_v60  ;;  %v5909_v5 = vpop.f32.mrb[87].mxu1  ;;  %8444 = vmatmul.mubr.f32.gmra.mrb[192].mxu1 %v6875_v7  ;;  %v6890_v60 = vld [vmem:[#allocation3 + $0x140] sm:$0xff] }
 0xa75   :  { %8446 = vmatprep.mubr.f32.mxu1 %v6876_v6  ;;  %v6889_v6 = vld [vmem:[#allocation3 + $0x138] sm:$0xff]  ;;  %v19497_v5 = vld [vmem:[#allocation165_spill] sm:$0xff] }
 0xa77   :  { %v5912_v10 = vpop.f32.mrb[88].mxu1 }
 0xa78   :  { %v15850_v41 = vadd.f32 %v19489_v13, %v5912_v10  ;;  %v5914_v48 = vpop.f32.mrb[89].mxu1  ;;  %8447 = vmatmul.mubr.f32.gmra.mrb[194].mxu1 %v6877_v46  ;;  %v6891_v10 = vld [vmem:[#allocation3 + $0x148] sm:$0xff]  ;;  %v6892_v13 = vld [vmem:[#allocation3 + $0x150] sm:$0xff] }
 0xa79   :  { %8449 = vmatprep.mubr.f32.mxu1 %v6878_v39 }
 0xa7b   :  { %v5917_v20 = vpop.f32.mrb[90].mxu1 }
 0xa7c   :  { %v15853_v30 = vadd.f32 %v19490_v47, %v5917_v20  ;;  %v5919_v44 = vpop.f32.mrb[91].mxu1  ;;  %8450 = vmatmul.mubr.f32.gmra.mrb[196].mxu1 %v6879_v26  ;;  %v19498_v26 = vld [vmem:[#allocation163_spill] sm:$0xff] }
 0xa7d   :  { %8452 = vmatprep.mubr.f32.mxu1 %v6880_v43  ;;  %v6893_v47 = vld [vmem:[#allocation3 + $0x158] sm:$0xff]  ;;  %v6568_v44 = vmul.f32 %v15766_v58, %v15766_v58 }
 0xa7f   :  { %v5922_v49 = vpop.f32.mrb[92].mxu1 }
 0xa80   :  { %v15856_v0 = vadd.f32 %v19491_v11, %v5922_v49  ;;  %v5924_v40 = vpop.f32.mrb[93].mxu1  ;;  %8453 = vmatmul.mubr.f32.gmra.mrb[198].mxu1 %v6881_v61  ;;  %v6894_v61 = vld [vmem:[#allocation3 + $0x160] sm:$0xff]  ;;  %v6567_v11 = vmul.f32 %v15762_v53, %v15762_v53 }
 0xa81   :  { %8455 = vmatprep.mubr.f32.mxu1 %v6882_v14  ;;  %v6498_v40 = vadd.f32 %v15766_v58, %v15762_v53 }
 0xa83   :  { %v5927_v25 = vpop.f32.mrb[94].mxu1 }
 0xa84   :  { %v15859_v45 = vadd.f32 %v19492_v28, %v5927_v25  ;;  %v5929_v33 = vpop.f32.mrb[95].mxu1  ;;  %8456 = vmatmul.mubr.f32.gmra.mrb[200].mxu1 %v6883_v16  ;;  %v6569_v16 = vmul.f32 %v15770_v12, %v15770_v12 }
 0xa85   :  { %8458 = vmatprep.mubr.f32.mxu1 %v6884_v59  ;;  %v19500_v59 = vld [vmem:[#allocation167_spill] sm:$0xff] }
 0xa86   :  { %19493 = vst [vmem:[#allocation68_spill] sm:$0xff] %v15859_v45 }
 0xa87   :  { %v5932_v42 = vpop.f32.mrb[96].mxu1 }
 0xa88   :  { %v15862_v52 = vadd.f32 %v19494_v18, %v5932_v42  ;;  %v5934_v15 = vpop.f32.mrb[97].mxu1  ;;  %8459 = vmatmul.mubr.f32.gmra.mrb[202].mxu1 %v6885_v27  ;;  %v6895_v27 = vld [vmem:[#allocation3 + $0x168] sm:$0xff]  ;;  %v6499_v42 = vadd.f32 %v6498_v40, %v15770_v12  ;;  %v6570_v18 = vmul.f32 %v15774_v17, %v15774_v17 }
 0xa89   :  { %8461 = vmatprep.mubr.f32.mxu1 %v6886_v1  ;;  %v6631_v1 = vadd.f32 %v6568_v44, %v6567_v11  ;;  %v6896_v15 = vld [vmem:[#allocation3 + $0x170] sm:$0xff]  ;;  %v6899_v11 = vld [vmem:[#allocation3 + $0x188] sm:$0xff] }
 0xa8a   :  { %v19503_v44 = vld [vmem:[#allocation170_spill] sm:$0xff] }
 0xa8b   :  { %v5937_v35 = vpop.f32.mrb[98].mxu1 }
 0xa8c   :  { %v15865_v63 = vadd.f32 %v19495_v2, %v5937_v35  ;;  %v5939_v7 = vpop.f32.mrb[99].mxu1  ;;  %8462 = vmatmul.mubr.f32.gmra.mrb[204].mxu1 %v6887_v36  ;;  %v15875_v49 = vpop.f32.mrb[214].mxu0  ;;  %v6500_v35 = vadd.f32 %v6499_v42, %v15774_v17  ;;  %v6571_v2 = vmul.f32 %v15778_v4, %v15778_v4 }
 0xa8d   :  { %8464 = vmatprep.mubr.f32.mxu1 %v6888_v21  ;;  %v15886_v33 = vpop.f32.mrb[215].mxu0  ;;  %v6632_v21 = vadd.f32 %v6631_v1, %v6569_v16  ;;  %v19501_v7 = vld [vmem:[#allocation166_spill] sm:$0xff] }
 0xa8e   :  { %19496 = vst [vmem:[#allocation69_spill] sm:$0xff] %v15865_v63 }
 0xa8f   :  { %v5942_v29 = vpop.f32.mrb[100].mxu1 }
 0xa90   :  { %v15868_v46 = vadd.f32 %v19497_v5, %v5942_v29  ;;  %v5944_v39 = vpop.f32.mrb[101].mxu1  ;;  %8465 = vmatmul.mubr.f32.gmra.mrb[206].mxu1 %v6889_v6  ;;  %v6897_v29 = vld [vmem:[#allocation3 + $0x178] sm:$0xff]  ;;  %v6633_v5 = vadd.f32 %v6632_v21, %v6570_v18  ;;  %v6575_v18 = vmul.f32 %v15796_v38, %v15796_v38 }
 0xa91   :  { %8467 = vmatprep.mubr.f32.mxu1 %v6890_v60  ;;  %v6501_v39 = vadd.f32 %v6500_v35, %v15778_v4  ;;  %v6901_v35 = vld [vmem:[#allocation3 + $0x198] sm:$0xff] }
 0xa93   :  { %v5947_v48 = vpop.f32.mrb[102].mxu1 }
 0xa94   :  { %v15871_v43 = vadd.f32 %v19498_v26, %v5947_v48  ;;  %v5949_v20 = vpop.f32.mrb[103].mxu1  ;;  %8468 = vmatmul.mubr.f32.gmra.mrb[208].mxu1 %v6891_v10  ;;  %v6572_v10 = vmul.f32 %v15782_v24, %v15782_v24  ;;  %v6634_v26 = vadd.f32 %v6633_v5, %v6571_v2 }
 0xa95   :  { %8470 = vmatprep.mubr.f32.mxu1 %v6892_v13  ;;  %v6898_v13 = vld [vmem:[#allocation3 + $0x180] sm:$0xff]  ;;  %v6502_v20 = vadd.f32 %v6501_v39, %v15782_v24 }
 0xa96   :  { %19499 = vst [vmem:[#allocation66_spill] sm:$0xff] %v15871_v43  ;;  %v6635_v40 = vadd.f32 %v6634_v26, %v6572_v10 }
 0xa97   :  { %v5952_v14 = vpop.f32.mrb[104].mxu1  ;;  %v6503_v16 = vadd.f32 %v6502_v20, %v15786_v50 }
 0xa98   :  { %v15884_v25 = vadd.f32 %v19500_v59, %v5952_v14  ;;  %v5954_v28 = vpop.f32.mrb[105].mxu1  ;;  %8471 = vmatmul.mubr.f32.gmra.mrb[210].mxu1 %v6893_v47  ;;  %v6573_v47 = vmul.f32 %v15786_v50, %v15786_v50  ;;  %v6574_v59 = vmul.f32 %v15790_v62, %v15790_v62 }
 0xa99   :  { %8473 = vmatprep.mubr.f32.mxu1 %v6894_v61  ;;  %v6900_v28 = vld [vmem:[#allocation3 + $0x190] sm:$0xff]  ;;  %v6504_v42 = vadd.f32 %v6503_v16, %v15790_v62 }
 0xa9a   :  { %v6636_v1 = vadd.f32 %v6635_v40, %v6573_v47  ;;  %v6903_v47 = vld [vmem:[#allocation3 + $0x1a8] sm:$0xff]  ;;  %v6904_v40 = vld [vmem:[#allocation3 + $0x1b0] sm:$0xff] }
 0xa9b   :  { %v5957_v36 = vpop.f32.mrb[106].mxu1 }
 0xa9c   :  { %v15895_v6 = vadd.f32 %v19501_v7, %v5957_v36  ;;  %v5959_v60 = vpop.f32.mrb[107].mxu1  ;;  %8474 = vmatmul.mubr.f32.gmra.mrb[212].mxu1 %v6895_v27  ;;  %v6637_v2 = vadd.f32 %v6636_v1, %v6574_v59  ;;  %v6505_v7 = vadd.f32 %v6504_v42, %v15796_v38  ;;  %v19507_v1 = vld [vmem:[#allocation172_spill] sm:$0xff] }
 0xa9d   :  { %8476 = vmatprep.mubr.f32.mxu1 %v6896_v15  ;;  %v19504_v15 = vld [vmem:[#allocation169_spill] sm:$0xff]  ;;  %v6576_v60 = vmul.f32 %v15803_v34, %v15803_v34 }
 0xa9e   :  { %19502 = vst [vmem:[#allocation73_spill] sm:$0xff] %v15895_v6  ;;  %v6638_v39 = vadd.f32 %v6637_v2, %v6575_v18  ;;  %v6506_v10 = vadd.f32 %v6505_v7, %v15803_v34  ;;  %v6580_v2 = vmul.f32 %v15817_v57, %v15817_v57  ;;  %v6906_v7 = vld [vmem:[#allocation3 + $0x1c0] sm:$0xff] }
 0xa9f   :  { %v5962_v48 = vpop.f32.mrb[108].mxu1 }
 0xaa0   :  { %v15904_v61 = vadd.f32 %v19503_v44, %v5962_v48  ;;  %v5964_v14 = vpop.f32.mrb[109].mxu1  ;;  %8477 = vmatmul.mubr.f32.gmra.mrb[214].mxu1 %v6897_v29  ;;  %v6902_v29 = vld [vmem:[#allocation3 + $0x1a0] sm:$0xff]  ;;  %v19506_v48 = vld [vmem:[#allocation173_spill] sm:$0xff]  ;;  %v6639_v44 = vadd.f32 %v6638_v39, %v6576_v60  ;;  %v6581_v39 = vmul.f32 %v15820_v8, %v15820_v8 }
 0xaa1   :  { %8479 = vmatprep.mubr.f32.mxu1 %v6898_v13  ;;  %v6577_v13 = vmul.f32 %v15807_v55, %v15807_v55  ;;  %v6507_v14 = vadd.f32 %v6506_v10, %v15807_v55  ;;  %v19509_v10 = vld [vmem:[#allocation176_spill] sm:$0xff] }
 0xaa3   :  { %v5967_v27 = vpop.f32.mrb[110].mxu1  ;;  %v6640_v59 = vadd.f32 %v6639_v44, %v6577_v13 }
 0xaa4   :  { %v15913_v36 = vadd.f32 %v19504_v15, %v5967_v27  ;;  %v5969_v21 = vpop.f32.mrb[111].mxu1  ;;  %8480 = vmatmul.mubr.f32.gmra.mrb[216].mxu1 %v6899_v11  ;;  %v6578_v11 = vmul.f32 %v15811_v32, %v15811_v32  ;;  %v6579_v27 = vmul.f32 %v15814_v23, %v15814_v23  ;;  %v6905_v15 = vld [vmem:[#allocation3 + $0x1b8] sm:$0xff] }
 0xaa5   :  { %8482 = vmatprep.mubr.f32.mxu1 %v6900_v28  ;;  %v6508_v28 = vadd.f32 %v6507_v14, %v15811_v32  ;;  %v6582_v14 = vmul.f32 %v15823_v56, %v15823_v56 }
 0xaa6   :  { %19505 = vst [vmem:[#allocation76_spill] sm:$0xff] %v15913_v36  ;;  %v6641_v21 = vadd.f32 %v6640_v59, %v6578_v11  ;;  %v6908_v11 = vld [vmem:[#allocation3 + $0x1d0] sm:$0xff] }
 0xaa7   :  { %v5972_v5 = vpop.f32.mrb[112].mxu1 }
 0xaa8   :  { %v15922_v26 = vadd.f32 %v19506_v48, %v5972_v5  ;;  %v5974_v20 = vpop.f32.mrb[113].mxu1  ;;  %8483 = vmatmul.mubr.f32.gmra.mrb[218].mxu1 %v6901_v35  ;;  %v6509_v35 = vadd.f32 %v6508_v28, %v15814_v23  ;;  %v6583_v28 = vmul.f32 %v15826_v54, %v15826_v54 }
 0xaa9   :  { %8485 = vmatprep.mubr.f32.mxu1 %v6902_v29  ;;  %v6642_v29 = vadd.f32 %v6641_v21, %v6579_v27  ;;  %v6907_v20 = vld [vmem:[#allocation3 + $0x1c8] sm:$0xff]  ;;  %v19510_v27 = vld [vmem:[#allocation175_spill] sm:$0xff] }
 0xaaa   :  { %v6510_v5 = vadd.f32 %v6509_v35, %v15817_v57 }
 0xaab   :  { %v5977_v16 = vpop.f32.mrb[114].mxu1 }
 0xaac   :  { %v15931_v42 = vadd.f32 %v19507_v1, %v5977_v16  ;;  %v5979_v18 = vpop.f32.mrb[115].mxu1  ;;  %8486 = vmatmul.mubr.f32.gmra.mrb[220].mxu1 %v6903_v47  ;;  %v6643_v47 = vadd.f32 %v6642_v29, %v6580_v2  ;;  %v6511_v44 = vadd.f32 %v6510_v5, %v15820_v8  ;;  %v6584_v2 = vmul.f32 %v15829_v37, %v15829_v37 }
 0xaad   :  { %8488 = vmatprep.mubr.f32.mxu1 %v6904_v40 }
 0xaae   :  { %19508 = vst [vmem:[#allocation81_spill] sm:$0xff] %v15931_v42  ;;  %v6644_v16 = vadd.f32 %v6643_v47, %v6581_v39  ;;  %v6512_v59 = vadd.f32 %v6511_v44, %v15823_v56  ;;  %v6585_v39 = vmul.f32 %v15832_v9, %v15832_v9  ;;  %v6911_v47 = vld [vmem:[#allocation3 + $0x1e8] sm:$0xff] }
 0xaaf   :  { %v5982_v60 = vpop.f32.mrb[116].mxu1 }
 0xab0   :  { %v15940_v13 = vadd.f32 %v19509_v10, %v5982_v60  ;;  %v5984_v48 = vpop.f32.mrb[117].mxu1  ;;  %8489 = vmatmul.mubr.f32.gmra.mrb[222].mxu1 %v6905_v15  ;;  %v6909_v15 = vld [vmem:[#allocation3 + $0x1d8] sm:$0xff]  ;;  %v6645_v21 = vadd.f32 %v6644_v16, %v6582_v14  ;;  %v6513_v35 = vadd.f32 %v6512_v59, %v15826_v54 }
 0xab1   :  { %8491 = vmatprep.mubr.f32.mxu1 %v6906_v7  ;;  %v6910_v7 = vld [vmem:[#allocation3 + $0x1e0] sm:$0xff]  ;;  %v19512_v10 = vld [vmem:[#allocation179_spill] sm:$0xff] }
 0xab2   :  { %v6646_v29 = vadd.f32 %v6645_v21, %v6583_v28  ;;  %v6514_v5 = vadd.f32 %v6513_v35, %v15829_v37  ;;  %v6913_v35 = vld [vmem:[#allocation3 + $0x1f8] sm:$0xff] }
 0xab3   :  { %v5987_v40 = vpop.f32.mrb[118].mxu1 }
 0xab4   :  { %v15949_v1 = vadd.f32 %v19510_v27, %v5987_v40  ;;  %v5989_v18 = vpop.f32.mrb[119].mxu1  ;;  %8492 = vmatmul.mubr.f32.gmra.mrb[224].mxu1 %v6907_v20  ;;  %v6647_v44 = vadd.f32 %v6646_v29, %v6584_v2  ;;  %v6515_v14 = vadd.f32 %v6514_v5, %v15832_v9  ;;  %v6912_v40 = vld [vmem:[#allocation3 + $0x1f0] sm:$0xff]  ;;  %v6587_v27 = vmul.f32 %v15838_v31, %v15838_v31 }
 0xab5   :  { %8494 = vmatprep.mubr.f32.mxu1 %v6908_v11  ;;  %v6586_v11 = vmul.f32 %v15835_v51, %v15835_v51  ;;  %v19513_v18 = vld [vmem:[#allocation178_spill] sm:$0xff] }
 0xab6   :  { %19511 = vst [vmem:[#allocation94_spill] sm:$0xff] %v15949_v1  ;;  %v6648_v59 = vadd.f32 %v6647_v44, %v6585_v39  ;;  %v6516_v28 = vadd.f32 %v6515_v14, %v15835_v51 }
 0xab7   :  { %v5992_v60 = vpop.f32.mrb[120].mxu1 }
 0xab8   :  { %v15958_v48 = vadd.f32 %v19512_v10, %v5992_v60  ;;  %v5994_v20 = vpop.f32.mrb[121].mxu1  ;;  %8495 = vmatmul.mubr.f32.gmra.mrb[226].mxu1 %v6909_v15  ;;  %v6649_v2 = vadd.f32 %v6648_v59, %v6586_v11  ;;  %v6588_v60 = vmul.f32 %v15841_v19, %v15841_v19  ;;  %v6589_v10 = vmul.f32 %v15844_v3, %v15844_v3 }
 0xab9   :  { %8497 = vmatprep.mubr.f32.mxu1 %v6910_v7  ;;  %v6517_v7 = vadd.f32 %v6516_v28, %v15838_v31  ;;  %v19515_v20 = vld [vmem:[#allocation182_spill] sm:$0xff] }
 0xaba   :  { %v6650_v5 = vadd.f32 %v6649_v2, %v6587_v27  ;;  %v6591_v27 = vmul.f32 %v15850_v41, %v15850_v41 }
 0xabb   :  { %v5997_v16 = vpop.f32.mrb[122].mxu1  ;;  %v6518_v39 = vadd.f32 %v6517_v7, %v15841_v19 }
 0xabc   :  { %v15967_v21 = vadd.f32 %v19513_v18, %v5997_v16  ;;  %v5999_v15 = vpop.f32.mrb[123].mxu1  ;;  %8498 = vmatmul.mubr.f32.gmra.mrb[228].mxu1 %v6911_v47  ;;  %v6651_v47 = vadd.f32 %v6650_v5, %v6588_v60  ;;  %v19516_v18 = vld [vmem:[#allocation181_spill] sm:$0xff]  ;;  %v6592_v60 = vmul.f32 %v15853_v30, %v15853_v30 }
 0xabd   :  { %8500 = vmatprep.mubr.f32.mxu1 %v6912_v40  ;;  %v6519_v11 = vadd.f32 %v6518_v39, %v15844_v3  ;;  %v6590_v40 = vmul.f32 %v15847_v22, %v15847_v22 }
 0xabe   :  { %19514 = vst [vmem:[#allocation99_spill] sm:$0xff] %v15967_v21  ;;  %v6652_v59 = vadd.f32 %v6651_v47, %v6589_v10  ;;  %v6593_v10 = vmul.f32 %v15856_v0, %v15856_v0 }
 0xabf   :  { %v6002_v29 = vpop.f32.mrb[124].mxu1  ;;  %v6520_v28 = vadd.f32 %v6519_v11, %v15847_v22 }
 0xac0   :  { %v15976_v44 = vadd.f32 %v19515_v20, %v6002_v29  ;;  %v6004_v14 = vpop.f32.mrb[125].mxu1  ;;  %8501 = vmatmul.mubr.f32.gmra.mrb[230].mxu1 %v6913_v35  ;;  %v6653_v7 = vadd.f32 %v6652_v59, %v6590_v40  ;;  %v19518_v20 = vld [vmem:[#allocation185_spill] sm:$0xff]  ;;  %v6594_v40 = vmul.f32 %v15859_v45, %v15859_v45 }
 0xac1   :  { %v6521_v35 = vadd.f32 %v6520_v28, %v15850_v41 }
 0xac2   :  { %v6654_v5 = vadd.f32 %v6653_v7, %v6591_v27  ;;  %v6595_v27 = vmul.f32 %v15862_v52, %v15862_v52 }
 0xac3   :  { %v6007_v16 = vpop.f32.mrb[126].mxu1  ;;  %v6522_v39 = vadd.f32 %v6521_v35, %v15853_v30 }
 0xac4   :  { %v15985_v15 = vadd.f32 %v19516_v18, %v6007_v16  ;;  %v6009_v2 = vpop.f32.mrb[127].mxu1  ;;  %v6655_v11 = vadd.f32 %v6654_v5, %v6592_v60  ;;  %v6596_v60 = vmul.f32 %v15865_v63, %v15865_v63 }
 0xac5   :  { %v6523_v16 = vadd.f32 %v6522_v39, %v15856_v0  ;;  %v19519_v2 = vld [vmem:[#allocation184_spill] sm:$0xff] }
 0xac6   :  { %19517 = vst [vmem:[#allocation96_spill] sm:$0xff] %v15985_v15  ;;  %v6656_v28 = vadd.f32 %v6655_v11, %v6593_v10  ;;  %v6597_v10 = vmul.f32 %v15868_v46, %v15868_v46  ;;  %v19521_v11 = vld [vmem:[#allocation188_spill] sm:$0xff] }
 0xac7   :  { %v6012_v29 = vpop.f32.mrb[128].mxu1  ;;  %v6524_v18 = vadd.f32 %v6523_v16, %v15859_v45 }
 0xac8   :  { %v15994_v14 = vadd.f32 %v19518_v20, %v6012_v29  ;;  %v6014_v47 = vpop.f32.mrb[129].mxu1  ;;  %v6657_v29 = vadd.f32 %v6656_v28, %v6594_v40  ;;  %v6598_v40 = vmul.f32 %v15871_v43, %v15871_v43 }
 0xac9   :  { %v6525_v20 = vadd.f32 %v6524_v18, %v15862_v52 }
 0xaca   :  { %v6658_v39 = vadd.f32 %v6657_v29, %v6595_v27  ;;  %v6599_v27 = vmul.f32 %v15884_v25, %v15884_v25  ;;  %v19522_v29 = vld [vmem:[#allocation187_spill] sm:$0xff] }
 0xacb   :  { %v6017_v59 = vpop.f32.mrb[130].mxu1  ;;  %v6526_v47 = vadd.f32 %v6525_v20, %v15865_v63 }
 0xacc   :  { %v16003_v7 = vadd.f32 %v19519_v2, %v6017_v59  ;;  %v6019_v35 = vpop.f32.mrb[131].mxu1  ;;  %v6659_v59 = vadd.f32 %v6658_v39, %v6596_v60  ;;  %v6600_v60 = vmul.f32 %v15895_v6, %v15895_v6 }
 0xacd   :  { %v6527_v2 = vadd.f32 %v6526_v47, %v15868_v46 }
 0xace   :  { %19520 = vst [vmem:[#allocation103_spill] sm:$0xff] %v16003_v7  ;;  %v6660_v18 = vadd.f32 %v6659_v59, %v6597_v10  ;;  %v6601_v10 = vmul.f32 %v15904_v61, %v15904_v61  ;;  %v19524_v59 = vld [vmem:[#allocation108_spill] sm:$0xff] }
 0xacf   :  { %v6022_v5 = vpop.f32.mrb[132].mxu1  ;;  %v6528_v35 = vadd.f32 %v6527_v2, %v15871_v43 }
 0xad0   :  { %v16012_v16 = vadd.f32 %v19521_v11, %v6022_v5  ;;  %v6024_v45 = vpop.f32.mrb[133].mxu1  ;;  %v6661_v5 = vadd.f32 %v6660_v18, %v6598_v40  ;;  %v6602_v40 = vmul.f32 %v15913_v36, %v15913_v36 }
 0xad1   :  { %v6529_v45 = vadd.f32 %v6528_v35, %v15884_v25 }
 0xad2   :  { %v6662_v47 = vadd.f32 %v6661_v5, %v6599_v27  ;;  %v6603_v27 = vmul.f32 %v15922_v26, %v15922_v26  ;;  %v19525_v5 = vld [vmem:[#allocation190_spill] sm:$0xff] }
 0xad3   :  { %v6027_v28 = vpop.f32.mrb[134].mxu1  ;;  %v6530_v11 = vadd.f32 %v6529_v45, %v15895_v6 }
 0xad4   :  { %v16021_v20 = vadd.f32 %v19522_v29, %v6027_v28  ;;  %v6029_v63 = vpop.f32.mrb[135].mxu1  ;;  %v6663_v28 = vadd.f32 %v6662_v47, %v6600_v60  ;;  %v6604_v60 = vmul.f32 %v15931_v42, %v15931_v42 }
 0xad5   :  { %v6531_v63 = vadd.f32 %v6530_v11, %v15904_v61 }
 0xad6   :  { %19523 = vst [vmem:[#allocation109_spill] sm:$0xff] %v16021_v20  ;;  %v6664_v35 = vadd.f32 %v6663_v28, %v6601_v10  ;;  %v6605_v10 = vmul.f32 %v15940_v13, %v15940_v13  ;;  %v19527_v28 = vld [vmem:[#allocation111_spill] sm:$0xff] }
 0xad7   :  { %v6032_v39 = vpop.f32.mrb[136].mxu1  ;;  %v6532_v29 = vadd.f32 %v6531_v63, %v15913_v36 }
 0xad8   :  { %v16030_v2 = vadd.f32 %v19524_v59, %v6032_v39  ;;  %v6034_v43 = vpop.f32.mrb[137].mxu1  ;;  %v6665_v39 = vadd.f32 %v6664_v35, %v6602_v40  ;;  %v6606_v40 = vmul.f32 %v15949_v1, %v15949_v1 }
 0xad9   :  { %v6533_v43 = vadd.f32 %v6532_v29, %v15922_v26 }
 0xada   :  { %v6666_v11 = vadd.f32 %v6665_v39, %v6603_v27  ;;  %v6607_v27 = vmul.f32 %v15958_v48, %v15958_v48  ;;  %v19528_v39 = vld [vmem:[#allocation192_spill] sm:$0xff] }
 0xadb   :  { %v6037_v18 = vpop.f32.mrb[138].mxu1  ;;  %v6534_v59 = vadd.f32 %v6533_v43, %v15931_v42 }
 0xadc   :  { %v16039_v45 = vadd.f32 %v19525_v5, %v6037_v18  ;;  %v6039_v6 = vpop.f32.mrb[139].mxu1  ;;  %v6667_v18 = vadd.f32 %v6666_v11, %v6604_v60  ;;  %v6608_v60 = vmul.f32 %v15967_v21, %v15967_v21 }
 0xadd   :  { %v6535_v6 = vadd.f32 %v6534_v59, %v15940_v13 }
 0xade   :  { %19526 = vst [vmem:[#allocation14_spill] sm:$0xff] %v16039_v45  ;;  %v6668_v29 = vadd.f32 %v6667_v18, %v6605_v10  ;;  %v6609_v10 = vmul.f32 %v15976_v44, %v15976_v44  ;;  %v19530_v18 = vld [vmem:[#allocation113_spill] sm:$0xff] }
 0xadf   :  { %v6042_v47 = vpop.f32.mrb[140].mxu1  ;;  %v6536_v5 = vadd.f32 %v6535_v6, %v15949_v1 }
 0xae0   :  { %v16048_v63 = vadd.f32 %v19527_v28, %v6042_v47  ;;  %v6044_v36 = vpop.f32.mrb[141].mxu1  ;;  %v6669_v47 = vadd.f32 %v6668_v29, %v6606_v40  ;;  %v6610_v40 = vmul.f32 %v15985_v15, %v15985_v15 }
 0xae1   :  { %v6537_v36 = vadd.f32 %v6536_v5, %v15958_v48 }
 0xae2   :  { %v6670_v59 = vadd.f32 %v6669_v47, %v6607_v27  ;;  %v6611_v27 = vmul.f32 %v15994_v14, %v15994_v14  ;;  %v19531_v47 = vld [vmem:[#allocation194_spill] sm:$0xff] }
 0xae3   :  { %v6047_v35 = vpop.f32.mrb[142].mxu1  ;;  %v6538_v28 = vadd.f32 %v6537_v36, %v15967_v21 }
 0xae4   :  { %v16057_v43 = vadd.f32 %v19528_v39, %v6047_v35  ;;  %v6049_v42 = vpop.f32.mrb[143].mxu1  ;;  %v6671_v35 = vadd.f32 %v6670_v59, %v6608_v60  ;;  %v6612_v60 = vmul.f32 %v16003_v7, %v16003_v7 }
 0xae5   :  { %v6539_v42 = vadd.f32 %v6538_v28, %v15976_v44 }
 0xae6   :  { %19529 = vst [vmem:[#allocation74_spill] sm:$0xff] %v16057_v43  ;;  %v6672_v5 = vadd.f32 %v6671_v35, %v6609_v10  ;;  %v6613_v10 = vmul.f32 %v16012_v16, %v16012_v16  ;;  %v19533_v35 = vld [vmem:[#allocation53_spill] sm:$0xff] }
 0xae7   :  { %v6052_v11 = vpop.f32.mrb[144].mxu1  ;;  %v6540_v39 = vadd.f32 %v6539_v42, %v15985_v15 }
 0xae8   :  { %v16066_v6 = vadd.f32 %v19530_v18, %v6052_v11  ;;  %v6054_v1 = vpop.f32.mrb[145].mxu1  ;;  %v6673_v11 = vadd.f32 %v6672_v5, %v6610_v40  ;;  %v6614_v40 = vmul.f32 %v16021_v20, %v16021_v20 }
 0xae9   :  { %v6541_v1 = vadd.f32 %v6540_v39, %v15994_v14 }
 0xaea   :  { %v6674_v28 = vadd.f32 %v6673_v11, %v6611_v27  ;;  %v6615_v27 = vmul.f32 %v16030_v2, %v16030_v2  ;;  %v19534_v11 = vld [vmem:[#allocation196_spill] sm:$0xff] }
 0xaeb   :  { %v6057_v29 = vpop.f32.mrb[146].mxu1  ;;  %v6542_v18 = vadd.f32 %v6541_v1, %v16003_v7 }
 0xaec   :  { %v16075_v36 = vadd.f32 %v19531_v47, %v6057_v29  ;;  %v6059_v21 = vpop.f32.mrb[147].mxu1  ;;  %v6675_v29 = vadd.f32 %v6674_v28, %v6612_v60  ;;  %v6616_v60 = vmul.f32 %v16039_v45, %v16039_v45 }
 0xaed   :  { %v6543_v21 = vadd.f32 %v6542_v18, %v16012_v16 }
 0xaee   :  { %19532 = vst [vmem:[#allocation83_spill] sm:$0xff] %v16075_v36  ;;  %v6676_v39 = vadd.f32 %v6675_v29, %v6613_v10  ;;  %v6617_v10 = vmul.f32 %v16048_v63, %v16048_v63  ;;  %v19536_v29 = vld [vmem:[#allocation115_spill] sm:$0xff] }
 0xaef   :  { %v6062_v59 = vpop.f32.mrb[148].mxu1  ;;  %v6544_v47 = vadd.f32 %v6543_v21, %v16021_v20 }
 0xaf0   :  { %v16084_v42 = vadd.f32 %v19533_v35, %v6062_v59  ;;  %v6064_v15 = vpop.f32.mrb[149].mxu1  ;;  %v6677_v59 = vadd.f32 %v6676_v39, %v6614_v40  ;;  %v6618_v40 = vmul.f32 %v16057_v43, %v16057_v43 }
 0xaf1   :  { %v6545_v15 = vadd.f32 %v6544_v47, %v16030_v2 }
 0xaf2   :  { %v6678_v18 = vadd.f32 %v6677_v59, %v6615_v27  ;;  %v6619_v27 = vmul.f32 %v16066_v6, %v16066_v6  ;;  %v19537_v59 = vld [vmem:[#allocation198_spill] sm:$0xff] }
 0xaf3   :  { %v6067_v5 = vpop.f32.mrb[150].mxu1  ;;  %v6546_v35 = vadd.f32 %v6545_v15, %v16039_v45 }
 0xaf4   :  { %v16093_v1 = vadd.f32 %v19534_v11, %v6067_v5  ;;  %v6069_v7 = vpop.f32.mrb[151].mxu1  ;;  %v6679_v5 = vadd.f32 %v6678_v18, %v6616_v60  ;;  %v6620_v60 = vmul.f32 %v16075_v36, %v16075_v36 }
 0xaf5   :  { %v6547_v7 = vadd.f32 %v6546_v35, %v16048_v63 }
 0xaf6   :  { %19535 = vst [vmem:[#allocation84_spill] sm:$0xff] %v16093_v1  ;;  %v6680_v47 = vadd.f32 %v6679_v5, %v6617_v10  ;;  %v6621_v10 = vmul.f32 %v16084_v42, %v16084_v42  ;;  %v19539_v5 = vld [vmem:[#allocation117_spill] sm:$0xff] }
 0xaf7   :  { %v6072_v28 = vpop.f32.mrb[152].mxu1  ;;  %v6548_v11 = vadd.f32 %v6547_v7, %v16057_v43 }
 0xaf8   :  { %v16102_v21 = vadd.f32 %v19536_v29, %v6072_v28  ;;  %v6074_v20 = vpop.f32.mrb[153].mxu1  ;;  %v6681_v28 = vadd.f32 %v6680_v47, %v6618_v40  ;;  %v6622_v40 = vmul.f32 %v16093_v1, %v16093_v1 }
 0xaf9   :  { %v6549_v20 = vadd.f32 %v6548_v11, %v16066_v6 }
 0xafa   :  { %v6682_v35 = vadd.f32 %v6681_v28, %v6619_v27  ;;  %v6623_v27 = vmul.f32 %v16102_v21, %v16102_v21  ;;  %v19541_v28 = vld [vmem:[#allocation200_spill] sm:$0xff] }
 0xafb   :  { %v6077_v39 = vpop.f32.mrb[154].mxu1  ;;  %v6550_v29 = vadd.f32 %v6549_v20, %v16075_v36 }
 0xafc   :  { %v16111_v15 = vadd.f32 %v19537_v59, %v6077_v39  ;;  %v6079_v45 = vpop.f32.mrb[155].mxu1  ;;  %v6683_v39 = vadd.f32 %v6682_v35, %v6620_v60 }
 0xafd   :  { %v6551_v45 = vadd.f32 %v6550_v29, %v16084_v42 }
 0xafe   :  { %19538 = vst [vmem:[#allocation89_spill] sm:$0xff] %v16111_v15  ;;  %v6684_v11 = vadd.f32 %v6683_v39, %v6621_v10  ;;  %v6624_v60 = vmul.f32 %v16111_v15, %v16111_v15  ;;  %v19543_v39 = vld [vmem:[#allocation118_spill] sm:$0xff] }
 0xaff   :  { %v6082_v18 = vpop.f32.mrb[156].mxu1  ;;  %v6552_v59 = vadd.f32 %v6551_v45, %v16093_v1 }
 0xb00   :  { %v16120_v7 = vadd.f32 %v19539_v5, %v6082_v18  ;;  %v6084_v43 = vpop.f32.mrb[157].mxu1  ;;  %v6685_v18 = vadd.f32 %v6684_v11, %v6622_v40 }
 0xb01   :  { %v6553_v43 = vadd.f32 %v6552_v59, %v16102_v21 }
 0xb02   :  { %19540 = vst [vmem:[#allocation51_spill] sm:$0xff] %v16120_v7  ;;  %v6686_v29 = vadd.f32 %v6685_v18, %v6623_v27  ;;  %v6625_v10 = vmul.f32 %v16120_v7, %v16120_v7  ;;  %v19545_v18 = vld [vmem:[#allocation106_spill] sm:$0xff] }
 0xb03   :  { %v6087_v47 = vpop.f32.mrb[158].mxu1  ;;  %v6554_v5 = vadd.f32 %v6553_v43, %v16111_v15 }
 0xb04   :  { %v16129_v20 = vadd.f32 %v19541_v28, %v6087_v47  ;;  %v6089_v36 = vpop.f32.mrb[159].mxu1  ;;  %v6687_v47 = vadd.f32 %v6686_v29, %v6624_v60 }
 0xb05   :  { %v6555_v36 = vadd.f32 %v6554_v5, %v16120_v7 }
 0xb06   :  { %19542 = vst [vmem:[#allocation46_spill] sm:$0xff] %v16129_v20  ;;  %v6626_v40 = vmul.f32 %v16129_v20, %v16129_v20  ;;  %v6688_v59 = vadd.f32 %v6687_v47, %v6625_v10 }
 0xb07   :  { %v6092_v35 = vpop.f32.mrb[160].mxu1  ;;  %v6556_v28 = vadd.f32 %v6555_v36, %v16129_v20 }
 0xb08   :  { %v16138_v45 = vadd.f32 %v19543_v39, %v6092_v35  ;;  %v6094_v1 = vpop.f32.mrb[161].mxu1  ;;  %v6689_v35 = vadd.f32 %v6688_v59, %v6626_v40 }
 0xb0a   :  { %19544 = vst [vmem:[#allocation49_spill] sm:$0xff] %v16138_v45  ;;  %v6627_v27 = vmul.f32 %v16138_v45, %v16138_v45  ;;  %v6557_v1 = vadd.f32 %v6556_v28, %v16138_v45 }
 0xb0b   :  { %v6097_v11 = vpop.f32.mrb[162].mxu1 }
 0xb0c   :  { %v16147_v43 = vadd.f32 %v19545_v18, %v6097_v11  ;;  %v6099_v15 = vpop.f32.mrb[163].mxu1  ;;  %v6690_v5 = vadd.f32 %v6689_v35, %v6627_v27 }
 0xb0e   :  { %19546 = vst [vmem:[#allocation95_spill] sm:$0xff] %v16147_v43  ;;  %v6628_v60 = vmul.f32 %v16147_v43, %v16147_v43  ;;  %v6558_v39 = vadd.f32 %v6557_v1, %v16147_v43 }
 0xb0f   :  { %v6102_v29 = vpop.f32.mrb[164].mxu1 }
 0xb10   :  { %v16154_v10 = vadd.f32 %v15886_v33, %v6102_v29  ;;  %v6104_v47 = vpop.f32.mrb[165].mxu1  ;;  %v6691_v36 = vadd.f32 %v6690_v5, %v6628_v60 }
 0xb12   :  { %19547 = vst [vmem:[#allocation97_spill] sm:$0xff] %v16154_v10  ;;  %v6559_v20 = vadd.f32 %v6558_v39, %v16154_v10  ;;  %v6629_v15 = vmul.f32 %v16154_v10, %v16154_v10 }
 0xb13   :  { %v6107_v40 = vpop.f32.mrb[166].mxu1 }
 0xb14   :  { %v6692_v11 = vadd.f32 %v6691_v36, %v6629_v15  ;;  %v16160_v59 = vadd.f32 %v15875_v49, %v6107_v40  ;;  %v6109_v28 = vpop.f32.mrb[167].mxu1 }
 0xb16   :  { %v6560_v27 = vadd.f32 %v6559_v20, %v16160_v59  ;;  %v6630_v18 = vmul.f32 %v16160_v59, %v16160_v59 }
 0xb17   :  { %v16165_v33 = vpop.f32.mrb[168].mxu1 }
 0xb18   :  { %19548 = vst [vmem:[#allocation100_spill] sm:$0xff] %v16165_v33  ;;  %v6561_v35 = vrot.slane %v6560_v27, 4  ;;  %v6693_v1 = vadd.f32 %v6692_v11, %v6630_v18  ;;  %v7387_v60 = vmul.f32 %v16165_v33, %v16165_v33  ;;  %v16169_v29 = vpop.f32.mrb[169].mxu1 }
 0xb19   :  { %19549 = vst [vmem:[#allocation102_spill] sm:$0xff] %v16169_v29  ;;  %v7317_v5 = vadd.f32 %v16165_v33, %v16169_v29  ;;  %v7386_v49 = vmul.f32 %v16169_v29, %v16169_v29 }
 0xb1a   :  { %v6562_v39 = vadd.f32 %v6561_v35, %v6560_v27  ;;  %v6694_v20 = vrot.slane %v6693_v1, 4 }
 0xb1b   :  { %v7450_v47 = vadd.f32 %v7387_v60, %v7386_v49  ;;  %v16175_v36 = vpop.f32.mrb[170].mxu1 }
 0xb1c   :  { %19550 = vst [vmem:[#allocation105_spill] sm:$0xff] %v16175_v36  ;;  %v6563_v15 = vrot.slane %v6562_v39, 2  ;;  %v6695_v40 = vadd.f32 %v6694_v20, %v6693_v1  ;;  %v16177_v28 = vpop.f32.mrb[171].mxu1  ;;  %v7389_v33 = vmul.f32 %v16175_v36, %v16175_v36 }
 0xb1d   :  { %19551 = vst [vmem:[#allocation107_spill] sm:$0xff] %v16177_v28  ;;  %v7318_v11 = vadd.f32 %v7317_v5, %v16177_v28  ;;  %v7388_v18 = vmul.f32 %v16177_v28, %v16177_v28 }
 0xb1e   :  { %v6564_v10 = vadd.f32 %v6563_v15, %v6562_v39  ;;  %v6696_v43 = vrot.slane %v6695_v40, 2 }
 0xb1f   :  { %v7319_v27 = vadd.f32 %v16175_v36, %v7318_v11  ;;  %v7451_v35 = vadd.f32 %v7450_v47, %v7388_v18  ;;  %v16185_v60 = vpop.f32.mrb[172].mxu1  ;;  %v19581_v36 = vld [vmem:[#allocation76_spill] sm:$0xff] }
 0xb20   :  { %19552 = vst [vmem:[#allocation110_spill] sm:$0xff] %v16185_v60  ;;  %v6565_v49 = vrot.slane %v6564_v10, 1  ;;  %v6697_v29 = vadd.f32 %v6696_v43, %v6695_v40  ;;  %v16187_v1 = vpop.f32.mrb[173].mxu1  ;;  %v7391_v45 = vmul.f32 %v16185_v60, %v16185_v60 }
 0xb21   :  { %19553 = vst [vmem:[#allocation114_spill] sm:$0xff] %v16187_v1  ;;  %v7452_v20 = vadd.f32 %v7451_v35, %v7389_v33  ;;  %v7320_v5 = vadd.f32 %v7319_v27, %v16187_v1  ;;  %v7390_v28 = vmul.f32 %v16187_v1, %v16187_v1 }
 0xb22   :  { %v6566_v39 = vadd.f32 %v6565_v49, %v6564_v10  ;;  %v6698_v15 = vrot.slane %v6697_v29, 1 }
 0xb23   :  { %v7453_v7 = vadd.f32 %v7452_v20, %v7390_v28  ;;  %v16194_v11 = vpop.f32.mrb[174].mxu1  ;;  %v7321_v47 = vadd.f32 %v16185_v60, %v7320_v5 }
 0xb24   :  { %19554 = vst [vmem:[#allocation116_spill] sm:$0xff] %v16194_v11  ;;  %v6699_v18 = vadd.f32 %v6698_v15, %v6697_v29  ;;  %v6700_v43 = vmul.f32 0.001953125, %v6566_v39  ;;  %v16197_v40 = vpop.f32.mrb[175].mxu1  ;;  %v7393_v1 = vmul.f32 %v16194_v11, %v16194_v11 }
 0xb25   :  { %19555 = vst [vmem:[#allocation119_spill] sm:$0xff] %v16197_v40  ;;  %v7322_v33 = vadd.f32 %v7321_v47, %v16197_v40  ;;  %v7392_v27 = vmul.f32 %v16197_v40, %v16197_v40  ;;  %v7454_v35 = vadd.f32 %v7453_v7, %v7391_v45 }
 0xb26   :  { %v6701_v10 = vmul.f32 0.001953125, %v6699_v18  ;;  %v6702_v49 = vmul.f32 %v6700_v43, %v6700_v43 }
 0xb27   :  { %v7455_v28 = vadd.f32 %v7454_v35, %v7392_v27  ;;  %v16204_v20 = vpop.f32.mrb[176].mxu1  ;;  %v7323_v5 = vadd.f32 %v16194_v11, %v7322_v33  ;;  %v19580_v11 = vld [vmem:[#allocation73_spill] sm:$0xff] }
 0xb28   :  { %19556 = vst [vmem:[#allocation122_spill] sm:$0xff] %v16204_v20  ;;  %v6703_v29 = vsub.f32 %v6701_v10, %v6702_v49  ;;  %v16207_v39 = vpop.f32.mrb[177].mxu1  ;;  %v7395_v45 = vmul.f32 %v16204_v20, %v16204_v20 }
 0xb29   :  { %19557 = vst [vmem:[#allocation125_spill] sm:$0xff] %v16207_v39  ;;  %v7324_v15 = vadd.f32 %v7323_v5, %v16207_v39  ;;  %v7394_v47 = vmul.f32 %v16207_v39, %v16207_v39  ;;  %v7456_v40 = vadd.f32 %v7455_v28, %v7393_v1 }
 0xb2a   :  { %v6704_v7 = vmax.f32 %v6703_v29, 0.0 }
 0xb2b   :  { %v7457_v18 = vadd.f32 %v7456_v40, %v7394_v47  ;;  %v16214_v60 = vpop.f32.mrb[178].mxu1  ;;  %v7325_v27 = vadd.f32 %v16204_v20, %v7324_v15 }
 0xb2c   :  { %19558 = vst [vmem:[#allocation128_spill] sm:$0xff] %v16214_v60  ;;  %v6705_v35 = vadd.f32 1e-05, %v6704_v7  ;;  %v16217_v33 = vpop.f32.mrb[179].mxu1  ;;  %v7397_v1 = vmul.f32 %v16214_v60, %v16214_v60 }
 0xb2d   :  { %19559 = vst [vmem:[#allocation131_spill] sm:$0xff] %v16217_v33  ;;  %v7326_v10 = vadd.f32 %v7325_v27, %v16217_v33  ;;  %v7396_v49 = vmul.f32 %v16217_v33, %v16217_v33  ;;  %v7458_v5 = vadd.f32 %v7457_v18, %v7395_v45 }
 0xb2e   :  { %9776 = vrsqrt.f32 %v6705_v35 }
 0xb2f   :  { %v7459_v28 = vadd.f32 %v7458_v5, %v7396_v49  ;;  %v16224_v29 = vpop.f32.mrb[180].mxu1  ;;  %v7327_v40 = vadd.f32 %v16214_v60, %v7326_v10 }
 0xb30   :  { %19560 = vst [vmem:[#allocation134_spill] sm:$0xff] %v16224_v29  ;;  %v16227_v47 = vpop.f32.mrb[181].mxu1  ;;  %v7399_v45 = vmul.f32 %v16224_v29, %v16224_v29 }
 0xb31   :  { %19561 = vst [vmem:[#allocation137_spill] sm:$0xff] %v16227_v47  ;;  %v7328_v15 = vadd.f32 %v7327_v40, %v16227_v47  ;;  %v7398_v7 = vmul.f32 %v16227_v47, %v16227_v47  ;;  %v7460_v27 = vadd.f32 %v7459_v28, %v7397_v1  ;;  %v6496_v1 = vld [vmem:[%s17871_s6] sm:$0x1] }
 0xb33   :  { %v7461_v18 = vadd.f32 %v7460_v27, %v7398_v7  ;;  %v16234_v35 = vpop.f32.mrb[182].mxu1  ;;  %v7329_v49 = vadd.f32 %v16224_v29, %v7328_v15 }
 0xb34   :  { %19562 = vst [vmem:[#allocation138_spill] sm:$0xff] %v16234_v35  ;;  %v16237_v5 = vpop.f32.mrb[183].mxu1  ;;  %v7401_v28 = vmul.f32 %v16234_v35, %v16234_v35 }
 0xb35   :  { %19563 = vst [vmem:[#allocation64_spill] sm:$0xff] %v16237_v5  ;;  %v7330_v10 = vadd.f32 %v7329_v49, %v16237_v5  ;;  %v7400_v60 = vmul.f32 %v16237_v5, %v16237_v5  ;;  %v7462_v40 = vadd.f32 %v7461_v18, %v7399_v45  ;;  %v6497_v5 = vld [vmem:[%s17872_s7] sm:$0x1] }
 0xb37   :  { %v7463_v7 = vadd.f32 %v7462_v40, %v7400_v60  ;;  %v16247_v27 = vpop.f32.mrb[184].mxu1  ;;  %v7331_v15 = vadd.f32 %v16234_v35, %v7330_v10  ;;  %v19566_v60 = vld [vmem:[#allocation16_spill] sm:$0xff] }
 0xb38   :  { %19564 = vst [vmem:[#allocation71_spill] sm:$0xff] %v16247_v27  ;;  %v9777_v29 = vpop.eup %9776  ;;  %v16250_v47 = vpop.f32.mrb[185].mxu1 }
 0xb39   :  { %19565 = vst [vmem:[#allocation79_spill] sm:$0xff] %v16250_v47  ;;  %v6707_v49 = vmul.f32 %v9777_v29, %v6496_v1  ;;  %v7332_v33 = vadd.f32 %v7331_v15, %v16250_v47  ;;  %v7402_v45 = vmul.f32 %v16250_v47, %v16250_v47  ;;  %v7464_v18 = vadd.f32 %v7463_v7, %v7401_v28 }
 0xb3a   :  { %v16270_v1 = vmul.f32 %v16247_v27, %v16247_v27 }
 0xb3b   :  { %v6708_v20 = vmul.f32 %v6707_v49, %v6700_v43  ;;  %v16259_v40 = vrot.slane %v6707_v49, %v19566_v60  ;;  %v16261_v39 = vadd.f32 %v7464_v18, %v7402_v45  ;;  %v16263_v10 = vpop.f32.mrb[186].mxu1  ;;  %v16266_v29 = vadd.f32 %v16247_v27, %v7332_v33 }
 0xb3c   :  { %19568 = vst [vmem:[#allocation101_spill] sm:$0xff] %v16263_v10  ;;  %19570 = vst [vmem:[#allocation12_spill] sm:$0xff] %v16270_v1  ;;  %v16272_v28 = vpop.f32.mrb[187].mxu1  ;;  %v19592_v1 = vld [vmem:[#allocation74_spill] sm:$0xff] }
 0xb3d   :  { %19567 = vst [vmem:[#allocation98_spill] sm:$0xff] %v16261_v39  ;;  %19569 = vst [vmem:[#allocation112_spill] sm:$0xff] %v16266_v29  ;;  %v6709_v7 = vsub.f32 %v6497_v5, %v6708_v20  ;;  %v6779_v43 = vmul.f32 %v16259_v40, %v16160_v59  ;;  %v16278_v15 = vmul.f32 %v16259_v40, %v15762_v53  ;;  %v19594_v29 = vld [vmem:[#allocation83_spill] sm:$0xff] }
 0xb3e   :  { %19571 = vst [vmem:[#allocation78_spill] sm:$0xff] %v16272_v28  ;;  %v16282_v49 = vmul.f32 %v16259_v40, %v15766_v58  ;;  %v16286_v33 = vmul.f32 %v16259_v40, %v15770_v12  ;;  %v16290_v45 = vmul.f32 %v16259_v40, %v15774_v17  ;;  %v16294_v20 = vmul.f32 %v16259_v40, %v15778_v4  ;;  %v19597_v28 = vld [vmem:[#allocation84_spill] sm:$0xff] }
 0xb3f   :  { %v16298_v53 = vmul.f32 %v16259_v40, %v15782_v24  ;;  %v16301_v59 = vrot.slane %v6709_v7, %v19566_v60  ;;  %v16305_v58 = vmul.f32 %v16259_v40, %v15786_v50  ;;  %v16309_v12 = vmul.f32 %v16259_v40, %v15790_v62  ;;  %v16315_v4 = vpop.f32.mrb[188].mxu1  ;;  %v19582_v60 = vld [vmem:[#allocation81_spill] sm:$0xff] }
 0xb40   :  { %v16313_v17 = vmul.f32 %v16259_v40, %v15796_v38  ;;  %19572 = vst [vmem:[#allocation88_spill] sm:$0xff] %v16315_v4  ;;  %v16319_v24 = vmul.f32 %v16259_v40, %v15803_v34  ;;  %v16323_v5 = vmul.f32 %v16259_v40, %v15807_v55  ;;  %v16327_v50 = vmul.f32 %v16259_v40, %v15811_v32  ;;  %v16333_v38 = vpop.f32.mrb[189].mxu1 }
 0xb41   :  { %v16331_v62 = vmul.f32 %v16259_v40, %v15814_v23  ;;  %19573 = vst [vmem:[#allocation91_spill] sm:$0xff] %v16333_v38  ;;  %v16336_v18 = vadd.f32 %v16301_v59, %v6779_v43  ;;  %v16340_v34 = vmul.f32 %v16259_v40, %v15817_v57  ;;  %v16344_v55 = vmul.f32 %v16259_v40, %v15820_v8 }
 0xb42   :  { %v16348_v32 = vmul.f32 %v16259_v40, %v15823_v56  ;;  %v16352_v23 = vmul.f32 %v16259_v40, %v15826_v54  ;;  %v16356_v7 = vmul.f32 %v16259_v40, %v15829_v37  ;;  %v16360_v57 = vmul.f32 %v16259_v40, %v15832_v9 }
 0xb43   :  { %19574 = vst [vmem:[#allocation19_spill] sm:$0xff] %v16336_v18  ;;  %v16364_v8 = vmul.f32 %v16259_v40, %v15835_v51  ;;  %v16368_v56 = vmul.f32 %v16259_v40, %v15838_v31  ;;  %v16372_v54 = vmul.f32 %v16259_v40, %v15841_v19  ;;  %v16376_v37 = vmul.f32 %v16259_v40, %v15844_v3  ;;  %v16382_v43 = vpop.f32.mrb[190].mxu1  ;;  %v19576_v3 = vld [vmem:[#allocation68_spill] sm:$0xff] }
 0xb44   :  { %v16380_v9 = vmul.f32 %v16259_v40, %v15847_v22  ;;  %19575 = vst [vmem:[#allocation23_spill] sm:$0xff] %v16382_v43  ;;  %v16386_v51 = vmul.f32 %v16259_v40, %v15850_v41  ;;  %v16390_v31 = vmul.f32 %v16259_v40, %v15853_v30  ;;  %v16394_v19 = vmul.f32 %v16259_v40, %v15856_v0  ;;  %v16400_v22 = vpop.f32.mrb[191].mxu1  ;;  %v19578_v41 = vld [vmem:[#allocation69_spill] sm:$0xff]  ;;  %v19579_v0 = vld [vmem:[#allocation66_spill] sm:$0xff] }
 0xb45   :  { %v16398_v18 = vmul.f32 %v16259_v40, %v19576_v3  ;;  %19577 = vst [vmem:[#allocation54_spill] sm:$0xff] %v16400_v22  ;;  %v16404_v27 = vmul.f32 %v16259_v40, %v15862_v52  ;;  %v16408_v47 = vmul.f32 %v16259_v40, %v19578_v41  ;;  %v16412_v30 = vmul.f32 %v16259_v40, %v15868_v46  ;;  %v19583_v43 = vld [vmem:[#allocation94_spill] sm:$0xff] }
 0xb46   :  { %v16416_v35 = vmul.f32 %v16259_v40, %v19579_v0  ;;  %v16420_v3 = vmul.f32 %v16259_v40, %v15884_v25  ;;  %v16424_v52 = vmul.f32 %v16259_v40, %v19580_v11  ;;  %v16428_v41 = vmul.f32 %v16259_v40, %v15904_v61 }
 0xb47   :  { %v16432_v46 = vmul.f32 %v16259_v40, %v19581_v36  ;;  %v16436_v0 = vmul.f32 %v16259_v40, %v15922_v26  ;;  %v16440_v25 = vmul.f32 %v16259_v40, %v19582_v60  ;;  %v16444_v11 = vmul.f32 %v16259_v40, %v15940_v13  ;;  %v16450_v22 = vpop.f32.mrb[192].mxu1  ;;  %v19585_v26 = vld [vmem:[#allocation99_spill] sm:$0xff]  ;;  %v19586_v13 = vld [vmem:[#allocation96_spill] sm:$0xff] }
 0xb48   :  { %v16448_v61 = vmul.f32 %v16259_v40, %v19583_v43  ;;  %19584 = vst [vmem:[#allocation135_spill] sm:$0xff] %v16450_v22  ;;  %v16454_v36 = vmul.f32 %v16259_v40, %v15958_v48  ;;  %v16458_v4 = vmul.f32 %v16259_v40, %v19585_v26  ;;  %v16462_v60 = vmul.f32 %v16259_v40, %v15976_v44  ;;  %v16468_v43 = vpop.f32.mrb[193].mxu1  ;;  %v19588_v48 = vld [vmem:[#allocation103_spill] sm:$0xff]  ;;  %v19589_v44 = vld [vmem:[#allocation109_spill] sm:$0xff] }
 0xb49   :  { %v16466_v38 = vmul.f32 %v16259_v40, %v19586_v13  ;;  %19587 = vst [vmem:[#allocation136_spill] sm:$0xff] %v16468_v43  ;;  %v16472_v22 = vmul.f32 %v16259_v40, %v15994_v14  ;;  %v16476_v10 = vmul.f32 %v16259_v40, %v19588_v48  ;;  %v16480_v26 = vmul.f32 %v16259_v40, %v16012_v16  ;;  %v19590_v43 = vld [vmem:[#allocation14_spill] sm:$0xff] }
 0xb4a   :  { %v16484_v39 = vmul.f32 %v16259_v40, %v19589_v44  ;;  %v16488_v13 = vmul.f32 %v16259_v40, %v16030_v2  ;;  %v16492_v14 = vmul.f32 %v16259_v40, %v19590_v43  ;;  %v16496_v48 = vmul.f32 %v16259_v40, %v16048_v63 }
 0xb4b   :  { %v16500_v16 = vmul.f32 %v16259_v40, %v19592_v1  ;;  %v16504_v44 = vmul.f32 %v16259_v40, %v16066_v6  ;;  %v16508_v2 = vmul.f32 %v16259_v40, %v19594_v29  ;;  %v16512_v43 = vmul.f32 %v16259_v40, %v16084_v42  ;;  %v19601_v6 = vld [vmem:[#allocation89_spill] sm:$0xff]  ;;  %v19603_v29 = vld [vmem:[#allocation51_spill] sm:$0xff]  ;;  %v19604_v42 = vld [vmem:[#allocation46_spill] sm:$0xff] }
 0xb4c   :  { %19591 = vst [vmem:[#allocation47_spill] sm:$0xff] %v16496_v48  ;;  %v16516_v63 = vmul.f32 %v16259_v40, %v19597_v28  ;;  %v16518_v48 = vpop.f32.mrb[194].mxu1  ;;  %v16522_v1 = vmul.f32 %v16259_v40, %v16102_v21  ;;  %v19606_v21 = vld [vmem:[#allocation95_spill] sm:$0xff] }
 0xb4d   :  { %19593 = vst [vmem:[#allocation50_spill] sm:$0xff] %v16504_v44  ;;  %19595 = vst [vmem:[#allocation41_spill] sm:$0xff] %v16508_v2  ;;  %v16526_v44 = vmul.f32 %v16259_v40, %v19601_v6  ;;  %v16530_v2 = vmul.f32 %v16259_v40, %v19603_v29  ;;  %v16536_v28 = vpop.f32.mrb[195].mxu1  ;;  %v19607_v6 = vld [vmem:[#allocation97_spill] sm:$0xff]  ;;  %v16552_v29 = vadd.f32 %v16301_v59, %v16278_v15 }
 0xb4e   :  { %19596 = vst [vmem:[#allocation44_spill] sm:$0xff] %v16512_v43  ;;  %19598 = vst [vmem:[#allocation43_spill] sm:$0xff] %v16516_v63  ;;  %v16534_v43 = vmul.f32 %v16259_v40, %v19604_v42  ;;  %v19605_v63 = vld [vmem:[#allocation49_spill] sm:$0xff]  ;;  %v16556_v42 = vadd.f32 %v16301_v59, %v16282_v49  ;;  %v16572_v15 = vadd.f32 %v16301_v59, %v16298_v53 }
 0xb4f   :  { %19599 = vst [vmem:[#allocation48_spill] sm:$0xff] %v16518_v48  ;;  %19600 = vst [vmem:[#allocation56_spill] sm:$0xff] %v16522_v1  ;;  %v16540_v48 = vmul.f32 %v16259_v40, %v19605_v63  ;;  %v16544_v1 = vmul.f32 %v16259_v40, %v19606_v21  ;;  %v16560_v63 = vadd.f32 %v16301_v59, %v16286_v33 }
 0xb50   :  { %19602 = vst [vmem:[#allocation55_spill] sm:$0xff] %v16526_v44  ;;  %v16548_v44 = vmul.f32 %v16259_v40, %v19607_v6  ;;  %19608 = vst [vmem:[#allocation57_spill] sm:$0xff] %v16552_v29  ;;  %v16564_v21 = vadd.f32 %v16301_v59, %v16290_v45  ;;  %v16568_v40 = vadd.f32 %v16301_v59, %v16294_v20  ;;  %v16586_v6 = vpop.f32.mrb[196].mxu1 }
 0xb51   :  { %19609 = vst [vmem:[#allocation65_spill] sm:$0xff] %v16556_v42  ;;  %19610 = vst [vmem:[#allocation70_spill] sm:$0xff] %v16560_v63  ;;  %v16576_v49 = vadd.f32 %v16301_v59, %v16305_v58  ;;  %v16580_v33 = vadd.f32 %v16301_v59, %v16309_v12  ;;  %v16584_v45 = vadd.f32 %v16301_v59, %v16313_v17  ;;  %v16604_v17 = vpop.f32.mrb[197].mxu1 }
 0xb52   :  { %19611 = vst [vmem:[#allocation72_spill] sm:$0xff] %v16564_v21  ;;  %19612 = vst [vmem:[#allocation77_spill] sm:$0xff] %v16568_v40  ;;  %v16590_v20 = vadd.f32 %v16301_v59, %v16319_v24  ;;  %v16594_v53 = vadd.f32 %v16301_v59, %v16323_v5  ;;  %v16598_v58 = vadd.f32 %v16301_v59, %v16327_v50 }
 0xb53   :  { %19613 = vst [vmem:[#allocation104_spill] sm:$0xff] %v16572_v15  ;;  %19614 = vst [vmem:[#allocation85_spill] sm:$0xff] %v16576_v49  ;;  %v16602_v12 = vadd.f32 %v16301_v59, %v16331_v62  ;;  %v16612_v24 = vadd.f32 %v16301_v59, %v16344_v55  ;;  %v16616_v5 = vadd.f32 %v16301_v59, %v16348_v32 }
 0xb54   :  { %19615 = vst [vmem:[#allocation90_spill] sm:$0xff] %v16580_v33  ;;  %19616 = vst [vmem:[#allocation13_spill] sm:$0xff] %v16584_v45  ;;  %v16608_v45 = vadd.f32 %v16301_v59, %v16340_v34  ;;  %v16620_v50 = vadd.f32 %v16301_v59, %v16352_v23  ;;  %v16624_v62 = vadd.f32 %v16301_v59, %v16356_v7 }
 0xb55   :  { %19617 = vst [vmem:[#allocation92_spill] sm:$0xff] %v16590_v20  ;;  %19618 = vst [vmem:[#allocation28_spill] sm:$0xff] %v16594_v53  ;;  %v16628_v34 = vadd.f32 %v16301_v59, %v16360_v57  ;;  %v16632_v55 = vadd.f32 %v16301_v59, %v16364_v8  ;;  %v16636_v32 = vadd.f32 %v16301_v59, %v16368_v56 }
 0xb56   :  { %19619 = vst [vmem:[#allocation29_spill] sm:$0xff] %v16598_v58  ;;  %19620 = vst [vmem:[#allocation30_spill] sm:$0xff] %v16602_v12  ;;  %v16640_v23 = vadd.f32 %v16301_v59, %v16372_v54  ;;  %v16644_v7 = vadd.f32 %v16301_v59, %v16376_v37  ;;  %v16648_v57 = vadd.f32 %v16301_v59, %v16380_v9 }
 0xb57   :  { %19621 = vst [vmem:[#allocation31_spill] sm:$0xff] %v16608_v45  ;;  %19622 = vst [vmem:[#allocation33_spill] sm:$0xff] %v16612_v24  ;;  %v16652_v8 = vadd.f32 %v16301_v59, %v16386_v51  ;;  %v16658_v56 = vadd.f32 %v16301_v59, %v16390_v31  ;;  %v16662_v54 = vadd.f32 %v16301_v59, %v16394_v19 }
 0xb58   :  { %19623 = vst [vmem:[#allocation93_spill] sm:$0xff] %v16616_v5  ;;  %19624 = vst [vmem:[#allocation35_spill] sm:$0xff] %v16620_v50  ;;  %v16666_v37 = vadd.f32 %v16301_v59, %v16398_v18  ;;  %v16670_v9 = vadd.f32 %v16301_v59, %v16404_v27  ;;  %v16680_v31 = vadd.f32 %v16301_v59, %v16412_v30 }
 0xb59   :  { %19625 = vst [vmem:[#allocation17_spill] sm:$0xff] %v16624_v62  ;;  %19626 = vst [vmem:[#allocation18_spill] sm:$0xff] %v16628_v34  ;;  %v16684_v19 = vadd.f32 %v16301_v59, %v16416_v35  ;;  %v16688_v18 = vadd.f32 %v16301_v59, %v16420_v3  ;;  %v16692_v27 = vadd.f32 %v16301_v59, %v16424_v52 }
 0xb5a   :  { %19627 = vst [vmem:[#allocation21_spill] sm:$0xff] %v16632_v55  ;;  %19628 = vst [vmem:[#allocation22_spill] sm:$0xff] %v16636_v32  ;;  %v16654_v55 = vpop.f32.mrb[198].mxu1  ;;  %v16700_v30 = vadd.f32 %v16301_v59, %v16432_v46  ;;  %v16704_v35 = vadd.f32 %v16301_v59, %v16436_v0  ;;  %v16708_v3 = vadd.f32 %v16301_v59, %v16440_v25 }
 0xb5b   :  { %19629 = vst [vmem:[#allocation45_spill] sm:$0xff] %v16640_v23  ;;  %19630 = vst [vmem:[#allocation27_spill] sm:$0xff] %v16644_v7  ;;  %v16672_v51 = vpop.f32.mrb[199].mxu1  ;;  %v16712_v52 = vadd.f32 %v16301_v59, %v16444_v11  ;;  %v16720_v46 = vadd.f32 %v16301_v59, %v16454_v36  ;;  %v16726_v0 = vadd.f32 %v16301_v59, %v16458_v4 }
 0xb5c   :  { %19631 = vst [vmem:[#allocation24_spill] sm:$0xff] %v16648_v57  ;;  %19632 = vst [vmem:[#allocation142_spill] sm:$0xff] %v16652_v8  ;;  %v16676_v8 = vadd.f32 %v16301_v59, %v16408_v47  ;;  %v16696_v47 = vadd.f32 %v16301_v59, %v16428_v41  ;;  %v16716_v41 = vadd.f32 %v16301_v59, %v16448_v61 }
 0xb5d   :  { %19633 = vst [vmem:[#allocation25_spill] sm:$0xff] %v16658_v56  ;;  %19634 = vst [vmem:[#allocation26_spill] sm:$0xff] %v16662_v54  ;;  %v16730_v25 = vadd.f32 %v16301_v59, %v16462_v60  ;;  %v16734_v11 = vadd.f32 %v16301_v59, %v16466_v38  ;;  %v16738_v61 = vadd.f32 %v16301_v59, %v16472_v22 }
 0xb5e   :  { %19635 = vst [vmem:[#allocation150_spill] sm:$0xff] %v16666_v37  ;;  %19636 = vst [vmem:[#allocation153_spill] sm:$0xff] %v16670_v9  ;;  %v16748_v4 = vadd.f32 %v16301_v59, %v16480_v26  ;;  %v16752_v60 = vadd.f32 %v16301_v59, %v16484_v39  ;;  %v16756_v38 = vadd.f32 %v16301_v59, %v16488_v13  ;;  %v19688_v9 = vld [vmem:[#allocation48_spill] sm:$0xff] }
 0xb5f   :  { %19637 = vst [vmem:[#allocation156_spill] sm:$0xff] %v16676_v8  ;;  %19638 = vst [vmem:[#allocation159_spill] sm:$0xff] %v16680_v31  ;;  %v16760_v22 = vadd.f32 %v16301_v59, %v16492_v14  ;;  %v16768_v26 = vadd.f32 %v16301_v59, %v16500_v16 }
 0xb60   :  { %19639 = vst [vmem:[#allocation162_spill] sm:$0xff] %v16684_v19  ;;  %19640 = vst [vmem:[#allocation164_spill] sm:$0xff] %v16688_v18  ;;  %v19687_v19 = vld [vmem:[#allocation135_spill] sm:$0xff] }
 0xb61   :  { %19641 = vst [vmem:[#allocation168_spill] sm:$0xff] %v16692_v27  ;;  %19642 = vst [vmem:[#allocation171_spill] sm:$0xff] %v16696_v47 }
 0xb62   :  { %19643 = vst [vmem:[#allocation174_spill] sm:$0xff] %v16700_v30  ;;  %19644 = vst [vmem:[#allocation177_spill] sm:$0xff] %v16704_v35  ;;  %v16722_v30 = vpop.f32.mrb[200].mxu1  ;;  %v19685_v35 = vld [vmem:[#allocation23_spill] sm:$0xff] }
 0xb63   :  { %19645 = vst [vmem:[#allocation180_spill] sm:$0xff] %v16708_v3  ;;  %19646 = vst [vmem:[#allocation183_spill] sm:$0xff] %v16712_v52  ;;  %v16740_v36 = vpop.f32.mrb[201].mxu1 }
 0xb64   :  { %19647 = vst [vmem:[#allocation186_spill] sm:$0xff] %v16716_v41  ;;  %19648 = vst [vmem:[#allocation189_spill] sm:$0xff] %v16720_v46  ;;  %v16744_v46 = vadd.f32 %v16301_v59, %v16476_v10 }
 0xb65   :  { %19649 = vst [vmem:[#allocation191_spill] sm:$0xff] %v16726_v0  ;;  %19650 = vst [vmem:[#allocation193_spill] sm:$0xff] %v16730_v25  ;;  %v19683_v25 = vld [vmem:[#allocation88_spill] sm:$0xff] }
 0xb66   :  { %19651 = vst [vmem:[#allocation195_spill] sm:$0xff] %v16734_v11  ;;  %19652 = vst [vmem:[#allocation197_spill] sm:$0xff] %v16738_v61  ;;  %v19658_v61 = vld [vmem:[#allocation47_spill] sm:$0xff] }
 0xb67   :  { %19653 = vst [vmem:[#allocation199_spill] sm:$0xff] %v16744_v46  ;;  %19654 = vst [vmem:[#allocation201_spill] sm:$0xff] %v16748_v4  ;;  %v16764_v10 = vadd.f32 %v16301_v59, %v19658_v61  ;;  %v19661_v4 = vld [vmem:[#allocation50_spill] sm:$0xff]  ;;  %v19682_v46 = vld [vmem:[#allocation91_spill] sm:$0xff] }
 0xb68   :  { %19655 = vst [vmem:[#allocation120_spill] sm:$0xff] %v16752_v60  ;;  %19656 = vst [vmem:[#allocation121_spill] sm:$0xff] %v16756_v38  ;;  %v16772_v39 = vadd.f32 %v16301_v59, %v19661_v4  ;;  %v19663_v60 = vld [vmem:[#allocation41_spill] sm:$0xff]  ;;  %v19665_v38 = vld [vmem:[#allocation44_spill] sm:$0xff] }
 0xb69   :  { %19657 = vst [vmem:[#allocation123_spill] sm:$0xff] %v16760_v22  ;;  %19659 = vst [vmem:[#allocation15_spill] sm:$0xff] %v16764_v10  ;;  %v16776_v13 = vadd.f32 %v16301_v59, %v19663_v60  ;;  %v16780_v14 = vadd.f32 %v16301_v59, %v19665_v38  ;;  %v19667_v22 = vld [vmem:[#allocation43_spill] sm:$0xff]  ;;  %v19669_v10 = vld [vmem:[#allocation56_spill] sm:$0xff]  ;;  %v16798_v60 = vadd.f32 %v16301_v59, %v16530_v2 }
 0xb6a   :  { %19660 = vst [vmem:[#allocation124_spill] sm:$0xff] %v16768_v26  ;;  %19662 = vst [vmem:[#allocation126_spill] sm:$0xff] %v16772_v39  ;;  %v16784_v61 = vadd.f32 %v16301_v59, %v19667_v22  ;;  %v16788_v16 = vadd.f32 %v16301_v59, %v19669_v10  ;;  %v16790_v26 = vpop.f32.mrb[202].mxu1  ;;  %v19671_v4 = vld [vmem:[#allocation55_spill] sm:$0xff]  ;;  %v16802_v38 = vadd.f32 %v16301_v59, %v16534_v43  ;;  %v19677_v2 = vld [vmem:[#allocation78_spill] sm:$0xff] }
 0xb6b   :  { %19664 = vst [vmem:[#allocation86_spill] sm:$0xff] %v16776_v13  ;;  %19666 = vst [vmem:[#allocation127_spill] sm:$0xff] %v16780_v14  ;;  %v16794_v39 = vadd.f32 %v16301_v59, %v19671_v4  ;;  %v16806_v22 = vadd.f32 %v16301_v59, %v16540_v48  ;;  %v16808_v10 = vpop.f32.mrb[203].mxu1  ;;  %v16816_v4 = vadd.f32 %v16301_v59, %v16548_v44 }
 0xb6c   :  { %19668 = vst [vmem:[#allocation20_spill] sm:$0xff] %v16784_v61  ;;  %19670 = vst [vmem:[#allocation129_spill] sm:$0xff] %v16788_v16  ;;  %v16812_v16 = vadd.f32 %v16301_v59, %v16544_v1  ;;  %v7404_v43 = vmul.f32 %v19677_v2, %v19677_v2  ;;  %v19680_v61 = vld [vmem:[#allocation98_spill] sm:$0xff]  ;;  %v16825_v13 = vpop.f32.mrb[204].mxu1  ;;  %v7406_v59 = vmul.f32 %v19682_v46, %v19682_v46 }
 0xb6d   :  { %19672 = vst [vmem:[#allocation130_spill] sm:$0xff] %v16794_v39  ;;  %19673 = vst [vmem:[#allocation132_spill] sm:$0xff] %v16798_v60  ;;  %v19678_v60 = vld [vmem:[#allocation112_spill] sm:$0xff]  ;;  %v16831_v44 = vpop.f32.mrb[205].mxu1 }
 0xb6e   :  { %19674 = vst [vmem:[#allocation133_spill] sm:$0xff] %v16802_v38  ;;  %19675 = vst [vmem:[#allocation38_spill] sm:$0xff] %v16806_v22  ;;  %v7334_v39 = vadd.f32 %v19678_v60, %v19677_v2  ;;  %v19679_v38 = vld [vmem:[#allocation12_spill] sm:$0xff]  ;;  %v19681_v22 = vld [vmem:[#allocation101_spill] sm:$0xff]  ;;  %v16835_v41 = vpop.f32.mrb[206].mxu1 }
 0xb6f   :  { %19676 = vst [vmem:[#allocation59_spill] sm:$0xff] %v16812_v16  ;;  %v7466_v48 = vadd.f32 %v19680_v61, %v19679_v38  ;;  %v7405_v1 = vmul.f32 %v19681_v22, %v19681_v22  ;;  %v19684_v38 = vld [vmem:[#allocation54_spill] sm:$0xff] }
 0xb70   :  { %v7335_v14 = vadd.f32 %v19681_v22, %v7334_v39  ;;  %v7407_v39 = vmul.f32 %v19683_v25, %v19683_v25  ;;  %v7408_v52 = vmul.f32 %v19684_v38, %v19684_v38 }
 0xb71   :  { %v7467_v16 = vadd.f32 %v7466_v48, %v7404_v43  ;;  %v16841_v43 = vpop.f32.mrb[207].mxu1 }
 0xb72   :  { %v7336_v60 = vadd.f32 %v7335_v14, %v19682_v46  ;;  %v16845_v14 = vpop.f32.mrb[208].mxu1 }
 0xb73   :  { %v7468_v11 = vadd.f32 %v7467_v16, %v7405_v1  ;;  %v7409_v16 = vmul.f32 %v19685_v35, %v19685_v35 }
 0xb74   :  { %v7337_v0 = vadd.f32 %v19683_v25, %v7336_v60  ;;  %v19686_v60 = vld [vmem:[#allocation136_spill] sm:$0xff] }
 0xb75   :  { %v7469_v61 = vadd.f32 %v7468_v11, %v7406_v59  ;;  %v7410_v27 = vmul.f32 %v19686_v60, %v19686_v60  ;;  %v16851_v11 = vpop.f32.mrb[209].mxu1 }
 0xb76   :  { %v7338_v48 = vadd.f32 %v7337_v0, %v19684_v38  ;;  %v16855_v0 = vpop.f32.mrb[210].mxu1 }
 0xb77   :  { %v7470_v3 = vadd.f32 %v7469_v61, %v7407_v39  ;;  %v7411_v39 = vmul.f32 %v19687_v19, %v19687_v19 }
 0xb78   :  { %v7339_v47 = vadd.f32 %v19685_v35, %v7338_v48  ;;  %v7412_v48 = vmul.f32 %v16536_v28, %v16536_v28 }
 0xb79   :  { %v7471_v1 = vadd.f32 %v7470_v3, %v7408_v52  ;;  %v16861_v3 = vpop.f32.mrb[211].mxu1 }
 0xb7a   :  { %v7340_v59 = vadd.f32 %v7339_v47, %v19686_v60  ;;  %v16865_v47 = vpop.f32.mrb[212].mxu1 }
 0xb7b   :  { %v7472_v18 = vadd.f32 %v7471_v1, %v7409_v16  ;;  %v7413_v16 = vmul.f32 %v19688_v9, %v19688_v9 }
 0xb7c   :  { %v7341_v31 = vadd.f32 %v19687_v19, %v7340_v59  ;;  %v7414_v59 = vmul.f32 %v16604_v17, %v16604_v17 }
 0xb7d   :  { %v7473_v61 = vadd.f32 %v7472_v18, %v7410_v27  ;;  %v16871_v18 = vpop.f32.mrb[213].mxu1 }
 0xb7e   :  { %v7342_v52 = vadd.f32 %v7341_v31, %v16536_v28  ;;  %v16875_v31 = vpop.f32.mrb[214].mxu1 }
 0xb7f   :  { %v7474_v8 = vadd.f32 %v7473_v61, %v7411_v39  ;;  %v7415_v39 = vmul.f32 %v16586_v6, %v16586_v6 }
 0xb80   :  { %v7343_v37 = vadd.f32 %v19688_v9, %v7342_v52  ;;  %v7416_v52 = vmul.f32 %v16672_v51, %v16672_v51 }
 0xb81   :  { %v7475_v1 = vadd.f32 %v7474_v8, %v7412_v48  ;;  %v16881_v8 = vpop.f32.mrb[215].mxu1 }
 0xb82   :  { %v7344_v27 = vadd.f32 %v7343_v37, %v16604_v17  ;;  %v16885_v37 = vpop.f32.mrb[216].mxu1 }
 0xb83   :  { %v7476_v54 = vadd.f32 %v7475_v1, %v7413_v16  ;;  %v7417_v16 = vmul.f32 %v16654_v55, %v16654_v55  ;;  %v7435_v21 = vmul.f32 %v16885_v37, %v16885_v37 }
 0xb84   :  { %v7345_v56 = vadd.f32 %v16586_v6, %v7344_v27  ;;  %v7418_v27 = vmul.f32 %v16740_v36, %v16740_v36 }
 0xb85   :  { %v7477_v61 = vadd.f32 %v7476_v54, %v7414_v59  ;;  %v16891_v54 = vpop.f32.mrb[217].mxu1 }
 0xb86   :  { %v7346_v48 = vadd.f32 %v7345_v56, %v16672_v51  ;;  %v16895_v56 = vpop.f32.mrb[218].mxu1 }
 0xb87   :  { %v7478_v57 = vadd.f32 %v7477_v61, %v7415_v39  ;;  %v7419_v39 = vmul.f32 %v16722_v30, %v16722_v30 }
 0xb88   :  { %v7347_v7 = vadd.f32 %v16654_v55, %v7346_v48  ;;  %v7420_v48 = vmul.f32 %v16808_v10, %v16808_v10 }
 0xb89   :  { %v7479_v1 = vadd.f32 %v7478_v57, %v7416_v52  ;;  %v16901_v57 = vpop.f32.mrb[219].mxu1 }
 0xb8a   :  { %v7348_v59 = vadd.f32 %v7347_v7, %v16740_v36  ;;  %v16905_v7 = vpop.f32.mrb[220].mxu1 }
 0xb8b   :  { %v7480_v23 = vadd.f32 %v7479_v1, %v7417_v16  ;;  %v7421_v16 = vmul.f32 %v16790_v26, %v16790_v26 }
 0xb8c   :  { %v7349_v32 = vadd.f32 %v16722_v30, %v7348_v59  ;;  %v7422_v59 = vmul.f32 %v16831_v44, %v16831_v44 }
 0xb8d   :  { %v7481_v61 = vadd.f32 %v7480_v23, %v7418_v27  ;;  %v16911_v23 = vpop.f32.mrb[221].mxu1 }
 0xb8e   :  { %v7350_v52 = vadd.f32 %v7349_v32, %v16808_v10  ;;  %v16915_v32 = vpop.f32.mrb[222].mxu1 }
 0xb8f   :  { %v7482_v34 = vadd.f32 %v7481_v61, %v7419_v39  ;;  %v7423_v39 = vmul.f32 %v16825_v13, %v16825_v13 }
 0xb90   :  { %v7351_v62 = vadd.f32 %v16790_v26, %v7350_v52  ;;  %v7424_v52 = vmul.f32 %v16841_v43, %v16841_v43 }
 0xb91   :  { %v7483_v1 = vadd.f32 %v7482_v34, %v7420_v48  ;;  %v16921_v34 = vpop.f32.mrb[223].mxu1 }
 0xb92   :  { %v7352_v27 = vadd.f32 %v7351_v62, %v16831_v44  ;;  %v16925_v62 = vpop.f32.mrb[224].mxu1 }
 0xb93   :  { %v7484_v50 = vadd.f32 %v7483_v1, %v7421_v16  ;;  %19689 = vst [vmem:[#allocation40_spill] sm:$0xff] %v16925_v62  ;;  %v7425_v16 = vmul.f32 %v16835_v41, %v16835_v41 }
 0xb94   :  { %v7353_v5 = vadd.f32 %v16825_v13, %v7352_v27  ;;  %v7426_v27 = vmul.f32 %v16851_v11, %v16851_v11 }
 0xb95   :  { %v7485_v61 = vadd.f32 %v7484_v50, %v7422_v59  ;;  %v16931_v50 = vpop.f32.mrb[225].mxu1 }
 0xb96   :  { %v7354_v48 = vadd.f32 %v7353_v5, %v16841_v43  ;;  %19690 = vst [vmem:[#allocation60_spill] sm:$0xff] %v16931_v50  ;;  %v16935_v5 = vpop.f32.mrb[226].mxu1 }
 0xb97   :  { %v7486_v24 = vadd.f32 %v7485_v61, %v7423_v39  ;;  %19691 = vst [vmem:[#allocation37_spill] sm:$0xff] %v16935_v5  ;;  %v7427_v39 = vmul.f32 %v16845_v14, %v16845_v14 }
 0xb98   :  { %v7355_v45 = vadd.f32 %v16835_v41, %v7354_v48  ;;  %v7428_v48 = vmul.f32 %v16861_v3, %v16861_v3 }
 0xb99   :  { %v7487_v1 = vadd.f32 %v7486_v24, %v7424_v52  ;;  %v16941_v24 = vpop.f32.mrb[227].mxu1 }
 0xb9a   :  { %v7356_v59 = vadd.f32 %v7355_v45, %v16851_v11  ;;  %19692 = vst [vmem:[#allocation34_spill] sm:$0xff] %v16941_v24  ;;  %v16945_v45 = vpop.f32.mrb[228].mxu1 }
 0xb9b   :  { %v7488_v12 = vadd.f32 %v7487_v1, %v7425_v16  ;;  %19693 = vst [vmem:[#allocation63_spill] sm:$0xff] %v16945_v45  ;;  %v7429_v16 = vmul.f32 %v16855_v0, %v16855_v0 }
 0xb9c   :  { %v7357_v58 = vadd.f32 %v16845_v14, %v7356_v59  ;;  %v7430_v59 = vmul.f32 %v16871_v18, %v16871_v18 }
 0xb9d   :  { %v7489_v61 = vadd.f32 %v7488_v12, %v7426_v27  ;;  %v16951_v12 = vpop.f32.mrb[229].mxu1 }
 0xb9e   :  { %v7358_v52 = vadd.f32 %v7357_v58, %v16861_v3  ;;  %19694 = vst [vmem:[#allocation80_spill] sm:$0xff] %v16951_v12  ;;  %v16955_v58 = vpop.f32.mrb[230].mxu1 }
 0xb9f   :  { %v7490_v53 = vadd.f32 %v7489_v61, %v7427_v39  ;;  %19695 = vst [vmem:[#allocation58_spill] sm:$0xff] %v16955_v58  ;;  %v7431_v39 = vmul.f32 %v16865_v47, %v16865_v47 }
 0xba0   :  { %v7359_v20 = vadd.f32 %v16855_v0, %v7358_v52  ;;  %v7432_v52 = vmul.f32 %v16881_v8, %v16881_v8 }
 0xba1   :  { %v7491_v1 = vadd.f32 %v7490_v53, %v7428_v48  ;;  %v16961_v53 = vpop.f32.mrb[231].mxu1 }
 0xba2   :  { %v7360_v27 = vadd.f32 %v7359_v20, %v16871_v18  ;;  %v7433_v20 = vmul.f32 %v16875_v31, %v16875_v31 }
 0xba3   :  { %v7492_v33 = vadd.f32 %v7491_v1, %v7429_v16  ;;  %v7434_v1 = vmul.f32 %v16891_v54, %v16891_v54 }
 0xba4   :  { %v7361_v49 = vadd.f32 %v16865_v47, %v7360_v27 }
 0xba5   :  { %v7493_v61 = vadd.f32 %v7492_v33, %v7430_v59 }
 0xba6   :  { %v7362_v48 = vadd.f32 %v7361_v49, %v16881_v8  ;;  %v7436_v49 = vmul.f32 %v16901_v57, %v16901_v57 }
 0xba7   :  { %v7494_v15 = vadd.f32 %v7493_v61, %v7431_v39 }
 0xba8   :  { %v7363_v40 = vadd.f32 %v16875_v31, %v7362_v48 }
 0xba9   :  { %v7495_v16 = vadd.f32 %v7494_v15, %v7432_v52  ;;  %v7437_v52 = vmul.f32 %v16895_v56, %v16895_v56 }
 0xbaa   :  { %v7364_v27 = vadd.f32 %v7363_v40, %v16891_v54  ;;  %v7438_v40 = vmul.f32 %v16911_v23, %v16911_v23 }
 0xbab   :  { %v7496_v33 = vadd.f32 %v7495_v16, %v7433_v20 }
 0xbac   :  { %v7365_v59 = vadd.f32 %v16885_v37, %v7364_v27  ;;  %v7439_v27 = vmul.f32 %v16905_v7, %v16905_v7 }
 0xbad   :  { %v7497_v63 = vadd.f32 %v7496_v33, %v7434_v1 }
 0xbae   :  { %v7366_v39 = vadd.f32 %v7365_v59, %v16901_v57 }
 0xbaf   :  { %v7498_v61 = vadd.f32 %v7497_v63, %v7435_v21  ;;  %v7440_v63 = vmul.f32 %v16921_v34, %v16921_v34 }
 0xbb0   :  { %v7367_v15 = vadd.f32 %v16895_v56, %v7366_v39  ;;  %v7441_v39 = vmul.f32 %v16915_v32, %v16915_v32 }
 0xbb1   :  { %v7499_v48 = vadd.f32 %v7498_v61, %v7436_v49 }
 0xbb2   :  { %v7368_v20 = vadd.f32 %v7367_v15, %v16911_v23  ;;  %v7442_v15 = vmul.f32 %v16931_v50, %v16931_v50 }
 0xbb3   :  { %v7500_v16 = vadd.f32 %v7499_v48, %v7437_v52 }
 0xbb4   :  { %v7369_v1 = vadd.f32 %v16905_v7, %v7368_v20  ;;  %v7443_v20 = vmul.f32 %v16925_v62, %v16925_v62 }
 0xbb5   :  { %v7501_v33 = vadd.f32 %v7500_v16, %v7438_v40 }
 0xbb6   :  { %v7370_v21 = vadd.f32 %v7369_v1, %v16921_v34  ;;  %v7444_v1 = vmul.f32 %v16941_v24, %v16941_v24 }
 0xbb7   :  { %v7502_v59 = vadd.f32 %v7501_v33, %v7439_v27 }
 0xbb8   :  { %v7371_v49 = vadd.f32 %v16915_v32, %v7370_v21  ;;  %v7445_v21 = vmul.f32 %v16935_v5, %v16935_v5 }
 0xbb9   :  { %v7503_v61 = vadd.f32 %v7502_v59, %v7440_v63 }
 0xbba   :  { %v7372_v52 = vadd.f32 %v7371_v49, %v16931_v50  ;;  %v7446_v49 = vmul.f32 %v16951_v12, %v16951_v12 }
 0xbbb   :  { %v7504_v48 = vadd.f32 %v7503_v61, %v7441_v39 }
 0xbbc   :  { %v7373_v40 = vadd.f32 %v16925_v62, %v7372_v52  ;;  %v7447_v52 = vmul.f32 %v16945_v45, %v16945_v45 }
 0xbbd   :  { %v7505_v16 = vadd.f32 %v7504_v48, %v7442_v15 }
 0xbbe   :  { %v7374_v27 = vadd.f32 %v7373_v40, %v16941_v24  ;;  %v7448_v40 = vmul.f32 %v16961_v53, %v16961_v53 }
 0xbbf   :  { %v7506_v33 = vadd.f32 %v7505_v16, %v7443_v20 }
 0xbc0   :  { %v7375_v63 = vadd.f32 %v16935_v5, %v7374_v27  ;;  %v7449_v27 = vmul.f32 %v16955_v58, %v16955_v58 }
 0xbc1   :  { %v7507_v59 = vadd.f32 %v7506_v33, %v7444_v1 }
 0xbc2   :  { %v7376_v39 = vadd.f32 %v7375_v63, %v16951_v12 }
 0xbc3   :  { %v7508_v61 = vadd.f32 %v7507_v59, %v7445_v21 }
 0xbc4   :  { %v7377_v15 = vadd.f32 %v16945_v45, %v7376_v39 }
 0xbc5   :  { %v7509_v48 = vadd.f32 %v7508_v61, %v7446_v49 }
 0xbc6   :  { %v7378_v20 = vadd.f32 %v7377_v15, %v16961_v53 }
 0xbc7   :  { %v7510_v16 = vadd.f32 %v7509_v48, %v7447_v52 }
 0xbc8   :  { %v7379_v1 = vadd.f32 %v16955_v58, %v7378_v20 }
 0xbc9   :  { %v7511_v33 = vadd.f32 %v7510_v16, %v7448_v40  ;;  %v7315_v40 = vld [vmem:[%s17874_s9] sm:$0x1]  ;;  %s10027_s9 = smov [#allocation8]  }
 0xbca   :  { %v7380_v63 = vrot.slane %v7379_v1, 4 }
 0xbcb   :  { %v7512_v21 = vadd.f32 %v7511_v33, %v7449_v27  ;;  %v19699_v33 = vld [vmem:[#allocation107_spill] sm:$0xff] }
 0xbcc   :  { %v7381_v59 = vadd.f32 %v7380_v63, %v7379_v1 }
 0xbcd   :  { %v7513_v39 = vrot.slane %v7512_v21, 4 }
 0xbce   :  { %v7382_v42 = vrot.slane %v7381_v59, 2 }
 0xbcf   :  { %v7514_v29 = vadd.f32 %v7513_v39, %v7512_v21  ;;  %v19700_v21 = vld [vmem:[#allocation105_spill] sm:$0xff]  ;;  %v19701_v39 = vld [vmem:[#allocation114_spill] sm:$0xff] }
 0xbd0   :  { %v7383_v45 = vadd.f32 %v7382_v42, %v7381_v59 }
 0xbd1   :  { %v7515_v49 = vrot.slane %v7514_v29, 2 }
 0xbd2   :  { %v7384_v61 = vrot.slane %v7383_v45, 1 }
 0xbd3   :  { %v7516_v12 = vadd.f32 %v7515_v49, %v7514_v29  ;;  %v7316_v29 = vld [vmem:[%s17875_s10] sm:$0x1]  ;;  %s7866_s10 = sshll.u32 %s10027_s9, 4  ;;  %s7867_s10 = int_to_ptr.vmem [resolvable:$true] %s7866_s10 }
 0xbd4   :  { %v7385_v5 = vadd.f32 %v7384_v61, %v7383_v45  ;;  %v19696_v45 = vld [vmem:[#allocation16_spill] sm:$0xff]  ;;  %s9993_s25 = scalar_lea.vmem %s7867_s10, 8192  ;;  %p9998_p3 = scmp.lt.s32.totalorder %s7867_s10, %s7867_s10 }
 0xbd5   :  { %v7517_v24 = vrot.slane %v7516_v12, 1  ;;  %p9994_p2 = scmp.ne.s32.totalorder %s7867_s10, %s9993_s25  ;;  %p9999_p4 = scmp.lt.s32.totalorder %s9993_s25, %s9993_s25 }
 0xbd6   :  { %v7519_v15 = vmul.f32 0.001953125, %v7385_v5 }
 0xbd7   :  { %v7518_v52 = vadd.f32 %v7517_v24, %v7516_v12  ;;  %p10000_p5 = por %p9999_p4, %p9998_p3 }
 0xbd8   :  { %v7521_v48 = vmul.f32 %v7519_v15, %v7519_v15 }
 0xbd9   :  { %v7520_v20 = vmul.f32 0.001953125, %v7518_v52  ;;  %v19703_v52 = vld [vmem:[#allocation119_spill] sm:$0xff]  ;;  %p10001_p6 = pnand %p10000_p5, %p9994_p2 }
 0xbdb   :  { %v7522_v62 = vsub.f32 %v7520_v20, %v7521_v48  ;;  %v19704_v20 = vld [vmem:[#allocation116_spill] sm:$0xff] }
 0xbdd   :  { %v7523_v50 = vmax.f32 %v7522_v62, 0.0 }
 0xbdf   :  { %v7524_v58 = vadd.f32 1e-05, %v7523_v50  ;;  %v19697_v50 = vld [vmem:[#allocation102_spill] sm:$0xff] }
 0xbe1   :  { %9778 = vrsqrt.f32 %v7524_v58  ;;  %v19698_v58 = vld [vmem:[#allocation100_spill] sm:$0xff] }
 0xbeb   :  { %v9779_v16 = vpop.eup %9778 }
 0xbec   :  { %v7526_v1 = vmul.f32 %v9779_v16, %v7315_v40  ;;  %v19705_v16 = vld [vmem:[#allocation125_spill] sm:$0xff] }
 0xbee   :  { %v7527_v42 = vmul.f32 %v7526_v1, %v7519_v15  ;;  %v17022_v5 = vrot.slane %v7526_v1, %v19696_v45 }
 0xbf0   :  { %v7528_v24 = vsub.f32 %v7316_v29, %v7527_v42  ;;  %v7597_v62 = vmul.f32 %v17022_v5, %v16961_v53  ;;  %v17028_v12 = vmul.f32 %v17022_v5, %v19697_v50  ;;  %v17032_v27 = vmul.f32 %v19698_v58, %v17022_v5  ;;  %v19702_v53 = vld [vmem:[#allocation110_spill] sm:$0xff]  ;;  %v19707_v50 = vld [vmem:[#allocation131_spill] sm:$0xff] }
 0xbf1   :  { %v17036_v63 = vmul.f32 %v17022_v5, %v19699_v33  ;;  %v17040_v59 = vmul.f32 %v19700_v21, %v17022_v5  ;;  %v17044_v49 = vmul.f32 %v17022_v5, %v19701_v39  ;;  %v17048_v61 = vmul.f32 %v19702_v53, %v17022_v5  ;;  %v19706_v29 = vld [vmem:[#allocation122_spill] sm:$0xff]  ;;  %v19710_v33 = vld [vmem:[#allocation137_spill] sm:$0xff] }
 0xbf2   :  { %v17051_v15 = vrot.slane %v7528_v24, %v19696_v45  ;;  %v17055_v48 = vmul.f32 %v17022_v5, %v19703_v52  ;;  %v17059_v40 = vmul.f32 %v19704_v20, %v17022_v5  ;;  %v17063_v1 = vmul.f32 %v17022_v5, %v19705_v16  ;;  %v19708_v24 = vld [vmem:[#allocation128_spill] sm:$0xff]  ;;  %v19712_v53 = vld [vmem:[#allocation134_spill] sm:$0xff] }
 0xbf3   :  { %v17067_v42 = vmul.f32 %v19706_v29, %v17022_v5  ;;  %v17071_v45 = vmul.f32 %v17022_v5, %v19707_v50  ;;  %v17075_v58 = vmul.f32 %v19708_v24, %v17022_v5  ;;  %v17079_v21 = vmul.f32 %v17022_v5, %v19710_v33  ;;  %v19713_v20 = vld [vmem:[#allocation64_spill] sm:$0xff]  ;;  %v19714_v29 = vld [vmem:[#allocation138_spill] sm:$0xff]  ;;  %v19715_v24 = vld [vmem:[#allocation79_spill] sm:$0xff] }
 0xbf4   :  { %v7667_v39 = vadd.f32 %v17051_v15, %v7597_v62  ;;  %v17084_v52 = vmul.f32 %v19712_v53, %v17022_v5  ;;  %v17088_v16 = vmul.f32 %v17022_v5, %v19713_v20  ;;  %v17092_v50 = vmul.f32 %v19714_v29, %v17022_v5  ;;  %v19716_v33 = vld [vmem:[#allocation71_spill] sm:$0xff] }
 0xbf5   :  { %19709 = vst [vmem:[#allocation87_spill] sm:$0xff] %v17075_v58  ;;  %19711 = vst [vmem:[#allocation32_spill] sm:$0xff] %v17079_v21  ;;  %v17096_v58 = vmul.f32 %v17022_v5, %v19715_v24  ;;  %v17100_v21 = vmul.f32 %v19716_v33, %v17022_v5  ;;  %v17104_v62 = vmul.f32 %v17022_v5, %v19677_v2 }
 0xbf6   :  { %v17108_v53 = vmul.f32 %v19681_v22, %v17022_v5  ;;  %v7731_v20 = vadd.f32 %v7667_v39, %v16816_v4  ;;  %v17113_v29 = vmul.f32 %v17022_v5, %v19682_v46  ;;  %v17117_v24 = vmul.f32 %v19683_v25, %v17022_v5  ;;  %v19720_v39 = vld [vmem:[#allocation60_spill] sm:$0xff] }
 0xbf7   :  { %v17121_v33 = vmul.f32 %v17022_v5, %v19684_v38  ;;  %v17125_v2 = vmul.f32 %v19685_v35, %v17022_v5  ;;  %v17129_v22 = vmul.f32 %v17022_v5, %v19686_v60  ;;  %v17133_v46 = vmul.f32 %v19687_v19, %v17022_v5 }
 0xbf8   :  { %v17137_v25 = vmul.f32 %v17022_v5, %v16536_v28  ;;  %v7795_v4 = vmax.f32 %v7731_v20, 0.0  ;;  %v17141_v38 = vmul.f32 %v19688_v9, %v17022_v5  ;;  %v17145_v35 = vmul.f32 %v17022_v5, %v16604_v17  ;;  %v19722_v20 = vld [vmem:[#allocation40_spill] sm:$0xff] }
 0xbf9   :  { %v17149_v60 = vmul.f32 %v16586_v6, %v17022_v5  ;;  %v17153_v19 = vmul.f32 %v17022_v5, %v16672_v51  ;;  %v17157_v28 = vmul.f32 %v16654_v55, %v17022_v5  ;;  %v17161_v9 = vmul.f32 %v17022_v5, %v16740_v36 }
 0xbfa   :  { %v17165_v17 = vmul.f32 %v16722_v30, %v17022_v5  ;;  %7859 = vst [vmem:[#allocation8 + $0x1f0] sm:$0xff] %v7795_v4  ;;  %v17169_v6 = vmul.f32 %v17022_v5, %v16808_v10  ;;  %v17173_v51 = vmul.f32 %v16790_v26, %v17022_v5  ;;  %v17177_v55 = vmul.f32 %v17022_v5, %v16831_v44  ;;  %v19723_v4 = vld [vmem:[#allocation34_spill] sm:$0xff] }
 0xbfb   :  { %v17181_v36 = vmul.f32 %v16825_v13, %v17022_v5  ;;  %v17185_v30 = vmul.f32 %v17022_v5, %v16841_v43  ;;  %v17189_v10 = vmul.f32 %v16835_v41, %v17022_v5  ;;  %v17193_v26 = vmul.f32 %v17022_v5, %v16851_v11 }
 0xbfc   :  { %v17197_v44 = vmul.f32 %v16845_v14, %v17022_v5  ;;  %v17201_v13 = vmul.f32 %v17022_v5, %v16861_v3  ;;  %v17205_v43 = vmul.f32 %v16855_v0, %v17022_v5  ;;  %v17209_v41 = vmul.f32 %v17022_v5, %v16871_v18 }
 0xbfd   :  { %v17213_v11 = vmul.f32 %v16865_v47, %v17022_v5  ;;  %v17217_v14 = vmul.f32 %v17022_v5, %v16881_v8  ;;  %v17221_v3 = vmul.f32 %v16875_v31, %v17022_v5  ;;  %v17225_v0 = vmul.f32 %v17022_v5, %v16891_v54 }
 0xbfe   :  { %v17229_v18 = vmul.f32 %v16885_v37, %v17022_v5  ;;  %v17233_v47 = vmul.f32 %v17022_v5, %v16901_v57  ;;  %v17237_v8 = vmul.f32 %v16895_v56, %v17022_v5  ;;  %v17241_v31 = vmul.f32 %v17022_v5, %v16911_v23 }
 0xbff   :  { %v17245_v54 = vmul.f32 %v16905_v7, %v17022_v5  ;;  %v17249_v37 = vmul.f32 %v17022_v5, %v16921_v34  ;;  %v17253_v57 = vmul.f32 %v16915_v32, %v17022_v5  ;;  %v17257_v56 = vmul.f32 %v17022_v5, %v19720_v39 }
 0xc00   :  { %v17261_v23 = vmul.f32 %v19722_v20, %v17022_v5  ;;  %v17265_v7 = vmul.f32 %v17022_v5, %v19723_v4  ;;  %v17285_v4 = vadd.f32 %v17051_v15, %v17028_v12  ;;  %v17305_v12 = vadd.f32 %v17051_v15, %v17048_v61 }
 0xc01   :  { %19717 = vst [vmem:[#allocation139_spill] sm:$0xff] %v17245_v54  ;;  %19718 = vst [vmem:[#allocation52_spill] sm:$0xff] %v17249_v37  ;;  %v19724_v54 = vld [vmem:[#allocation37_spill] sm:$0xff]  ;;  %v19725_v37 = vld [vmem:[#allocation80_spill] sm:$0xff]  ;;  %v17325_v61 = vadd.f32 %v17051_v15, %v17071_v45  ;;  %v17345_v45 = vadd.f32 %v17051_v15, %v17092_v50  ;;  %v17365_v50 = vadd.f32 %v17051_v15, %v17113_v29 }
 0xc02   :  { %19719 = vst [vmem:[#allocation67_spill] sm:$0xff] %v17253_v57  ;;  %19721 = vst [vmem:[#allocation62_spill] sm:$0xff] %v17257_v56  ;;  %v17269_v34 = vmul.f32 %v19724_v54, %v17022_v5  ;;  %v17273_v32 = vmul.f32 %v17022_v5, %v19725_v37  ;;  %v19726_v57 = vld [vmem:[#allocation63_spill] sm:$0xff]  ;;  %v19727_v56 = vld [vmem:[#allocation58_spill] sm:$0xff]  ;;  %v17289_v54 = vadd.f32 %v17051_v15, %v17032_v27 }
 0xc03   :  { %v17277_v39 = vmul.f32 %v19726_v57, %v17022_v5  ;;  %v17281_v20 = vmul.f32 %v19727_v56, %v17022_v5  ;;  %v17293_v37 = vadd.f32 %v17051_v15, %v17036_v63  ;;  %v17297_v57 = vadd.f32 %v17051_v15, %v17040_v59  ;;  %v19729_v56 = vld [vmem:[#allocation87_spill] sm:$0xff] }
 0xc04   :  { %v17301_v5 = vadd.f32 %v17051_v15, %v17044_v49  ;;  %v17309_v27 = vadd.f32 %v17051_v15, %v17055_v48  ;;  %v17313_v63 = vadd.f32 %v17051_v15, %v17059_v40  ;;  %v17317_v59 = vadd.f32 %v17051_v15, %v17063_v1 }
 0xc05   :  { %v17321_v49 = vadd.f32 %v17051_v15, %v17067_v42  ;;  %v17329_v48 = vadd.f32 %v17051_v15, %v19729_v56  ;;  %v17337_v1 = vadd.f32 %v17051_v15, %v17084_v52  ;;  %v17341_v42 = vadd.f32 %v17051_v15, %v17088_v16 }
 0xc06   :  { %19728 = vst [vmem:[#allocation82_spill] sm:$0xff] %v17309_v27  ;;  %v19730_v27 = vld [vmem:[#allocation32_spill] sm:$0xff]  ;;  %v17349_v56 = vadd.f32 %v17051_v15, %v17096_v58  ;;  %v17357_v52 = vadd.f32 %v17051_v15, %v17104_v62  ;;  %v17361_v16 = vadd.f32 %v17051_v15, %v17108_v53  ;;  %v17369_v58 = vadd.f32 %v17051_v15, %v17117_v24 }
 0xc07   :  { %v17333_v40 = vadd.f32 %v17051_v15, %v19730_v27  ;;  %v17353_v27 = vadd.f32 %v17051_v15, %v17100_v21  ;;  %v17373_v21 = vadd.f32 %v17051_v15, %v17121_v33  ;;  %v17377_v62 = vadd.f32 %v17051_v15, %v17125_v2 }
 0xc08   :  { %v17381_v53 = vadd.f32 %v17051_v15, %v17129_v22  ;;  %v17385_v29 = vadd.f32 %v17051_v15, %v17133_v46  ;;  %v17389_v24 = vadd.f32 %v17051_v15, %v17137_v25  ;;  %v17393_v33 = vadd.f32 %v17051_v15, %v17141_v38 }
 0xc09   :  { %v17397_v2 = vadd.f32 %v17051_v15, %v17145_v35  ;;  %v17401_v22 = vadd.f32 %v17051_v15, %v17149_v60  ;;  %v17405_v46 = vadd.f32 %v17051_v15, %v17153_v19  ;;  %v17409_v25 = vadd.f32 %v17051_v15, %v17157_v28 }
 0xc0a   :  { %v17413_v38 = vadd.f32 %v17051_v15, %v17161_v9  ;;  %v17417_v35 = vadd.f32 %v17051_v15, %v17165_v17  ;;  %v17421_v60 = vadd.f32 %v17051_v15, %v17169_v6  ;;  %v17425_v19 = vadd.f32 %v17051_v15, %v17173_v51 }
 0xc0b   :  { %v17429_v28 = vadd.f32 %v17051_v15, %v17177_v55  ;;  %v17433_v9 = vadd.f32 %v17051_v15, %v17181_v36  ;;  %v17437_v17 = vadd.f32 %v17051_v15, %v17185_v30  ;;  %v17441_v6 = vadd.f32 %v17051_v15, %v17189_v10 }
 0xc0c   :  { %v17445_v51 = vadd.f32 %v17051_v15, %v17193_v26  ;;  %v17449_v55 = vadd.f32 %v17051_v15, %v17197_v44  ;;  %v17453_v36 = vadd.f32 %v17051_v15, %v17201_v13  ;;  %v17457_v30 = vadd.f32 %v17051_v15, %v17205_v43 }
 0xc0d   :  { %v17461_v10 = vadd.f32 %v17051_v15, %v17209_v41  ;;  %v17465_v26 = vadd.f32 %v17051_v15, %v17213_v11  ;;  %v17469_v44 = vadd.f32 %v17051_v15, %v17217_v14  ;;  %v17473_v13 = vadd.f32 %v17051_v15, %v17221_v3 }
 0xc0e   :  { %v17477_v43 = vadd.f32 %v17051_v15, %v17225_v0  ;;  %v17481_v41 = vadd.f32 %v17051_v15, %v17229_v18  ;;  %v17485_v11 = vadd.f32 %v17051_v15, %v17233_v47  ;;  %v17489_v14 = vadd.f32 %v17051_v15, %v17237_v8 }
 0xc0f   :  { %19731 = vst [vmem:[#allocation61_spill] sm:$0xff] %v17473_v13  ;;  %v17493_v3 = vadd.f32 %v17051_v15, %v17241_v31  ;;  %v19735_v13 = vld [vmem:[#allocation139_spill] sm:$0xff]  ;;  %v17513_v31 = vadd.f32 %v17051_v15, %v17261_v23  ;;  %v17533_v23 = vadd.f32 %v17051_v15, %v17281_v20  ;;  %v19750_v20 = vld [vmem:[#allocation104_spill] sm:$0xff] }
 0xc10   :  { %19732 = vst [vmem:[#allocation75_spill] sm:$0xff] %v17477_v43  ;;  %19733 = vst [vmem:[#allocation39_spill] sm:$0xff] %v17481_v41  ;;  %v17497_v0 = vadd.f32 %v17051_v15, %v19735_v13  ;;  %v19736_v43 = vld [vmem:[#allocation52_spill] sm:$0xff]  ;;  %v19737_v41 = vld [vmem:[#allocation67_spill] sm:$0xff]  ;;  %v17517_v13 = vadd.f32 %v17051_v15, %v17265_v7 }
 0xc11   :  { %19734 = vst [vmem:[#allocation36_spill] sm:$0xff] %v17485_v11  ;;  %v17501_v18 = vadd.f32 %v17051_v15, %v19736_v43  ;;  %v17505_v47 = vadd.f32 %v17051_v15, %v19737_v41  ;;  %v19738_v11 = vld [vmem:[#allocation62_spill] sm:$0xff]  ;;  %19739 = vst [vmem:[#allocation140_spill] sm:$0xff] %v17513_v31  ;;  %v17521_v43 = vadd.f32 %v17051_v15, %v17269_v34  ;;  %v19744_v31 = vld [vmem:[#allocation57_spill] sm:$0xff] }
 0xc12   :  { %v17509_v8 = vadd.f32 %v17051_v15, %v19738_v11  ;;  %19740 = vst [vmem:[#allocation42_spill] sm:$0xff] %v17517_v13  ;;  %v17525_v41 = vadd.f32 %v17051_v15, %v17273_v32  ;;  %v17529_v11 = vadd.f32 %v17051_v15, %v17277_v39  ;;  %v17537_v7 = vadd.f32 %v17285_v4, %v19744_v31  ;;  %v19746_v13 = vld [vmem:[#allocation65_spill] sm:$0xff] }
 0xc13   :  { %19741 = vst [vmem:[#allocation143_spill] sm:$0xff] %v17521_v43  ;;  %v17541_v34 = vadd.f32 %v17289_v54, %v19746_v13  ;;  %v19747_v43 = vld [vmem:[#allocation70_spill] sm:$0xff]  ;;  %v17557_v4 = vadd.f32 %v17305_v12, %v19750_v20  ;;  %v19751_v31 = vld [vmem:[#allocation85_spill] sm:$0xff] }
 0xc14   :  { %19742 = vst [vmem:[#allocation141_spill] sm:$0xff] %v17525_v41  ;;  %19743 = vst [vmem:[#allocation145_spill] sm:$0xff] %v17529_v11  ;;  %v17545_v32 = vadd.f32 %v17293_v37, %v19747_v43  ;;  %v19748_v41 = vld [vmem:[#allocation72_spill] sm:$0xff]  ;;  %v19749_v11 = vld [vmem:[#allocation77_spill] sm:$0xff] }
 0xc15   :  { %19745 = vst [vmem:[#allocation144_spill] sm:$0xff] %v17537_v7  ;;  %v17549_v39 = vadd.f32 %v17297_v57, %v19748_v41  ;;  %v17553_v15 = vadd.f32 %v17301_v5, %v19749_v11  ;;  %v19752_v7 = vld [vmem:[#allocation82_spill] sm:$0xff]  ;;  %v19754_v43 = vld [vmem:[#allocation13_spill] sm:$0xff]  ;;  %v19755_v41 = vld [vmem:[#allocation92_spill] sm:$0xff] }
 0xc16   :  { %v17561_v54 = vadd.f32 %v19752_v7, %v19751_v31  ;;  %v19753_v13 = vld [vmem:[#allocation90_spill] sm:$0xff]  ;;  %v17569_v57 = vadd.f32 %v17317_v59, %v19754_v43  ;;  %v17573_v5 = vadd.f32 %v17321_v49, %v19755_v41  ;;  %v19756_v11 = vld [vmem:[#allocation28_spill] sm:$0xff]  ;;  %v19757_v20 = vld [vmem:[#allocation29_spill] sm:$0xff] }
 0xc17   :  { %v17565_v37 = vadd.f32 %v17313_v63, %v19753_v13  ;;  %v17577_v12 = vadd.f32 %v17325_v61, %v19756_v11  ;;  %v17581_v7 = vadd.f32 %v17329_v48, %v19757_v20  ;;  %v19758_v31 = vld [vmem:[#allocation30_spill] sm:$0xff]  ;;  %v19759_v13 = vld [vmem:[#allocation31_spill] sm:$0xff]  ;;  %v19760_v43 = vld [vmem:[#allocation33_spill] sm:$0xff] }
 0xc18   :  { %v17585_v63 = vadd.f32 %v17333_v40, %v19758_v31  ;;  %v17589_v59 = vadd.f32 %v17337_v1, %v19759_v13  ;;  %v17593_v49 = vadd.f32 %v17341_v42, %v19760_v43  ;;  %v19761_v41 = vld [vmem:[#allocation93_spill] sm:$0xff]  ;;  %v19762_v11 = vld [vmem:[#allocation35_spill] sm:$0xff]  ;;  %v19764_v31 = vld [vmem:[#allocation18_spill] sm:$0xff] }
 0xc19   :  { %v17597_v61 = vadd.f32 %v17345_v45, %v19761_v41  ;;  %v17601_v48 = vadd.f32 %v17349_v56, %v19762_v11  ;;  %v19763_v20 = vld [vmem:[#allocation17_spill] sm:$0xff]  ;;  %v17609_v1 = vadd.f32 %v17357_v52, %v19764_v31  ;;  %v19766_v43 = vld [vmem:[#allocation22_spill] sm:$0xff]  ;;  %v19768_v11 = vld [vmem:[#allocation27_spill] sm:$0xff] }
 0xc1a   :  { %v17605_v40 = vadd.f32 %v17353_v27, %v19763_v20  ;;  %v19765_v13 = vld [vmem:[#allocation21_spill] sm:$0xff]  ;;  %v17617_v45 = vadd.f32 %v17365_v50, %v19766_v43  ;;  %v17625_v27 = vadd.f32 %v17373_v21, %v19768_v11  ;;  %v19769_v20 = vld [vmem:[#allocation24_spill] sm:$0xff]  ;;  %v19770_v31 = vld [vmem:[#allocation142_spill] sm:$0xff] }
 0xc1b   :  { %v17613_v42 = vadd.f32 %v17361_v16, %v19765_v13  ;;  %v19767_v41 = vld [vmem:[#allocation45_spill] sm:$0xff]  ;;  %v17629_v52 = vadd.f32 %v17377_v62, %v19769_v20  ;;  %v17633_v16 = vadd.f32 %v17381_v53, %v19770_v31  ;;  %v19772_v43 = vld [vmem:[#allocation26_spill] sm:$0xff]  ;;  %v19775_v20 = vld [vmem:[#allocation156_spill] sm:$0xff] }
 0xc1c   :  { %v17621_v56 = vadd.f32 %v17369_v58, %v19767_v41  ;;  %v19771_v13 = vld [vmem:[#allocation25_spill] sm:$0xff]  ;;  %v17641_v58 = vadd.f32 %v17389_v24, %v19772_v43  ;;  %v19773_v41 = vld [vmem:[#allocation150_spill] sm:$0xff]  ;;  %v17653_v53 = vadd.f32 %v17401_v22, %v19775_v20  ;;  %v19776_v31 = vld [vmem:[#allocation159_spill] sm:$0xff] }
 0xc1d   :  { %v17637_v50 = vadd.f32 %v17385_v29, %v19771_v13  ;;  %v17645_v21 = vadd.f32 %v17393_v33, %v19773_v41  ;;  %v19774_v11 = vld [vmem:[#allocation153_spill] sm:$0xff]  ;;  %v17657_v29 = vadd.f32 %v17405_v46, %v19776_v31  ;;  %v19777_v13 = vld [vmem:[#allocation162_spill] sm:$0xff]  ;;  %v19778_v43 = vld [vmem:[#allocation164_spill] sm:$0xff] }
 0xc1e   :  { %v17649_v62 = vadd.f32 %v17397_v2, %v19774_v11  ;;  %v17661_v24 = vadd.f32 %v17409_v25, %v19777_v13  ;;  %v17665_v33 = vadd.f32 %v17413_v38, %v19778_v43  ;;  %v19779_v41 = vld [vmem:[#allocation168_spill] sm:$0xff]  ;;  %v19780_v11 = vld [vmem:[#allocation171_spill] sm:$0xff]  ;;  %v19781_v20 = vld [vmem:[#allocation174_spill] sm:$0xff] }
 0xc1f   :  { %v17669_v2 = vadd.f32 %v17417_v35, %v19779_v41  ;;  %v17673_v22 = vadd.f32 %v17421_v60, %v19780_v11  ;;  %v17677_v46 = vadd.f32 %v17425_v19, %v19781_v20  ;;  %v19782_v31 = vld [vmem:[#allocation177_spill] sm:$0xff]  ;;  %v19783_v13 = vld [vmem:[#allocation180_spill] sm:$0xff]  ;;  %v19784_v43 = vld [vmem:[#allocation183_spill] sm:$0xff] }
 0xc20   :  { %v17681_v25 = vadd.f32 %v17429_v28, %v19782_v31  ;;  %v17685_v38 = vadd.f32 %v17433_v9, %v19783_v13  ;;  %v17689_v35 = vadd.f32 %v17437_v17, %v19784_v43  ;;  %v19785_v41 = vld [vmem:[#allocation186_spill] sm:$0xff]  ;;  %v19786_v11 = vld [vmem:[#allocation189_spill] sm:$0xff]  ;;  %v19787_v20 = vld [vmem:[#allocation191_spill] sm:$0xff] }
 0xc21   :  { %v17693_v60 = vadd.f32 %v17441_v6, %v19785_v41  ;;  %v17697_v19 = vadd.f32 %v17445_v51, %v19786_v11  ;;  %v17701_v28 = vadd.f32 %v17449_v55, %v19787_v20  ;;  %v19789_v31 = vld [vmem:[#allocation193_spill] sm:$0xff]  ;;  %v19791_v13 = vld [vmem:[#allocation195_spill] sm:$0xff]  ;;  %v19797_v20 = vld [vmem:[#allocation120_spill] sm:$0xff] }
 0xc22   :  { %v17705_v9 = vadd.f32 %v17453_v36, %v19789_v31  ;;  %v17709_v17 = vadd.f32 %v17457_v30, %v19791_v13  ;;  %v19793_v43 = vld [vmem:[#allocation197_spill] sm:$0xff]  ;;  %v19795_v41 = vld [vmem:[#allocation199_spill] sm:$0xff] }
 0xc23   :  { %19788 = vst [vmem:[#allocation147_spill] sm:$0xff] %v17701_v28  ;;  %v17713_v6 = vadd.f32 %v17461_v10, %v19793_v43  ;;  %v17717_v51 = vadd.f32 %v17465_v26, %v19795_v41  ;;  %v19796_v11 = vld [vmem:[#allocation201_spill] sm:$0xff]  ;;  %v19801_v13 = vld [vmem:[#allocation123_spill] sm:$0xff]  ;;  %v19805_v41 = vld [vmem:[#allocation124_spill] sm:$0xff] }
 0xc24   :  { %19790 = vst [vmem:[#allocation146_spill] sm:$0xff] %v17705_v9  ;;  %19792 = vst [vmem:[#allocation149_spill] sm:$0xff] %v17709_v17  ;;  %v17721_v55 = vadd.f32 %v17469_v44, %v19796_v11  ;;  %v19798_v28 = vld [vmem:[#allocation61_spill] sm:$0xff]  ;;  %v19800_v9 = vld [vmem:[#allocation75_spill] sm:$0xff]  ;;  %v17741_v44 = vadd.f32 %v17489_v14, %v19805_v41 }
 0xc25   :  { %19794 = vst [vmem:[#allocation148_spill] sm:$0xff] %v17713_v6  ;;  %v17725_v36 = vadd.f32 %v19798_v28, %v19797_v20  ;;  %v19799_v31 = vld [vmem:[#allocation121_spill] sm:$0xff]  ;;  %v19802_v17 = vld [vmem:[#allocation39_spill] sm:$0xff]  ;;  %v19804_v6 = vld [vmem:[#allocation36_spill] sm:$0xff] }
 0xc26   :  { %v17729_v30 = vadd.f32 %v19800_v9, %v19799_v31  ;;  %v17733_v10 = vadd.f32 %v19802_v17, %v19801_v13  ;;  %v19803_v43 = vld [vmem:[#allocation15_spill] sm:$0xff]  ;;  %19806 = vst [vmem:[#allocation152_spill] sm:$0xff] %v17741_v44  ;;  %v19807_v11 = vld [vmem:[#allocation126_spill] sm:$0xff]  ;;  %v19813_v13 = vld [vmem:[#allocation20_spill] sm:$0xff] }
 0xc27   :  { %v17737_v26 = vadd.f32 %v19804_v6, %v19803_v43  ;;  %v17745_v28 = vadd.f32 %v17493_v3, %v19807_v11  ;;  %v19809_v20 = vld [vmem:[#allocation86_spill] sm:$0xff]  ;;  %v19811_v31 = vld [vmem:[#allocation127_spill] sm:$0xff]  ;;  %v17757_v6 = vadd.f32 %v17505_v47, %v19813_v13  ;;  %v19815_v43 = vld [vmem:[#allocation129_spill] sm:$0xff] }
 0xc28   :  { %v17749_v9 = vadd.f32 %v17497_v0, %v19809_v20  ;;  %v17753_v17 = vadd.f32 %v17501_v18, %v19811_v31  ;;  %v17761_v14 = vadd.f32 %v17509_v8, %v19815_v43  ;;  %v19816_v41 = vld [vmem:[#allocation130_spill] sm:$0xff]  ;;  %v19817_v44 = vld [vmem:[#allocation140_spill] sm:$0xff]  ;;  %v19821_v20 = vld [vmem:[#allocation133_spill] sm:$0xff] }
 0xc29   :  { %19808 = vst [vmem:[#allocation151_spill] sm:$0xff] %v17745_v28  ;;  %19814 = vst [vmem:[#allocation158_spill] sm:$0xff] %v17757_v6  ;;  %v17765_v3 = vadd.f32 %v19817_v44, %v19816_v41  ;;  %v19819_v11 = vld [vmem:[#allocation132_spill] sm:$0xff]  ;;  %v19820_v28 = vld [vmem:[#allocation42_spill] sm:$0xff] }
 0xc2a   :  { %19810 = vst [vmem:[#allocation155_spill] sm:$0xff] %v17749_v9  ;;  %19812 = vst [vmem:[#allocation154_spill] sm:$0xff] %v17753_v17  ;;  %v17769_v0 = vadd.f32 %v19820_v28, %v19819_v11  ;;  %v19822_v9 = vld [vmem:[#allocation143_spill] sm:$0xff]  ;;  %v19823_v31 = vld [vmem:[#allocation38_spill] sm:$0xff]  ;;  %v7734_v28 = vmax.f32 %v17541_v34, 0.0  ;;  %v7735_v11 = vmax.f32 %v17545_v32, 0.0 }
 0xc2b   :  { %19818 = vst [vmem:[#allocation157_spill] sm:$0xff] %v17765_v3  ;;  %v17773_v18 = vadd.f32 %v19822_v9, %v19821_v20  ;;  %v19824_v17 = vld [vmem:[#allocation141_spill] sm:$0xff]  ;;  %v19825_v13 = vld [vmem:[#allocation59_spill] sm:$0xff]  ;;  %v19828_v41 = vld [vmem:[#allocation144_spill] sm:$0xff]  ;;  %v7736_v9 = vmax.f32 %v17549_v39, 0.0  ;;  %v7737_v20 = vmax.f32 %v17553_v15, 0.0 }
 0xc2c   :  { %v17777_v47 = vadd.f32 %v19824_v17, %v19823_v31  ;;  %v19826_v6 = vld [vmem:[#allocation145_spill] sm:$0xff]  ;;  %v19827_v43 = vld [vmem:[#allocation19_spill] sm:$0xff]  ;;  %v7733_v3 = vmax.f32 %v19828_v41, 0.0  ;;  %v7738_v17 = vmax.f32 %v17557_v4, 0.0  ;;  %v7739_v31 = vmax.f32 %v17561_v54, 0.0  ;;  %7798 = vst [vmem:[#allocation8 + $0x8] sm:$0xff] %v7734_v28 }
 0xc2d   :  { %v17781_v8 = vadd.f32 %v19826_v6, %v19825_v13  ;;  %v17785_v44 = vadd.f32 %v17533_v23, %v19827_v43  ;;  %v7740_v6 = vmax.f32 %v17565_v37, 0.0  ;;  %v7741_v13 = vmax.f32 %v17569_v57, 0.0  ;;  %7799 = vst [vmem:[#allocation8 + $0x10] sm:$0xff] %v7735_v11  ;;  %7800 = vst [vmem:[#allocation8 + $0x18] sm:$0xff] %v7736_v9  ;;  %v19833_v9 = vld [vmem:[#allocation152_spill] sm:$0xff] }
 0xc2e   :  { %7797 = vst [vmem:[#allocation8] sm:$0xff] %v7733_v3  ;;  %v7742_v23 = vmax.f32 %v17573_v5, 0.0  ;;  %v7743_v43 = vmax.f32 %v17577_v12, 0.0  ;;  %v7744_v34 = vmax.f32 %v17581_v7, 0.0  ;;  %v7745_v32 = vmax.f32 %v17585_v63, 0.0  ;;  %7801 = vst [vmem:[#allocation8 + $0x20] sm:$0xff] %v7737_v20 }
 0xc2f   :  { %v7746_v39 = vmax.f32 %v17589_v59, 0.0  ;;  %v7747_v15 = vmax.f32 %v17593_v49, 0.0  ;;  %v7748_v4 = vmax.f32 %v17597_v61, 0.0  ;;  %v7749_v54 = vmax.f32 %v17601_v48, 0.0  ;;  %7802 = vst [vmem:[#allocation8 + $0x28] sm:$0xff] %v7738_v17  ;;  %7803 = vst [vmem:[#allocation8 + $0x30] sm:$0xff] %v7739_v31 }
 0xc30   :  { %7804 = vst [vmem:[#allocation8 + $0x38] sm:$0xff] %v7740_v6  ;;  %7805 = vst [vmem:[#allocation8 + $0x40] sm:$0xff] %v7741_v13  ;;  %v7750_v37 = vmax.f32 %v17605_v40, 0.0  ;;  %v7751_v57 = vmax.f32 %v17609_v1, 0.0  ;;  %v7752_v5 = vmax.f32 %v17613_v42, 0.0  ;;  %v7753_v12 = vmax.f32 %v17617_v45, 0.0 }
 0xc31   :  { %7806 = vst [vmem:[#allocation8 + $0x48] sm:$0xff] %v7742_v23  ;;  %7807 = vst [vmem:[#allocation8 + $0x50] sm:$0xff] %v7743_v43  ;;  %v7754_v7 = vmax.f32 %v17621_v56, 0.0  ;;  %v7755_v63 = vmax.f32 %v17625_v27, 0.0  ;;  %v7756_v59 = vmax.f32 %v17629_v52, 0.0  ;;  %v7757_v49 = vmax.f32 %v17633_v16, 0.0 }
 0xc32   :  { %7808 = vst [vmem:[#allocation8 + $0x58] sm:$0xff] %v7744_v34  ;;  %7809 = vst [vmem:[#allocation8 + $0x60] sm:$0xff] %v7745_v32  ;;  %v7758_v61 = vmax.f32 %v17637_v50, 0.0  ;;  %v7759_v48 = vmax.f32 %v17641_v58, 0.0  ;;  %v7760_v40 = vmax.f32 %v17645_v21, 0.0  ;;  %v7761_v1 = vmax.f32 %v17649_v62, 0.0 }
 0xc33   :  { %7810 = vst [vmem:[#allocation8 + $0x68] sm:$0xff] %v7746_v39  ;;  %7811 = vst [vmem:[#allocation8 + $0x70] sm:$0xff] %v7747_v15  ;;  %v7762_v42 = vmax.f32 %v17653_v53, 0.0  ;;  %v7763_v45 = vmax.f32 %v17657_v29, 0.0  ;;  %v7764_v56 = vmax.f32 %v17661_v24, 0.0  ;;  %v7765_v27 = vmax.f32 %v17665_v33, 0.0 }
 0xc34   :  { %7812 = vst [vmem:[#allocation8 + $0x78] sm:$0xff] %v7748_v4  ;;  %7813 = vst [vmem:[#allocation8 + $0x80] sm:$0xff] %v7749_v54  ;;  %v7766_v52 = vmax.f32 %v17669_v2, 0.0  ;;  %v7767_v16 = vmax.f32 %v17673_v22, 0.0  ;;  %v7768_v50 = vmax.f32 %v17677_v46, 0.0  ;;  %v7769_v58 = vmax.f32 %v17681_v25, 0.0 }
 0xc35   :  { %7814 = vst [vmem:[#allocation8 + $0x88] sm:$0xff] %v7750_v37  ;;  %7815 = vst [vmem:[#allocation8 + $0x90] sm:$0xff] %v7751_v57  ;;  %v7770_v21 = vmax.f32 %v17685_v38, 0.0  ;;  %v7771_v62 = vmax.f32 %v17689_v35, 0.0  ;;  %v7772_v53 = vmax.f32 %v17693_v60, 0.0  ;;  %v7773_v29 = vmax.f32 %v17697_v19, 0.0 }
 0xc36   :  { %7816 = vst [vmem:[#allocation8 + $0x98] sm:$0xff] %v7752_v5  ;;  %7817 = vst [vmem:[#allocation8 + $0xa0] sm:$0xff] %v7753_v12  ;;  %v19829_v24 = vld [vmem:[#allocation147_spill] sm:$0xff]  ;;  %v19830_v2 = vld [vmem:[#allocation146_spill] sm:$0xff]  ;;  %v7778_v38 = vmax.f32 %v17717_v51, 0.0  ;;  %v7779_v35 = vmax.f32 %v17721_v55, 0.0 }
 0xc37   :  { %7818 = vst [vmem:[#allocation8 + $0xa8] sm:$0xff] %v7754_v7  ;;  %7819 = vst [vmem:[#allocation8 + $0xb0] sm:$0xff] %v7755_v63  ;;  %v7774_v33 = vmax.f32 %v19829_v24, 0.0  ;;  %v7775_v22 = vmax.f32 %v19830_v2, 0.0  ;;  %v19831_v46 = vld [vmem:[#allocation149_spill] sm:$0xff]  ;;  %v19832_v3 = vld [vmem:[#allocation148_spill] sm:$0xff] }
 0xc38   :  { %7820 = vst [vmem:[#allocation8 + $0xb8] sm:$0xff] %v7756_v59  ;;  %7821 = vst [vmem:[#allocation8 + $0xc0] sm:$0xff] %v7757_v49  ;;  %v7776_v25 = vmax.f32 %v19831_v46, 0.0  ;;  %v7777_v41 = vmax.f32 %v19832_v3, 0.0  ;;  %v7780_v60 = vmax.f32 %v17725_v36, 0.0  ;;  %v7781_v19 = vmax.f32 %v17729_v30, 0.0 }
 0xc39   :  { %7822 = vst [vmem:[#allocation8 + $0xc8] sm:$0xff] %v7758_v61  ;;  %7823 = vst [vmem:[#allocation8 + $0xd0] sm:$0xff] %v7759_v48  ;;  %v7782_v28 = vmax.f32 %v17733_v10, 0.0  ;;  %v7783_v11 = vmax.f32 %v17737_v26, 0.0  ;;  %v7784_v20 = vmax.f32 %v19833_v9, 0.0  ;;  %v19834_v17 = vld [vmem:[#allocation151_spill] sm:$0xff] }
 0xc3a   :  { %7824 = vst [vmem:[#allocation8 + $0xd8] sm:$0xff] %v7760_v40  ;;  %7825 = vst [vmem:[#allocation8 + $0xe0] sm:$0xff] %v7761_v1  ;;  %v7785_v31 = vmax.f32 %v19834_v17, 0.0  ;;  %v19835_v51 = vld [vmem:[#allocation155_spill] sm:$0xff]  ;;  %v19836_v36 = vld [vmem:[#allocation154_spill] sm:$0xff]  ;;  %v7789_v10 = vmax.f32 %v17761_v14, 0.0 }
 0xc3b   :  { %7826 = vst [vmem:[#allocation8 + $0xe8] sm:$0xff] %v7762_v42  ;;  %7827 = vst [vmem:[#allocation8 + $0xf0] sm:$0xff] %v7763_v45  ;;  %v7786_v55 = vmax.f32 %v19835_v51, 0.0  ;;  %v7787_v30 = vmax.f32 %v19836_v36, 0.0  ;;  %v19837_v6 = vld [vmem:[#allocation158_spill] sm:$0xff]  ;;  %v19838_v26 = vld [vmem:[#allocation157_spill] sm:$0xff] }
 0xc3c   :  { %7828 = vst [vmem:[#allocation8 + $0xf8] sm:$0xff] %v7764_v56  ;;  %7829 = vst [vmem:[#allocation8 + $0x100] sm:$0xff] %v7765_v27  ;;  %v7788_v13 = vmax.f32 %v19837_v6, 0.0  ;;  %v7790_v23 = vmax.f32 %v19838_v26, 0.0  ;;  %v7791_v43 = vmax.f32 %v17769_v0, 0.0  ;;  %v7792_v34 = vmax.f32 %v17773_v18, 0.0 }
 0xc3d   :  { %7830 = vst [vmem:[#allocation8 + $0x108] sm:$0xff] %v7766_v52  ;;  %7831 = vst [vmem:[#allocation8 + $0x110] sm:$0xff] %v7767_v16  ;;  %v7793_v32 = vmax.f32 %v17777_v47, 0.0  ;;  %v7794_v39 = vmax.f32 %v17781_v8, 0.0  ;;  %v7796_v14 = vmax.f32 %v17785_v44, 0.0 }
 0xc3e   :  { %7832 = vst [vmem:[#allocation8 + $0x118] sm:$0xff] %v7768_v50  ;;  %7833 = vst [vmem:[#allocation8 + $0x120] sm:$0xff] %v7769_v58 }
 0xc3f   :  { %7834 = vst [vmem:[#allocation8 + $0x128] sm:$0xff] %v7770_v21  ;;  %7835 = vst [vmem:[#allocation8 + $0x130] sm:$0xff] %v7771_v62 }
 0xc40   :  { %7836 = vst [vmem:[#allocation8 + $0x138] sm:$0xff] %v7772_v53  ;;  %7837 = vst [vmem:[#allocation8 + $0x140] sm:$0xff] %v7773_v29 }
 0xc41   :  { %7838 = vst [vmem:[#allocation8 + $0x148] sm:$0xff] %v7774_v33  ;;  %7839 = vst [vmem:[#allocation8 + $0x150] sm:$0xff] %v7775_v22 }
 0xc42   :  { %7840 = vst [vmem:[#allocation8 + $0x158] sm:$0xff] %v7776_v25  ;;  %7841 = vst [vmem:[#allocation8 + $0x160] sm:$0xff] %v7777_v41 }
 0xc43   :  { %7842 = vst [vmem:[#allocation8 + $0x168] sm:$0xff] %v7778_v38  ;;  %7843 = vst [vmem:[#allocation8 + $0x170] sm:$0xff] %v7779_v35 }
 0xc44   :  { %7844 = vst [vmem:[#allocation8 + $0x178] sm:$0xff] %v7780_v60  ;;  %7845 = vst [vmem:[#allocation8 + $0x180] sm:$0xff] %v7781_v19 }
 0xc45   :  { %7846 = vst [vmem:[#allocation8 + $0x188] sm:$0xff] %v7782_v28  ;;  %7847 = vst [vmem:[#allocation8 + $0x190] sm:$0xff] %v7783_v11 }
 0xc46   :  { %7848 = vst [vmem:[#allocation8 + $0x198] sm:$0xff] %v7784_v20  ;;  %7849 = vst [vmem:[#allocation8 + $0x1a0] sm:$0xff] %v7785_v31 }
 0xc47   :  { %7850 = vst [vmem:[#allocation8 + $0x1a8] sm:$0xff] %v7786_v55  ;;  %7851 = vst [vmem:[#allocation8 + $0x1b0] sm:$0xff] %v7787_v30 }
 0xc48   :  { %7852 = vst [vmem:[#allocation8 + $0x1b8] sm:$0xff] %v7788_v13  ;;  %7853 = vst [vmem:[#allocation8 + $0x1c0] sm:$0xff] %v7789_v10 }
 0xc49   :  { %7854 = vst [vmem:[#allocation8 + $0x1c8] sm:$0xff] %v7790_v23  ;;  %7855 = vst [vmem:[#allocation8 + $0x1d0] sm:$0xff] %v7791_v43 }
 0xc4a   :  { %7856 = vst [vmem:[#allocation8 + $0x1d8] sm:$0xff] %v7792_v34  ;;  %7857 = vst [vmem:[#allocation8 + $0x1e0] sm:$0xff] %v7793_v32 }
 0xc4b   :  { %7858 = vst [vmem:[#allocation8 + $0x1e8] sm:$0xff] %v7794_v39  ;;  %7860 = vst [vmem:[#allocation8 + $0x1f8] sm:$0xff] %v7796_v14 }
 0xc4c   :  { %10004 = shalt.err (!%p10001_p6)
}
 0xc4d   :  { %s10005_s30 = scalar_lea.hbm %s17876_s11, 8192 }
 0xc4e   :  { %p10006_p7 = scmp.ne.s32.totalorder %s17876_s11, %s10005_s30  ;;  %p10009_p8 = scmp.lt.u32.totalorder %s10005_s30, %s17876_s11 }
 0xc50   :  { %p10011_p9 = pnand %p10009_p8, %p10006_p7 }
 0xc52   :  { %10014 = shalt.err (!%p10011_p9)
}
 0xc53   :  { %7872 = dma.vmem_to_hbm [thread:$0]  %s7867_s10, 8192, %s17876_s11, [#allocation5], %s10022_s27, %s10022_s27, %s10023_s28  }
 0xc54   :  { %10019 = dma.done.wait [#allocation5], 8192  }
 0xc55   :  { %10020 = vsyncadd [#allocation5], 4294959104 }
 0xc56   :  { %7876 = vsyncpa [#allocation4], 1 }
 0xc57   :  { %7877 = vsyncpa [#allocation7], 1 }
 0xc58   :  { %7878 = vsyncpa [#allocation5], 1 }

</bundles_post_ra>
